<compile_context>
chip_gen: v7x
topology: tpu7x:2x2x1
jax: 0.10.0
libtpu: 0.0.40
codegen_flags: <defaults>
</compile_context>

<pallas_src>
import math

import jax
import jax.numpy as jnp
from jax.experimental import pallas as pl
from jax.experimental.pallas import tpu as pltpu

EPS = 1e-5  # PyTorch LayerNorm default


def _layer_norm(x, gamma, beta):
    mu = jnp.mean(x, axis=-1, keepdims=True)
    var = jnp.mean(jnp.square(x - mu), axis=-1, keepdims=True)
    return (x - mu) * jax.lax.rsqrt(var + EPS) * gamma + beta


def _make_kernel(num_layers, scale):
    def kernel(x_ref, pew_ref, pos_ref,
               wqkv_ref, bqkv_ref, wo_ref,
               mw1_ref, mb1_ref, mw2_ref,
               lnv_ref, lnf_ref, o_ref):
        Bb, N, P = x_ref.shape
        E = pew_ref.shape[1]
        rows = Bb * N
        bf16 = jnp.bfloat16

        # ---- PatchEmbeder: linear projection + (bias + position) encodings ----
        x2 = x_ref[...].reshape(rows, P)
        h = jnp.dot(x2.astype(bf16), pew_ref[...],
                    preferred_element_type=jnp.float32)
        h = (h.reshape(Bb, N, E) + pos_ref[...][None, :, :]).reshape(rows, E)

        # ---- Encoder blocks (statically unrolled) ----
        for l in range(num_layers):
            lnv = lnv_ref[l]  # (6, E) f32: [g1, b1, bo, g2, b2, mb2]

            # --- self-attention sub-block (pre-norm, single head) ---
            xn = _layer_norm(h, lnv[0][None, :], lnv[1][None, :])
            qkv = jnp.dot(xn.astype(bf16), wqkv_ref[l],
                          preferred_element_type=jnp.float32)
            qkv = qkv + bqkv_ref[l][None, :]
            q = qkv[:, :E].reshape(Bb, N, E)
            k = qkv[:, E:2 * E].reshape(Bb, N, E)
            v = qkv[:, 2 * E:].reshape(Bb, N, E)

            s = jnp.einsum('bqd,bkd->bqk', q.astype(bf16), k.astype(bf16),
                           preferred_element_type=jnp.float32) * scale
            s = s - jnp.max(s, axis=-1, keepdims=True)
            p = jnp.exp(s)
            p = p * pl.reciprocal(jnp.sum(p, axis=-1, keepdims=True),
                                  approx=True)
            att = jnp.einsum('bqk,bkd->bqd', p.astype(bf16), v.astype(bf16),
                             preferred_element_type=jnp.float32)
            att = jnp.dot(att.reshape(rows, E).astype(bf16), wo_ref[l],
                          preferred_element_type=jnp.float32) + lnv[2][None, :]
            h = h + att

            # --- MLP sub-block ---
            hn = _layer_norm(h, lnv[3][None, :], lnv[4][None, :])
            m = jnp.dot(hn.astype(bf16), mw1_ref[l],
                        preferred_element_type=jnp.float32) + mb1_ref[l][None, :]
            # TODO(synk): PyTorch nn.GELU default is exact erf; tanh approximation used here.
            m = jax.nn.gelu(m, approximate=True)
            m = jnp.dot(m.astype(bf16), mw2_ref[l],
                        preferred_element_type=jnp.float32) + lnv[5][None, :]
            h = h + m

        # ---- last_layer=True: final LayerNorm ----
        h = _layer_norm(h, lnf_ref[0][None, :], lnf_ref[1][None, :])
        o_ref[...] = h.reshape(Bb, N, E)

    return kernel


def init_params(key, patch_pixel_count, embedding_size, num_of_patches,
                num_layers=6, mlp_hidden=None):
    if mlp_hidden is None:
        mlp_hidden = 4 * embedding_size
    P, E, N, L, Hd = patch_pixel_count, embedding_size, num_of_patches, num_layers, mlp_hidden
    keys = jax.random.split(key, 8)
    s = 0.02
    return dict(
        pe_w=jax.random.normal(keys[0], (P, E), jnp.float32) * s,
        pe_b=jnp.zeros((1, E), jnp.float32),
        pos=jax.random.normal(keys[1], (N, E), jnp.float32) * s,
        g1=jnp.ones((L, E), jnp.float32),
        be1=jnp.zeros((L, E), jnp.float32),
        wq=jax.random.normal(keys[2], (L, E, E), jnp.float32) * s,
        bq=jnp.zeros((L, E), jnp.float32),
        wk=jax.random.normal(keys[3], (L, E, E), jnp.float32) * s,
        bk=jnp.zeros((L, E), jnp.float32),
        wv=jax.random.normal(keys[4], (L, E, E), jnp.float32) * s,
        bv=jnp.zeros((L, E), jnp.float32),
        wo=jax.random.normal(keys[5], (L, E, E), jnp.float32) * s,
        bo=jnp.zeros((L, E), jnp.float32),
        g2=jnp.ones((L, E), jnp.float32),
        be2=jnp.zeros((L, E), jnp.float32),
        mw1=jax.random.normal(keys[6], (L, E, Hd), jnp.float32) * s,
        mb1=jnp.zeros((L, Hd), jnp.float32),
        mw2=jax.random.normal(keys[7], (L, Hd, E), jnp.float32) * s,
        mb2=jnp.zeros((L, E), jnp.float32),
        gf=jnp.ones((1, E), jnp.float32),
        bf=jnp.zeros((1, E), jnp.float32),
    )


def vit_forward(x_img, params, patch_size, batch_block=None):
    B, C, H, W = x_img.shape
    ph, pw = H // patch_size, W // patch_size
    N = ph * pw
    P = C * patch_size * patch_size
    E = params["pe_w"].shape[1]
    L = params["wq"].shape[0]
    scale = 1.0 / math.sqrt(E)

    # Choose how many batch elements share one grid step (bounded row count).
    if batch_block is None:
        batch_block = 1
        for d in range(B, 0, -1):
            if B % d == 0 and d * N <= 1024:
                batch_block = d
                break
    assert B % batch_block == 0

    # Patchify (glue, plain JAX): NCHW -> (B, num_patches, patch_pixel_count)
    xp = x_img.reshape(B, C, ph, patch_size, pw, patch_size)
    xp = xp.transpose(0, 2, 4, 1, 3, 5).reshape(B, N, P)

    bf16 = jnp.bfloat16
    # ---- Trace-time parameter packing / fusion (glue, plain JAX) ----
    pe_w = params["pe_w"].astype(bf16)                                        # (P, E)
    pos_bias = (params["pe_b"] + params["pos"]).astype(jnp.float32)           # (N, E)
    wqkv = jnp.concatenate([params["wq"], params["wk"], params["wv"]],
                           axis=-1).astype(bf16)                              # (L, E, 3E)
    bqkv = jnp.concatenate([params["bq"], params["bk"], params["bv"]],
                           axis=-1)                                           # (L, 3E)
    wo = params["wo"].astype(bf16)                                            # (L, E, E)
    mw1 = params["mw1"].astype(bf16)                                          # (L, E, Hd)
    mb1 = params["mb1"]                                                       # (L, Hd)
    mw2 = params["mw2"].astype(bf16)                                          # (L, Hd, E)
    lnv = jnp.stack([params["g1"], params["be1"], params["bo"],
                     params["g2"], params["be2"], params["mb2"]], axis=1)     # (L, 6, E)
    lnf = jnp.concatenate([params["gf"], params["bf"]], axis=0)               # (2, E)

    weights = [pe_w, pos_bias, wqkv, bqkv, wo, mw1, mb1, mw2, lnv, lnf]

    def const_spec(a):
        nd = a.ndim
        return pl.BlockSpec(a.shape, lambda b, _nd=nd: (0,) * _nd)

    in_specs = [pl.BlockSpec((batch_block, N, P), lambda b: (b, 0, 0))]
    in_specs += [const_spec(w) for w in weights]

    # TODO(synk): at real ViT widths (E>=768) add a layer grid axis / stream
    # per-layer weights instead of keeping all layers VMEM-resident.
    out = pl.pallas_call(
        _make_kernel(L, scale),
        out_shape=jax.ShapeDtypeStruct((B, N, E), jnp.float32),
        grid_spec=pltpu.PrefetchScalarGridSpec(
            num_scalar_prefetch=0,
            grid=(B // batch_block,),
            in_specs=in_specs,
            out_specs=pl.BlockSpec((batch_block, N, E), lambda b: (b, 0, 0)),
        ),
        compiler_params=pltpu.CompilerParams(
            dimension_semantics=("parallel",),
            vmem_limit_bytes=48 * 1024 * 1024),
    )(xp, *weights)
    return out


if __name__ == "__main__":
    key = jax.random.PRNGKey(0)
    k_img, k_par = jax.random.split(key)

    # Small ViT: 16x16 4-channel image, 4x4 patches, lane-dense embedding.
    B, C, H, W = 2, 4, 16, 16
    patch = 4
    num_of_patches = (H // patch) * (W // patch)   # 16
    patch_pixel_count = C * patch * patch          # 64
    embedding_size = 128                           # multiple of 128 lanes

    x = jax.random.normal(k_img, (B, C, H, W), jnp.float32)
    params = init_params(k_par, patch_pixel_count, embedding_size, num_of_patches)

    out = vit_forward(x, params, patch)
    out = jax.block_until_ready(out)
    assert out.shape == (B, num_of_patches, embedding_size)
    assert bool(jnp.all(jnp.isfinite(out)))
    print("KERNEL_OK")
</pallas_src>

<mosaic_0001>
module attributes {stable_mosaic.version = 11 : i64} {
  func.func @kernel(%arg0: i32, %arg1: memref<2x16x64xf32, #tpu.memory_space<vmem>>, %arg2: memref<64x128xbf16, #tpu.memory_space<vmem>>, %arg3: memref<16x128xf32, #tpu.memory_space<vmem>>, %arg4: memref<6x128x384xbf16, #tpu.memory_space<vmem>>, %arg5: memref<6x384xf32, #tpu.memory_space<vmem>>, %arg6: memref<6x128x128xbf16, #tpu.memory_space<vmem>>, %arg7: memref<6x128x512xbf16, #tpu.memory_space<vmem>>, %arg8: memref<6x512xf32, #tpu.memory_space<vmem>>, %arg9: memref<6x512x128xbf16, #tpu.memory_space<vmem>>, %arg10: memref<6x6x128xf32, #tpu.memory_space<vmem>>, %arg11: memref<2x128xf32, #tpu.memory_space<vmem>>, %arg12: memref<2x16x128xf32, #tpu.memory_space<vmem>>) attributes {dimension_semantics = [#tpu.dimension_semantics<parallel>], iteration_bounds = array<i64: 1>, scalar_prefetch = 0 : i64, scratch_operands = 0 : i64, tpu.core_type = #tpu.core_type<tc>, window_params = [{transform_indices = @transform_0, window_bounds = array<i64: 2, 16, 64>}, {pipeline_mode = #tpu.pipeline_mode<synchronous>, transform_indices = @transform_1, window_bounds = array<i64: 64, 128>}, {pipeline_mode = #tpu.pipeline_mode<synchronous>, transform_indices = @transform_2, window_bounds = array<i64: 16, 128>}, {pipeline_mode = #tpu.pipeline_mode<synchronous>, transform_indices = @transform_3, window_bounds = array<i64: 6, 128, 384>}, {pipeline_mode = #tpu.pipeline_mode<synchronous>, transform_indices = @transform_4, window_bounds = array<i64: 6, 384>}, {pipeline_mode = #tpu.pipeline_mode<synchronous>, transform_indices = @transform_5, window_bounds = array<i64: 6, 128, 128>}, {pipeline_mode = #tpu.pipeline_mode<synchronous>, transform_indices = @transform_6, window_bounds = array<i64: 6, 128, 512>}, {pipeline_mode = #tpu.pipeline_mode<synchronous>, transform_indices = @transform_7, window_bounds = array<i64: 6, 512>}, {pipeline_mode = #tpu.pipeline_mode<synchronous>, transform_indices = @transform_8, window_bounds = array<i64: 6, 512, 128>}, {pipeline_mode = #tpu.pipeline_mode<synchronous>, transform_indices = @transform_9, window_bounds = array<i64: 6, 6, 128>}, {pipeline_mode = #tpu.pipeline_mode<synchronous>, transform_indices = @transform_10, window_bounds = array<i64: 2, 128>}, {transform_indices = @transform_11, window_bounds = array<i64: 2, 16, 128>}]} {
    %c0 = arith.constant 0 : index
    %c0_0 = arith.constant 0 : index
    %c0_1 = arith.constant 0 : index
    %0 = vector.load %arg1[%c0, %c0_0, %c0_1] : memref<2x16x64xf32, #tpu.memory_space<vmem>>, vector<2x16x64xf32>
    %1 = vector.shape_cast %0 : vector<2x16x64xf32> to vector<32x64xf32>
    %2 = arith.truncf %1 : vector<32x64xf32> to vector<32x64xbf16>
    %c0_2 = arith.constant 0 : index
    %c0_3 = arith.constant 0 : index
    %3 = vector.load %arg2[%c0_2, %c0_3] : memref<64x128xbf16, #tpu.memory_space<vmem>>, vector<64x128xbf16>
    %cst = arith.constant dense<0.000000e+00> : vector<32x128xf32>
    %4 = tpu.matmul %2, %3, %cst {dimension_numbers = #tpu.dot_dimension_numbers<[1], [0], [0], [1], [0, 0, 1, 1], [], []>} : vector<32x64xbf16>, vector<64x128xbf16>, vector<32x128xf32> -> vector<32x128xf32>
    %5 = vector.shape_cast %4 : vector<32x128xf32> to vector<2x16x128xf32>
    %c0_4 = arith.constant 0 : index
    %c0_5 = arith.constant 0 : index
    %6 = vector.load %arg3[%c0_4, %c0_5] : memref<16x128xf32, #tpu.memory_space<vmem>>, vector<16x128xf32>
    %7 = vector.shape_cast %6 : vector<16x128xf32> to vector<1x16x128xf32>
    %8 = vector.broadcast %7 : vector<1x16x128xf32> to vector<2x16x128xf32>
    %9 = arith.addf %5, %8 : vector<2x16x128xf32>
    %10 = vector.shape_cast %9 : vector<2x16x128xf32> to vector<32x128xf32>
    %c0_6 = arith.constant 0 : index
    %c0_7 = arith.constant 0 : index
    %c0_8 = arith.constant 0 : index
    %11 = vector.load %arg10[%c0_6, %c0_7, %c0_8] : memref<6x6x128xf32, #tpu.memory_space<vmem>>, vector<1x6x128xf32>
    %12 = vector.shape_cast %11 : vector<1x6x128xf32> to vector<6x128xf32>
    %13 = vector.extract_strided_slice %12 {offsets = [0, 0], sizes = [1, 128], strides = [1, 1]} : vector<6x128xf32> to vector<1x128xf32>
    %14 = vector.shape_cast %13 : vector<1x128xf32> to vector<128xf32>
    %15 = vector.shape_cast %14 : vector<128xf32> to vector<1x128xf32>
    %16 = vector.extract_strided_slice %12 {offsets = [1, 0], sizes = [1, 128], strides = [1, 1]} : vector<6x128xf32> to vector<1x128xf32>
    %17 = vector.shape_cast %16 : vector<1x128xf32> to vector<128xf32>
    %18 = vector.shape_cast %17 : vector<128xf32> to vector<1x128xf32>
    %cst_9 = arith.constant dense<0.000000e+00> : vector<32xf32>
    %19 = vector.multi_reduction <add>, %10, %cst_9 [1] : vector<32x128xf32> to vector<32xf32>
    %20 = vector.shape_cast %19 : vector<32xf32> to vector<32x1xf32>
    %cst_10 = arith.constant 1.280000e+02 : f32
    %21 = vector.broadcast %cst_10 : f32 to vector<32x1xf32>
    %22 = arith.divf %20, %21 : vector<32x1xf32>
    %23 = vector.broadcast %22 : vector<32x1xf32> to vector<32x128xf32>
    %24 = arith.subf %10, %23 : vector<32x128xf32>
    %25 = arith.mulf %24, %24 : vector<32x128xf32>
    %cst_11 = arith.constant dense<0.000000e+00> : vector<32xf32>
    %26 = vector.multi_reduction <add>, %25, %cst_11 [1] : vector<32x128xf32> to vector<32xf32>
    %27 = vector.shape_cast %26 : vector<32xf32> to vector<32x1xf32>
    %cst_12 = arith.constant 1.280000e+02 : f32
    %28 = vector.broadcast %cst_12 : f32 to vector<32x1xf32>
    %29 = arith.divf %27, %28 : vector<32x1xf32>
    %30 = vector.broadcast %22 : vector<32x1xf32> to vector<32x128xf32>
    %31 = arith.subf %10, %30 : vector<32x128xf32>
    %cst_13 = arith.constant 9.99999974E-6 : f32
    %32 = vector.broadcast %cst_13 : f32 to vector<32x1xf32>
    %33 = arith.addf %29, %32 : vector<32x1xf32>
    %34 = math.rsqrt %33 : vector<32x1xf32>
    %35 = vector.broadcast %34 : vector<32x1xf32> to vector<32x128xf32>
    %36 = arith.mulf %31, %35 : vector<32x128xf32>
    %37 = vector.broadcast %15 : vector<1x128xf32> to vector<32x128xf32>
    %38 = arith.mulf %36, %37 : vector<32x128xf32>
    %39 = vector.broadcast %18 : vector<1x128xf32> to vector<32x128xf32>
    %40 = arith.addf %38, %39 : vector<32x128xf32>
    %41 = arith.truncf %40 : vector<32x128xf32> to vector<32x128xbf16>
    %c0_14 = arith.constant 0 : index
    %c0_15 = arith.constant 0 : index
    %c0_16 = arith.constant 0 : index
    %42 = vector.load %arg4[%c0_14, %c0_15, %c0_16] : memref<6x128x384xbf16, #tpu.memory_space<vmem>>, vector<1x128x384xbf16>
    %43 = vector.shape_cast %42 : vector<1x128x384xbf16> to vector<128x384xbf16>
    %cst_17 = arith.constant dense<0.000000e+00> : vector<32x384xf32>
    %44 = tpu.matmul %41, %43, %cst_17 {dimension_numbers = #tpu.dot_dimension_numbers<[1], [0], [0], [1], [0, 0, 1, 1], [], []>} : vector<32x128xbf16>, vector<128x384xbf16>, vector<32x384xf32> -> vector<32x384xf32>
    %c0_18 = arith.constant 0 : index
    %c0_19 = arith.constant 0 : index
    %45 = vector.load %arg5[%c0_18, %c0_19] : memref<6x384xf32, #tpu.memory_space<vmem>>, vector<1x384xf32>
    %46 = vector.shape_cast %45 : vector<1x384xf32> to vector<384xf32>
    %47 = vector.shape_cast %46 : vector<384xf32> to vector<1x384xf32>
    %48 = vector.broadcast %47 : vector<1x384xf32> to vector<32x384xf32>
    %49 = arith.addf %44, %48 : vector<32x384xf32>
    %50 = vector.extract_strided_slice %49 {offsets = [0, 0], sizes = [32, 128], strides = [1, 1]} : vector<32x384xf32> to vector<32x128xf32>
    %51 = vector.shape_cast %50 : vector<32x128xf32> to vector<2x16x128xf32>
    %52 = vector.extract_strided_slice %49 {offsets = [0, 128], sizes = [32, 128], strides = [1, 1]} : vector<32x384xf32> to vector<32x128xf32>
    %53 = vector.shape_cast %52 : vector<32x128xf32> to vector<2x16x128xf32>
    %54 = vector.extract_strided_slice %49 {offsets = [0, 256], sizes = [32, 128], strides = [1, 1]} : vector<32x384xf32> to vector<32x128xf32>
    %55 = vector.shape_cast %54 : vector<32x128xf32> to vector<2x16x128xf32>
    %56 = arith.truncf %51 : vector<2x16x128xf32> to vector<2x16x128xbf16>
    %57 = arith.truncf %53 : vector<2x16x128xf32> to vector<2x16x128xbf16>
    "tpu.trace_start"() <{level = 10 : i32, message = "bqd,bkd->bqk"}> : () -> ()
    %cst_20 = arith.constant dense<0.000000e+00> : vector<2x16x16xf32>
    %58 = tpu.matmul %56, %57, %cst_20 {dimension_numbers = #tpu.dot_dimension_numbers<[2], [2], [1], [1], [0, 0, 0, 1, 1, 1], [0], [0]>} : vector<2x16x128xbf16>, vector<2x16x128xbf16>, vector<2x16x16xf32> -> vector<2x16x16xf32>
    "tpu.trace_stop"() : () -> ()
    %cst_21 = arith.constant 0.0883883461 : f32
    %59 = vector.broadcast %cst_21 : f32 to vector<2x16x16xf32>
    %60 = arith.mulf %58, %59 : vector<2x16x16xf32>
    %cst_22 = arith.constant dense<0xFF800000> : vector<2x16xf32>
    %61 = vector.multi_reduction <maximumf>, %60, %cst_22 [2] : vector<2x16x16xf32> to vector<2x16xf32>
    %62 = vector.shape_cast %61 : vector<2x16xf32> to vector<2x16x1xf32>
    %63 = vector.broadcast %62 : vector<2x16x1xf32> to vector<2x16x16xf32>
    %64 = arith.subf %60, %63 : vector<2x16x16xf32>
    %65 = math.exp %64 : vector<2x16x16xf32>
    %cst_23 = arith.constant dense<0.000000e+00> : vector<2x16xf32>
    %66 = vector.multi_reduction <add>, %65, %cst_23 [2] : vector<2x16x16xf32> to vector<2x16xf32>
    %67 = vector.shape_cast %66 : vector<2x16xf32> to vector<2x16x1xf32>
    %68 = tpu.reciprocal %67 {approx = true} : vector<2x16x1xf32> -> vector<2x16x1xf32>
    %69 = vector.broadcast %68 : vector<2x16x1xf32> to vector<2x16x16xf32>
    %70 = arith.mulf %65, %69 : vector<2x16x16xf32>
    %71 = arith.truncf %70 : vector<2x16x16xf32> to vector<2x16x16xbf16>
    %72 = arith.truncf %55 : vector<2x16x128xf32> to vector<2x16x128xbf16>
    "tpu.trace_start"() <{level = 10 : i32, message = "bqk,bkd->bqd"}> : () -> ()
    %cst_24 = arith.constant dense<0.000000e+00> : vector<2x16x128xf32>
    %73 = tpu.matmul %71, %72, %cst_24 {dimension_numbers = #tpu.dot_dimension_numbers<[2], [1], [1], [2], [0, 0, 0, 1, 1, 2], [0], [0]>} : vector<2x16x16xbf16>, vector<2x16x128xbf16>, vector<2x16x128xf32> -> vector<2x16x128xf32>
    "tpu.trace_stop"() : () -> ()
    %74 = vector.shape_cast %73 : vector<2x16x128xf32> to vector<32x128xf32>
    %75 = arith.truncf %74 : vector<32x128xf32> to vector<32x128xbf16>
    %c0_25 = arith.constant 0 : index
    %c0_26 = arith.constant 0 : index
    %c0_27 = arith.constant 0 : index
    %76 = vector.load %arg6[%c0_25, %c0_26, %c0_27] : memref<6x128x128xbf16, #tpu.memory_space<vmem>>, vector<1x128x128xbf16>
    %77 = vector.shape_cast %76 : vector<1x128x128xbf16> to vector<128x128xbf16>
    %cst_28 = arith.constant dense<0.000000e+00> : vector<32x128xf32>
    %78 = tpu.matmul %75, %77, %cst_28 {dimension_numbers = #tpu.dot_dimension_numbers<[1], [0], [0], [1], [0, 0, 1, 1], [], []>} : vector<32x128xbf16>, vector<128x128xbf16>, vector<32x128xf32> -> vector<32x128xf32>
    %79 = vector.extract_strided_slice %12 {offsets = [2, 0], sizes = [1, 128], strides = [1, 1]} : vector<6x128xf32> to vector<1x128xf32>
    %80 = vector.shape_cast %79 : vector<1x128xf32> to vector<128xf32>
    %81 = vector.shape_cast %80 : vector<128xf32> to vector<1x128xf32>
    %82 = vector.broadcast %81 : vector<1x128xf32> to vector<32x128xf32>
    %83 = arith.addf %78, %82 : vector<32x128xf32>
    %84 = arith.addf %10, %83 : vector<32x128xf32>
    %85 = vector.extract_strided_slice %12 {offsets = [3, 0], sizes = [1, 128], strides = [1, 1]} : vector<6x128xf32> to vector<1x128xf32>
    %86 = vector.shape_cast %85 : vector<1x128xf32> to vector<128xf32>
    %87 = vector.shape_cast %86 : vector<128xf32> to vector<1x128xf32>
    %88 = vector.extract_strided_slice %12 {offsets = [4, 0], sizes = [1, 128], strides = [1, 1]} : vector<6x128xf32> to vector<1x128xf32>
    %89 = vector.shape_cast %88 : vector<1x128xf32> to vector<128xf32>
    %90 = vector.shape_cast %89 : vector<128xf32> to vector<1x128xf32>
    %cst_29 = arith.constant dense<0.000000e+00> : vector<32xf32>
    %91 = vector.multi_reduction <add>, %84, %cst_29 [1] : vector<32x128xf32> to vector<32xf32>
    %92 = vector.shape_cast %91 : vector<32xf32> to vector<32x1xf32>
    %cst_30 = arith.constant 1.280000e+02 : f32
    %93 = vector.broadcast %cst_30 : f32 to vector<32x1xf32>
    %94 = arith.divf %92, %93 : vector<32x1xf32>
    %95 = vector.broadcast %94 : vector<32x1xf32> to vector<32x128xf32>
    %96 = arith.subf %84, %95 : vector<32x128xf32>
    %97 = arith.mulf %96, %96 : vector<32x128xf32>
    %cst_31 = arith.constant dense<0.000000e+00> : vector<32xf32>
    %98 = vector.multi_reduction <add>, %97, %cst_31 [1] : vector<32x128xf32> to vector<32xf32>
    %99 = vector.shape_cast %98 : vector<32xf32> to vector<32x1xf32>
    %cst_32 = arith.constant 1.280000e+02 : f32
    %100 = vector.broadcast %cst_32 : f32 to vector<32x1xf32>
    %101 = arith.divf %99, %100 : vector<32x1xf32>
    %102 = vector.broadcast %94 : vector<32x1xf32> to vector<32x128xf32>
    %103 = arith.subf %84, %102 : vector<32x128xf32>
    %cst_33 = arith.constant 9.99999974E-6 : f32
    %104 = vector.broadcast %cst_33 : f32 to vector<32x1xf32>
    %105 = arith.addf %101, %104 : vector<32x1xf32>
    %106 = math.rsqrt %105 : vector<32x1xf32>
    %107 = vector.broadcast %106 : vector<32x1xf32> to vector<32x128xf32>
    %108 = arith.mulf %103, %107 : vector<32x128xf32>
    %109 = vector.broadcast %87 : vector<1x128xf32> to vector<32x128xf32>
    %110 = arith.mulf %108, %109 : vector<32x128xf32>
    %111 = vector.broadcast %90 : vector<1x128xf32> to vector<32x128xf32>
    %112 = arith.addf %110, %111 : vector<32x128xf32>
    %113 = arith.truncf %112 : vector<32x128xf32> to vector<32x128xbf16>
    %c0_34 = arith.constant 0 : index
    %c0_35 = arith.constant 0 : index
    %c0_36 = arith.constant 0 : index
    %114 = vector.load %arg7[%c0_34, %c0_35, %c0_36] : memref<6x128x512xbf16, #tpu.memory_space<vmem>>, vector<1x128x512xbf16>
    %115 = vector.shape_cast %114 : vector<1x128x512xbf16> to vector<128x512xbf16>
    %cst_37 = arith.constant dense<0.000000e+00> : vector<32x512xf32>
    %116 = tpu.matmul %113, %115, %cst_37 {dimension_numbers = #tpu.dot_dimension_numbers<[1], [0], [0], [1], [0, 0, 1, 1], [], []>} : vector<32x128xbf16>, vector<128x512xbf16>, vector<32x512xf32> -> vector<32x512xf32>
    %c0_38 = arith.constant 0 : index
    %c0_39 = arith.constant 0 : index
    %117 = vector.load %arg8[%c0_38, %c0_39] : memref<6x512xf32, #tpu.memory_space<vmem>>, vector<1x512xf32>
    %118 = vector.shape_cast %117 : vector<1x512xf32> to vector<512xf32>
    %119 = vector.shape_cast %118 : vector<512xf32> to vector<1x512xf32>
    %120 = vector.broadcast %119 : vector<1x512xf32> to vector<32x512xf32>
    %121 = arith.addf %116, %120 : vector<32x512xf32>
    %122 = arith.mulf %121, %121 : vector<32x512xf32>
    %123 = arith.mulf %121, %122 : vector<32x512xf32>
    %cst_40 = arith.constant 4.471500e-02 : f32
    %124 = vector.broadcast %cst_40 : f32 to vector<32x512xf32>
    %125 = arith.mulf %124, %123 : vector<32x512xf32>
    %126 = arith.addf %121, %125 : vector<32x512xf32>
    %cst_41 = arith.constant 0.797884583 : f32
    %127 = vector.broadcast %cst_41 : f32 to vector<32x512xf32>
    %128 = arith.mulf %127, %126 : vector<32x512xf32>
    %129 = math.tanh %128 : vector<32x512xf32>
    %cst_42 = arith.constant 1.000000e+00 : f32
    %130 = vector.broadcast %cst_42 : f32 to vector<32x512xf32>
    %131 = arith.addf %130, %129 : vector<32x512xf32>
    %cst_43 = arith.constant 5.000000e-01 : f32
    %132 = vector.broadcast %cst_43 : f32 to vector<32x512xf32>
    %133 = arith.mulf %132, %131 : vector<32x512xf32>
    %134 = arith.mulf %121, %133 : vector<32x512xf32>
    %135 = arith.truncf %134 : vector<32x512xf32> to vector<32x512xbf16>
    %c0_44 = arith.constant 0 : index
    %c0_45 = arith.constant 0 : index
    %c0_46 = arith.constant 0 : index
    %136 = vector.load %arg9[%c0_44, %c0_45, %c0_46] : memref<6x512x128xbf16, #tpu.memory_space<vmem>>, vector<1x512x128xbf16>
    %137 = vector.shape_cast %136 : vector<1x512x128xbf16> to vector<512x128xbf16>
    %cst_47 = arith.constant dense<0.000000e+00> : vector<32x128xf32>
    %138 = tpu.matmul %135, %137, %cst_47 {dimension_numbers = #tpu.dot_dimension_numbers<[1], [0], [0], [1], [0, 0, 1, 1], [], []>} : vector<32x512xbf16>, vector<512x128xbf16>, vector<32x128xf32> -> vector<32x128xf32>
    %139 = vector.extract_strided_slice %12 {offsets = [5, 0], sizes = [1, 128], strides = [1, 1]} : vector<6x128xf32> to vector<1x128xf32>
    %140 = vector.shape_cast %139 : vector<1x128xf32> to vector<128xf32>
    %141 = vector.shape_cast %140 : vector<128xf32> to vector<1x128xf32>
    %142 = vector.broadcast %141 : vector<1x128xf32> to vector<32x128xf32>
    %143 = arith.addf %138, %142 : vector<32x128xf32>
    %144 = arith.addf %84, %143 : vector<32x128xf32>
    %c1 = arith.constant 1 : index
    %c0_48 = arith.constant 0 : index
    %c0_49 = arith.constant 0 : index
    %145 = vector.load %arg10[%c1, %c0_48, %c0_49] : memref<6x6x128xf32, #tpu.memory_space<vmem>>, vector<1x6x128xf32>
    %146 = vector.shape_cast %145 : vector<1x6x128xf32> to vector<6x128xf32>
    %147 = vector.extract_strided_slice %146 {offsets = [0, 0], sizes = [1, 128], strides = [1, 1]} : vector<6x128xf32> to vector<1x128xf32>
    %148 = vector.shape_cast %147 : vector<1x128xf32> to vector<128xf32>
    %149 = vector.shape_cast %148 : vector<128xf32> to vector<1x128xf32>
    %150 = vector.extract_strided_slice %146 {offsets = [1, 0], sizes = [1, 128], strides = [1, 1]} : vector<6x128xf32> to vector<1x128xf32>
    %151 = vector.shape_cast %150 : vector<1x128xf32> to vector<128xf32>
    %152 = vector.shape_cast %151 : vector<128xf32> to vector<1x128xf32>
    %cst_50 = arith.constant dense<0.000000e+00> : vector<32xf32>
    %153 = vector.multi_reduction <add>, %144, %cst_50 [1] : vector<32x128xf32> to vector<32xf32>
    %154 = vector.shape_cast %153 : vector<32xf32> to vector<32x1xf32>
    %cst_51 = arith.constant 1.280000e+02 : f32
    %155 = vector.broadcast %cst_51 : f32 to vector<32x1xf32>
    %156 = arith.divf %154, %155 : vector<32x1xf32>
    %157 = vector.broadcast %156 : vector<32x1xf32> to vector<32x128xf32>
    %158 = arith.subf %144, %157 : vector<32x128xf32>
    %159 = arith.mulf %158, %158 : vector<32x128xf32>
    %cst_52 = arith.constant dense<0.000000e+00> : vector<32xf32>
    %160 = vector.multi_reduction <add>, %159, %cst_52 [1] : vector<32x128xf32> to vector<32xf32>
    %161 = vector.shape_cast %160 : vector<32xf32> to vector<32x1xf32>
    %cst_53 = arith.constant 1.280000e+02 : f32
    %162 = vector.broadcast %cst_53 : f32 to vector<32x1xf32>
    %163 = arith.divf %161, %162 : vector<32x1xf32>
    %164 = vector.broadcast %156 : vector<32x1xf32> to vector<32x128xf32>
    %165 = arith.subf %144, %164 : vector<32x128xf32>
    %cst_54 = arith.constant 9.99999974E-6 : f32
    %166 = vector.broadcast %cst_54 : f32 to vector<32x1xf32>
    %167 = arith.addf %163, %166 : vector<32x1xf32>
    %168 = math.rsqrt %167 : vector<32x1xf32>
    %169 = vector.broadcast %168 : vector<32x1xf32> to vector<32x128xf32>
    %170 = arith.mulf %165, %169 : vector<32x128xf32>
    %171 = vector.broadcast %149 : vector<1x128xf32> to vector<32x128xf32>
    %172 = arith.mulf %170, %171 : vector<32x128xf32>
    %173 = vector.broadcast %152 : vector<1x128xf32> to vector<32x128xf32>
    %174 = arith.addf %172, %173 : vector<32x128xf32>
    %175 = arith.truncf %174 : vector<32x128xf32> to vector<32x128xbf16>
    %c1_55 = arith.constant 1 : index
    %c0_56 = arith.constant 0 : index
    %c0_57 = arith.constant 0 : index
    %176 = vector.load %arg4[%c1_55, %c0_56, %c0_57] : memref<6x128x384xbf16, #tpu.memory_space<vmem>>, vector<1x128x384xbf16>
    %177 = vector.shape_cast %176 : vector<1x128x384xbf16> to vector<128x384xbf16>
    %cst_58 = arith.constant dense<0.000000e+00> : vector<32x384xf32>
    %178 = tpu.matmul %175, %177, %cst_58 {dimension_numbers = #tpu.dot_dimension_numbers<[1], [0], [0], [1], [0, 0, 1, 1], [], []>} : vector<32x128xbf16>, vector<128x384xbf16>, vector<32x384xf32> -> vector<32x384xf32>
    %c1_59 = arith.constant 1 : index
    %c0_60 = arith.constant 0 : index
    %179 = vector.load %arg5[%c1_59, %c0_60] : memref<6x384xf32, #tpu.memory_space<vmem>>, vector<1x384xf32>
    %180 = vector.shape_cast %179 : vector<1x384xf32> to vector<384xf32>
    %181 = vector.shape_cast %180 : vector<384xf32> to vector<1x384xf32>
    %182 = vector.broadcast %181 : vector<1x384xf32> to vector<32x384xf32>
    %183 = arith.addf %178, %182 : vector<32x384xf32>
    %184 = vector.extract_strided_slice %183 {offsets = [0, 0], sizes = [32, 128], strides = [1, 1]} : vector<32x384xf32> to vector<32x128xf32>
    %185 = vector.shape_cast %184 : vector<32x128xf32> to vector<2x16x128xf32>
    %186 = vector.extract_strided_slice %183 {offsets = [0, 128], sizes = [32, 128], strides = [1, 1]} : vector<32x384xf32> to vector<32x128xf32>
    %187 = vector.shape_cast %186 : vector<32x128xf32> to vector<2x16x128xf32>
    %188 = vector.extract_strided_slice %183 {offsets = [0, 256], sizes = [32, 128], strides = [1, 1]} : vector<32x384xf32> to vector<32x128xf32>
    %189 = vector.shape_cast %188 : vector<32x128xf32> to vector<2x16x128xf32>
    %190 = arith.truncf %185 : vector<2x16x128xf32> to vector<2x16x128xbf16>
    %191 = arith.truncf %187 : vector<2x16x128xf32> to vector<2x16x128xbf16>
    "tpu.trace_start"() <{level = 10 : i32, message = "bqd,bkd->bqk"}> : () -> ()
    %cst_61 = arith.constant dense<0.000000e+00> : vector<2x16x16xf32>
    %192 = tpu.matmul %190, %191, %cst_61 {dimension_numbers = #tpu.dot_dimension_numbers<[2], [2], [1], [1], [0, 0, 0, 1, 1, 1], [0], [0]>} : vector<2x16x128xbf16>, vector<2x16x128xbf16>, vector<2x16x16xf32> -> vector<2x16x16xf32>
    "tpu.trace_stop"() : () -> ()
    %cst_62 = arith.constant 0.0883883461 : f32
    %193 = vector.broadcast %cst_62 : f32 to vector<2x16x16xf32>
    %194 = arith.mulf %192, %193 : vector<2x16x16xf32>
    %cst_63 = arith.constant dense<0xFF800000> : vector<2x16xf32>
    %195 = vector.multi_reduction <maximumf>, %194, %cst_63 [2] : vector<2x16x16xf32> to vector<2x16xf32>
    %196 = vector.shape_cast %195 : vector<2x16xf32> to vector<2x16x1xf32>
    %197 = vector.broadcast %196 : vector<2x16x1xf32> to vector<2x16x16xf32>
    %198 = arith.subf %194, %197 : vector<2x16x16xf32>
    %199 = math.exp %198 : vector<2x16x16xf32>
    %cst_64 = arith.constant dense<0.000000e+00> : vector<2x16xf32>
    %200 = vector.multi_reduction <add>, %199, %cst_64 [2] : vector<2x16x16xf32> to vector<2x16xf32>
    %201 = vector.shape_cast %200 : vector<2x16xf32> to vector<2x16x1xf32>
    %202 = tpu.reciprocal %201 {approx = true} : vector<2x16x1xf32> -> vector<2x16x1xf32>
    %203 = vector.broadcast %202 : vector<2x16x1xf32> to vector<2x16x16xf32>
    %204 = arith.mulf %199, %203 : vector<2x16x16xf32>
    %205 = arith.truncf %204 : vector<2x16x16xf32> to vector<2x16x16xbf16>
    %206 = arith.truncf %189 : vector<2x16x128xf32> to vector<2x16x128xbf16>
    "tpu.trace_start"() <{level = 10 : i32, message = "bqk,bkd->bqd"}> : () -> ()
    %cst_65 = arith.constant dense<0.000000e+00> : vector<2x16x128xf32>
    %207 = tpu.matmul %205, %206, %cst_65 {dimension_numbers = #tpu.dot_dimension_numbers<[2], [1], [1], [2], [0, 0, 0, 1, 1, 2], [0], [0]>} : vector<2x16x16xbf16>, vector<2x16x128xbf16>, vector<2x16x128xf32> -> vector<2x16x128xf32>
    "tpu.trace_stop"() : () -> ()
    %208 = vector.shape_cast %207 : vector<2x16x128xf32> to vector<32x128xf32>
    %209 = arith.truncf %208 : vector<32x128xf32> to vector<32x128xbf16>
    %c1_66 = arith.constant 1 : index
    %c0_67 = arith.constant 0 : index
    %c0_68 = arith.constant 0 : index
    %210 = vector.load %arg6[%c1_66, %c0_67, %c0_68] : memref<6x128x128xbf16, #tpu.memory_space<vmem>>, vector<1x128x128xbf16>
    %211 = vector.shape_cast %210 : vector<1x128x128xbf16> to vector<128x128xbf16>
    %cst_69 = arith.constant dense<0.000000e+00> : vector<32x128xf32>
    %212 = tpu.matmul %209, %211, %cst_69 {dimension_numbers = #tpu.dot_dimension_numbers<[1], [0], [0], [1], [0, 0, 1, 1], [], []>} : vector<32x128xbf16>, vector<128x128xbf16>, vector<32x128xf32> -> vector<32x128xf32>
    %213 = vector.extract_strided_slice %146 {offsets = [2, 0], sizes = [1, 128], strides = [1, 1]} : vector<6x128xf32> to vector<1x128xf32>
    %214 = vector.shape_cast %213 : vector<1x128xf32> to vector<128xf32>
    %215 = vector.shape_cast %214 : vector<128xf32> to vector<1x128xf32>
    %216 = vector.broadcast %215 : vector<1x128xf32> to vector<32x128xf32>
    %217 = arith.addf %212, %216 : vector<32x128xf32>
    %218 = arith.addf %144, %217 : vector<32x128xf32>
    %219 = vector.extract_strided_slice %146 {offsets = [3, 0], sizes = [1, 128], strides = [1, 1]} : vector<6x128xf32> to vector<1x128xf32>
    %220 = vector.shape_cast %219 : vector<1x128xf32> to vector<128xf32>
    %221 = vector.shape_cast %220 : vector<128xf32> to vector<1x128xf32>
    %222 = vector.extract_strided_slice %146 {offsets = [4, 0], sizes = [1, 128], strides = [1, 1]} : vector<6x128xf32> to vector<1x128xf32>
    %223 = vector.shape_cast %222 : vector<1x128xf32> to vector<128xf32>
    %224 = vector.shape_cast %223 : vector<128xf32> to vector<1x128xf32>
    %cst_70 = arith.constant dense<0.000000e+00> : vector<32xf32>
    %225 = vector.multi_reduction <add>, %218, %cst_70 [1] : vector<32x128xf32> to vector<32xf32>
    %226 = vector.shape_cast %225 : vector<32xf32> to vector<32x1xf32>
    %cst_71 = arith.constant 1.280000e+02 : f32
    %227 = vector.broadcast %cst_71 : f32 to vector<32x1xf32>
    %228 = arith.divf %226, %227 : vector<32x1xf32>
    %229 = vector.broadcast %228 : vector<32x1xf32> to vector<32x128xf32>
    %230 = arith.subf %218, %229 : vector<32x128xf32>
    %231 = arith.mulf %230, %230 : vector<32x128xf32>
    %cst_72 = arith.constant dense<0.000000e+00> : vector<32xf32>
    %232 = vector.multi_reduction <add>, %231, %cst_72 [1] : vector<32x128xf32> to vector<32xf32>
    %233 = vector.shape_cast %232 : vector<32xf32> to vector<32x1xf32>
    %cst_73 = arith.constant 1.280000e+02 : f32
    %234 = vector.broadcast %cst_73 : f32 to vector<32x1xf32>
    %235 = arith.divf %233, %234 : vector<32x1xf32>
    %236 = vector.broadcast %228 : vector<32x1xf32> to vector<32x128xf32>
    %237 = arith.subf %218, %236 : vector<32x128xf32>
    %cst_74 = arith.constant 9.99999974E-6 : f32
    %238 = vector.broadcast %cst_74 : f32 to vector<32x1xf32>
    %239 = arith.addf %235, %238 : vector<32x1xf32>
    %240 = math.rsqrt %239 : vector<32x1xf32>
    %241 = vector.broadcast %240 : vector<32x1xf32> to vector<32x128xf32>
    %242 = arith.mulf %237, %241 : vector<32x128xf32>
    %243 = vector.broadcast %221 : vector<1x128xf32> to vector<32x128xf32>
    %244 = arith.mulf %242, %243 : vector<32x128xf32>
    %245 = vector.broadcast %224 : vector<1x128xf32> to vector<32x128xf32>
    %246 = arith.addf %244, %245 : vector<32x128xf32>
    %247 = arith.truncf %246 : vector<32x128xf32> to vector<32x128xbf16>
    %c1_75 = arith.constant 1 : index
    %c0_76 = arith.constant 0 : index
    %c0_77 = arith.constant 0 : index
    %248 = vector.load %arg7[%c1_75, %c0_76, %c0_77] : memref<6x128x512xbf16, #tpu.memory_space<vmem>>, vector<1x128x512xbf16>
    %249 = vector.shape_cast %248 : vector<1x128x512xbf16> to vector<128x512xbf16>
    %cst_78 = arith.constant dense<0.000000e+00> : vector<32x512xf32>
    %250 = tpu.matmul %247, %249, %cst_78 {dimension_numbers = #tpu.dot_dimension_numbers<[1], [0], [0], [1], [0, 0, 1, 1], [], []>} : vector<32x128xbf16>, vector<128x512xbf16>, vector<32x512xf32> -> vector<32x512xf32>
    %c1_79 = arith.constant 1 : index
    %c0_80 = arith.constant 0 : index
    %251 = vector.load %arg8[%c1_79, %c0_80] : memref<6x512xf32, #tpu.memory_space<vmem>>, vector<1x512xf32>
    %252 = vector.shape_cast %251 : vector<1x512xf32> to vector<512xf32>
    %253 = vector.shape_cast %252 : vector<512xf32> to vector<1x512xf32>
    %254 = vector.broadcast %253 : vector<1x512xf32> to vector<32x512xf32>
    %255 = arith.addf %250, %254 : vector<32x512xf32>
    %256 = arith.mulf %255, %255 : vector<32x512xf32>
    %257 = arith.mulf %255, %256 : vector<32x512xf32>
    %cst_81 = arith.constant 4.471500e-02 : f32
    %258 = vector.broadcast %cst_81 : f32 to vector<32x512xf32>
    %259 = arith.mulf %258, %257 : vector<32x512xf32>
    %260 = arith.addf %255, %259 : vector<32x512xf32>
    %cst_82 = arith.constant 0.797884583 : f32
    %261 = vector.broadcast %cst_82 : f32 to vector<32x512xf32>
    %262 = arith.mulf %261, %260 : vector<32x512xf32>
    %263 = math.tanh %262 : vector<32x512xf32>
    %cst_83 = arith.constant 1.000000e+00 : f32
    %264 = vector.broadcast %cst_83 : f32 to vector<32x512xf32>
    %265 = arith.addf %264, %263 : vector<32x512xf32>
    %cst_84 = arith.constant 5.000000e-01 : f32
    %266 = vector.broadcast %cst_84 : f32 to vector<32x512xf32>
    %267 = arith.mulf %266, %265 : vector<32x512xf32>
    %268 = arith.mulf %255, %267 : vector<32x512xf32>
    %269 = arith.truncf %268 : vector<32x512xf32> to vector<32x512xbf16>
    %c1_85 = arith.constant 1 : index
    %c0_86 = arith.constant 0 : index
    %c0_87 = arith.constant 0 : index
    %270 = vector.load %arg9[%c1_85, %c0_86, %c0_87] : memref<6x512x128xbf16, #tpu.memory_space<vmem>>, vector<1x512x128xbf16>
    %271 = vector.shape_cast %270 : vector<1x512x128xbf16> to vector<512x128xbf16>
    %cst_88 = arith.constant dense<0.000000e+00> : vector<32x128xf32>
    %272 = tpu.matmul %269, %271, %cst_88 {dimension_numbers = #tpu.dot_dimension_numbers<[1], [0], [0], [1], [0, 0, 1, 1], [], []>} : vector<32x512xbf16>, vector<512x128xbf16>, vector<32x128xf32> -> vector<32x128xf32>
    %273 = vector.extract_strided_slice %146 {offsets = [5, 0], sizes = [1, 128], strides = [1, 1]} : vector<6x128xf32> to vector<1x128xf32>
    %274 = vector.shape_cast %273 : vector<1x128xf32> to vector<128xf32>
    %275 = vector.shape_cast %274 : vector<128xf32> to vector<1x128xf32>
    %276 = vector.broadcast %275 : vector<1x128xf32> to vector<32x128xf32>
    %277 = arith.addf %272, %276 : vector<32x128xf32>
    %278 = arith.addf %218, %277 : vector<32x128xf32>
    %c2 = arith.constant 2 : index
    %c0_89 = arith.constant 0 : index
    %c0_90 = arith.constant 0 : index
    %279 = vector.load %arg10[%c2, %c0_89, %c0_90] : memref<6x6x128xf32, #tpu.memory_space<vmem>>, vector<1x6x128xf32>
    %280 = vector.shape_cast %279 : vector<1x6x128xf32> to vector<6x128xf32>
    %281 = vector.extract_strided_slice %280 {offsets = [0, 0], sizes = [1, 128], strides = [1, 1]} : vector<6x128xf32> to vector<1x128xf32>
    %282 = vector.shape_cast %281 : vector<1x128xf32> to vector<128xf32>
    %283 = vector.shape_cast %282 : vector<128xf32> to vector<1x128xf32>
    %284 = vector.extract_strided_slice %280 {offsets = [1, 0], sizes = [1, 128], strides = [1, 1]} : vector<6x128xf32> to vector<1x128xf32>
    %285 = vector.shape_cast %284 : vector<1x128xf32> to vector<128xf32>
    %286 = vector.shape_cast %285 : vector<128xf32> to vector<1x128xf32>
    %cst_91 = arith.constant dense<0.000000e+00> : vector<32xf32>
    %287 = vector.multi_reduction <add>, %278, %cst_91 [1] : vector<32x128xf32> to vector<32xf32>
    %288 = vector.shape_cast %287 : vector<32xf32> to vector<32x1xf32>
    %cst_92 = arith.constant 1.280000e+02 : f32
    %289 = vector.broadcast %cst_92 : f32 to vector<32x1xf32>
    %290 = arith.divf %288, %289 : vector<32x1xf32>
    %291 = vector.broadcast %290 : vector<32x1xf32> to vector<32x128xf32>
    %292 = arith.subf %278, %291 : vector<32x128xf32>
    %293 = arith.mulf %292, %292 : vector<32x128xf32>
    %cst_93 = arith.constant dense<0.000000e+00> : vector<32xf32>
    %294 = vector.multi_reduction <add>, %293, %cst_93 [1] : vector<32x128xf32> to vector<32xf32>
    %295 = vector.shape_cast %294 : vector<32xf32> to vector<32x1xf32>
    %cst_94 = arith.constant 1.280000e+02 : f32
    %296 = vector.broadcast %cst_94 : f32 to vector<32x1xf32>
    %297 = arith.divf %295, %296 : vector<32x1xf32>
    %298 = vector.broadcast %290 : vector<32x1xf32> to vector<32x128xf32>
    %299 = arith.subf %278, %298 : vector<32x128xf32>
    %cst_95 = arith.constant 9.99999974E-6 : f32
    %300 = vector.broadcast %cst_95 : f32 to vector<32x1xf32>
    %301 = arith.addf %297, %300 : vector<32x1xf32>
    %302 = math.rsqrt %301 : vector<32x1xf32>
    %303 = vector.broadcast %302 : vector<32x1xf32> to vector<32x128xf32>
    %304 = arith.mulf %299, %303 : vector<32x128xf32>
    %305 = vector.broadcast %283 : vector<1x128xf32> to vector<32x128xf32>
    %306 = arith.mulf %304, %305 : vector<32x128xf32>
    %307 = vector.broadcast %286 : vector<1x128xf32> to vector<32x128xf32>
    %308 = arith.addf %306, %307 : vector<32x128xf32>
    %309 = arith.truncf %308 : vector<32x128xf32> to vector<32x128xbf16>
    %c2_96 = arith.constant 2 : index
    %c0_97 = arith.constant 0 : index
    %c0_98 = arith.constant 0 : index
    %310 = vector.load %arg4[%c2_96, %c0_97, %c0_98] : memref<6x128x384xbf16, #tpu.memory_space<vmem>>, vector<1x128x384xbf16>
    %311 = vector.shape_cast %310 : vector<1x128x384xbf16> to vector<128x384xbf16>
    %cst_99 = arith.constant dense<0.000000e+00> : vector<32x384xf32>
    %312 = tpu.matmul %309, %311, %cst_99 {dimension_numbers = #tpu.dot_dimension_numbers<[1], [0], [0], [1], [0, 0, 1, 1], [], []>} : vector<32x128xbf16>, vector<128x384xbf16>, vector<32x384xf32> -> vector<32x384xf32>
    %c2_100 = arith.constant 2 : index
    %c0_101 = arith.constant 0 : index
    %313 = vector.load %arg5[%c2_100, %c0_101] : memref<6x384xf32, #tpu.memory_space<vmem>>, vector<1x384xf32>
    %314 = vector.shape_cast %313 : vector<1x384xf32> to vector<384xf32>
    %315 = vector.shape_cast %314 : vector<384xf32> to vector<1x384xf32>
    %316 = vector.broadcast %315 : vector<1x384xf32> to vector<32x384xf32>
    %317 = arith.addf %312, %316 : vector<32x384xf32>
    %318 = vector.extract_strided_slice %317 {offsets = [0, 0], sizes = [32, 128], strides = [1, 1]} : vector<32x384xf32> to vector<32x128xf32>
    %319 = vector.shape_cast %318 : vector<32x128xf32> to vector<2x16x128xf32>
    %320 = vector.extract_strided_slice %317 {offsets = [0, 128], sizes = [32, 128], strides = [1, 1]} : vector<32x384xf32> to vector<32x128xf32>
    %321 = vector.shape_cast %320 : vector<32x128xf32> to vector<2x16x128xf32>
    %322 = vector.extract_strided_slice %317 {offsets = [0, 256], sizes = [32, 128], strides = [1, 1]} : vector<32x384xf32> to vector<32x128xf32>
    %323 = vector.shape_cast %322 : vector<32x128xf32> to vector<2x16x128xf32>
    %324 = arith.truncf %319 : vector<2x16x128xf32> to vector<2x16x128xbf16>
    %325 = arith.truncf %321 : vector<2x16x128xf32> to vector<2x16x128xbf16>
    "tpu.trace_start"() <{level = 10 : i32, message = "bqd,bkd->bqk"}> : () -> ()
    %cst_102 = arith.constant dense<0.000000e+00> : vector<2x16x16xf32>
    %326 = tpu.matmul %324, %325, %cst_102 {dimension_numbers = #tpu.dot_dimension_numbers<[2], [2], [1], [1], [0, 0, 0, 1, 1, 1], [0], [0]>} : vector<2x16x128xbf16>, vector<2x16x128xbf16>, vector<2x16x16xf32> -> vector<2x16x16xf32>
    "tpu.trace_stop"() : () -> ()
    %cst_103 = arith.constant 0.0883883461 : f32
    %327 = vector.broadcast %cst_103 : f32 to vector<2x16x16xf32>
    %328 = arith.mulf %326, %327 : vector<2x16x16xf32>
    %cst_104 = arith.constant dense<0xFF800000> : vector<2x16xf32>
    %329 = vector.multi_reduction <maximumf>, %328, %cst_104 [2] : vector<2x16x16xf32> to vector<2x16xf32>
    %330 = vector.shape_cast %329 : vector<2x16xf32> to vector<2x16x1xf32>
    %331 = vector.broadcast %330 : vector<2x16x1xf32> to vector<2x16x16xf32>
    %332 = arith.subf %328, %331 : vector<2x16x16xf32>
    %333 = math.exp %332 : vector<2x16x16xf32>
    %cst_105 = arith.constant dense<0.000000e+00> : vector<2x16xf32>
    %334 = vector.multi_reduction <add>, %333, %cst_105 [2] : vector<2x16x16xf32> to vector<2x16xf32>
    %335 = vector.shape_cast %334 : vector<2x16xf32> to vector<2x16x1xf32>
    %336 = tpu.reciprocal %335 {approx = true} : vector<2x16x1xf32> -> vector<2x16x1xf32>
    %337 = vector.broadcast %336 : vector<2x16x1xf32> to vector<2x16x16xf32>
    %338 = arith.mulf %333, %337 : vector<2x16x16xf32>
    %339 = arith.truncf %338 : vector<2x16x16xf32> to vector<2x16x16xbf16>
    %340 = arith.truncf %323 : vector<2x16x128xf32> to vector<2x16x128xbf16>
    "tpu.trace_start"() <{level = 10 : i32, message = "bqk,bkd->bqd"}> : () -> ()
    %cst_106 = arith.constant dense<0.000000e+00> : vector<2x16x128xf32>
    %341 = tpu.matmul %339, %340, %cst_106 {dimension_numbers = #tpu.dot_dimension_numbers<[2], [1], [1], [2], [0, 0, 0, 1, 1, 2], [0], [0]>} : vector<2x16x16xbf16>, vector<2x16x128xbf16>, vector<2x16x128xf32> -> vector<2x16x128xf32>
    "tpu.trace_stop"() : () -> ()
    %342 = vector.shape_cast %341 : vector<2x16x128xf32> to vector<32x128xf32>
    %343 = arith.truncf %342 : vector<32x128xf32> to vector<32x128xbf16>
    %c2_107 = arith.constant 2 : index
    %c0_108 = arith.constant 0 : index
    %c0_109 = arith.constant 0 : index
    %344 = vector.load %arg6[%c2_107, %c0_108, %c0_109] : memref<6x128x128xbf16, #tpu.memory_space<vmem>>, vector<1x128x128xbf16>
    %345 = vector.shape_cast %344 : vector<1x128x128xbf16> to vector<128x128xbf16>
    %cst_110 = arith.constant dense<0.000000e+00> : vector<32x128xf32>
    %346 = tpu.matmul %343, %345, %cst_110 {dimension_numbers = #tpu.dot_dimension_numbers<[1], [0], [0], [1], [0, 0, 1, 1], [], []>} : vector<32x128xbf16>, vector<128x128xbf16>, vector<32x128xf32> -> vector<32x128xf32>
    %347 = vector.extract_strided_slice %280 {offsets = [2, 0], sizes = [1, 128], strides = [1, 1]} : vector<6x128xf32> to vector<1x128xf32>
    %348 = vector.shape_cast %347 : vector<1x128xf32> to vector<128xf32>
    %349 = vector.shape_cast %348 : vector<128xf32> to vector<1x128xf32>
    %350 = vector.broadcast %349 : vector<1x128xf32> to vector<32x128xf32>
    %351 = arith.addf %346, %350 : vector<32x128xf32>
    %352 = arith.addf %278, %351 : vector<32x128xf32>
    %353 = vector.extract_strided_slice %280 {offsets = [3, 0], sizes = [1, 128], strides = [1, 1]} : vector<6x128xf32> to vector<1x128xf32>
    %354 = vector.shape_cast %353 : vector<1x128xf32> to vector<128xf32>
    %355 = vector.shape_cast %354 : vector<128xf32> to vector<1x128xf32>
    %356 = vector.extract_strided_slice %280 {offsets = [4, 0], sizes = [1, 128], strides = [1, 1]} : vector<6x128xf32> to vector<1x128xf32>
    %357 = vector.shape_cast %356 : vector<1x128xf32> to vector<128xf32>
    %358 = vector.shape_cast %357 : vector<128xf32> to vector<1x128xf32>
    %cst_111 = arith.constant dense<0.000000e+00> : vector<32xf32>
    %359 = vector.multi_reduction <add>, %352, %cst_111 [1] : vector<32x128xf32> to vector<32xf32>
    %360 = vector.shape_cast %359 : vector<32xf32> to vector<32x1xf32>
    %cst_112 = arith.constant 1.280000e+02 : f32
    %361 = vector.broadcast %cst_112 : f32 to vector<32x1xf32>
    %362 = arith.divf %360, %361 : vector<32x1xf32>
    %363 = vector.broadcast %362 : vector<32x1xf32> to vector<32x128xf32>
    %364 = arith.subf %352, %363 : vector<32x128xf32>
    %365 = arith.mulf %364, %364 : vector<32x128xf32>
    %cst_113 = arith.constant dense<0.000000e+00> : vector<32xf32>
    %366 = vector.multi_reduction <add>, %365, %cst_113 [1] : vector<32x128xf32> to vector<32xf32>
    %367 = vector.shape_cast %366 : vector<32xf32> to vector<32x1xf32>
    %cst_114 = arith.constant 1.280000e+02 : f32
    %368 = vector.broadcast %cst_114 : f32 to vector<32x1xf32>
    %369 = arith.divf %367, %368 : vector<32x1xf32>
    %370 = vector.broadcast %362 : vector<32x1xf32> to vector<32x128xf32>
    %371 = arith.subf %352, %370 : vector<32x128xf32>
    %cst_115 = arith.constant 9.99999974E-6 : f32
    %372 = vector.broadcast %cst_115 : f32 to vector<32x1xf32>
    %373 = arith.addf %369, %372 : vector<32x1xf32>
    %374 = math.rsqrt %373 : vector<32x1xf32>
    %375 = vector.broadcast %374 : vector<32x1xf32> to vector<32x128xf32>
    %376 = arith.mulf %371, %375 : vector<32x128xf32>
    %377 = vector.broadcast %355 : vector<1x128xf32> to vector<32x128xf32>
    %378 = arith.mulf %376, %377 : vector<32x128xf32>
    %379 = vector.broadcast %358 : vector<1x128xf32> to vector<32x128xf32>
    %380 = arith.addf %378, %379 : vector<32x128xf32>
    %381 = arith.truncf %380 : vector<32x128xf32> to vector<32x128xbf16>
    %c2_116 = arith.constant 2 : index
    %c0_117 = arith.constant 0 : index
    %c0_118 = arith.constant 0 : index
    %382 = vector.load %arg7[%c2_116, %c0_117, %c0_118] : memref<6x128x512xbf16, #tpu.memory_space<vmem>>, vector<1x128x512xbf16>
    %383 = vector.shape_cast %382 : vector<1x128x512xbf16> to vector<128x512xbf16>
    %cst_119 = arith.constant dense<0.000000e+00> : vector<32x512xf32>
    %384 = tpu.matmul %381, %383, %cst_119 {dimension_numbers = #tpu.dot_dimension_numbers<[1], [0], [0], [1], [0, 0, 1, 1], [], []>} : vector<32x128xbf16>, vector<128x512xbf16>, vector<32x512xf32> -> vector<32x512xf32>
    %c2_120 = arith.constant 2 : index
    %c0_121 = arith.constant 0 : index
    %385 = vector.load %arg8[%c2_120, %c0_121] : memref<6x512xf32, #tpu.memory_space<vmem>>, vector<1x512xf32>
    %386 = vector.shape_cast %385 : vector<1x512xf32> to vector<512xf32>
    %387 = vector.shape_cast %386 : vector<512xf32> to vector<1x512xf32>
    %388 = vector.broadcast %387 : vector<1x512xf32> to vector<32x512xf32>
    %389 = arith.addf %384, %388 : vector<32x512xf32>
    %390 = arith.mulf %389, %389 : vector<32x512xf32>
    %391 = arith.mulf %389, %390 : vector<32x512xf32>
    %cst_122 = arith.constant 4.471500e-02 : f32
    %392 = vector.broadcast %cst_122 : f32 to vector<32x512xf32>
    %393 = arith.mulf %392, %391 : vector<32x512xf32>
    %394 = arith.addf %389, %393 : vector<32x512xf32>
    %cst_123 = arith.constant 0.797884583 : f32
    %395 = vector.broadcast %cst_123 : f32 to vector<32x512xf32>
    %396 = arith.mulf %395, %394 : vector<32x512xf32>
    %397 = math.tanh %396 : vector<32x512xf32>
    %cst_124 = arith.constant 1.000000e+00 : f32
    %398 = vector.broadcast %cst_124 : f32 to vector<32x512xf32>
    %399 = arith.addf %398, %397 : vector<32x512xf32>
    %cst_125 = arith.constant 5.000000e-01 : f32
    %400 = vector.broadcast %cst_125 : f32 to vector<32x512xf32>
    %401 = arith.mulf %400, %399 : vector<32x512xf32>
    %402 = arith.mulf %389, %401 : vector<32x512xf32>
    %403 = arith.truncf %402 : vector<32x512xf32> to vector<32x512xbf16>
    %c2_126 = arith.constant 2 : index
    %c0_127 = arith.constant 0 : index
    %c0_128 = arith.constant 0 : index
    %404 = vector.load %arg9[%c2_126, %c0_127, %c0_128] : memref<6x512x128xbf16, #tpu.memory_space<vmem>>, vector<1x512x128xbf16>
    %405 = vector.shape_cast %404 : vector<1x512x128xbf16> to vector<512x128xbf16>
    %cst_129 = arith.constant dense<0.000000e+00> : vector<32x128xf32>
    %406 = tpu.matmul %403, %405, %cst_129 {dimension_numbers = #tpu.dot_dimension_numbers<[1], [0], [0], [1], [0, 0, 1, 1], [], []>} : vector<32x512xbf16>, vector<512x128xbf16>, vector<32x128xf32> -> vector<32x128xf32>
    %407 = vector.extract_strided_slice %280 {offsets = [5, 0], sizes = [1, 128], strides = [1, 1]} : vector<6x128xf32> to vector<1x128xf32>
    %408 = vector.shape_cast %407 : vector<1x128xf32> to vector<128xf32>
    %409 = vector.shape_cast %408 : vector<128xf32> to vector<1x128xf32>
    %410 = vector.broadcast %409 : vector<1x128xf32> to vector<32x128xf32>
    %411 = arith.addf %406, %410 : vector<32x128xf32>
    %412 = arith.addf %352, %411 : vector<32x128xf32>
    %c3 = arith.constant 3 : index
    %c0_130 = arith.constant 0 : index
    %c0_131 = arith.constant 0 : index
    %413 = vector.load %arg10[%c3, %c0_130, %c0_131] : memref<6x6x128xf32, #tpu.memory_space<vmem>>, vector<1x6x128xf32>
    %414 = vector.shape_cast %413 : vector<1x6x128xf32> to vector<6x128xf32>
    %415 = vector.extract_strided_slice %414 {offsets = [0, 0], sizes = [1, 128], strides = [1, 1]} : vector<6x128xf32> to vector<1x128xf32>
    %416 = vector.shape_cast %415 : vector<1x128xf32> to vector<128xf32>
    %417 = vector.shape_cast %416 : vector<128xf32> to vector<1x128xf32>
    %418 = vector.extract_strided_slice %414 {offsets = [1, 0], sizes = [1, 128], strides = [1, 1]} : vector<6x128xf32> to vector<1x128xf32>
    %419 = vector.shape_cast %418 : vector<1x128xf32> to vector<128xf32>
    %420 = vector.shape_cast %419 : vector<128xf32> to vector<1x128xf32>
    %cst_132 = arith.constant dense<0.000000e+00> : vector<32xf32>
    %421 = vector.multi_reduction <add>, %412, %cst_132 [1] : vector<32x128xf32> to vector<32xf32>
    %422 = vector.shape_cast %421 : vector<32xf32> to vector<32x1xf32>
    %cst_133 = arith.constant 1.280000e+02 : f32
    %423 = vector.broadcast %cst_133 : f32 to vector<32x1xf32>
    %424 = arith.divf %422, %423 : vector<32x1xf32>
    %425 = vector.broadcast %424 : vector<32x1xf32> to vector<32x128xf32>
    %426 = arith.subf %412, %425 : vector<32x128xf32>
    %427 = arith.mulf %426, %426 : vector<32x128xf32>
    %cst_134 = arith.constant dense<0.000000e+00> : vector<32xf32>
    %428 = vector.multi_reduction <add>, %427, %cst_134 [1] : vector<32x128xf32> to vector<32xf32>
    %429 = vector.shape_cast %428 : vector<32xf32> to vector<32x1xf32>
    %cst_135 = arith.constant 1.280000e+02 : f32
    %430 = vector.broadcast %cst_135 : f32 to vector<32x1xf32>
    %431 = arith.divf %429, %430 : vector<32x1xf32>
    %432 = vector.broadcast %424 : vector<32x1xf32> to vector<32x128xf32>
    %433 = arith.subf %412, %432 : vector<32x128xf32>
    %cst_136 = arith.constant 9.99999974E-6 : f32
    %434 = vector.broadcast %cst_136 : f32 to vector<32x1xf32>
    %435 = arith.addf %431, %434 : vector<32x1xf32>
    %436 = math.rsqrt %435 : vector<32x1xf32>
    %437 = vector.broadcast %436 : vector<32x1xf32> to vector<32x128xf32>
    %438 = arith.mulf %433, %437 : vector<32x128xf32>
    %439 = vector.broadcast %417 : vector<1x128xf32> to vector<32x128xf32>
    %440 = arith.mulf %438, %439 : vector<32x128xf32>
    %441 = vector.broadcast %420 : vector<1x128xf32> to vector<32x128xf32>
    %442 = arith.addf %440, %441 : vector<32x128xf32>
    %443 = arith.truncf %442 : vector<32x128xf32> to vector<32x128xbf16>
    %c3_137 = arith.constant 3 : index
    %c0_138 = arith.constant 0 : index
    %c0_139 = arith.constant 0 : index
    %444 = vector.load %arg4[%c3_137, %c0_138, %c0_139] : memref<6x128x384xbf16, #tpu.memory_space<vmem>>, vector<1x128x384xbf16>
    %445 = vector.shape_cast %444 : vector<1x128x384xbf16> to vector<128x384xbf16>
    %cst_140 = arith.constant dense<0.000000e+00> : vector<32x384xf32>
    %446 = tpu.matmul %443, %445, %cst_140 {dimension_numbers = #tpu.dot_dimension_numbers<[1], [0], [0], [1], [0, 0, 1, 1], [], []>} : vector<32x128xbf16>, vector<128x384xbf16>, vector<32x384xf32> -> vector<32x384xf32>
    %c3_141 = arith.constant 3 : index
    %c0_142 = arith.constant 0 : index
    %447 = vector.load %arg5[%c3_141, %c0_142] : memref<6x384xf32, #tpu.memory_space<vmem>>, vector<1x384xf32>
    %448 = vector.shape_cast %447 : vector<1x384xf32> to vector<384xf32>
    %449 = vector.shape_cast %448 : vector<384xf32> to vector<1x384xf32>
    %450 = vector.broadcast %449 : vector<1x384xf32> to vector<32x384xf32>
    %451 = arith.addf %446, %450 : vector<32x384xf32>
    %452 = vector.extract_strided_slice %451 {offsets = [0, 0], sizes = [32, 128], strides = [1, 1]} : vector<32x384xf32> to vector<32x128xf32>
    %453 = vector.shape_cast %452 : vector<32x128xf32> to vector<2x16x128xf32>
    %454 = vector.extract_strided_slice %451 {offsets = [0, 128], sizes = [32, 128], strides = [1, 1]} : vector<32x384xf32> to vector<32x128xf32>
    %455 = vector.shape_cast %454 : vector<32x128xf32> to vector<2x16x128xf32>
    %456 = vector.extract_strided_slice %451 {offsets = [0, 256], sizes = [32, 128], strides = [1, 1]} : vector<32x384xf32> to vector<32x128xf32>
    %457 = vector.shape_cast %456 : vector<32x128xf32> to vector<2x16x128xf32>
    %458 = arith.truncf %453 : vector<2x16x128xf32> to vector<2x16x128xbf16>
    %459 = arith.truncf %455 : vector<2x16x128xf32> to vector<2x16x128xbf16>
    "tpu.trace_start"() <{level = 10 : i32, message = "bqd,bkd->bqk"}> : () -> ()
    %cst_143 = arith.constant dense<0.000000e+00> : vector<2x16x16xf32>
    %460 = tpu.matmul %458, %459, %cst_143 {dimension_numbers = #tpu.dot_dimension_numbers<[2], [2], [1], [1], [0, 0, 0, 1, 1, 1], [0], [0]>} : vector<2x16x128xbf16>, vector<2x16x128xbf16>, vector<2x16x16xf32> -> vector<2x16x16xf32>
    "tpu.trace_stop"() : () -> ()
    %cst_144 = arith.constant 0.0883883461 : f32
    %461 = vector.broadcast %cst_144 : f32 to vector<2x16x16xf32>
    %462 = arith.mulf %460, %461 : vector<2x16x16xf32>
    %cst_145 = arith.constant dense<0xFF800000> : vector<2x16xf32>
    %463 = vector.multi_reduction <maximumf>, %462, %cst_145 [2] : vector<2x16x16xf32> to vector<2x16xf32>
    %464 = vector.shape_cast %463 : vector<2x16xf32> to vector<2x16x1xf32>
    %465 = vector.broadcast %464 : vector<2x16x1xf32> to vector<2x16x16xf32>
    %466 = arith.subf %462, %465 : vector<2x16x16xf32>
    %467 = math.exp %466 : vector<2x16x16xf32>
    %cst_146 = arith.constant dense<0.000000e+00> : vector<2x16xf32>
    %468 = vector.multi_reduction <add>, %467, %cst_146 [2] : vector<2x16x16xf32> to vector<2x16xf32>
    %469 = vector.shape_cast %468 : vector<2x16xf32> to vector<2x16x1xf32>
    %470 = tpu.reciprocal %469 {approx = true} : vector<2x16x1xf32> -> vector<2x16x1xf32>
    %471 = vector.broadcast %470 : vector<2x16x1xf32> to vector<2x16x16xf32>
    %472 = arith.mulf %467, %471 : vector<2x16x16xf32>
    %473 = arith.truncf %472 : vector<2x16x16xf32> to vector<2x16x16xbf16>
    %474 = arith.truncf %457 : vector<2x16x128xf32> to vector<2x16x128xbf16>
    "tpu.trace_start"() <{level = 10 : i32, message = "bqk,bkd->bqd"}> : () -> ()
    %cst_147 = arith.constant dense<0.000000e+00> : vector<2x16x128xf32>
    %475 = tpu.matmul %473, %474, %cst_147 {dimension_numbers = #tpu.dot_dimension_numbers<[2], [1], [1], [2], [0, 0, 0, 1, 1, 2], [0], [0]>} : vector<2x16x16xbf16>, vector<2x16x128xbf16>, vector<2x16x128xf32> -> vector<2x16x128xf32>
    "tpu.trace_stop"() : () -> ()
    %476 = vector.shape_cast %475 : vector<2x16x128xf32> to vector<32x128xf32>
    %477 = arith.truncf %476 : vector<32x128xf32> to vector<32x128xbf16>
    %c3_148 = arith.constant 3 : index
    %c0_149 = arith.constant 0 : index
    %c0_150 = arith.constant 0 : index
    %478 = vector.load %arg6[%c3_148, %c0_149, %c0_150] : memref<6x128x128xbf16, #tpu.memory_space<vmem>>, vector<1x128x128xbf16>
    %479 = vector.shape_cast %478 : vector<1x128x128xbf16> to vector<128x128xbf16>
    %cst_151 = arith.constant dense<0.000000e+00> : vector<32x128xf32>
    %480 = tpu.matmul %477, %479, %cst_151 {dimension_numbers = #tpu.dot_dimension_numbers<[1], [0], [0], [1], [0, 0, 1, 1], [], []>} : vector<32x128xbf16>, vector<128x128xbf16>, vector<32x128xf32> -> vector<32x128xf32>
    %481 = vector.extract_strided_slice %414 {offsets = [2, 0], sizes = [1, 128], strides = [1, 1]} : vector<6x128xf32> to vector<1x128xf32>
    %482 = vector.shape_cast %481 : vector<1x128xf32> to vector<128xf32>
    %483 = vector.shape_cast %482 : vector<128xf32> to vector<1x128xf32>
    %484 = vector.broadcast %483 : vector<1x128xf32> to vector<32x128xf32>
    %485 = arith.addf %480, %484 : vector<32x128xf32>
    %486 = arith.addf %412, %485 : vector<32x128xf32>
    %487 = vector.extract_strided_slice %414 {offsets = [3, 0], sizes = [1, 128], strides = [1, 1]} : vector<6x128xf32> to vector<1x128xf32>
    %488 = vector.shape_cast %487 : vector<1x128xf32> to vector<128xf32>
    %489 = vector.shape_cast %488 : vector<128xf32> to vector<1x128xf32>
    %490 = vector.extract_strided_slice %414 {offsets = [4, 0], sizes = [1, 128], strides = [1, 1]} : vector<6x128xf32> to vector<1x128xf32>
    %491 = vector.shape_cast %490 : vector<1x128xf32> to vector<128xf32>
    %492 = vector.shape_cast %491 : vector<128xf32> to vector<1x128xf32>
    %cst_152 = arith.constant dense<0.000000e+00> : vector<32xf32>
    %493 = vector.multi_reduction <add>, %486, %cst_152 [1] : vector<32x128xf32> to vector<32xf32>
    %494 = vector.shape_cast %493 : vector<32xf32> to vector<32x1xf32>
    %cst_153 = arith.constant 1.280000e+02 : f32
    %495 = vector.broadcast %cst_153 : f32 to vector<32x1xf32>
    %496 = arith.divf %494, %495 : vector<32x1xf32>
    %497 = vector.broadcast %496 : vector<32x1xf32> to vector<32x128xf32>
    %498 = arith.subf %486, %497 : vector<32x128xf32>
    %499 = arith.mulf %498, %498 : vector<32x128xf32>
    %cst_154 = arith.constant dense<0.000000e+00> : vector<32xf32>
    %500 = vector.multi_reduction <add>, %499, %cst_154 [1] : vector<32x128xf32> to vector<32xf32>
    %501 = vector.shape_cast %500 : vector<32xf32> to vector<32x1xf32>
    %cst_155 = arith.constant 1.280000e+02 : f32
    %502 = vector.broadcast %cst_155 : f32 to vector<32x1xf32>
    %503 = arith.divf %501, %502 : vector<32x1xf32>
    %504 = vector.broadcast %496 : vector<32x1xf32> to vector<32x128xf32>
    %505 = arith.subf %486, %504 : vector<32x128xf32>
    %cst_156 = arith.constant 9.99999974E-6 : f32
    %506 = vector.broadcast %cst_156 : f32 to vector<32x1xf32>
    %507 = arith.addf %503, %506 : vector<32x1xf32>
    %508 = math.rsqrt %507 : vector<32x1xf32>
    %509 = vector.broadcast %508 : vector<32x1xf32> to vector<32x128xf32>
    %510 = arith.mulf %505, %509 : vector<32x128xf32>
    %511 = vector.broadcast %489 : vector<1x128xf32> to vector<32x128xf32>
    %512 = arith.mulf %510, %511 : vector<32x128xf32>
    %513 = vector.broadcast %492 : vector<1x128xf32> to vector<32x128xf32>
    %514 = arith.addf %512, %513 : vector<32x128xf32>
    %515 = arith.truncf %514 : vector<32x128xf32> to vector<32x128xbf16>
    %c3_157 = arith.constant 3 : index
    %c0_158 = arith.constant 0 : index
    %c0_159 = arith.constant 0 : index
    %516 = vector.load %arg7[%c3_157, %c0_158, %c0_159] : memref<6x128x512xbf16, #tpu.memory_space<vmem>>, vector<1x128x512xbf16>
    %517 = vector.shape_cast %516 : vector<1x128x512xbf16> to vector<128x512xbf16>
    %cst_160 = arith.constant dense<0.000000e+00> : vector<32x512xf32>
    %518 = tpu.matmul %515, %517, %cst_160 {dimension_numbers = #tpu.dot_dimension_numbers<[1], [0], [0], [1], [0, 0, 1, 1], [], []>} : vector<32x128xbf16>, vector<128x512xbf16>, vector<32x512xf32> -> vector<32x512xf32>
    %c3_161 = arith.constant 3 : index
    %c0_162 = arith.constant 0 : index
    %519 = vector.load %arg8[%c3_161, %c0_162] : memref<6x512xf32, #tpu.memory_space<vmem>>, vector<1x512xf32>
    %520 = vector.shape_cast %519 : vector<1x512xf32> to vector<512xf32>
    %521 = vector.shape_cast %520 : vector<512xf32> to vector<1x512xf32>
    %522 = vector.broadcast %521 : vector<1x512xf32> to vector<32x512xf32>
    %523 = arith.addf %518, %522 : vector<32x512xf32>
    %524 = arith.mulf %523, %523 : vector<32x512xf32>
    %525 = arith.mulf %523, %524 : vector<32x512xf32>
    %cst_163 = arith.constant 4.471500e-02 : f32
    %526 = vector.broadcast %cst_163 : f32 to vector<32x512xf32>
    %527 = arith.mulf %526, %525 : vector<32x512xf32>
    %528 = arith.addf %523, %527 : vector<32x512xf32>
    %cst_164 = arith.constant 0.797884583 : f32
    %529 = vector.broadcast %cst_164 : f32 to vector<32x512xf32>
    %530 = arith.mulf %529, %528 : vector<32x512xf32>
    %531 = math.tanh %530 : vector<32x512xf32>
    %cst_165 = arith.constant 1.000000e+00 : f32
    %532 = vector.broadcast %cst_165 : f32 to vector<32x512xf32>
    %533 = arith.addf %532, %531 : vector<32x512xf32>
    %cst_166 = arith.constant 5.000000e-01 : f32
    %534 = vector.broadcast %cst_166 : f32 to vector<32x512xf32>
    %535 = arith.mulf %534, %533 : vector<32x512xf32>
    %536 = arith.mulf %523, %535 : vector<32x512xf32>
    %537 = arith.truncf %536 : vector<32x512xf32> to vector<32x512xbf16>
    %c3_167 = arith.constant 3 : index
    %c0_168 = arith.constant 0 : index
    %c0_169 = arith.constant 0 : index
    %538 = vector.load %arg9[%c3_167, %c0_168, %c0_169] : memref<6x512x128xbf16, #tpu.memory_space<vmem>>, vector<1x512x128xbf16>
    %539 = vector.shape_cast %538 : vector<1x512x128xbf16> to vector<512x128xbf16>
    %cst_170 = arith.constant dense<0.000000e+00> : vector<32x128xf32>
    %540 = tpu.matmul %537, %539, %cst_170 {dimension_numbers = #tpu.dot_dimension_numbers<[1], [0], [0], [1], [0, 0, 1, 1], [], []>} : vector<32x512xbf16>, vector<512x128xbf16>, vector<32x128xf32> -> vector<32x128xf32>
    %541 = vector.extract_strided_slice %414 {offsets = [5, 0], sizes = [1, 128], strides = [1, 1]} : vector<6x128xf32> to vector<1x128xf32>
    %542 = vector.shape_cast %541 : vector<1x128xf32> to vector<128xf32>
    %543 = vector.shape_cast %542 : vector<128xf32> to vector<1x128xf32>
    %544 = vector.broadcast %543 : vector<1x128xf32> to vector<32x128xf32>
    %545 = arith.addf %540, %544 : vector<32x128xf32>
    %546 = arith.addf %486, %545 : vector<32x128xf32>
    %c4 = arith.constant 4 : index
    %c0_171 = arith.constant 0 : index
    %c0_172 = arith.constant 0 : index
    %547 = vector.load %arg10[%c4, %c0_171, %c0_172] : memref<6x6x128xf32, #tpu.memory_space<vmem>>, vector<1x6x128xf32>
    %548 = vector.shape_cast %547 : vector<1x6x128xf32> to vector<6x128xf32>
    %549 = vector.extract_strided_slice %548 {offsets = [0, 0], sizes = [1, 128], strides = [1, 1]} : vector<6x128xf32> to vector<1x128xf32>
    %550 = vector.shape_cast %549 : vector<1x128xf32> to vector<128xf32>
    %551 = vector.shape_cast %550 : vector<128xf32> to vector<1x128xf32>
    %552 = vector.extract_strided_slice %548 {offsets = [1, 0], sizes = [1, 128], strides = [1, 1]} : vector<6x128xf32> to vector<1x128xf32>
    %553 = vector.shape_cast %552 : vector<1x128xf32> to vector<128xf32>
    %554 = vector.shape_cast %553 : vector<128xf32> to vector<1x128xf32>
    %cst_173 = arith.constant dense<0.000000e+00> : vector<32xf32>
    %555 = vector.multi_reduction <add>, %546, %cst_173 [1] : vector<32x128xf32> to vector<32xf32>
    %556 = vector.shape_cast %555 : vector<32xf32> to vector<32x1xf32>
    %cst_174 = arith.constant 1.280000e+02 : f32
    %557 = vector.broadcast %cst_174 : f32 to vector<32x1xf32>
    %558 = arith.divf %556, %557 : vector<32x1xf32>
    %559 = vector.broadcast %558 : vector<32x1xf32> to vector<32x128xf32>
    %560 = arith.subf %546, %559 : vector<32x128xf32>
    %561 = arith.mulf %560, %560 : vector<32x128xf32>
    %cst_175 = arith.constant dense<0.000000e+00> : vector<32xf32>
    %562 = vector.multi_reduction <add>, %561, %cst_175 [1] : vector<32x128xf32> to vector<32xf32>
    %563 = vector.shape_cast %562 : vector<32xf32> to vector<32x1xf32>
    %cst_176 = arith.constant 1.280000e+02 : f32
    %564 = vector.broadcast %cst_176 : f32 to vector<32x1xf32>
    %565 = arith.divf %563, %564 : vector<32x1xf32>
    %566 = vector.broadcast %558 : vector<32x1xf32> to vector<32x128xf32>
    %567 = arith.subf %546, %566 : vector<32x128xf32>
    %cst_177 = arith.constant 9.99999974E-6 : f32
    %568 = vector.broadcast %cst_177 : f32 to vector<32x1xf32>
    %569 = arith.addf %565, %568 : vector<32x1xf32>
    %570 = math.rsqrt %569 : vector<32x1xf32>
    %571 = vector.broadcast %570 : vector<32x1xf32> to vector<32x128xf32>
    %572 = arith.mulf %567, %571 : vector<32x128xf32>
    %573 = vector.broadcast %551 : vector<1x128xf32> to vector<32x128xf32>
    %574 = arith.mulf %572, %573 : vector<32x128xf32>
    %575 = vector.broadcast %554 : vector<1x128xf32> to vector<32x128xf32>
    %576 = arith.addf %574, %575 : vector<32x128xf32>
    %577 = arith.truncf %576 : vector<32x128xf32> to vector<32x128xbf16>
    %c4_178 = arith.constant 4 : index
    %c0_179 = arith.constant 0 : index
    %c0_180 = arith.constant 0 : index
    %578 = vector.load %arg4[%c4_178, %c0_179, %c0_180] : memref<6x128x384xbf16, #tpu.memory_space<vmem>>, vector<1x128x384xbf16>
    %579 = vector.shape_cast %578 : vector<1x128x384xbf16> to vector<128x384xbf16>
    %cst_181 = arith.constant dense<0.000000e+00> : vector<32x384xf32>
    %580 = tpu.matmul %577, %579, %cst_181 {dimension_numbers = #tpu.dot_dimension_numbers<[1], [0], [0], [1], [0, 0, 1, 1], [], []>} : vector<32x128xbf16>, vector<128x384xbf16>, vector<32x384xf32> -> vector<32x384xf32>
    %c4_182 = arith.constant 4 : index
    %c0_183 = arith.constant 0 : index
    %581 = vector.load %arg5[%c4_182, %c0_183] : memref<6x384xf32, #tpu.memory_space<vmem>>, vector<1x384xf32>
    %582 = vector.shape_cast %581 : vector<1x384xf32> to vector<384xf32>
    %583 = vector.shape_cast %582 : vector<384xf32> to vector<1x384xf32>
    %584 = vector.broadcast %583 : vector<1x384xf32> to vector<32x384xf32>
    %585 = arith.addf %580, %584 : vector<32x384xf32>
    %586 = vector.extract_strided_slice %585 {offsets = [0, 0], sizes = [32, 128], strides = [1, 1]} : vector<32x384xf32> to vector<32x128xf32>
    %587 = vector.shape_cast %586 : vector<32x128xf32> to vector<2x16x128xf32>
    %588 = vector.extract_strided_slice %585 {offsets = [0, 128], sizes = [32, 128], strides = [1, 1]} : vector<32x384xf32> to vector<32x128xf32>
    %589 = vector.shape_cast %588 : vector<32x128xf32> to vector<2x16x128xf32>
    %590 = vector.extract_strided_slice %585 {offsets = [0, 256], sizes = [32, 128], strides = [1, 1]} : vector<32x384xf32> to vector<32x128xf32>
    %591 = vector.shape_cast %590 : vector<32x128xf32> to vector<2x16x128xf32>
    %592 = arith.truncf %587 : vector<2x16x128xf32> to vector<2x16x128xbf16>
    %593 = arith.truncf %589 : vector<2x16x128xf32> to vector<2x16x128xbf16>
    "tpu.trace_start"() <{level = 10 : i32, message = "bqd,bkd->bqk"}> : () -> ()
    %cst_184 = arith.constant dense<0.000000e+00> : vector<2x16x16xf32>
    %594 = tpu.matmul %592, %593, %cst_184 {dimension_numbers = #tpu.dot_dimension_numbers<[2], [2], [1], [1], [0, 0, 0, 1, 1, 1], [0], [0]>} : vector<2x16x128xbf16>, vector<2x16x128xbf16>, vector<2x16x16xf32> -> vector<2x16x16xf32>
    "tpu.trace_stop"() : () -> ()
    %cst_185 = arith.constant 0.0883883461 : f32
    %595 = vector.broadcast %cst_185 : f32 to vector<2x16x16xf32>
    %596 = arith.mulf %594, %595 : vector<2x16x16xf32>
    %cst_186 = arith.constant dense<0xFF800000> : vector<2x16xf32>
    %597 = vector.multi_reduction <maximumf>, %596, %cst_186 [2] : vector<2x16x16xf32> to vector<2x16xf32>
    %598 = vector.shape_cast %597 : vector<2x16xf32> to vector<2x16x1xf32>
    %599 = vector.broadcast %598 : vector<2x16x1xf32> to vector<2x16x16xf32>
    %600 = arith.subf %596, %599 : vector<2x16x16xf32>
    %601 = math.exp %600 : vector<2x16x16xf32>
    %cst_187 = arith.constant dense<0.000000e+00> : vector<2x16xf32>
    %602 = vector.multi_reduction <add>, %601, %cst_187 [2] : vector<2x16x16xf32> to vector<2x16xf32>
    %603 = vector.shape_cast %602 : vector<2x16xf32> to vector<2x16x1xf32>
    %604 = tpu.reciprocal %603 {approx = true} : vector<2x16x1xf32> -> vector<2x16x1xf32>
    %605 = vector.broadcast %604 : vector<2x16x1xf32> to vector<2x16x16xf32>
    %606 = arith.mulf %601, %605 : vector<2x16x16xf32>
    %607 = arith.truncf %606 : vector<2x16x16xf32> to vector<2x16x16xbf16>
    %608 = arith.truncf %591 : vector<2x16x128xf32> to vector<2x16x128xbf16>
    "tpu.trace_start"() <{level = 10 : i32, message = "bqk,bkd->bqd"}> : () -> ()
    %cst_188 = arith.constant dense<0.000000e+00> : vector<2x16x128xf32>
    %609 = tpu.matmul %607, %608, %cst_188 {dimension_numbers = #tpu.dot_dimension_numbers<[2], [1], [1], [2], [0, 0, 0, 1, 1, 2], [0], [0]>} : vector<2x16x16xbf16>, vector<2x16x128xbf16>, vector<2x16x128xf32> -> vector<2x16x128xf32>
    "tpu.trace_stop"() : () -> ()
    %610 = vector.shape_cast %609 : vector<2x16x128xf32> to vector<32x128xf32>
    %611 = arith.truncf %610 : vector<32x128xf32> to vector<32x128xbf16>
    %c4_189 = arith.constant 4 : index
    %c0_190 = arith.constant 0 : index
    %c0_191 = arith.constant 0 : index
    %612 = vector.load %arg6[%c4_189, %c0_190, %c0_191] : memref<6x128x128xbf16, #tpu.memory_space<vmem>>, vector<1x128x128xbf16>
    %613 = vector.shape_cast %612 : vector<1x128x128xbf16> to vector<128x128xbf16>
    %cst_192 = arith.constant dense<0.000000e+00> : vector<32x128xf32>
    %614 = tpu.matmul %611, %613, %cst_192 {dimension_numbers = #tpu.dot_dimension_numbers<[1], [0], [0], [1], [0, 0, 1, 1], [], []>} : vector<32x128xbf16>, vector<128x128xbf16>, vector<32x128xf32> -> vector<32x128xf32>
    %615 = vector.extract_strided_slice %548 {offsets = [2, 0], sizes = [1, 128], strides = [1, 1]} : vector<6x128xf32> to vector<1x128xf32>
    %616 = vector.shape_cast %615 : vector<1x128xf32> to vector<128xf32>
    %617 = vector.shape_cast %616 : vector<128xf32> to vector<1x128xf32>
    %618 = vector.broadcast %617 : vector<1x128xf32> to vector<32x128xf32>
    %619 = arith.addf %614, %618 : vector<32x128xf32>
    %620 = arith.addf %546, %619 : vector<32x128xf32>
    %621 = vector.extract_strided_slice %548 {offsets = [3, 0], sizes = [1, 128], strides = [1, 1]} : vector<6x128xf32> to vector<1x128xf32>
    %622 = vector.shape_cast %621 : vector<1x128xf32> to vector<128xf32>
    %623 = vector.shape_cast %622 : vector<128xf32> to vector<1x128xf32>
    %624 = vector.extract_strided_slice %548 {offsets = [4, 0], sizes = [1, 128], strides = [1, 1]} : vector<6x128xf32> to vector<1x128xf32>
    %625 = vector.shape_cast %624 : vector<1x128xf32> to vector<128xf32>
    %626 = vector.shape_cast %625 : vector<128xf32> to vector<1x128xf32>
    %cst_193 = arith.constant dense<0.000000e+00> : vector<32xf32>
    %627 = vector.multi_reduction <add>, %620, %cst_193 [1] : vector<32x128xf32> to vector<32xf32>
    %628 = vector.shape_cast %627 : vector<32xf32> to vector<32x1xf32>
    %cst_194 = arith.constant 1.280000e+02 : f32
    %629 = vector.broadcast %cst_194 : f32 to vector<32x1xf32>
    %630 = arith.divf %628, %629 : vector<32x1xf32>
    %631 = vector.broadcast %630 : vector<32x1xf32> to vector<32x128xf32>
    %632 = arith.subf %620, %631 : vector<32x128xf32>
    %633 = arith.mulf %632, %632 : vector<32x128xf32>
    %cst_195 = arith.constant dense<0.000000e+00> : vector<32xf32>
    %634 = vector.multi_reduction <add>, %633, %cst_195 [1] : vector<32x128xf32> to vector<32xf32>
    %635 = vector.shape_cast %634 : vector<32xf32> to vector<32x1xf32>
    %cst_196 = arith.constant 1.280000e+02 : f32
    %636 = vector.broadcast %cst_196 : f32 to vector<32x1xf32>
    %637 = arith.divf %635, %636 : vector<32x1xf32>
    %638 = vector.broadcast %630 : vector<32x1xf32> to vector<32x128xf32>
    %639 = arith.subf %620, %638 : vector<32x128xf32>
    %cst_197 = arith.constant 9.99999974E-6 : f32
    %640 = vector.broadcast %cst_197 : f32 to vector<32x1xf32>
    %641 = arith.addf %637, %640 : vector<32x1xf32>
    %642 = math.rsqrt %641 : vector<32x1xf32>
    %643 = vector.broadcast %642 : vector<32x1xf32> to vector<32x128xf32>
    %644 = arith.mulf %639, %643 : vector<32x128xf32>
    %645 = vector.broadcast %623 : vector<1x128xf32> to vector<32x128xf32>
    %646 = arith.mulf %644, %645 : vector<32x128xf32>
    %647 = vector.broadcast %626 : vector<1x128xf32> to vector<32x128xf32>
    %648 = arith.addf %646, %647 : vector<32x128xf32>
    %649 = arith.truncf %648 : vector<32x128xf32> to vector<32x128xbf16>
    %c4_198 = arith.constant 4 : index
    %c0_199 = arith.constant 0 : index
    %c0_200 = arith.constant 0 : index
    %650 = vector.load %arg7[%c4_198, %c0_199, %c0_200] : memref<6x128x512xbf16, #tpu.memory_space<vmem>>, vector<1x128x512xbf16>
    %651 = vector.shape_cast %650 : vector<1x128x512xbf16> to vector<128x512xbf16>
    %cst_201 = arith.constant dense<0.000000e+00> : vector<32x512xf32>
    %652 = tpu.matmul %649, %651, %cst_201 {dimension_numbers = #tpu.dot_dimension_numbers<[1], [0], [0], [1], [0, 0, 1, 1], [], []>} : vector<32x128xbf16>, vector<128x512xbf16>, vector<32x512xf32> -> vector<32x512xf32>
    %c4_202 = arith.constant 4 : index
    %c0_203 = arith.constant 0 : index
    %653 = vector.load %arg8[%c4_202, %c0_203] : memref<6x512xf32, #tpu.memory_space<vmem>>, vector<1x512xf32>
    %654 = vector.shape_cast %653 : vector<1x512xf32> to vector<512xf32>
    %655 = vector.shape_cast %654 : vector<512xf32> to vector<1x512xf32>
    %656 = vector.broadcast %655 : vector<1x512xf32> to vector<32x512xf32>
    %657 = arith.addf %652, %656 : vector<32x512xf32>
    %658 = arith.mulf %657, %657 : vector<32x512xf32>
    %659 = arith.mulf %657, %658 : vector<32x512xf32>
    %cst_204 = arith.constant 4.471500e-02 : f32
    %660 = vector.broadcast %cst_204 : f32 to vector<32x512xf32>
    %661 = arith.mulf %660, %659 : vector<32x512xf32>
    %662 = arith.addf %657, %661 : vector<32x512xf32>
    %cst_205 = arith.constant 0.797884583 : f32
    %663 = vector.broadcast %cst_205 : f32 to vector<32x512xf32>
    %664 = arith.mulf %663, %662 : vector<32x512xf32>
    %665 = math.tanh %664 : vector<32x512xf32>
    %cst_206 = arith.constant 1.000000e+00 : f32
    %666 = vector.broadcast %cst_206 : f32 to vector<32x512xf32>
    %667 = arith.addf %666, %665 : vector<32x512xf32>
    %cst_207 = arith.constant 5.000000e-01 : f32
    %668 = vector.broadcast %cst_207 : f32 to vector<32x512xf32>
    %669 = arith.mulf %668, %667 : vector<32x512xf32>
    %670 = arith.mulf %657, %669 : vector<32x512xf32>
    %671 = arith.truncf %670 : vector<32x512xf32> to vector<32x512xbf16>
    %c4_208 = arith.constant 4 : index
    %c0_209 = arith.constant 0 : index
    %c0_210 = arith.constant 0 : index
    %672 = vector.load %arg9[%c4_208, %c0_209, %c0_210] : memref<6x512x128xbf16, #tpu.memory_space<vmem>>, vector<1x512x128xbf16>
    %673 = vector.shape_cast %672 : vector<1x512x128xbf16> to vector<512x128xbf16>
    %cst_211 = arith.constant dense<0.000000e+00> : vector<32x128xf32>
    %674 = tpu.matmul %671, %673, %cst_211 {dimension_numbers = #tpu.dot_dimension_numbers<[1], [0], [0], [1], [0, 0, 1, 1], [], []>} : vector<32x512xbf16>, vector<512x128xbf16>, vector<32x128xf32> -> vector<32x128xf32>
    %675 = vector.extract_strided_slice %548 {offsets = [5, 0], sizes = [1, 128], strides = [1, 1]} : vector<6x128xf32> to vector<1x128xf32>
    %676 = vector.shape_cast %675 : vector<1x128xf32> to vector<128xf32>
    %677 = vector.shape_cast %676 : vector<128xf32> to vector<1x128xf32>
    %678 = vector.broadcast %677 : vector<1x128xf32> to vector<32x128xf32>
    %679 = arith.addf %674, %678 : vector<32x128xf32>
    %680 = arith.addf %620, %679 : vector<32x128xf32>
    %c5 = arith.constant 5 : index
    %c0_212 = arith.constant 0 : index
    %c0_213 = arith.constant 0 : index
    %681 = vector.load %arg10[%c5, %c0_212, %c0_213] : memref<6x6x128xf32, #tpu.memory_space<vmem>>, vector<1x6x128xf32>
    %682 = vector.shape_cast %681 : vector<1x6x128xf32> to vector<6x128xf32>
    %683 = vector.extract_strided_slice %682 {offsets = [0, 0], sizes = [1, 128], strides = [1, 1]} : vector<6x128xf32> to vector<1x128xf32>
    %684 = vector.shape_cast %683 : vector<1x128xf32> to vector<128xf32>
    %685 = vector.shape_cast %684 : vector<128xf32> to vector<1x128xf32>
    %686 = vector.extract_strided_slice %682 {offsets = [1, 0], sizes = [1, 128], strides = [1, 1]} : vector<6x128xf32> to vector<1x128xf32>
    %687 = vector.shape_cast %686 : vector<1x128xf32> to vector<128xf32>
    %688 = vector.shape_cast %687 : vector<128xf32> to vector<1x128xf32>
    %cst_214 = arith.constant dense<0.000000e+00> : vector<32xf32>
    %689 = vector.multi_reduction <add>, %680, %cst_214 [1] : vector<32x128xf32> to vector<32xf32>
    %690 = vector.shape_cast %689 : vector<32xf32> to vector<32x1xf32>
    %cst_215 = arith.constant 1.280000e+02 : f32
    %691 = vector.broadcast %cst_215 : f32 to vector<32x1xf32>
    %692 = arith.divf %690, %691 : vector<32x1xf32>
    %693 = vector.broadcast %692 : vector<32x1xf32> to vector<32x128xf32>
    %694 = arith.subf %680, %693 : vector<32x128xf32>
    %695 = arith.mulf %694, %694 : vector<32x128xf32>
    %cst_216 = arith.constant dense<0.000000e+00> : vector<32xf32>
    %696 = vector.multi_reduction <add>, %695, %cst_216 [1] : vector<32x128xf32> to vector<32xf32>
    %697 = vector.shape_cast %696 : vector<32xf32> to vector<32x1xf32>
    %cst_217 = arith.constant 1.280000e+02 : f32
    %698 = vector.broadcast %cst_217 : f32 to vector<32x1xf32>
    %699 = arith.divf %697, %698 : vector<32x1xf32>
    %700 = vector.broadcast %692 : vector<32x1xf32> to vector<32x128xf32>
    %701 = arith.subf %680, %700 : vector<32x128xf32>
    %cst_218 = arith.constant 9.99999974E-6 : f32
    %702 = vector.broadcast %cst_218 : f32 to vector<32x1xf32>
    %703 = arith.addf %699, %702 : vector<32x1xf32>
    %704 = math.rsqrt %703 : vector<32x1xf32>
    %705 = vector.broadcast %704 : vector<32x1xf32> to vector<32x128xf32>
    %706 = arith.mulf %701, %705 : vector<32x128xf32>
    %707 = vector.broadcast %685 : vector<1x128xf32> to vector<32x128xf32>
    %708 = arith.mulf %706, %707 : vector<32x128xf32>
    %709 = vector.broadcast %688 : vector<1x128xf32> to vector<32x128xf32>
    %710 = arith.addf %708, %709 : vector<32x128xf32>
    %711 = arith.truncf %710 : vector<32x128xf32> to vector<32x128xbf16>
    %c5_219 = arith.constant 5 : index
    %c0_220 = arith.constant 0 : index
    %c0_221 = arith.constant 0 : index
    %712 = vector.load %arg4[%c5_219, %c0_220, %c0_221] : memref<6x128x384xbf16, #tpu.memory_space<vmem>>, vector<1x128x384xbf16>
    %713 = vector.shape_cast %712 : vector<1x128x384xbf16> to vector<128x384xbf16>
    %cst_222 = arith.constant dense<0.000000e+00> : vector<32x384xf32>
    %714 = tpu.matmul %711, %713, %cst_222 {dimension_numbers = #tpu.dot_dimension_numbers<[1], [0], [0], [1], [0, 0, 1, 1], [], []>} : vector<32x128xbf16>, vector<128x384xbf16>, vector<32x384xf32> -> vector<32x384xf32>
    %c5_223 = arith.constant 5 : index
    %c0_224 = arith.constant 0 : index
    %715 = vector.load %arg5[%c5_223, %c0_224] : memref<6x384xf32, #tpu.memory_space<vmem>>, vector<1x384xf32>
    %716 = vector.shape_cast %715 : vector<1x384xf32> to vector<384xf32>
    %717 = vector.shape_cast %716 : vector<384xf32> to vector<1x384xf32>
    %718 = vector.broadcast %717 : vector<1x384xf32> to vector<32x384xf32>
    %719 = arith.addf %714, %718 : vector<32x384xf32>
    %720 = vector.extract_strided_slice %719 {offsets = [0, 0], sizes = [32, 128], strides = [1, 1]} : vector<32x384xf32> to vector<32x128xf32>
    %721 = vector.shape_cast %720 : vector<32x128xf32> to vector<2x16x128xf32>
    %722 = vector.extract_strided_slice %719 {offsets = [0, 128], sizes = [32, 128], strides = [1, 1]} : vector<32x384xf32> to vector<32x128xf32>
    %723 = vector.shape_cast %722 : vector<32x128xf32> to vector<2x16x128xf32>
    %724 = vector.extract_strided_slice %719 {offsets = [0, 256], sizes = [32, 128], strides = [1, 1]} : vector<32x384xf32> to vector<32x128xf32>
    %725 = vector.shape_cast %724 : vector<32x128xf32> to vector<2x16x128xf32>
    %726 = arith.truncf %721 : vector<2x16x128xf32> to vector<2x16x128xbf16>
    %727 = arith.truncf %723 : vector<2x16x128xf32> to vector<2x16x128xbf16>
    "tpu.trace_start"() <{level = 10 : i32, message = "bqd,bkd->bqk"}> : () -> ()
    %cst_225 = arith.constant dense<0.000000e+00> : vector<2x16x16xf32>
    %728 = tpu.matmul %726, %727, %cst_225 {dimension_numbers = #tpu.dot_dimension_numbers<[2], [2], [1], [1], [0, 0, 0, 1, 1, 1], [0], [0]>} : vector<2x16x128xbf16>, vector<2x16x128xbf16>, vector<2x16x16xf32> -> vector<2x16x16xf32>
    "tpu.trace_stop"() : () -> ()
    %cst_226 = arith.constant 0.0883883461 : f32
    %729 = vector.broadcast %cst_226 : f32 to vector<2x16x16xf32>
    %730 = arith.mulf %728, %729 : vector<2x16x16xf32>
    %cst_227 = arith.constant dense<0xFF800000> : vector<2x16xf32>
    %731 = vector.multi_reduction <maximumf>, %730, %cst_227 [2] : vector<2x16x16xf32> to vector<2x16xf32>
    %732 = vector.shape_cast %731 : vector<2x16xf32> to vector<2x16x1xf32>
    %733 = vector.broadcast %732 : vector<2x16x1xf32> to vector<2x16x16xf32>
    %734 = arith.subf %730, %733 : vector<2x16x16xf32>
    %735 = math.exp %734 : vector<2x16x16xf32>
    %cst_228 = arith.constant dense<0.000000e+00> : vector<2x16xf32>
    %736 = vector.multi_reduction <add>, %735, %cst_228 [2] : vector<2x16x16xf32> to vector<2x16xf32>
    %737 = vector.shape_cast %736 : vector<2x16xf32> to vector<2x16x1xf32>
    %738 = tpu.reciprocal %737 {approx = true} : vector<2x16x1xf32> -> vector<2x16x1xf32>
    %739 = vector.broadcast %738 : vector<2x16x1xf32> to vector<2x16x16xf32>
    %740 = arith.mulf %735, %739 : vector<2x16x16xf32>
    %741 = arith.truncf %740 : vector<2x16x16xf32> to vector<2x16x16xbf16>
    %742 = arith.truncf %725 : vector<2x16x128xf32> to vector<2x16x128xbf16>
    "tpu.trace_start"() <{level = 10 : i32, message = "bqk,bkd->bqd"}> : () -> ()
    %cst_229 = arith.constant dense<0.000000e+00> : vector<2x16x128xf32>
    %743 = tpu.matmul %741, %742, %cst_229 {dimension_numbers = #tpu.dot_dimension_numbers<[2], [1], [1], [2], [0, 0, 0, 1, 1, 2], [0], [0]>} : vector<2x16x16xbf16>, vector<2x16x128xbf16>, vector<2x16x128xf32> -> vector<2x16x128xf32>
    "tpu.trace_stop"() : () -> ()
    %744 = vector.shape_cast %743 : vector<2x16x128xf32> to vector<32x128xf32>
    %745 = arith.truncf %744 : vector<32x128xf32> to vector<32x128xbf16>
    %c5_230 = arith.constant 5 : index
    %c0_231 = arith.constant 0 : index
    %c0_232 = arith.constant 0 : index
    %746 = vector.load %arg6[%c5_230, %c0_231, %c0_232] : memref<6x128x128xbf16, #tpu.memory_space<vmem>>, vector<1x128x128xbf16>
    %747 = vector.shape_cast %746 : vector<1x128x128xbf16> to vector<128x128xbf16>
    %cst_233 = arith.constant dense<0.000000e+00> : vector<32x128xf32>
    %748 = tpu.matmul %745, %747, %cst_233 {dimension_numbers = #tpu.dot_dimension_numbers<[1], [0], [0], [1], [0, 0, 1, 1], [], []>} : vector<32x128xbf16>, vector<128x128xbf16>, vector<32x128xf32> -> vector<32x128xf32>
    %749 = vector.extract_strided_slice %682 {offsets = [2, 0], sizes = [1, 128], strides = [1, 1]} : vector<6x128xf32> to vector<1x128xf32>
    %750 = vector.shape_cast %749 : vector<1x128xf32> to vector<128xf32>
    %751 = vector.shape_cast %750 : vector<128xf32> to vector<1x128xf32>
    %752 = vector.broadcast %751 : vector<1x128xf32> to vector<32x128xf32>
    %753 = arith.addf %748, %752 : vector<32x128xf32>
    %754 = arith.addf %680, %753 : vector<32x128xf32>
    %755 = vector.extract_strided_slice %682 {offsets = [3, 0], sizes = [1, 128], strides = [1, 1]} : vector<6x128xf32> to vector<1x128xf32>
    %756 = vector.shape_cast %755 : vector<1x128xf32> to vector<128xf32>
    %757 = vector.shape_cast %756 : vector<128xf32> to vector<1x128xf32>
    %758 = vector.extract_strided_slice %682 {offsets = [4, 0], sizes = [1, 128], strides = [1, 1]} : vector<6x128xf32> to vector<1x128xf32>
    %759 = vector.shape_cast %758 : vector<1x128xf32> to vector<128xf32>
    %760 = vector.shape_cast %759 : vector<128xf32> to vector<1x128xf32>
    %cst_234 = arith.constant dense<0.000000e+00> : vector<32xf32>
    %761 = vector.multi_reduction <add>, %754, %cst_234 [1] : vector<32x128xf32> to vector<32xf32>
    %762 = vector.shape_cast %761 : vector<32xf32> to vector<32x1xf32>
    %cst_235 = arith.constant 1.280000e+02 : f32
    %763 = vector.broadcast %cst_235 : f32 to vector<32x1xf32>
    %764 = arith.divf %762, %763 : vector<32x1xf32>
    %765 = vector.broadcast %764 : vector<32x1xf32> to vector<32x128xf32>
    %766 = arith.subf %754, %765 : vector<32x128xf32>
    %767 = arith.mulf %766, %766 : vector<32x128xf32>
    %cst_236 = arith.constant dense<0.000000e+00> : vector<32xf32>
    %768 = vector.multi_reduction <add>, %767, %cst_236 [1] : vector<32x128xf32> to vector<32xf32>
    %769 = vector.shape_cast %768 : vector<32xf32> to vector<32x1xf32>
    %cst_237 = arith.constant 1.280000e+02 : f32
    %770 = vector.broadcast %cst_237 : f32 to vector<32x1xf32>
    %771 = arith.divf %769, %770 : vector<32x1xf32>
    %772 = vector.broadcast %764 : vector<32x1xf32> to vector<32x128xf32>
    %773 = arith.subf %754, %772 : vector<32x128xf32>
    %cst_238 = arith.constant 9.99999974E-6 : f32
    %774 = vector.broadcast %cst_238 : f32 to vector<32x1xf32>
    %775 = arith.addf %771, %774 : vector<32x1xf32>
    %776 = math.rsqrt %775 : vector<32x1xf32>
    %777 = vector.broadcast %776 : vector<32x1xf32> to vector<32x128xf32>
    %778 = arith.mulf %773, %777 : vector<32x128xf32>
    %779 = vector.broadcast %757 : vector<1x128xf32> to vector<32x128xf32>
    %780 = arith.mulf %778, %779 : vector<32x128xf32>
    %781 = vector.broadcast %760 : vector<1x128xf32> to vector<32x128xf32>
    %782 = arith.addf %780, %781 : vector<32x128xf32>
    %783 = arith.truncf %782 : vector<32x128xf32> to vector<32x128xbf16>
    %c5_239 = arith.constant 5 : index
    %c0_240 = arith.constant 0 : index
    %c0_241 = arith.constant 0 : index
    %784 = vector.load %arg7[%c5_239, %c0_240, %c0_241] : memref<6x128x512xbf16, #tpu.memory_space<vmem>>, vector<1x128x512xbf16>
    %785 = vector.shape_cast %784 : vector<1x128x512xbf16> to vector<128x512xbf16>
    %cst_242 = arith.constant dense<0.000000e+00> : vector<32x512xf32>
    %786 = tpu.matmul %783, %785, %cst_242 {dimension_numbers = #tpu.dot_dimension_numbers<[1], [0], [0], [1], [0, 0, 1, 1], [], []>} : vector<32x128xbf16>, vector<128x512xbf16>, vector<32x512xf32> -> vector<32x512xf32>
    %c5_243 = arith.constant 5 : index
    %c0_244 = arith.constant 0 : index
    %787 = vector.load %arg8[%c5_243, %c0_244] : memref<6x512xf32, #tpu.memory_space<vmem>>, vector<1x512xf32>
    %788 = vector.shape_cast %787 : vector<1x512xf32> to vector<512xf32>
    %789 = vector.shape_cast %788 : vector<512xf32> to vector<1x512xf32>
    %790 = vector.broadcast %789 : vector<1x512xf32> to vector<32x512xf32>
    %791 = arith.addf %786, %790 : vector<32x512xf32>
    %792 = arith.mulf %791, %791 : vector<32x512xf32>
    %793 = arith.mulf %791, %792 : vector<32x512xf32>
    %cst_245 = arith.constant 4.471500e-02 : f32
    %794 = vector.broadcast %cst_245 : f32 to vector<32x512xf32>
    %795 = arith.mulf %794, %793 : vector<32x512xf32>
    %796 = arith.addf %791, %795 : vector<32x512xf32>
    %cst_246 = arith.constant 0.797884583 : f32
    %797 = vector.broadcast %cst_246 : f32 to vector<32x512xf32>
    %798 = arith.mulf %797, %796 : vector<32x512xf32>
    %799 = math.tanh %798 : vector<32x512xf32>
    %cst_247 = arith.constant 1.000000e+00 : f32
    %800 = vector.broadcast %cst_247 : f32 to vector<32x512xf32>
    %801 = arith.addf %800, %799 : vector<32x512xf32>
    %cst_248 = arith.constant 5.000000e-01 : f32
    %802 = vector.broadcast %cst_248 : f32 to vector<32x512xf32>
    %803 = arith.mulf %802, %801 : vector<32x512xf32>
    %804 = arith.mulf %791, %803 : vector<32x512xf32>
    %805 = arith.truncf %804 : vector<32x512xf32> to vector<32x512xbf16>
    %c5_249 = arith.constant 5 : index
    %c0_250 = arith.constant 0 : index
    %c0_251 = arith.constant 0 : index
    %806 = vector.load %arg9[%c5_249, %c0_250, %c0_251] : memref<6x512x128xbf16, #tpu.memory_space<vmem>>, vector<1x512x128xbf16>
    %807 = vector.shape_cast %806 : vector<1x512x128xbf16> to vector<512x128xbf16>
    %cst_252 = arith.constant dense<0.000000e+00> : vector<32x128xf32>
    %808 = tpu.matmul %805, %807, %cst_252 {dimension_numbers = #tpu.dot_dimension_numbers<[1], [0], [0], [1], [0, 0, 1, 1], [], []>} : vector<32x512xbf16>, vector<512x128xbf16>, vector<32x128xf32> -> vector<32x128xf32>
    %809 = vector.extract_strided_slice %682 {offsets = [5, 0], sizes = [1, 128], strides = [1, 1]} : vector<6x128xf32> to vector<1x128xf32>
    %810 = vector.shape_cast %809 : vector<1x128xf32> to vector<128xf32>
    %811 = vector.shape_cast %810 : vector<128xf32> to vector<1x128xf32>
    %812 = vector.broadcast %811 : vector<1x128xf32> to vector<32x128xf32>
    %813 = arith.addf %808, %812 : vector<32x128xf32>
    %814 = arith.addf %754, %813 : vector<32x128xf32>
    %c0_253 = arith.constant 0 : index
    %c0_254 = arith.constant 0 : index
    %815 = vector.load %arg11[%c0_253, %c0_254] : memref<2x128xf32, #tpu.memory_space<vmem>>, vector<1x128xf32>
    %816 = vector.shape_cast %815 : vector<1x128xf32> to vector<128xf32>
    %817 = vector.shape_cast %816 : vector<128xf32> to vector<1x128xf32>
    %c1_255 = arith.constant 1 : index
    %c0_256 = arith.constant 0 : index
    %818 = vector.load %arg11[%c1_255, %c0_256] : memref<2x128xf32, #tpu.memory_space<vmem>>, vector<1x128xf32>
    %819 = vector.shape_cast %818 : vector<1x128xf32> to vector<128xf32>
    %820 = vector.shape_cast %819 : vector<128xf32> to vector<1x128xf32>
    %cst_257 = arith.constant dense<0.000000e+00> : vector<32xf32>
    %821 = vector.multi_reduction <add>, %814, %cst_257 [1] : vector<32x128xf32> to vector<32xf32>
    %822 = vector.shape_cast %821 : vector<32xf32> to vector<32x1xf32>
    %cst_258 = arith.constant 1.280000e+02 : f32
    %823 = vector.broadcast %cst_258 : f32 to vector<32x1xf32>
    %824 = arith.divf %822, %823 : vector<32x1xf32>
    %825 = vector.broadcast %824 : vector<32x1xf32> to vector<32x128xf32>
    %826 = arith.subf %814, %825 : vector<32x128xf32>
    %827 = arith.mulf %826, %826 : vector<32x128xf32>
    %cst_259 = arith.constant dense<0.000000e+00> : vector<32xf32>
    %828 = vector.multi_reduction <add>, %827, %cst_259 [1] : vector<32x128xf32> to vector<32xf32>
    %829 = vector.shape_cast %828 : vector<32xf32> to vector<32x1xf32>
    %cst_260 = arith.constant 1.280000e+02 : f32
    %830 = vector.broadcast %cst_260 : f32 to vector<32x1xf32>
    %831 = arith.divf %829, %830 : vector<32x1xf32>
    %832 = vector.broadcast %824 : vector<32x1xf32> to vector<32x128xf32>
    %833 = arith.subf %814, %832 : vector<32x128xf32>
    %cst_261 = arith.constant 9.99999974E-6 : f32
    %834 = vector.broadcast %cst_261 : f32 to vector<32x1xf32>
    %835 = arith.addf %831, %834 : vector<32x1xf32>
    %836 = math.rsqrt %835 : vector<32x1xf32>
    %837 = vector.broadcast %836 : vector<32x1xf32> to vector<32x128xf32>
    %838 = arith.mulf %833, %837 : vector<32x128xf32>
    %839 = vector.broadcast %817 : vector<1x128xf32> to vector<32x128xf32>
    %840 = arith.mulf %838, %839 : vector<32x128xf32>
    %841 = vector.broadcast %820 : vector<1x128xf32> to vector<32x128xf32>
    %842 = arith.addf %840, %841 : vector<32x128xf32>
    %843 = vector.shape_cast %842 : vector<32x128xf32> to vector<2x16x128xf32>
    %c0_262 = arith.constant 0 : index
    %c0_263 = arith.constant 0 : index
    %c0_264 = arith.constant 0 : index
    %844 = vector.load %arg12[%c0_262, %c0_263, %c0_264] : memref<2x16x128xf32, #tpu.memory_space<vmem>>, vector<2x16x128xf32>
    tpu.vector_store %arg12[%c0_262, %c0_263, %c0_264], %843 {strides = array<i32>} : memref<2x16x128xf32, #tpu.memory_space<vmem>>, vector<2x16x128xf32>,
    return
  }
  func.func @transform_0(%arg0: i32) -> (i32, i32, i32) {
    %c0_i32 = arith.constant 0 : i32
    %c0_i32_0 = arith.constant 0 : i32
    %c0_i32_1 = arith.constant 0 : i32
    return %arg0, %c0_i32, %c0_i32_0 : i32, i32, i32
  }
  func.func @transform_1(%arg0: i32) -> (i32, i32) {
    %c0_i32 = arith.constant 0 : i32
    %c0_i32_0 = arith.constant 0 : i32
    %c0_i32_1 = arith.constant 0 : i32
    return %c0_i32, %c0_i32_0 : i32, i32
  }
  func.func @transform_2(%arg0: i32) -> (i32, i32) {
    %c0_i32 = arith.constant 0 : i32
    %c0_i32_0 = arith.constant 0 : i32
    %c0_i32_1 = arith.constant 0 : i32
    return %c0_i32, %c0_i32_0 : i32, i32
  }
  func.func @transform_3(%arg0: i32) -> (i32, i32, i32) {
    %c0_i32 = arith.constant 0 : i32
    %c0_i32_0 = arith.constant 0 : i32
    %c0_i32_1 = arith.constant 0 : i32
    %c0_i32_2 = arith.constant 0 : i32
    return %c0_i32, %c0_i32_0, %c0_i32_1 : i32, i32, i32
  }
  func.func @transform_4(%arg0: i32) -> (i32, i32) {
    %c0_i32 = arith.constant 0 : i32
    %c0_i32_0 = arith.constant 0 : i32
    %c0_i32_1 = arith.constant 0 : i32
    return %c0_i32, %c0_i32_0 : i32, i32
  }
  func.func @transform_5(%arg0: i32) -> (i32, i32, i32) {
    %c0_i32 = arith.constant 0 : i32
    %c0_i32_0 = arith.constant 0 : i32
    %c0_i32_1 = arith.constant 0 : i32
    %c0_i32_2 = arith.constant 0 : i32
    return %c0_i32, %c0_i32_0, %c0_i32_1 : i32, i32, i32
  }
  func.func @transform_6(%arg0: i32) -> (i32, i32, i32) {
    %c0_i32 = arith.constant 0 : i32
    %c0_i32_0 = arith.constant 0 : i32
    %c0_i32_1 = arith.constant 0 : i32
    %c0_i32_2 = arith.constant 0 : i32
    return %c0_i32, %c0_i32_0, %c0_i32_1 : i32, i32, i32
  }
  func.func @transform_7(%arg0: i32) -> (i32, i32) {
    %c0_i32 = arith.constant 0 : i32
    %c0_i32_0 = arith.constant 0 : i32
    %c0_i32_1 = arith.constant 0 : i32
    return %c0_i32, %c0_i32_0 : i32, i32
  }
  func.func @transform_8(%arg0: i32) -> (i32, i32, i32) {
    %c0_i32 = arith.constant 0 : i32
    %c0_i32_0 = arith.constant 0 : i32
    %c0_i32_1 = arith.constant 0 : i32
    %c0_i32_2 = arith.constant 0 : i32
    return %c0_i32, %c0_i32_0, %c0_i32_1 : i32, i32, i32
  }
  func.func @transform_9(%arg0: i32) -> (i32, i32, i32) {
    %c0_i32 = arith.constant 0 : i32
    %c0_i32_0 = arith.constant 0 : i32
    %c0_i32_1 = arith.constant 0 : i32
    %c0_i32_2 = arith.constant 0 : i32
    return %c0_i32, %c0_i32_0, %c0_i32_1 : i32, i32, i32
  }
  func.func @transform_10(%arg0: i32) -> (i32, i32) {
    %c0_i32 = arith.constant 0 : i32
    %c0_i32_0 = arith.constant 0 : i32
    %c0_i32_1 = arith.constant 0 : i32
    return %c0_i32, %c0_i32_0 : i32, i32
  }
  func.func @transform_11(%arg0: i32) -> (i32, i32, i32) {
    %c0_i32 = arith.constant 0 : i32
    %c0_i32_0 = arith.constant 0 : i32
    %c0_i32_1 = arith.constant 0 : i32
    return %arg0, %c0_i32, %c0_i32_0 : i32, i32, i32
  }
}

</mosaic_0001>

<bundles_post_ra>
// kernel: tpu_custom_call.1
= control target key start
LH: loop header
LB: loop body
LE: loop exit
PB: predicated region body
PF: predicated region fallthrough
CT: control target
= control target key end

     0   :  { %16 = vsyncpa [#allocation3], 0  ;;  %s14673_s0 = inlined_call_operand.hbm [shape: f32[2,16,64], index: 0, kind: input, shape index: {}]   ;;  %s14674_s1 = inlined_call_operand.hbm [shape: bf16[64,128], index: 1, kind: input, shape index: {}]   ;;  %s14675_s2 = inlined_call_operand.hbm [shape: f32[16,128], index: 2, kind: input, shape index: {}]   ;;  %s14676_s3 = inlined_call_operand.hbm [shape: bf16[6,128,384], index: 3, kind: input, shape index: {}]   ;;  %s14677_s4 = inlined_call_operand.hbm [shape: f32[6,384], index: 4, kind: input, shape index: {}]   ;;  %s14678_s5 = inlined_call_operand.hbm [shape: bf16[6,128,128], index: 5, kind: input, shape index: {}]   ;;  %s14679_s6 = inlined_call_operand.hbm [shape: bf16[6,128,512], index: 6, kind: input, shape index: {}]   ;;  %s14680_s7 = inlined_call_operand.hbm [shape: f32[6,512], index: 7, kind: input, shape index: {}]   ;;  %s14681_s8 = inlined_call_operand.hbm [shape: bf16[6,512,128], index: 8, kind: input, shape index: {}]   ;;  %s14682_s9 = inlined_call_operand.hbm [shape: f32[6,6,128], index: 9, kind: input, shape index: {}]   ;;  %s14683_s10 = inlined_call_operand.vmem [shape: f32[2,128], index: 10, kind: input, shape index: {}]   ;;  %s14684_s11 = inlined_call_operand.hbm [shape: f32[2,16,128], index: 11, kind: output, shape index: {}]  }
   0x1   :  { %17 = vsyncpa [#allocation6], 0 }
   0x2   :  { %18 = vsyncpa [#allocation9], 0 }
   0x3   :  { %19 = vsyncpa [#allocation12], 0 }
   0x4   :  { %20 = vsyncpa [#allocation15], 0 }
   0x5   :  { %21 = vsyncpa [#allocation18], 0 }
   0x6   :  { %22 = vsyncpa [#allocation4], 0  ;;  %s12821_s17 = smov [#allocation5]   ;;  %s12565_s21 = scalar_lea.hbm %s14674_s1, 512 }
   0x7   :  { %s40_s18 = sshll.u32 %s12821_s17, 4  ;;  %p12566_p0 = scmp.ne.s32.totalorder %s14674_s1, %s12565_s21  ;;  %s41_s18 = int_to_ptr.vmem [resolvable:$true] %s40_s18 }
   0x8   :  { %p12569_p1 = scmp.lt.u32.totalorder %s12565_s21, %s14674_s1 }
   0xa   :  { %p12571_p2 = pnand %p12569_p1, %p12566_p0 }
   0xc   :  { %12574 = shalt.err (!%p12571_p2)
}
   0xd   :  { %s12575_s26 = scalar_lea.vmem %s41_s18, 512  ;;  %p12580_p4 = scmp.lt.s32.totalorder %s41_s18, %s41_s18 }
   0xe   :  { %p12576_p3 = scmp.ne.s32.totalorder %s41_s18, %s12575_s26  ;;  %p12581_p5 = scmp.lt.s32.totalorder %s12575_s26, %s12575_s26 }
  0x10   :  { %p12582_p6 = por %p12581_p5, %p12580_p4 }
  0x12   :  { %p12583_p7 = pnand %p12582_p6, %p12576_p3 }
  0x14   :  { %12586 = shalt.err (!%p12583_p7)
}
  0x15   :  { %s12822_s27 = smov 64   ;;  %s12823_s28 = smov 4  }
  0x16   :  { %46 = dma.hbm_to_vmem [thread:$0]  %s14674_s1, 512, %s41_s18, [#allocation6], %s12822_s27, %s12822_s27, %s12823_s28  }
  0x17   :  { %s12824_s12 = smov [#allocation8]   ;;  %s12587_s16 = scalar_lea.hbm %s14676_s3, 18432 }
  0x18   :  { %s64_s13 = sshll.u32 %s12824_s12, 4  ;;  %p12588_p8 = scmp.ne.s32.totalorder %s14676_s3, %s12587_s16  ;;  %s65_s13 = int_to_ptr.vmem [resolvable:$true] %s64_s13 }
  0x19   :  { %p12591_p9 = scmp.lt.u32.totalorder %s12587_s16, %s14676_s3 }
  0x1b   :  { %p12593_p10 = pnand %p12591_p9, %p12588_p8 }
  0x1d   :  { %12596 = shalt.err (!%p12593_p10)
}
  0x1e   :  { %s12597_s22 = scalar_lea.vmem %s65_s13, 18432  ;;  %p12602_p12 = scmp.lt.s32.totalorder %s65_s13, %s65_s13 }
  0x1f   :  { %p12598_p11 = scmp.ne.s32.totalorder %s65_s13, %s12597_s22  ;;  %p12603_p13 = scmp.lt.s32.totalorder %s12597_s22, %s12597_s22 }
  0x21   :  { %p12604_p0 = por %p12603_p13, %p12602_p12 }
  0x23   :  { %p12605_p1 = pnand %p12604_p0, %p12598_p11 }
  0x25   :  { %12608 = shalt.err (!%p12605_p1)
}
  0x26   :  { %s12825_s1 = smov 192   ;;  %s12826_s18 = smov 12  }
  0x27   :  { %70 = dma.hbm_to_vmem [thread:$0]  %s14676_s3, 18432, %s65_s13, [#allocation9], %s12825_s1, %s12825_s1, %s12826_s18  }
  0x28   :  { %s12827_s25 = smov [#allocation11]   ;;  %s12828_s29 = smov [#allocation14]  }
  0x29   :  { %s86_s26 = sshll.u32 %s12827_s25, 4  ;;  %s111_s30 = sshll.u32 %s12828_s29, 4  ;;  %s87_s26 = int_to_ptr.vmem [resolvable:$true] %s86_s26  ;;  %s112_s30 = int_to_ptr.vmem [resolvable:$true] %s111_s30 }
  0x2a   :  { %s12609_s15 = scalar_lea.hbm %s14678_s5, 6144 }
  0x2b   :  { %p12610_p2 = scmp.ne.s32.totalorder %s14678_s5, %s12609_s15  ;;  %p12613_p3 = scmp.lt.u32.totalorder %s12609_s15, %s14678_s5 }
  0x2d   :  { %p12615_p4 = pnand %p12613_p3, %p12610_p2 }
  0x2f   :  { %12618 = shalt.err (!%p12615_p4)
}
  0x30   :  { %s12619_s3 = scalar_lea.vmem %s87_s26, 6144  ;;  %p12624_p6 = scmp.lt.s32.totalorder %s87_s26, %s87_s26 }
  0x31   :  { %p12620_p5 = scmp.ne.s32.totalorder %s87_s26, %s12619_s3  ;;  %p12625_p7 = scmp.lt.s32.totalorder %s12619_s3, %s12619_s3 }
  0x33   :  { %p12626_p8 = por %p12625_p7, %p12624_p6 }
  0x35   :  { %p12627_p9 = pnand %p12626_p8, %p12620_p5 }
  0x37   :  { %12630 = shalt.err (!%p12627_p9)
}
  0x38   :  { %92 = dma.hbm_to_vmem [thread:$0]  %s14678_s5, 6144, %s87_s26, [#allocation12], %s12822_s27, %s12822_s27, %s12823_s28  }
  0x39   :  { %s12631_s18 = scalar_lea.hbm %s14680_s7, 512 }
  0x3a   :  { %p12632_p10 = scmp.ne.s32.totalorder %s14680_s7, %s12631_s18  ;;  %p12635_p11 = scmp.lt.u32.totalorder %s12631_s18, %s14680_s7 }
  0x3c   :  { %p12637_p12 = pnand %p12635_p11, %p12632_p10 }
  0x3e   :  { %12640 = shalt.err (!%p12637_p12)
}
  0x3f   :  { %s12641_s12 = scalar_lea.vmem %s112_s30, 512  ;;  %p12646_p0 = scmp.lt.s32.totalorder %s112_s30, %s112_s30 }
  0x40   :  { %p12642_p13 = scmp.ne.s32.totalorder %s112_s30, %s12641_s12  ;;  %p12647_p1 = scmp.lt.s32.totalorder %s12641_s12, %s12641_s12 }
  0x42   :  { %p12648_p2 = por %p12647_p1, %p12646_p0 }
  0x44   :  { %p12649_p3 = pnand %p12648_p2, %p12642_p13 }
  0x46   :  { %12652 = shalt.err (!%p12649_p3)
}
  0x47   :  { %114 = dma.hbm_to_vmem [thread:$0]  %s14680_s7, 512, %s112_s30, [#allocation15]  }
  0x48   :  { %s12829_s14 = smov [#allocation2]   ;;  %s12653_s19 = scalar_lea.hbm %s14673_s0, 512 }
  0x49   :  { %s28_s15 = sshll.u32 %s12829_s14, 4  ;;  %p12654_p4 = scmp.ne.s32.totalorder %s14673_s0, %s12653_s19  ;;  %s29_s15 = int_to_ptr.vmem [resolvable:$true] %s28_s15 }
  0x4a   :  { %p12657_p5 = scmp.lt.u32.totalorder %s12653_s19, %s14673_s0 }
  0x4c   :  { %p12659_p6 = pnand %p12657_p5, %p12654_p4 }
  0x4e   :  { %12662 = shalt.err (!%p12659_p6)
}
  0x4f   :  { %s12663_s22 = scalar_lea.vmem %s29_s15, 512  ;;  %p12668_p8 = scmp.lt.s32.totalorder %s29_s15, %s29_s15 }
  0x50   :  { %p12664_p7 = scmp.ne.s32.totalorder %s29_s15, %s12663_s22  ;;  %p12669_p9 = scmp.lt.s32.totalorder %s12663_s22, %s12663_s22 }
  0x52   :  { %p12670_p10 = por %p12669_p9, %p12668_p8 }
  0x54   :  { %p12671_p11 = pnand %p12670_p10, %p12664_p7 }
  0x56   :  { %12674 = shalt.err (!%p12671_p11)
}
  0x57   :  { %s12830_s7 = smov 128   ;;  %s12831_s30 = smov 8  }
  0x58   :  { %34 = dma.hbm_to_vmem [thread:$0]  %s14673_s0, 512, %s29_s15, [#allocation3], %s12830_s7, %s12830_s7, %s12831_s30  }
  0x59   :  { %s12832_s23 = smov [#allocation7]   ;;  %s12833_s25 = smov [#allocation10]  }
  0x5a   :  { %s52_s24 = sshll.u32 %s12832_s23, 4  ;;  %s77_s29 = sshll.u32 %s12833_s25, 4  ;;  %s53_s24 = int_to_ptr.vmem [resolvable:$true] %s52_s24  ;;  %s78_s29 = int_to_ptr.vmem [resolvable:$true] %s77_s29 }
  0x5b   :  { %s12675_s26 = scalar_lea.hbm %s14675_s2, 256 }
  0x5c   :  { %p12676_p12 = scmp.ne.s32.totalorder %s14675_s2, %s12675_s26  ;;  %p12679_p13 = scmp.lt.u32.totalorder %s12675_s26, %s14675_s2 }
  0x5e   :  { %p12681_p0 = pnand %p12679_p13, %p12676_p12 }
  0x60   :  { %12684 = shalt.err (!%p12681_p0)
}
  0x61   :  { %s12685_s0 = scalar_lea.vmem %s53_s24, 256  ;;  %p12690_p2 = scmp.lt.s32.totalorder %s53_s24, %s53_s24 }
  0x62   :  { %p12686_p1 = scmp.ne.s32.totalorder %s53_s24, %s12685_s0  ;;  %p12691_p3 = scmp.lt.s32.totalorder %s12685_s0, %s12685_s0 }
  0x64   :  { %p12692_p4 = por %p12691_p3, %p12690_p2 }
  0x66   :  { %p12693_p5 = pnand %p12692_p4, %p12686_p1 }
  0x68   :  { %12696 = shalt.err (!%p12693_p5)
}
  0x69   :  { %58 = dma.hbm_to_vmem [thread:$0]  %s14675_s2, 256, %s53_s24, [#allocation6], %s12830_s7, %s12830_s7, %s12831_s30  }
  0x6a   :  { %s12697_s21 = scalar_lea.hbm %s14677_s4, 384 }
  0x6b   :  { %p12698_p6 = scmp.ne.s32.totalorder %s14677_s4, %s12697_s21  ;;  %p12701_p7 = scmp.lt.u32.totalorder %s12697_s21, %s14677_s4 }
  0x6d   :  { %p12703_p8 = pnand %p12701_p7, %p12698_p6 }
  0x6f   :  { %12706 = shalt.err (!%p12703_p8)
}
  0x70   :  { %s12707_s25 = scalar_lea.vmem %s78_s29, 384  ;;  %p12712_p10 = scmp.lt.s32.totalorder %s78_s29, %s78_s29 }
  0x71   :  { %p12708_p9 = scmp.ne.s32.totalorder %s78_s29, %s12707_s25  ;;  %p12713_p11 = scmp.lt.s32.totalorder %s12707_s25, %s12707_s25 }
  0x73   :  { %p12714_p12 = por %p12713_p11, %p12712_p10 }
  0x75   :  { %p12715_p13 = pnand %p12714_p12, %p12708_p9 }
  0x77   :  { %12718 = shalt.err (!%p12715_p13)
}
  0x78   :  { %80 = dma.hbm_to_vmem [thread:$0]  %s14677_s4, 384, %s78_s29, [#allocation9]  }
  0x79   :  { %s12834_s12 = smov [#allocation13]   ;;  %s12719_s16 = scalar_lea.hbm %s14679_s6, 24576 }
  0x7a   :  { %s98_s5 = sshll.u32 %s12834_s12, 4  ;;  %p12720_p0 = scmp.ne.s32.totalorder %s14679_s6, %s12719_s16  ;;  %s99_s5 = int_to_ptr.vmem [resolvable:$true] %s98_s5 }
  0x7b   :  { %p12723_p1 = scmp.lt.u32.totalorder %s12719_s16, %s14679_s6 }
  0x7d   :  { %p12725_p2 = pnand %p12723_p1, %p12720_p0 }
  0x7f   :  { %12728 = shalt.err (!%p12725_p2)
}
  0x80   :  { %s12729_s20 = scalar_lea.vmem %s99_s5, 24576  ;;  %p12734_p4 = scmp.lt.s32.totalorder %s99_s5, %s99_s5 }
  0x81   :  { %p12730_p3 = scmp.ne.s32.totalorder %s99_s5, %s12729_s20  ;;  %p12735_p5 = scmp.lt.s32.totalorder %s12729_s20, %s12729_s20 }
  0x83   :  { %p12736_p6 = por %p12735_p5, %p12734_p4 }
  0x85   :  { %p12737_p7 = pnand %p12736_p6, %p12730_p3 }
  0x87   :  { %12740 = shalt.err (!%p12737_p7)
}
  0x88   :  { %s12835_s4 = smov 256   ;;  %s12836_s29 = smov 16  }
  0x89   :  { %104 = dma.hbm_to_vmem [thread:$0]  %s14679_s6, 24576, %s99_s5, [#allocation12], %s12835_s4, %s12835_s4, %s12836_s29  }
  0x8a   :  { %s12837_s21 = smov [#allocation16]   ;;  %s12838_s1 = smov [#allocation17]  }
  0x8b   :  { %s120_s22 = sshll.u32 %s12837_s21, 4  ;;  %s132_s18 = sshll.u32 %s12838_s1, 4  ;;  %s121_s22 = int_to_ptr.vmem [resolvable:$true] %s120_s22  ;;  %s13011_s18 = int_to_ptr.vmem [resolvable:$true] %s132_s18 }
  0x8c   :  { %s12741_s2 = scalar_lea.hbm %s14681_s8, 24576 }
  0x8d   :  { %p12742_p8 = scmp.ne.s32.totalorder %s14681_s8, %s12741_s2  ;;  %p12745_p9 = scmp.lt.u32.totalorder %s12741_s2, %s14681_s8 }
  0x8f   :  { %p12747_p10 = pnand %p12745_p9, %p12742_p8 }
  0x91   :  { %12750 = shalt.err (!%p12747_p10)
}
  0x92   :  { %s12751_s6 = scalar_lea.vmem %s121_s22, 24576  ;;  %p12756_p12 = scmp.lt.s32.totalorder %s121_s22, %s121_s22 }
  0x93   :  { %p12752_p11 = scmp.ne.s32.totalorder %s121_s22, %s12751_s6  ;;  %p12757_p13 = scmp.lt.s32.totalorder %s12751_s6, %s12751_s6 }
  0x95   :  { %p12758_p0 = por %p12757_p13, %p12756_p12 }
  0x97   :  { %p12759_p1 = pnand %p12758_p0, %p12752_p11 }
  0x99   :  { %12762 = shalt.err (!%p12759_p1)
}
  0x9a   :  { %126 = dma.hbm_to_vmem [thread:$0]  %s14681_s8, 24576, %s121_s22, [#allocation15], %s12822_s27, %s12822_s27, %s12823_s28  }
  0x9b   :  { %s12763_s0 = scalar_lea.hbm %s14682_s9, 768 }
  0x9c   :  { %p12764_p2 = scmp.ne.s32.totalorder %s14682_s9, %s12763_s0  ;;  %p12767_p3 = scmp.lt.u32.totalorder %s12763_s0, %s14682_s9 }
  0x9e   :  { %p12769_p4 = pnand %p12767_p3, %p12764_p2 }
  0xa0   :  { %12772 = shalt.err (!%p12769_p4)
}
  0xa1   :  { %s12773_s3 = scalar_lea.vmem %s13011_s18, 768  ;;  %p12778_p6 = scmp.lt.s32.totalorder %s13011_s18, %s13011_s18 }
  0xa2   :  { %p12774_p5 = scmp.ne.s32.totalorder %s13011_s18, %s12773_s3  ;;  %p12779_p7 = scmp.lt.s32.totalorder %s12773_s3, %s12773_s3 }
  0xa4   :  { %p12780_p8 = por %p12779_p7, %p12778_p6 }
  0xa6   :  { %p12781_p9 = pnand %p12780_p8, %p12774_p5 }
  0xa8   :  { %12784 = shalt.err (!%p12781_p9)
}
  0xa9   :  { %138 = dma.hbm_to_vmem [thread:$0]  %s14682_s9, 768, %s13011_s18, [#allocation18], %s12830_s7, %s12830_s7, %s12831_s30  }
  0xaa   :  { %12807 = dma.done.wait [#allocation3], 512  }
  0xab   :  { %12808 = vsyncadd [#allocation3], 4294966784 }
  0xac   :  { %12809 = dma.done.wait [#allocation6], 768  }
  0xad   :  { %12810 = vsyncadd [#allocation6], 4294966528 }
  0xae   :  { %12811 = dma.done.wait [#allocation9], 18816  }
  0xaf   :  { %12812 = vsyncadd [#allocation9], 4294948480 }
  0xb0   :  { %12813 = dma.done.wait [#allocation12], 30720  }
  0xb1   :  { %12814 = vsyncadd [#allocation12], 4294936576 }
  0xb2   :  { %12815 = dma.done.wait [#allocation15], 25088  }
  0xb3   :  { %12816 = vsyncadd [#allocation15], 4294942208 }
  0xb4   :  { %12817 = dma.done.wait [#allocation18], 768  }
  0xb5   :  { %12818 = vsyncadd [#allocation18], 4294966528  ;;  %v11443_v0 = vld [vmem:[#allocation5] sm:$0xff]   ;;  %v11444_v1 = vld [vmem:[#allocation5 + $0x8] sm:$0xff]   ;;  %vm210_vm0 = vcmask 523264   ;;  %v12839_v55 = vmov 0  }
  0xb6   :  { %11025 = vmatprep.subr.bf16.mxu1 %v11443_v0  ;;  %v11445_v2 = vld [vmem:[#allocation5 + $0x10] sm:$0xff]   ;;  %v172_v3 = vld [vmem:[#allocation2] sm:$0xff]  ;;  %v173_v4 = vld [vmem:[#allocation2 + $0x8] sm:$0xff]  ;;  %vm12841_vm1 = vmmov 0   ;;  %vm705_vm2 = vcmask 130048  }
  0xb7   :  { %11026 = vmatpush3.bf16.msra.mxu1 %v11443_v0  ;;  %v176_v5 = vpack.c.bf16 %v173_v4, %v172_v3  ;;  %v11446_v6 = vld [vmem:[#allocation5 + $0x18] sm:$0xff]   ;;  %v174_v7 = vld [vmem:[#allocation2 + $0x10] sm:$0xff]  ;;  %v266_v10 = vld [vmem:[#allocation7] sm:$0xff] }
  0xb8   :  { %11027 = vmatprep.subr.bf16.mxu1 %v11444_v1  ;;  %v175_v8 = vld [vmem:[#allocation2 + $0x18] sm:$0xff]  ;;  %v267_v12 = vld [vmem:[#allocation7 + $0x8] sm:$0xff]  ;;  %v11449_v21 = vld [vmem:[#allocation8 + $0x4] ss:$12 sps:$4 sm:$0xff]  }
  0xb9   :  { %11033 = vmatprep.mubr.msk.bf16.mxu1 %vm210_vm0, %v176_v5  ;;  %v177_v9 = vpack.c.bf16 %v175_v8, %v174_v7  ;;  %v11447_v20 = vld [vmem:[#allocation8] ss:$12 sps:$4 sm:$0xff]   ;;  %v11450_v22 = vld [vmem:[#allocation8 + $0x18] ss:$12 sps:$4 sm:$0xff]   ;;  %v11452_v23 = vld [vmem:[#allocation8 + $0x1c] ss:$12 sps:$4 sm:$0xff]  }
  0xba   :  { %v11453_v24 = vld [vmem:[#allocation8 + $0x8] ss:$12 sps:$4 sm:$0xff]   ;;  %v11457_v42 = vld [vmem:[#allocation8 + $0x20] ss:$12 sps:$4 sm:$0xff]   ;;  %v11454_v43 = vld [vmem:[#allocation8 + $0x30] ss:$12 sps:$4 sm:$0xff]  }
  0xbb   :  { %11028 = vmatpush3.bf16.msra.mxu1 %v11444_v1  ;;  %11037 = vmatprep.subr.bf16.mxu0 %v11453_v24  ;;  %v11456_v41 = vld [vmem:[#allocation8 + $0x34] ss:$12 sps:$4 sm:$0xff]   ;;  %v11460_v44 = vld [vmem:[#allocation8 + $0x4c] ss:$12 sps:$4 sm:$0xff]   ;;  %v11464_v47 = vld [vmem:[#allocation8 + $0x64] ss:$12 sps:$4 sm:$0xff]  }
  0xbc   :  { %11029 = vmatprep.subr.bf16.mxu1 %v11445_v2  ;;  %11038 = vmatpush3.bf16.msra.mxu0 %v11453_v24  ;;  %v11461_v45 = vld [vmem:[#allocation8 + $0x38] ss:$12 sps:$4 sm:$0xff]   ;;  %v11458_v46 = vld [vmem:[#allocation8 + $0x48] ss:$12 sps:$4 sm:$0xff]   ;;  %v11465_v48 = vld [vmem:[#allocation8 + $0x50] ss:$12 sps:$4 sm:$0xff]  }
  0xbd   :  { %11039 = vmatprep.subr.bf16.mxu0 %v11457_v42  ;;  %v11462_v49 = vld [vmem:[#allocation8 + $0x60] ss:$12 sps:$4 sm:$0xff]   ;;  %v11468_v50 = vld [vmem:[#allocation8 + $0x7c] ss:$12 sps:$4 sm:$0xff]   ;;  %v11466_v52 = vld [vmem:[#allocation8 + $0x78] ss:$12 sps:$4 sm:$0xff]  }
  0xbe   :  { %v11469_v51 = vld [vmem:[#allocation8 + $0x68] ss:$12 sps:$4 sm:$0xff]   ;;  %v11473_v54 = vld [vmem:[#allocation8 + $0x80] ss:$12 sps:$4 sm:$0xff]   ;;  %v11470_v56 = vld [vmem:[#allocation8 + $0x90] ss:$12 sps:$4 sm:$0xff]  }
  0xbf   :  { %11030 = vmatpush3.bf16.msra.mxu1 %v11445_v2  ;;  %v11472_v53 = vld [vmem:[#allocation8 + $0x94] ss:$12 sps:$4 sm:$0xff]   ;;  %v11476_v57 = vld [vmem:[#allocation8 + $0xac] ss:$12 sps:$4 sm:$0xff]   ;;  %v11478_v60 = vld [vmem:[#allocation8 + $0xb0] ss:$12 sps:$4 sm:$0xff]   ;;  %v318_v2 = vlaneseq }
  0xc0   :  { %11031 = vmatprep.subr.bf16.mxu1 %v11446_v6  ;;  %11040 = vmatpush3.bf16.msra.mxu0 %v11457_v42  ;;  %v11477_v58 = vld [vmem:[#allocation8 + $0x98] ss:$12 sps:$4 sm:$0xff]   ;;  %v11474_v59 = vld [vmem:[#allocation8 + $0xa8] ss:$12 sps:$4 sm:$0xff]  }
  0xc1   :  { %11041 = vmatprep.subr.bf16.mxu0 %v11461_v45  ;;  %v13081_v8 = vshrl.u32 %v318_v2, 7 }
  0xc3   :  { %11032 = vmatpush3.bf16.msra.mxu1 %v11446_v6 }
  0xc4   :  { %513 = vmatprep.subr.bf16.mxu1 %v11449_v21  ;;  %11042 = vmatpush3.bf16.msra.mxu0 %v11461_v45 }
  0xc5   :  { %11043 = vmatprep.subr.bf16.mxu0 %v11465_v48 }
  0xc6   :  { %11034 = vmatmul.mubr.msk.bf16.vlgmr.msra.gmra.mrb[0].mxu1 %vm210_vm0, %v177_v9 }
  0xc7   :  { %514 = vmatpush1.bf16.msra.mxu1 %v11447_v20  ;;  %545 = vmatprep.mubr.bf16.mxu1 %v12839_v55  ;;  %v13092_v20 = vsub.s32 1, %v13081_v8 }
  0xc8   :  { %515 = vmatprep.subr.bf16.mxu1 %v11452_v23  ;;  %11044 = vmatpush3.bf16.msra.mxu0 %v11465_v48 }
  0xc9   :  { %11045 = vmatprep.subr.bf16.mxu0 %v11469_v51 }
  0xcb   :  { %516 = vmatpush1.bf16.msra.mxu1 %v11450_v22 }
  0xcc   :  { %517 = vmatprep.subr.bf16.mxu1 %v11456_v41  ;;  %11046 = vmatpush3.bf16.msra.mxu0 %v11469_v51  ;;  %v13108_v41 = vsub.s32 2, %v13081_v8 }
  0xcd   :  { %11047 = vmatprep.subr.bf16.mxu0 %v11473_v54 }
  0xcf   :  { %518 = vmatpush1.bf16.msra.mxu1 %v11454_v43 }
  0xd0   :  { %519 = vmatprep.subr.bf16.mxu1 %v11460_v44  ;;  %11048 = vmatpush3.bf16.msra.mxu0 %v11473_v54 }
  0xd1   :  { %11049 = vmatprep.subr.bf16.mxu0 %v11477_v58 }
  0xd3   :  { %520 = vmatpush1.bf16.msra.mxu1 %v11458_v46 }
  0xd4   :  { %521 = vmatprep.subr.bf16.mxu1 %v11464_v47  ;;  %11050 = vmatpush3.bf16.msra.mxu0 %v11477_v58 }
  0xd5   :  { %11051 = vmatprep.subr.bf16.mxu0 %v11478_v60 }
  0xd7   :  { %522 = vmatpush1.bf16.msra.mxu1 %v11462_v49 }
  0xd8   :  { %523 = vmatprep.subr.bf16.mxu1 %v11468_v50  ;;  %11052 = vmatpush3.bf16.msra.mxu0 %v11478_v60 }
  0xdb   :  { %524 = vmatpush1.bf16.msra.mxu1 %v11466_v52 }
  0xdc   :  { %525 = vmatprep.subr.bf16.mxu1 %v11472_v53 }
  0xdf   :  { %526 = vmatpush1.bf16.msra.mxu1 %v11470_v56 }
  0xe0   :  { %527 = vmatprep.subr.bf16.mxu1 %v11476_v57 }
  0xe3   :  { %528 = vmatpush1.bf16.msra.mxu1 %v11474_v59 }
 0x199   :  { %v11035_v11 = vpop.f32.mrb[0].mxu1 }
 0x19a   :  { %v13048_v13 = vadd.f32 %v11035_v11, %v266_v10  ;;  %v251_v14 = vpop.f32.mrb[1].mxu1  ;;  %v13084_v11 = vsub.s32 0, %v13081_v8 }
 0x19b   :  { %v13050_v15 = vadd.f32 %v266_v10, %v251_v14  ;;  %v11036_v16 = vpop.f32.mrb[2].mxu1 }
 0x19c   :  { %277 = vadd.xlane.f32.xlu1 %v13048_v13  ;;  %v254_v17 = vpop.f32.mrb[3].mxu1  ;;  %v13054_v18 = vadd.f32 %v11036_v16, %v267_v12 }
 0x19d   :  { %273 = vadd.xlane.f32.xlu0 %v13050_v15  ;;  %v13056_v19 = vadd.f32 %v267_v12, %v254_v17  ;;  %v13086_v12 = vld [vmem:[#allocation17] sm:$0x3f] }
 0x19e   :  { %v321_v17 = vrot.slane %v13086_v12, %v13084_v11 }
 0x1a0   :  { %279 = vadd.xlane.f32.xlu1 %v13054_v18 }
 0x1a1   :  { %275 = vadd.xlane.f32.xlu0 %v13056_v19 }
 0x229   :  { %v278_v25 = vpop.xlane.xlu1 %277 }
 0x22a   :  { %v274_v26 = vpop.xlane.xlu0 %273  ;;  %v284_v27 = vmul.f32 0.0078125, %v278_v25  ;;  %v329_v25 = vrot.slane %v13086_v12, %v13092_v20 }
 0x22b   :  { %v282_v28 = vmul.f32 0.0078125, %v274_v26 }
 0x22c   :  { %v13066_v35 = vsub.f32 %v13048_v13, %v284_v27 }
 0x22d   :  { %v280_v29 = vpop.xlane.xlu1 %279  ;;  %v13061_v30 = vsub.f32 %v13050_v15, %v282_v28 }
 0x22e   :  { %v276_v31 = vpop.xlane.xlu0 %275  ;;  %v285_v32 = vmul.f32 0.0078125, %v280_v29  ;;  %v292_v37 = vmul.f32 %v13066_v35, %v13066_v35 }
 0x22f   :  { %v283_v33 = vmul.f32 0.0078125, %v276_v31  ;;  %v290_v34 = vmul.f32 %v13061_v30, %v13061_v30 }
 0x230   :  { %v13076_v39 = vsub.f32 %v13054_v18, %v285_v32 }
 0x231   :  { %294 = vadd.xlane.f32.xlu0 %v290_v34  ;;  %v13069_v36 = vsub.f32 %v13056_v19, %v283_v33 }
 0x232   :  { %v293_v40 = vmul.f32 %v13076_v39, %v13076_v39 }
 0x233   :  { %v291_v38 = vmul.f32 %v13069_v36, %v13069_v36 }
 0x235   :  { %298 = vadd.xlane.f32.xlu0 %v292_v37  ;;  %296 = vadd.xlane.f32.xlu1 %v291_v38 }
 0x239   :  { %300 = vadd.xlane.f32.xlu1 %v293_v40  ;;  %v12840_v40 = vmov 0.0  }
 0x23a   :  { %11057 = vmatprep.subr.bf16.mxu1 %v12840_v40  ;;  %11063 = vmatprep.subr.bf16.mxu0 %v12840_v40 }
 0x2be   :  { %v295_v61 = vpop.xlane.xlu0 %294 }
 0x2bf   :  { %v302_v62 = vmul.f32 0.0078125, %v295_v61 }
 0x2c1   :  { %v306_v63 = vadd.f32 1e-05, %v302_v62 }
 0x2c2   :  { %v297_v0 = vpop.xlane.xlu1 %296  ;;  %v299_v1 = vpop.xlane.xlu0 %298 }
 0x2c3   :  { %12167 = vrsqrt.f32 %v306_v63  ;;  %v303_v3 = vmul.f32 0.0078125, %v297_v0  ;;  %v304_v4 = vmul.f32 0.0078125, %v299_v1 }
 0x2c5   :  { %v307_v5 = vadd.f32 1e-05, %v303_v3  ;;  %v308_v6 = vadd.f32 1e-05, %v304_v4 }
 0x2c6   :  { %v301_v7 = vpop.xlane.xlu1 %300 }
 0x2c7   :  { %12169 = vrsqrt.f32 %v307_v5  ;;  %v305_v9 = vmul.f32 0.0078125, %v301_v7 }
 0x2c8   :  { %12171 = vrsqrt.f32 %v308_v6 }
 0x2c9   :  { %v309_v10 = vadd.f32 1e-05, %v305_v9 }
 0x2cb   :  { %12173 = vrsqrt.f32 %v309_v10 }
 0x2cd   :  { %v12168_v14 = vpop.eup %12167 }
 0x2ce   :  { %v314_v16 = vmul.f32 %v12168_v14, %v13061_v30 }
 0x2d0   :  { %v322_v24 = vmul.f32 %v321_v17, %v314_v16 }
 0x2d1   :  { %v12170_v21 = vpop.eup %12169 }
 0x2d2   :  { %v12172_v22 = vpop.eup %12171  ;;  %v315_v23 = vmul.f32 %v12170_v21, %v13069_v36  ;;  %v330_v29 = vadd.f32 %v329_v25, %v322_v24 }
 0x2d3   :  { %v316_v26 = vmul.f32 %v12172_v22, %v13066_v35  ;;  %v368_v35 = vld [vmem:[#allocation10] ss:$8 sm:$0x7] }
 0x2d4   :  { %v323_v27 = vmul.f32 %v321_v17, %v315_v23  ;;  %v377_v43 = vrot.slane %v368_v35, %v13092_v20  ;;  %v381_v49 = vrot.slane %v368_v35, %v13108_v41 }
 0x2d5   :  { %v12174_v28 = vpop.eup %12173  ;;  %v324_v32 = vmul.f32 %v321_v17, %v316_v26 }
 0x2d6   :  { %v331_v30 = vadd.f32 %v329_v25, %v323_v27  ;;  %v317_v31 = vmul.f32 %v12174_v28, %v13076_v39  ;;  %v373_v39 = vrot.slane %v368_v35, %v13084_v11 }
 0x2d7   :  { %v332_v37 = vadd.f32 %v329_v25, %v324_v32 }
 0x2d8   :  { %v334_v33 = vpack.c.bf16 %v331_v30, %v330_v29  ;;  %v325_v34 = vmul.f32 %v321_v17, %v317_v31 }
 0x2da   :  { %546 = vmatmul.mubr.bf16.vlgmr.msra.gmra.mrb[4].mxu1 %v334_v33  ;;  %11053 = vmatprep.mubr.bf16.mxu0 %v334_v33  ;;  %v333_v38 = vadd.f32 %v329_v25, %v325_v34 }
 0x2db   :  { %555 = vmatprep.mubr.bf16.mxu1 %v12839_v55 }
 0x2dc   :  { %v335_v36 = vpack.c.bf16 %v333_v38, %v332_v37 }
 0x2de   :  { %11054 = vmatmul.mubr.bf16.vlgmr.msra.gmra.mrb[0].mxu0 %v335_v36 }
 0x2df   :  { %11065 = vmatprep.mubr.msk.bf16.mxu0 %vm12841_vm1, %v12840_v40 }
 0x2e2   :  { %556 = vmatmul.mubr.bf16.gmra.mrb[8].mxu1 %v335_v36 }
 0x2e3   :  { %11059 = vmatprep.mubr.msk.bf16.mxu1 %vm12841_vm1, %v12840_v40 }
 0x3ad   :  { %v547_v42 = vpop.f32.mrb[4].mxu1 }
 0x3ae   :  { %v549_v44 = vpop.f32.mrb[5].mxu1  ;;  %v548_v46 = vadd.f32 %v547_v42, %v373_v39 }
 0x3af   :  { %v551_v45 = vpop.f32.mrb[6].mxu1  ;;  %v550_v50 = vadd.f32 %v549_v44, %v377_v43 }
 0x3b0   :  { %v552_v47 = vadd.f32 %v551_v45, %v373_v39  ;;  %v553_v48 = vpop.f32.mrb[7].mxu1 }
 0x3b1   :  { %v554_v51 = vadd.f32 %v553_v48, %v377_v43  ;;  %v11055_v52 = vpop.f32.mrb[0].mxu0 }
 0x3b2   :  { %v615_v53 = vpack.c.bf16 %v552_v47, %v548_v46  ;;  %v600_v54 = vpop.f32.mrb[1].mxu0  ;;  %v609_v58 = vadd.f32 %v11055_v52, %v381_v49 }
 0x3b3   :  { %v617_v56 = vpack.c.bf16 %v554_v51, %v550_v50  ;;  %v11056_v57 = vpop.f32.mrb[2].mxu0  ;;  %v601_v61 = vadd.f32 %v600_v54, %v381_v49 }
 0x3b4   :  { %v612_v59 = vadd.f32 %v11056_v57, %v381_v49  ;;  %v603_v60 = vpop.f32.mrb[3].mxu0 }
 0x3b5   :  { %v604_v62 = vadd.f32 %v603_v60, %v381_v49  ;;  %v557_v63 = vpop.f32.mrb[8].mxu1  ;;  %11058 = vmatpush3.bf16.xpose.msra.mxu1 %v617_v56 }
 0x3b6   :  { %v753_v0 = vpack.c.bf16 %v612_v59, %v609_v58  ;;  %v559_v1 = vpop.f32.mrb[9].mxu1  ;;  %11069 = vmatprep.subr.bf16.mxu1 %v12840_v40  ;;  %v558_v4 = vadd.f32 %v557_v63, %v373_v39  ;;  %v11479_v58 = vld [vmem:[#allocation11] sm:$0xff]  }
 0x3b7   :  { %v752_v2 = vpack.c.bf16 %v604_v62, %v601_v61  ;;  %v561_v3 = vpop.f32.mrb[10].mxu1  ;;  %v560_v7 = vadd.f32 %v559_v1, %v377_v43 }
 0x3b8   :  { %v562_v5 = vadd.f32 %v561_v3, %v373_v39  ;;  %v563_v6 = vpop.f32.mrb[11].mxu1 }
 0x3b9   :  { %v564_v9 = vadd.f32 %v563_v6, %v377_v43  ;;  %v11481_v6 = vld [vmem:[#allocation11 + $0x10] sm:$0xff]  }
 0x3ba   :  { %v616_v10 = vpack.c.bf16 %v562_v5, %v558_v4  ;;  %v11480_v4 = vld [vmem:[#allocation11 + $0x8] sm:$0xff]  }
 0x3bb   :  { %v618_v14 = vpack.c.bf16 %v564_v9, %v560_v7 }
 0x3bc   :  { %11060 = vmatmul.mubr.bf16.vlgmr.msra.gmra.mrb[12].mxu1 %v615_v53 }
 0x3bd   :  { %11064 = vmatpush3.bf16.xpose.msra.mxu0 %v618_v14  ;;  %11070 = vmatpush3.bf16.msra.mxu1 %v752_v2 }
 0x3be   :  { %11075 = vmatprep.subr.bf16.mxu0 %v12840_v40  ;;  %11071 = vmatprep.mubr.msk.bf16.mxu1 %vm12841_vm1, %v12840_v40 }
 0x3bf   :  { %11081 = vmatprep.subr.bf16.mxu1 %v11479_v58 }
 0x3c4   :  { %11066 = vmatmul.mubr.bf16.vlgmr.msra.gmra.mrb[4].mxu0 %v616_v10 }
 0x3c5   :  { %11076 = vmatpush3.bf16.msra.mxu0 %v753_v0  ;;  %11077 = vmatprep.mubr.msk.bf16.mxu0 %vm12841_vm1, %v12840_v40 }
 0x48f   :  { %v653_v16 = vpop.f32.mrb[12].mxu1 }
 0x490   :  { %v701_v17 = vmul.f32 0.088388346, %v653_v16  ;;  %v11061_v21 = vpop.f32.mrb[13].mxu1  ;;  %v11482_v16 = vld [vmem:[#allocation11 + $0x18] sm:$0xff]  }
 0x491   :  { %v656_v22 = vpop.f32.mrb[14].mxu1  ;;  %v11484_v21 = vld [vmem:[#allocation11 + $0x28] sm:$0xff]  }
 0x492   :  { %v702_v23 = vmul.f32 0.088388346, %v656_v22  ;;  %v11062_v24 = vpop.f32.mrb[15].mxu1  ;;  %v706_v25 = vsel %vm705_vm2, %v701_v17, -inf  ;;  %v11485_v22 = vld [vmem:[#allocation11 + $0x30] sm:$0xff]  }
 0x493   :  { %707 = vmax.xlane.f32.xlu0 %v706_v25 }
 0x494   :  { %v709_v26 = vsel %vm705_vm2, %v702_v23, -inf }
 0x495   :  { %710 = vmax.xlane.f32.xlu1 %v709_v26 }
 0x497   :  { %v694_v27 = vpop.f32.mrb[4].mxu0 }
 0x498   :  { %v703_v28 = vmul.f32 0.088388346, %v694_v27  ;;  %v11067_v29 = vpop.f32.mrb[5].mxu0 }
 0x499   :  { %v697_v30 = vpop.f32.mrb[6].mxu0 }
 0x49a   :  { %v704_v31 = vmul.f32 0.088388346, %v697_v30  ;;  %v11068_v32 = vpop.f32.mrb[7].mxu0  ;;  %v712_v33 = vsel %vm705_vm2, %v703_v28, -inf }
 0x49b   :  { %713 = vmax.xlane.f32.xlu0 %v712_v33 }
 0x49c   :  { %v715_v34 = vsel %vm705_vm2, %v704_v31, -inf }
 0x49d   :  { %716 = vmax.xlane.f32.xlu1 %v715_v34  ;;  %v863_v34 = vrot.slane %v13086_v12, %v13108_v41 }
 0x520   :  { %v708_v37 = vpop.xlane.xlu0 %707 }
 0x521   :  { %v718_v38 = vsub.f32 %v701_v17, %v708_v37  ;;  %v11483_v17 = vld [vmem:[#allocation11 + $0x20] sm:$0xff]  }
 0x522   :  { %v711_v36 = vpop.xlane.xlu1 %710 }
 0x523   :  { %v722_v35 = vmul.f32 1.442695, %v718_v38  ;;  %v719_v39 = vsub.f32 %v702_v23, %v711_v36  ;;  %v11486_v23 = vld [vmem:[#allocation11 + $0x38] sm:$0xff]  }
 0x525   :  { %12175 = vpow2.f32 %v722_v35  ;;  %v724_v42 = vmul.f32 1.442695, %v719_v39 }
 0x527   :  { %12177 = vpow2.f32 %v724_v42 }
 0x528   :  { %v714_v43 = vpop.xlane.xlu0 %713 }
 0x529   :  { %v720_v44 = vsub.f32 %v703_v28, %v714_v43 }
 0x52a   :  { %v717_v45 = vpop.xlane.xlu1 %716 }
 0x52b   :  { %v726_v46 = vmul.f32 1.442695, %v720_v44  ;;  %v721_v47 = vsub.f32 %v704_v31, %v717_v45 }
 0x52d   :  { %12179 = vpow2.f32 %v726_v46  ;;  %v728_v48 = vmul.f32 1.442695, %v721_v47 }
 0x52f   :  { %v12176_v49 = vpop.eup %12175  ;;  %12181 = vpow2.f32 %v728_v48 }
 0x530   :  { %v730_v50 = vsel %vm705_vm2, %v12176_v49, 0.0 }
 0x531   :  { %v12178_v51 = vpop.eup %12177  ;;  %731 = vadd.xlane.f32.xlu0 %v730_v50  ;;  %v11490_v50 = vld [vmem:[#allocation13 + $0x8] ss:$16 sps:$4 sm:$0xff]  }
 0x532   :  { %v733_v52 = vsel %vm705_vm2, %v12178_v51, 0.0 }
 0x533   :  { %734 = vadd.xlane.f32.xlu1 %v733_v52  ;;  %v11498_v52 = vld [vmem:[#allocation13 + $0x2c] ss:$16 sps:$4 sm:$0xff]  }
 0x537   :  { %v12180_v53 = vpop.eup %12179 }
 0x538   :  { %v736_v54 = vsel %vm705_vm2, %v12180_v53, 0.0 }
 0x539   :  { %v12182_v56 = vpop.eup %12181  ;;  %737 = vadd.xlane.f32.xlu0 %v736_v54 }
 0x53a   :  { %v739_v57 = vsel %vm705_vm2, %v12182_v56, 0.0 }
 0x53b   :  { %740 = vadd.xlane.f32.xlu1 %v739_v57 }
 0x5be   :  { %v732_v59 = vpop.xlane.xlu0 %731 }
 0x5bf   :  { %12183 = vrcp.f32 %v732_v59 }
 0x5c0   :  { %v735_v60 = vpop.xlane.xlu1 %734 }
 0x5c1   :  { %12185 = vrcp.f32 %v735_v60 }
 0x5c6   :  { %v738_v61 = vpop.xlane.xlu0 %737 }
 0x5c7   :  { %12187 = vrcp.f32 %v738_v61 }
 0x5c8   :  { %v741_v62 = vpop.xlane.xlu1 %740 }
 0x5c9   :  { %v12184_v63 = vpop.eup %12183  ;;  %12189 = vrcp.f32 %v741_v62 }
 0x5ca   :  { %v746_v1 = vmul.f32 %v12184_v63, %v12176_v49  ;;  %v11489_v49 = vld [vmem:[#allocation13 + $0x4] ss:$16 sps:$4 sm:$0xff]  }
 0x5cb   :  { %v12186_v0 = vpop.eup %12185  ;;  %1241 = vmatprep.subr.bf16.mxu0 %v11489_v49 }
 0x5cc   :  { %v747_v2 = vmul.f32 %v12186_v0, %v12178_v51  ;;  %v11492_v51 = vld [vmem:[#allocation13 + $0xc] ss:$16 sps:$4 sm:$0xff]  }
 0x5ce   :  { %v750_v3 = vpack.c.bf16 %v747_v2, %v746_v1 }
 0x5d0   :  { %11072 = vmatmul.mubr.msk.bf16.vlgmr.msra.gmra.mrb[16].mxu1 %vm705_vm2, %v750_v3 }
 0x5d1   :  { %v12188_v5 = vpop.eup %12187  ;;  %11082 = vmatpush3.bf16.msra.mxu1 %v11479_v58 }
 0x5d2   :  { %11083 = vmatprep.subr.bf16.mxu1 %v11480_v4  ;;  %v748_v9 = vmul.f32 %v12188_v5, %v12180_v53  ;;  %v11496_v53 = vld [vmem:[#allocation13 + $0x28] ss:$16 sps:$4 sm:$0xff]  }
 0x5d3   :  { %v12190_v7 = vpop.eup %12189 }
 0x5d4   :  { %v749_v10 = vmul.f32 %v12190_v7, %v12182_v56  ;;  %v11504_v7 = vld [vmem:[#allocation13 + $0x4c] ss:$16 sps:$4 sm:$0xff]  }
 0x5d5   :  { %11084 = vmatpush3.bf16.msra.mxu1 %v11480_v4 }
 0x5d6   :  { %v751_v14 = vpack.c.bf16 %v749_v10, %v748_v9  ;;  %11085 = vmatprep.subr.bf16.mxu1 %v11481_v6  ;;  %v11499_v9 = vld [vmem:[#allocation13 + $0x40] ss:$16 sps:$4 sm:$0xff]   ;;  %v11502_v10 = vld [vmem:[#allocation13 + $0x48] ss:$16 sps:$4 sm:$0xff]  }
 0x5d8   :  { %11078 = vmatmul.mubr.msk.bf16.vlgmr.msra.gmra.mrb[8].mxu0 %vm705_vm2, %v751_v14  ;;  %v11507_v14 = vld [vmem:[#allocation13 + $0x64] ss:$16 sps:$4 sm:$0xff]  }
 0x5d9   :  { %11086 = vmatpush3.bf16.msra.mxu1 %v11481_v6  ;;  %1273 = vmatprep.mubr.bf16.mxu0 %v12839_v55  ;;  %v11501_v6 = vld [vmem:[#allocation13 + $0x44] ss:$16 sps:$4 sm:$0xff]  }
 0x5da   :  { %11087 = vmatprep.subr.bf16.mxu1 %v11482_v16 }
 0x5dd   :  { %11088 = vmatpush3.bf16.msra.mxu1 %v11482_v16  ;;  %v11510_v16 = vld [vmem:[#allocation13 + $0x6c] ss:$16 sps:$4 sm:$0xff]  }
 0x5de   :  { %11089 = vmatprep.subr.bf16.mxu1 %v11483_v17 }
 0x5e1   :  { %11090 = vmatpush3.bf16.msra.mxu1 %v11483_v17  ;;  %v11505_v17 = vld [vmem:[#allocation13 + $0x60] ss:$16 sps:$4 sm:$0xff]  }
 0x5e2   :  { %11091 = vmatprep.subr.bf16.mxu1 %v11484_v21 }
 0x5e5   :  { %11092 = vmatpush3.bf16.msra.mxu1 %v11484_v21  ;;  %v11508_v21 = vld [vmem:[#allocation13 + $0x68] ss:$16 sps:$4 sm:$0xff]  }
 0x5e6   :  { %11093 = vmatprep.subr.bf16.mxu1 %v11485_v22 }
 0x5e9   :  { %11094 = vmatpush3.bf16.msra.mxu1 %v11485_v22  ;;  %v11513_v22 = vld [vmem:[#allocation13 + $0x84] ss:$16 sps:$4 sm:$0xff]  }
 0x5ea   :  { %11095 = vmatprep.subr.bf16.mxu1 %v11486_v23 }
 0x5ed   :  { %11096 = vmatpush3.bf16.msra.mxu1 %v11486_v23  ;;  %v11516_v23 = vld [vmem:[#allocation13 + $0x8c] ss:$16 sps:$4 sm:$0xff]  }
 0x5ee   :  { %1294 = vmatprep.subr.bf16.mxu1 %v11492_v51 }
 0x6a3   :  { %v791_v24 = vpop.f32.mrb[16].mxu1 }
 0x6a4   :  { %v11073_v25 = vpop.f32.mrb[17].mxu1 }
 0x6a5   :  { %v794_v26 = vpop.f32.mrb[18].mxu1  ;;  %v11514_v25 = vld [vmem:[#allocation13 + $0x88] ss:$16 sps:$4 sm:$0xff]  }
 0x6a6   :  { %v842_v27 = vpack.c.bf16 %v794_v26, %v791_v24  ;;  %v11074_v28 = vpop.f32.mrb[19].mxu1  ;;  %v11511_v24 = vld [vmem:[#allocation13 + $0x80] ss:$16 sps:$4 sm:$0xff]   ;;  %v11519_v26 = vld [vmem:[#allocation13 + $0xa4] ss:$16 sps:$4 sm:$0xff]  }
 0x6a7   :  { %v11520_v28 = vld [vmem:[#allocation13 + $0xa8] ss:$16 sps:$4 sm:$0xff]  }
 0x6a8   :  { %11097 = vmatprep.mubr.bf16.mxu1 %v842_v27  ;;  %v11517_v27 = vld [vmem:[#allocation13 + $0xa0] ss:$16 sps:$4 sm:$0xff]  }
 0x6ab   :  { %v835_v29 = vpop.f32.mrb[8].mxu0 }
 0x6ac   :  { %v11079_v30 = vpop.f32.mrb[9].mxu0 }
 0x6ad   :  { %v838_v31 = vpop.f32.mrb[10].mxu0  ;;  %v11525_v30 = vld [vmem:[#allocation13 + $0xc4] ss:$16 sps:$4 sm:$0xff]  }
 0x6ae   :  { %v843_v32 = vpack.c.bf16 %v838_v31, %v835_v29  ;;  %v11080_v33 = vpop.f32.mrb[11].mxu0  ;;  %v11522_v29 = vld [vmem:[#allocation13 + $0xac] ss:$16 sps:$4 sm:$0xff]  }
 0x6af   :  { %v11528_v31 = vld [vmem:[#allocation13 + $0xcc] ss:$16 sps:$4 sm:$0xff]   ;;  %v11526_v33 = vld [vmem:[#allocation13 + $0xc8] ss:$16 sps:$4 sm:$0xff]  }
 0x6b0   :  { %11098 = vmatmul.mubr.bf16.vlgmr.msra.gmra.mrb[20].mxu1 %v843_v32  ;;  %v11523_v32 = vld [vmem:[#allocation13 + $0xc0] ss:$16 sps:$4 sm:$0xff]  }
 0x6b1   :  { %1326 = vmatprep.mubr.bf16.mxu1 %v12839_v55  ;;  %1295 = vmatpush1.bf16.msra.mxu1 %v11490_v50 }
 0x6b2   :  { %1296 = vmatprep.subr.bf16.mxu1 %v11498_v52 }
 0x6b5   :  { %1297 = vmatpush1.bf16.msra.mxu1 %v11496_v53  ;;  %v13169_v53 = vsub.s32 3, %v13081_v8 }
 0x6b6   :  { %1298 = vmatprep.subr.bf16.mxu1 %v11504_v7 }
 0x6b9   :  { %1299 = vmatpush1.bf16.msra.mxu1 %v11502_v10 }
 0x6ba   :  { %1300 = vmatprep.subr.bf16.mxu1 %v11510_v16 }
 0x6bd   :  { %1301 = vmatpush1.bf16.msra.mxu1 %v11508_v21  ;;  %v11536_v21 = vld [vmem:[#allocation16 + $0xc0] sm:$0xff]  }
 0x6be   :  { %1302 = vmatprep.subr.bf16.mxu1 %v11516_v23  ;;  %v11540_v23 = vld [vmem:[#allocation16 + $0xc8] sm:$0xff]  }
 0x6c1   :  { %1303 = vmatpush1.bf16.msra.mxu1 %v11514_v25  ;;  %v11542_v25 = vld [vmem:[#allocation16 + $0x88] sm:$0xff]  }
 0x6c2   :  { %1304 = vmatprep.subr.bf16.mxu1 %v11522_v29  ;;  %v11546_v29 = vld [vmem:[#allocation16 + $0x90] sm:$0xff]  }
 0x6c5   :  { %1305 = vmatpush1.bf16.msra.mxu1 %v11520_v28  ;;  %v11545_v28 = vld [vmem:[#allocation16 + $0x10] sm:$0xff]  }
 0x6c6   :  { %1306 = vmatprep.subr.bf16.mxu1 %v11528_v31  ;;  %v11548_v31 = vld [vmem:[#allocation16 + $0xd8] sm:$0xff]  }
 0x6c9   :  { %1307 = vmatpush1.bf16.msra.mxu1 %v11526_v33  ;;  %v11550_v33 = vld [vmem:[#allocation16 + $0x98] sm:$0xff]  }
 0x783   :  { %v11099_v37 = vpop.f32.mrb[20].mxu1 }
 0x784   :  { %v946_v38 = vpop.f32.mrb[21].mxu1  ;;  %v955_v42 = vadd.f32 %v11099_v37, %v863_v34  ;;  %v11534_v37 = vld [vmem:[#allocation13 + $0xec] ss:$16 sps:$4 sm:$0xff]  }
 0x785   :  { %v947_v36 = vadd.f32 %v946_v38, %v863_v34  ;;  %v11100_v35 = vpop.f32.mrb[22].mxu1  ;;  %v11529_v38 = vld [vmem:[#allocation13 + $0xe0] ss:$16 sps:$4 sm:$0xff]   ;;  %1308 = vmatprep.subr.bf16.mxu1 %v11534_v37 }
 0x786   :  { %v949_v39 = vpop.f32.mrb[23].mxu1  ;;  %v958_v45 = vadd.f32 %v11100_v35, %v863_v34  ;;  %v13140_v47 = vadd.f32 %v955_v42, %v13048_v13  ;;  %v11493_v13 = vld [vmem:[#allocation13 + $0x20] ss:$16 sps:$4 sm:$0xff]  }
 0x787   :  { %v13133_v43 = vadd.f32 %v947_v36, %v13050_v15  ;;  %v950_v44 = vadd.f32 %v949_v39, %v863_v34  ;;  %v11487_v15 = vld [vmem:[#allocation13] ss:$16 sps:$4 sm:$0xff]   ;;  %v11531_v34 = vld [vmem:[#allocation13 + $0xe4] ss:$16 sps:$4 sm:$0xff]   ;;  %v11532_v36 = vld [vmem:[#allocation13 + $0xe8] ss:$16 sps:$4 sm:$0xff]  }
 0x788   :  { %v13144_v48 = vadd.f32 %v958_v45, %v13054_v18  ;;  %1242 = vmatpush1.bf16.msra.mxu0 %v11487_v15  ;;  %1309 = vmatpush1.bf16.msra.mxu1 %v11532_v36  ;;  %v11552_v37 = vld [vmem:[#allocation16 + $0xe0] sm:$0xff]  }
 0x789   :  { %v13136_v46 = vadd.f32 %v950_v44, %v13056_v19  ;;  %965 = vadd.xlane.f32.xlu0 %v13133_v43  ;;  %v11495_v19 = vld [vmem:[#allocation13 + $0x24] ss:$16 sps:$4 sm:$0xff]   ;;  %10577 = vmatprep.subr.bf16.mxu1 %v11536_v21 }
 0x78a   :  { %1243 = vmatprep.subr.bf16.mxu0 %v11495_v19  ;;  %v11554_v36 = vld [vmem:[#allocation16 + $0xa0] sm:$0xff]  }
 0x78b   :  { %967 = vadd.xlane.f32.xlu1 %v13136_v46 }
 0x78c   :  { %1244 = vmatpush1.bf16.msra.mxu0 %v11493_v13 }
 0x78d   :  { %969 = vadd.xlane.f32.xlu0 %v13140_v47  ;;  %1245 = vmatprep.subr.bf16.mxu0 %v11501_v6 }
 0x78f   :  { %971 = vadd.xlane.f32.xlu1 %v13144_v48 }
 0x790   :  { %1246 = vmatpush1.bf16.msra.mxu0 %v11499_v9 }
 0x791   :  { %1247 = vmatprep.subr.bf16.mxu0 %v11507_v14 }
 0x794   :  { %1248 = vmatpush1.bf16.msra.mxu0 %v11505_v17  ;;  %v11535_v17 = vld [vmem:[#allocation16 + $0x40] sm:$0xff]  }
 0x795   :  { %1249 = vmatprep.subr.bf16.mxu0 %v11513_v22  ;;  %v11537_v22 = vld [vmem:[#allocation16] sm:$0xff]  }
 0x798   :  { %1250 = vmatpush1.bf16.msra.mxu0 %v11511_v24  ;;  %v11541_v24 = vld [vmem:[#allocation16 + $0x8] sm:$0xff]  }
 0x799   :  { %1251 = vmatprep.subr.bf16.mxu0 %v11519_v26  ;;  %v11543_v26 = vld [vmem:[#allocation16 + $0x50] sm:$0xff]  }
 0x79c   :  { %1252 = vmatpush1.bf16.msra.mxu0 %v11517_v27  ;;  %v11544_v27 = vld [vmem:[#allocation16 + $0xd0] sm:$0xff]  }
 0x79d   :  { %1253 = vmatprep.subr.bf16.mxu0 %v11525_v30  ;;  %v11547_v30 = vld [vmem:[#allocation16 + $0x58] sm:$0xff]  }
 0x7a0   :  { %1254 = vmatpush1.bf16.msra.mxu0 %v11523_v32  ;;  %v11549_v32 = vld [vmem:[#allocation16 + $0x18] sm:$0xff]  }
 0x7a1   :  { %1255 = vmatprep.subr.bf16.mxu0 %v11531_v34  ;;  %v11551_v34 = vld [vmem:[#allocation16 + $0x60] sm:$0xff]  }
 0x7a4   :  { %1256 = vmatpush1.bf16.msra.mxu0 %v11529_v38  ;;  %v11553_v38 = vld [vmem:[#allocation16 + $0x20] sm:$0xff]  }
 0x7a5   :  { %10549 = vmatprep.subr.bf16.mxu0 %v11535_v17 }
 0x816   :  { %v966_v18 = vpop.xlane.xlu0 %965 }
 0x817   :  { %v973_v54 = vmul.f32 0.0078125, %v966_v18  ;;  %v1012_v18 = vrot.slane %v13086_v12, %v13169_v53 }
 0x818   :  { %v968_v56 = vpop.xlane.xlu1 %967 }
 0x819   :  { %v974_v57 = vmul.f32 0.0078125, %v968_v56  ;;  %v13149_v58 = vsub.f32 %v13133_v43, %v973_v54  ;;  %v13174_v54 = vsub.s32 4, %v13081_v8 }
 0x81a   :  { %v970_v59 = vpop.xlane.xlu0 %969 }
 0x81b   :  { %v975_v60 = vmul.f32 0.0078125, %v970_v59  ;;  %v981_v61 = vmul.f32 %v13149_v58, %v13149_v58  ;;  %v13154_v62 = vsub.f32 %v13136_v46, %v974_v57 }
 0x81c   :  { %v972_v63 = vpop.xlane.xlu1 %971 }
 0x81d   :  { %v976_v0 = vmul.f32 0.0078125, %v972_v63  ;;  %985 = vadd.xlane.f32.xlu0 %v981_v61  ;;  %v982_v1 = vmul.f32 %v13154_v62, %v13154_v62  ;;  %v13159_v2 = vsub.f32 %v13140_v47, %v975_v60  ;;  %v1020_v63 = vrot.slane %v13086_v12, %v13174_v54 }
 0x81f   :  { %987 = vadd.xlane.f32.xlu1 %v982_v1  ;;  %v983_v3 = vmul.f32 %v13159_v2, %v13159_v2  ;;  %v13164_v4 = vsub.f32 %v13144_v48, %v976_v0 }
 0x821   :  { %989 = vadd.xlane.f32.xlu0 %v983_v3  ;;  %v984_v5 = vmul.f32 %v13164_v4, %v13164_v4 }
 0x823   :  { %991 = vadd.xlane.f32.xlu1 %v984_v5 }
 0x8aa   :  { %v986_v35 = vpop.xlane.xlu0 %985 }
 0x8ab   :  { %v993_v39 = vmul.f32 0.0078125, %v986_v35  ;;  %v11555_v35 = vld [vmem:[#allocation16 + $0x68] sm:$0xff]  }
 0x8ac   :  { %v988_v42 = vpop.xlane.xlu1 %987 }
 0x8ad   :  { %v997_v44 = vadd.f32 1e-05, %v993_v39  ;;  %v994_v45 = vmul.f32 0.0078125, %v988_v42  ;;  %v11556_v39 = vld [vmem:[#allocation16 + $0xe8] sm:$0xff]  }
 0x8ae   :  { %v990_v15 = vpop.xlane.xlu0 %989  ;;  %v11557_v42 = vld [vmem:[#allocation16 + $0x28] sm:$0xff]  }
 0x8af   :  { %12191 = vrsqrt.f32 %v997_v44  ;;  %v998_v49 = vadd.f32 1e-05, %v994_v45  ;;  %v995_v50 = vmul.f32 0.0078125, %v990_v15  ;;  %v11558_v44 = vld [vmem:[#allocation16 + $0xa8] sm:$0xff]   ;;  %v11559_v45 = vld [vmem:[#allocation16 + $0x70] sm:$0xff]  }
 0x8b0   :  { %v992_v51 = vpop.xlane.xlu1 %991  ;;  %v11560_v15 = vld [vmem:[#allocation16 + $0xf0] sm:$0xff]  }
 0x8b1   :  { %12193 = vrsqrt.f32 %v998_v49  ;;  %v999_v19 = vadd.f32 1e-05, %v995_v50  ;;  %v996_v52 = vmul.f32 0.0078125, %v992_v51  ;;  %v11561_v49 = vld [vmem:[#allocation16 + $0x30] sm:$0xff]   ;;  %v11563_v51 = vld [vmem:[#allocation16 + $0x78] sm:$0xff]  }
 0x8b2   :  { %v11562_v50 = vld [vmem:[#allocation16 + $0xb0] sm:$0xff]  }
 0x8b3   :  { %12195 = vrsqrt.f32 %v999_v19  ;;  %v1000_v13 = vadd.f32 1e-05, %v996_v52  ;;  %v11564_v19 = vld [vmem:[#allocation16 + $0xf8] sm:$0xff]  }
 0x8b4   :  { %v11565_v52 = vld [vmem:[#allocation16 + $0x38] sm:$0xff]  }
 0x8b5   :  { %12197 = vrsqrt.f32 %v1000_v13  ;;  %v11566_v13 = vld [vmem:[#allocation16 + $0xb8] sm:$0xff]  }
 0x8b9   :  { %v12192_v56 = vpop.eup %12191 }
 0x8ba   :  { %v1005_v57 = vmul.f32 %v12192_v56, %v13149_v58 }
 0x8bb   :  { %v12194_v59 = vpop.eup %12193 }
 0x8bc   :  { %v1006_v60 = vmul.f32 %v12194_v59, %v13154_v62  ;;  %v1013_v61 = vmul.f32 %v1012_v18, %v1005_v57 }
 0x8bd   :  { %v12196_v0 = vpop.eup %12195 }
 0x8be   :  { %v1014_v1 = vmul.f32 %v1012_v18, %v1006_v60  ;;  %v1021_v5 = vadd.f32 %v1020_v63, %v1013_v61  ;;  %v1007_v7 = vmul.f32 %v12196_v0, %v13159_v2  ;;  %v11538_v2 = vld [vmem:[#allocation16 + $0x80] sm:$0xff]  }
 0x8bf   :  { %v12198_v3 = vpop.eup %12197 }
 0x8c0   :  { %v1022_v6 = vadd.f32 %v1020_v63, %v1014_v1  ;;  %v1008_v9 = vmul.f32 %v12198_v3, %v13164_v4  ;;  %v1015_v58 = vmul.f32 %v1012_v18, %v1007_v7  ;;  %v11539_v4 = vld [vmem:[#allocation16 + $0x48] sm:$0xff]  }
 0x8c2   :  { %v1025_v10 = vpack.c.bf16 %v1022_v6, %v1021_v5  ;;  %v1016_v14 = vmul.f32 %v1012_v18, %v1008_v9  ;;  %v1023_v12 = vadd.f32 %v1020_v63, %v1015_v58  ;;  %v1059_v18 = vld [vmem:[#allocation14] ss:$8 sm:$0xf] }
 0x8c3   :  { %v13185_v56 = vrot.slane %v1059_v18, %v13084_v11  ;;  %v13188_v57 = vrot.slane %v1059_v18, %v13108_v41  ;;  %v13191_v59 = vrot.slane %v1059_v18, %v13092_v20  ;;  %v13194_v60 = vrot.slane %v1059_v18, %v13169_v53 }
 0x8c4   :  { %1274 = vmatmul.mubr.bf16.vlgmr.msra.gmra.mrb[12].mxu0 %v1025_v10  ;;  %1327 = vmatmul.mubr.bf16.vlgmr.msra.gmra.mrb[24].mxu1 %v1025_v10  ;;  %v1024_v62 = vadd.f32 %v1020_v63, %v1016_v14 }
 0x8c5   :  { %1283 = vmatprep.mubr.bf16.mxu0 %v12839_v55  ;;  %1336 = vmatprep.mubr.bf16.mxu1 %v12839_v55 }
 0x8c6   :  { %v1026_v16 = vpack.c.bf16 %v1024_v62, %v1023_v12  ;;  %10550 = vmatpush3.bf16.msra.mxu0 %v11537_v22  ;;  %10578 = vmatpush3.bf16.msra.mxu1 %v11538_v2 }
 0x8c7   :  { %10551 = vmatprep.subr.bf16.mxu0 %v11539_v4  ;;  %10579 = vmatprep.subr.bf16.mxu1 %v11540_v23 }
 0x8ca   :  { %10552 = vmatpush3.bf16.msra.mxu0 %v11541_v24  ;;  %10580 = vmatpush3.bf16.msra.mxu1 %v11542_v25 }
 0x8cb   :  { %10553 = vmatprep.subr.bf16.mxu0 %v11543_v26  ;;  %10581 = vmatprep.subr.bf16.mxu1 %v11544_v27 }
 0x8cc   :  { %1284 = vmatmul.mubr.bf16.gmra.mrb[16].mxu0 %v1026_v16  ;;  %1337 = vmatmul.mubr.bf16.gmra.mrb[28].mxu1 %v1026_v16 }
 0x8ce   :  { %10554 = vmatpush3.bf16.msra.mxu0 %v11545_v28  ;;  %10582 = vmatpush3.bf16.msra.mxu1 %v11546_v29 }
 0x8cf   :  { %10555 = vmatprep.subr.bf16.mxu0 %v11547_v30  ;;  %10583 = vmatprep.subr.bf16.mxu1 %v11548_v31 }
 0x8d2   :  { %10556 = vmatpush3.bf16.msra.mxu0 %v11549_v32  ;;  %10584 = vmatpush3.bf16.msra.mxu1 %v11550_v33 }
 0x8d3   :  { %10557 = vmatprep.subr.bf16.mxu0 %v11551_v34  ;;  %10585 = vmatprep.subr.bf16.mxu1 %v11552_v37 }
 0x8d6   :  { %10558 = vmatpush3.bf16.msra.mxu0 %v11553_v38  ;;  %10586 = vmatpush3.bf16.msra.mxu1 %v11554_v36 }
 0x8d7   :  { %10559 = vmatprep.subr.bf16.mxu0 %v11555_v35  ;;  %10587 = vmatprep.subr.bf16.mxu1 %v11556_v39 }
 0x8da   :  { %10560 = vmatpush3.bf16.msra.mxu0 %v11557_v42  ;;  %10588 = vmatpush3.bf16.msra.mxu1 %v11558_v44 }
 0x8db   :  { %10561 = vmatprep.subr.bf16.mxu0 %v11559_v45  ;;  %10589 = vmatprep.subr.bf16.mxu1 %v11560_v15 }
 0x8de   :  { %10562 = vmatpush3.bf16.msra.mxu0 %v11561_v49  ;;  %10590 = vmatpush3.bf16.msra.mxu1 %v11562_v50 }
 0x8df   :  { %10563 = vmatprep.subr.bf16.mxu0 %v11563_v51  ;;  %10591 = vmatprep.subr.bf16.mxu1 %v11564_v19 }
 0x8e2   :  { %10564 = vmatpush3.bf16.msra.mxu0 %v11565_v52  ;;  %10592 = vmatpush3.bf16.msra.mxu1 %v11566_v13 }
 0x997   :  { %v1275_v61 = vpop.f32.mrb[12].mxu0  ;;  %v1328_v63 = vpop.f32.mrb[24].mxu1 }
 0x998   :  { %v13197_v0 = vadd.f32 %v1275_v61, %v13185_v56  ;;  %v13200_v1 = vadd.f32 %v1328_v63, %v13188_v57  ;;  %v1277_v3 = vpop.f32.mrb[13].mxu0  ;;  %v1330_v5 = vpop.f32.mrb[25].mxu1 }
 0x999   :  { %v13203_v6 = vadd.f32 %v1277_v3, %v13191_v59  ;;  %v13206_v7 = vadd.f32 %v1330_v5, %v13194_v60  ;;  %v1279_v9 = vpop.f32.mrb[14].mxu0  ;;  %v1332_v10 = vpop.f32.mrb[26].mxu1 }
 0x99a   :  { %v1347_v14 = vmul.f32 %v13197_v0, %v13197_v0  ;;  %v1349_v58 = vmul.f32 %v13200_v1, %v13200_v1  ;;  %v13213_v62 = vadd.f32 %v1279_v9, %v13185_v56  ;;  %v13216_v12 = vadd.f32 %v1332_v10, %v13188_v57  ;;  %v1281_v16 = vpop.f32.mrb[15].mxu0  ;;  %v1334_v17 = vpop.f32.mrb[27].mxu1 }
 0x99b   :  { %v1348_v21 = vmul.f32 %v13203_v6, %v13203_v6  ;;  %v1350_v22 = vmul.f32 %v13206_v7, %v13206_v7  ;;  %v13223_v2 = vadd.f32 %v1281_v16, %v13191_v59  ;;  %v13226_v4 = vadd.f32 %v1334_v17, %v13194_v60 }
 0x99c   :  { %v1363_v23 = vmul.f32 %v1347_v14, %v13197_v0  ;;  %v1365_v24 = vmul.f32 %v1349_v58, %v13200_v1  ;;  %v1351_v25 = vmul.f32 %v13213_v62, %v13213_v62  ;;  %v1353_v26 = vmul.f32 %v13216_v12, %v13216_v12 }
 0x99d   :  { %v1364_v27 = vmul.f32 %v1348_v21, %v13203_v6  ;;  %v1366_v28 = vmul.f32 %v1350_v22, %v13206_v7  ;;  %v1352_v29 = vmul.f32 %v13223_v2, %v13223_v2  ;;  %v1354_v30 = vmul.f32 %v13226_v4, %v13226_v4 }
 0x99e   :  { %v1379_v31 = vmul.f32 0.044715, %v1363_v23  ;;  %v1381_v32 = vmul.f32 0.044715, %v1365_v24  ;;  %v1367_v33 = vmul.f32 %v1351_v25, %v13213_v62  ;;  %v1369_v34 = vmul.f32 %v1353_v26, %v13216_v12 }
 0x99f   :  { %v1380_v37 = vmul.f32 0.044715, %v1364_v27  ;;  %v1382_v38 = vmul.f32 0.044715, %v1366_v28  ;;  %v1368_v36 = vmul.f32 %v1352_v29, %v13223_v2  ;;  %v1370_v35 = vmul.f32 %v1354_v30, %v13226_v4  ;;  %v1285_v39 = vpop.f32.mrb[16].mxu0  ;;  %v1338_v42 = vpop.f32.mrb[28].mxu1 }
 0x9a0   :  { %v1395_v44 = vadd.f32 %v1379_v31, %v13197_v0  ;;  %v1397_v45 = vadd.f32 %v1381_v32, %v13200_v1  ;;  %v1383_v15 = vmul.f32 0.044715, %v1367_v33  ;;  %v1385_v49 = vmul.f32 0.044715, %v1369_v34  ;;  %v1287_v50 = vpop.f32.mrb[17].mxu0  ;;  %v1340_v51 = vpop.f32.mrb[29].mxu1 }
 0x9a1   :  { %v1396_v19 = vadd.f32 %v1380_v37, %v13203_v6  ;;  %v1398_v52 = vadd.f32 %v1382_v38, %v13206_v7  ;;  %v1384_v13 = vmul.f32 0.044715, %v1368_v36  ;;  %v1386_v18 = vmul.f32 0.044715, %v1370_v35  ;;  %v1289_v61 = vpop.f32.mrb[18].mxu0  ;;  %v1342_v63 = vpop.f32.mrb[30].mxu1 }
 0x9a2   :  { %v1411_v3 = vmul.f32 0.7978846, %v1395_v44  ;;  %v1413_v5 = vmul.f32 0.7978846, %v1397_v45  ;;  %v1399_v9 = vadd.f32 %v1383_v15, %v13213_v62  ;;  %v1401_v10 = vadd.f32 %v1385_v49, %v13216_v12  ;;  %v1291_v14 = vpop.f32.mrb[19].mxu0  ;;  %v1344_v58 = vpop.f32.mrb[31].mxu1 }
 0x9a3   :  { %v1412_v16 = vmul.f32 0.7978846, %v1396_v19  ;;  %v1414_v17 = vmul.f32 0.7978846, %v1398_v52  ;;  %v1400_v21 = vadd.f32 %v1384_v13, %v13223_v2  ;;  %v1402_v22 = vadd.f32 %v1386_v18, %v13226_v4 }
 0x9a4   :  { %12199 = vtanh.f32 %v1411_v3  ;;  %v1415_v23 = vmul.f32 0.7978846, %v1399_v9  ;;  %v1417_v24 = vmul.f32 0.7978846, %v1401_v10  ;;  %v13253_v25 = vadd.f32 %v1285_v39, %v13185_v56 }
 0x9a5   :  { %12201 = vtanh.f32 %v1413_v5  ;;  %v1416_v26 = vmul.f32 0.7978846, %v1400_v21  ;;  %v1418_v27 = vmul.f32 0.7978846, %v1402_v22  ;;  %v13256_v28 = vadd.f32 %v1338_v42, %v13188_v57 }
 0x9a6   :  { %12203 = vtanh.f32 %v1412_v16  ;;  %v1355_v29 = vmul.f32 %v13253_v25, %v13253_v25  ;;  %v13261_v30 = vadd.f32 %v1287_v50, %v13191_v59  ;;  %v13264_v31 = vadd.f32 %v1340_v51, %v13194_v60 }
 0x9a7   :  { %12205 = vtanh.f32 %v1414_v17  ;;  %v1357_v32 = vmul.f32 %v13256_v28, %v13256_v28  ;;  %v13269_v33 = vadd.f32 %v1289_v61, %v13185_v56  ;;  %v13272_v34 = vadd.f32 %v1342_v63, %v13188_v57 }
 0x9a8   :  { %12207 = vtanh.f32 %v1415_v23  ;;  %v1371_v37 = vmul.f32 %v1355_v29, %v13253_v25  ;;  %v1356_v38 = vmul.f32 %v13261_v30, %v13261_v30  ;;  %v1358_v36 = vmul.f32 %v13264_v31, %v13264_v31 }
 0x9a9   :  { %12209 = vtanh.f32 %v1417_v24  ;;  %v1373_v35 = vmul.f32 %v1357_v32, %v13256_v28  ;;  %v1359_v39 = vmul.f32 %v13269_v33, %v13269_v33  ;;  %v1361_v56 = vmul.f32 %v13272_v34, %v13272_v34 }
 0x9aa   :  { %12211 = vtanh.f32 %v1416_v26  ;;  %v1387_v57 = vmul.f32 0.044715, %v1371_v37  ;;  %v1372_v42 = vmul.f32 %v1356_v38, %v13261_v30  ;;  %v1374_v44 = vmul.f32 %v1358_v36, %v13264_v31 }
 0x9ab   :  { %12213 = vtanh.f32 %v1418_v27  ;;  %v1389_v45 = vmul.f32 0.044715, %v1373_v35  ;;  %v1375_v15 = vmul.f32 %v1359_v39, %v13269_v33  ;;  %v1377_v49 = vmul.f32 %v1361_v56, %v13272_v34 }
 0x9ac   :  { %v1403_v50 = vadd.f32 %v1387_v57, %v13253_v25  ;;  %v1388_v51 = vmul.f32 0.044715, %v1372_v42  ;;  %v1390_v19 = vmul.f32 0.044715, %v1374_v44  ;;  %v13290_v52 = vadd.f32 %v1291_v14, %v13191_v59 }
 0x9ad   :  { %v1405_v13 = vadd.f32 %v1389_v45, %v13256_v28  ;;  %v1391_v18 = vmul.f32 0.044715, %v1375_v15  ;;  %v1393_v61 = vmul.f32 0.044715, %v1377_v49  ;;  %v13294_v63 = vadd.f32 %v1344_v58, %v13194_v60 }
 0x9ae   :  { %v12200_v3 = vpop.eup %12199  ;;  %v1419_v5 = vmul.f32 0.7978846, %v1403_v50  ;;  %v1404_v9 = vadd.f32 %v1388_v51, %v13261_v30  ;;  %v1406_v10 = vadd.f32 %v1390_v19, %v13264_v31  ;;  %v1360_v16 = vmul.f32 %v13290_v52, %v13290_v52 }
 0x9af   :  { %v12202_v17 = vpop.eup %12201  ;;  %v1443_v21 = vadd.f32 1.0, %v12200_v3  ;;  %v1421_v59 = vmul.f32 0.7978846, %v1405_v13  ;;  %v1407_v14 = vadd.f32 %v1391_v18, %v13269_v33  ;;  %v1409_v22 = vadd.f32 %v1393_v61, %v13272_v34 }
 0x9b0   :  { %v12204_v23 = vpop.eup %12203  ;;  %v1445_v24 = vadd.f32 1.0, %v12202_v17  ;;  %12215 = vtanh.f32 %v1419_v5  ;;  %v1420_v60 = vmul.f32 0.7978846, %v1404_v9  ;;  %v1422_v58 = vmul.f32 0.7978846, %v1406_v10 }
 0x9b1   :  { %v12206_v26 = vpop.eup %12205  ;;  %v1459_v27 = vmul.f32 0.5, %v1443_v21  ;;  %12217 = vtanh.f32 %v1421_v59  ;;  %v1423_v29 = vmul.f32 0.7978846, %v1407_v14  ;;  %v1425_v32 = vmul.f32 0.7978846, %v1409_v22 }
 0x9b2   :  { %v12208_v37 = vpop.eup %12207  ;;  %v1461_v38 = vmul.f32 0.5, %v1445_v24  ;;  %12219 = vtanh.f32 %v1420_v60  ;;  %v1376_v36 = vmul.f32 %v1360_v16, %v13290_v52  ;;  %v1362_v35 = vmul.f32 %v13294_v63, %v13294_v63 }
 0x9b3   :  { %v12210_v39 = vpop.eup %12209  ;;  %v1475_v56 = vmul.f32 %v1459_v27, %v13197_v0  ;;  %v1447_v57 = vadd.f32 1.0, %v12208_v37  ;;  %12221 = vtanh.f32 %v1422_v58  ;;  %v1444_v42 = vadd.f32 1.0, %v12204_v23 }
 0x9b4   :  { %v12212_v44 = vpop.eup %12211  ;;  %v1477_v45 = vmul.f32 %v1461_v38, %v13200_v1  ;;  %v1449_v15 = vadd.f32 1.0, %v12210_v39  ;;  %12223 = vtanh.f32 %v1423_v29  ;;  %v1392_v49 = vmul.f32 0.044715, %v1376_v36 }
 0x9b5   :  { %v12214_v50 = vpop.eup %12213  ;;  %v1463_v51 = vmul.f32 0.5, %v1447_v57  ;;  %12225 = vtanh.f32 %v1425_v32  ;;  %v1378_v19 = vmul.f32 %v1362_v35, %v13294_v63  ;;  %v1448_v13 = vadd.f32 1.0, %v12212_v44 }
 0x9b6   :  { %v1465_v18 = vmul.f32 0.5, %v1449_v15  ;;  %v1408_v61 = vadd.f32 %v1392_v49, %v13290_v52  ;;  %v1460_v3 = vmul.f32 0.5, %v1444_v42  ;;  %v1446_v0 = vadd.f32 1.0, %v12206_v26 }
 0x9b7   :  { %v1479_v5 = vmul.f32 %v1463_v51, %v13213_v62  ;;  %v1394_v9 = vmul.f32 0.044715, %v1378_v19  ;;  %v1464_v10 = vmul.f32 0.5, %v1448_v13  ;;  %v1450_v16 = vadd.f32 1.0, %v12214_v50 }
 0x9b8   :  { %v1481_v1 = vmul.f32 %v1465_v18, %v13216_v12  ;;  %v1424_v17 = vmul.f32 0.7978846, %v1408_v61  ;;  %v1476_v21 = vmul.f32 %v1460_v3, %v13203_v6  ;;  %v1462_v59 = vmul.f32 0.5, %v1446_v0 }
 0x9b9   :  { %v1491_v14 = vpack.c.bf16 %v1479_v5, %v1475_v56  ;;  %v1410_v22 = vadd.f32 %v1394_v9, %v13294_v63  ;;  %v1480_v23 = vmul.f32 %v1464_v10, %v13223_v2  ;;  %v1466_v24 = vmul.f32 0.5, %v1450_v16 }
 0x9ba   :  { %v12216_v60 = vpop.eup %12215  ;;  %v1493_v58 = vpack.c.bf16 %v1481_v1, %v1477_v45  ;;  %12227 = vtanh.f32 %v1424_v17  ;;  %v1478_v62 = vmul.f32 %v1462_v59, %v13206_v7 }
 0x9bb   :  { %v12218_v26 = vpop.eup %12217  ;;  %v1426_v27 = vmul.f32 0.7978846, %v1410_v22  ;;  %v1492_v29 = vpack.c.bf16 %v1480_v23, %v1476_v21  ;;  %v1482_v12 = vmul.f32 %v1466_v24, %v13226_v4  ;;  %v1451_v32 = vadd.f32 1.0, %v12216_v60 }
 0x9bc   :  { %v12220_v37 = vpop.eup %12219  ;;  %v1453_v6 = vadd.f32 1.0, %v12218_v26  ;;  %v13326_v21 = vsub.s32 5, %v13081_v8 }
 0x9bd   :  { %v12222_v38 = vpop.eup %12221  ;;  %12229 = vtanh.f32 %v1426_v27  ;;  %1791 = vmatprep.mubr.bf16.mxu0 %v1492_v29  ;;  %v1494_v36 = vpack.c.bf16 %v1482_v12, %v1478_v62  ;;  %v1467_v56 = vmul.f32 0.5, %v1451_v32  ;;  %v1452_v42 = vadd.f32 1.0, %v12220_v37 }
 0x9be   :  { %v12224_v35 = vpop.eup %12223  ;;  %1792 = vmatmul.mubr.bf16.vlgmr.msra.gmra.mrb[20].mxu0 %v1491_v14  ;;  %v1469_v57 = vmul.f32 0.5, %v1453_v6  ;;  %v1454_v50 = vadd.f32 1.0, %v12222_v38 }
 0x9bf   :  { %v12226_v2 = vpop.eup %12225  ;;  %1840 = vmatprep.mubr.bf16.mxu1 %v1494_v36  ;;  %v1455_v39 = vadd.f32 1.0, %v12224_v35  ;;  %v1483_v4 = vmul.f32 %v1467_v56, %v13253_v25  ;;  %v1468_v18 = vmul.f32 0.5, %v1452_v42 }
 0x9c0   :  { %1841 = vmatmul.mubr.bf16.vlgmr.msra.gmra.mrb[32].mxu1 %v1493_v58  ;;  %v1457_v7 = vadd.f32 1.0, %v12226_v2  ;;  %v1485_v51 = vmul.f32 %v1469_v57, %v13256_v28  ;;  %v1470_v10 = vmul.f32 0.5, %v1454_v50 }
 0x9c1   :  { %v1471_v44 = vmul.f32 0.5, %v1455_v39  ;;  %v1484_v16 = vmul.f32 %v1468_v18, %v13261_v30  ;;  %v12559_v30 = vld [vmem:[#allocation17] sm:$0x3f] }
 0x9c2   :  { %v1473_v45 = vmul.f32 0.5, %v1457_v7  ;;  %v1486_v17 = vmul.f32 %v1470_v10, %v13264_v31  ;;  %v11572_v18 = vld [vmem:[#allocation8 + $0xdc] ss:$12 sps:$4 sm:$0xff]  }
 0x9c3   :  { %v1487_v15 = vmul.f32 %v1471_v44, %v13269_v33 }
 0x9c4   :  { %v12228_v49 = vpop.eup %12227  ;;  %v1489_v19 = vmul.f32 %v1473_v45, %v13272_v34 }
 0x9c5   :  { %v1456_v13 = vadd.f32 1.0, %v12228_v49  ;;  %v1495_v61 = vpack.c.bf16 %v1487_v15, %v1483_v4 }
 0x9c6   :  { %v1497_v3 = vpack.c.bf16 %v1489_v19, %v1485_v51  ;;  %v11567_v19 = vld [vmem:[#allocation8 + $0xc0] ss:$12 sps:$4 sm:$0xff]  }
 0x9c7   :  { %v12230_v0 = vpop.eup %12229  ;;  %v1472_v5 = vmul.f32 0.5, %v1456_v13  ;;  %v11569_v13 = vld [vmem:[#allocation8 + $0xc4] ss:$12 sps:$4 sm:$0xff]  }
 0x9c8   :  { %v1458_v9 = vadd.f32 1.0, %v12230_v0  ;;  %2104 = vmatprep.subr.bf16.mxu0 %v11569_v13 }
 0x9c9   :  { %v1488_v25 = vmul.f32 %v1472_v5, %v13290_v52  ;;  %v1566_v52 = vrot.slane %v12559_v30, %v13326_v21  ;;  %2105 = vmatpush1.bf16.msra.mxu0 %v11567_v19 }
 0x9ca   :  { %v1474_v1 = vmul.f32 0.5, %v1458_v9  ;;  %2106 = vmatprep.subr.bf16.mxu0 %v11572_v18 }
 0x9cb   :  { %v1496_v33 = vpack.c.bf16 %v1488_v25, %v1484_v16 }
 0x9cc   :  { %v1490_v28 = vmul.f32 %v1474_v1, %v13294_v63 }
 0x9cd   :  { %1799 = vmatprep.mubr.bf16.mxu0 %v1496_v33 }
 0x9ce   :  { %v1498_v34 = vpack.c.bf16 %v1490_v28, %v1486_v17  ;;  %1800 = vmatmul.mubr.bf16.gmra.mrb[24].mxu0 %v1495_v61  ;;  %v11570_v61 = vld [vmem:[#allocation8 + $0xd8] ss:$12 sps:$4 sm:$0xff]  }
 0x9cf   :  { %2136 = vmatprep.mubr.bf16.mxu0 %v12839_v55  ;;  %2107 = vmatpush1.bf16.msra.mxu0 %v11570_v61 }
 0x9d0   :  { %1848 = vmatprep.mubr.bf16.mxu1 %v1498_v34 }
 0x9d1   :  { %1849 = vmatmul.mubr.bf16.gmra.mrb[36].mxu1 %v1497_v3 }
 0xa91   :  { %v10565_v59 = vpop.f32.mrb[20].mxu0 }
 0xa92   :  { %v10566_v14 = vpop.f32.mrb[21].mxu0 }
 0xa93   :  { %v10593_v22 = vpop.f32.mrb[32].mxu1  ;;  %v10567_v23 = vadd.f32 %v10566_v14, %v10565_v59  ;;  %v10568_v31 = vpop.f32.mrb[22].mxu0  ;;  %v11576_v14 = vld [vmem:[#allocation8 + $0xc8] ss:$12 sps:$4 sm:$0xff]  }
 0xa94   :  { %v10594_v24 = vpop.f32.mrb[33].mxu1  ;;  %v10569_v63 = vpop.f32.mrb[23].mxu0  ;;  %11101 = vmatprep.subr.bf16.mxu1 %v11576_v14 }
 0xa95   :  { %v1794_v60 = vadd.f32 %v10567_v23, %v1566_v52  ;;  %v10595_v58 = vadd.f32 %v10594_v24, %v10593_v22  ;;  %v10596_v62 = vpop.f32.mrb[34].mxu1  ;;  %v10570_v26 = vadd.f32 %v10569_v63, %v10568_v31  ;;  %v11573_v22 = vld [vmem:[#allocation8 + $0xf0] ss:$12 sps:$4 sm:$0xff]   ;;  %11102 = vmatpush3.bf16.msra.mxu1 %v11576_v14  ;;  %v11579_v23 = vld [vmem:[#allocation8 + $0x10c] ss:$12 sps:$4 sm:$0xff]  }
 0xa96   :  { %v10597_v27 = vpop.f32.mrb[35].mxu1  ;;  %v11580_v31 = vld [vmem:[#allocation8 + $0xe0] ss:$12 sps:$4 sm:$0xff]   ;;  %v11577_v24 = vld [vmem:[#allocation8 + $0x108] ss:$12 sps:$4 sm:$0xff]  }
 0xa97   :  { %v1843_v29 = vadd.f32 %v10595_v58, %v1794_v60  ;;  %v1797_v12 = vadd.f32 %v10570_v26, %v1566_v52  ;;  %v10598_v32 = vadd.f32 %v10597_v27, %v10596_v62  ;;  %11103 = vmatprep.subr.bf16.mxu1 %v11580_v31  ;;  %v11583_v63 = vld [vmem:[#allocation8 + $0x124] ss:$12 sps:$4 sm:$0xff]   ;;  %v11581_v58 = vld [vmem:[#allocation8 + $0x120] ss:$12 sps:$4 sm:$0xff]   ;;  %v11587_v62 = vld [vmem:[#allocation8 + $0x13c] ss:$12 sps:$4 sm:$0xff]  }
 0xa98   :  { %v11584_v60 = vld [vmem:[#allocation8 + $0xf8] ss:$12 sps:$4 sm:$0xff]   ;;  %v11588_v26 = vld [vmem:[#allocation8 + $0x110] ss:$12 sps:$4 sm:$0xff]  }
 0xa99   :  { %v1846_v8 = vadd.f32 %v10598_v32, %v1797_v12  ;;  %v13330_v37 = vadd.f32 %v1843_v29, %v13133_v43  ;;  %11104 = vmatpush3.bf16.msra.mxu1 %v11580_v31  ;;  %v11585_v27 = vld [vmem:[#allocation8 + $0x138] ss:$12 sps:$4 sm:$0xff]   ;;  %v11591_v29 = vld [vmem:[#allocation8 + $0x154] ss:$12 sps:$4 sm:$0xff]   ;;  %v11589_v32 = vld [vmem:[#allocation8 + $0x150] ss:$12 sps:$4 sm:$0xff]  }
 0xa9a   :  { %11105 = vmatprep.subr.bf16.mxu1 %v11584_v60  ;;  %v11592_v12 = vld [vmem:[#allocation8 + $0x128] ss:$12 sps:$4 sm:$0xff]  }
 0xa9b   :  { %1863 = vadd.xlane.f32.xlu0 %v13330_v37  ;;  %v13334_v6 = vadd.f32 %v1846_v8, %v13136_v46  ;;  %v11595_v8 = vld [vmem:[#allocation8 + $0x16c] ss:$12 sps:$4 sm:$0xff]  }
 0xa9d   :  { %1865 = vadd.xlane.f32.xlu1 %v13334_v6  ;;  %11106 = vmatpush3.bf16.msra.mxu1 %v11584_v60 }
 0xa9e   :  { %11107 = vmatprep.subr.bf16.mxu1 %v11588_v26 }
 0xaa1   :  { %v10571_v38 = vpop.f32.mrb[24].mxu0  ;;  %11108 = vmatpush3.bf16.msra.mxu1 %v11588_v26 }
 0xaa2   :  { %v10572_v36 = vpop.f32.mrb[25].mxu0  ;;  %11109 = vmatprep.subr.bf16.mxu1 %v11592_v12 }
 0xaa3   :  { %v10573_v35 = vadd.f32 %v10572_v36, %v10571_v38  ;;  %v10574_v2 = vpop.f32.mrb[26].mxu0  ;;  %v11596_v38 = vld [vmem:[#allocation8 + $0x140] ss:$12 sps:$4 sm:$0xff]   ;;  %v11593_v36 = vld [vmem:[#allocation8 + $0x168] ss:$12 sps:$4 sm:$0xff]  }
 0xaa4   :  { %v10599_v39 = vpop.f32.mrb[36].mxu1  ;;  %v10575_v56 = vpop.f32.mrb[27].mxu0 }
 0xaa5   :  { %v1802_v7 = vadd.f32 %v10573_v35, %v1566_v52  ;;  %v10600_v57 = vpop.f32.mrb[37].mxu1  ;;  %v10576_v42 = vadd.f32 %v10575_v56, %v10574_v2  ;;  %11110 = vmatpush3.bf16.msra.mxu1 %v11592_v12  ;;  %v11597_v35 = vld [vmem:[#allocation8 + $0x158] ss:$12 sps:$4 sm:$0xff]   ;;  %v11598_v2 = vld [vmem:[#allocation8 + $0x170] ss:$12 sps:$4 sm:$0xff]  }
 0xaa6   :  { %v10601_v44 = vadd.f32 %v10600_v57, %v10599_v39  ;;  %v10602_v45 = vpop.f32.mrb[38].mxu1  ;;  %11111 = vmatprep.subr.bf16.mxu1 %v11596_v38 }
 0xaa7   :  { %v1805_v43 = vadd.f32 %v10576_v42, %v1566_v52  ;;  %v10603_v4 = vpop.f32.mrb[39].mxu1  ;;  %v11575_v52 = vld [vmem:[#allocation8 + $0xf4] ss:$12 sps:$4 sm:$0xff]  }
 0xaa8   :  { %v1851_v15 = vadd.f32 %v10601_v44, %v1802_v7  ;;  %v10604_v49 = vadd.f32 %v10603_v4, %v10602_v45  ;;  %2108 = vmatprep.subr.bf16.mxu0 %v11575_v52  ;;  %v13367_v45 = vld [vmem:[#allocation17 + $0x8] sm:$0x3f] }
 0xaa9   :  { %2109 = vmatpush1.bf16.msra.mxu0 %v11573_v22  ;;  %11112 = vmatpush3.bf16.msra.mxu1 %v11596_v38  ;;  %v1918_v61 = vrot.slane %v13367_v45, %v13092_v20 }
 0xaaa   :  { %v1854_v50 = vadd.f32 %v10604_v49, %v1805_v43  ;;  %v13338_v46 = vadd.f32 %v1851_v15, %v13140_v47  ;;  %2110 = vmatprep.subr.bf16.mxu0 %v11579_v23  ;;  %11113 = vmatprep.subr.bf16.mxu1 %v11597_v35  ;;  %v1910_v43 = vrot.slane %v13367_v45, %v13084_v11  ;;  %v1959_v23 = vld [vmem:[#allocation10 + $0x1] ss:$8 sm:$0x7] }
 0xaab   :  { %v1964_v31 = vrot.slane %v1959_v23, %v13084_v11 }
 0xaac   :  { %1867 = vadd.xlane.f32.xlu0 %v13338_v46  ;;  %v13342_v51 = vadd.f32 %v1854_v50, %v13144_v48 }
 0xaad   :  { %2111 = vmatpush1.bf16.msra.mxu0 %v11577_v24  ;;  %11114 = vmatpush3.bf16.msra.mxu1 %v11597_v35  ;;  %v1968_v24 = vrot.slane %v1959_v23, %v13092_v20 }
 0xaae   :  { %1869 = vadd.xlane.f32.xlu1 %v13342_v51  ;;  %2112 = vmatprep.subr.bf16.mxu0 %v11583_v63 }
 0xaaf   :  { %11115 = vmatprep.subr.bf16.mxu1 %v11598_v2 }
 0xab1   :  { %2113 = vmatpush1.bf16.msra.mxu0 %v11581_v58  ;;  %11116 = vmatpush3.bf16.msra.mxu1 %v11598_v2 }
 0xab2   :  { %2114 = vmatprep.subr.bf16.mxu0 %v11587_v62  ;;  %11139 = vmatprep.subr.bf16.mxu1 %v12840_v40 }
 0xab5   :  { %2115 = vmatpush1.bf16.msra.mxu0 %v11585_v27 }
 0xab6   :  { %2116 = vmatprep.subr.bf16.mxu0 %v11591_v29 }
 0xab9   :  { %2117 = vmatpush1.bf16.msra.mxu0 %v11589_v32  ;;  %v1972_v32 = vrot.slane %v1959_v23, %v13108_v41 }
 0xaba   :  { %2118 = vmatprep.subr.bf16.mxu0 %v11595_v8 }
 0xabd   :  { %2119 = vmatpush1.bf16.msra.mxu0 %v11593_v36 }
 0xabe   :  { %11121 = vmatprep.subr.bf16.mxu0 %v12840_v40 }
 0xb28   :  { %v1864_v3 = vpop.xlane.xlu0 %1863 }
 0xb29   :  { %v1871_v0 = vmul.f32 0.0078125, %v1864_v3 }
 0xb2a   :  { %v1866_v5 = vpop.xlane.xlu1 %1865 }
 0xb2b   :  { %v1872_v47 = vmul.f32 0.0078125, %v1866_v5  ;;  %v13346_v9 = vsub.f32 %v13330_v37, %v1871_v0 }
 0xb2d   :  { %v1879_v48 = vmul.f32 %v13346_v9, %v13346_v9  ;;  %v13351_v10 = vsub.f32 %v13334_v6, %v1872_v47 }
 0xb2f   :  { %1883 = vadd.xlane.f32.xlu0 %v1879_v48  ;;  %v1880_v16 = vmul.f32 %v13351_v10, %v13351_v10 }
 0xb31   :  { %1885 = vadd.xlane.f32.xlu1 %v1880_v16 }
 0xb39   :  { %v1868_v25 = vpop.xlane.xlu0 %1867 }
 0xb3a   :  { %v1873_v1 = vmul.f32 0.0078125, %v1868_v25 }
 0xb3b   :  { %v1870_v33 = vpop.xlane.xlu1 %1869 }
 0xb3c   :  { %v1874_v17 = vmul.f32 0.0078125, %v1870_v33  ;;  %v13356_v28 = vsub.f32 %v13338_v46, %v1873_v1 }
 0xb3e   :  { %v1881_v34 = vmul.f32 %v13356_v28, %v13356_v28  ;;  %v13361_v59 = vsub.f32 %v13342_v51, %v1874_v17 }
 0xb40   :  { %1887 = vadd.xlane.f32.xlu0 %v1881_v34  ;;  %v1882_v30 = vmul.f32 %v13361_v59, %v13361_v59 }
 0xb42   :  { %1889 = vadd.xlane.f32.xlu1 %v1882_v30 }
 0xbbc   :  { %v1884_v39 = vpop.xlane.xlu0 %1883 }
 0xbbd   :  { %v1891_v56 = vmul.f32 0.0078125, %v1884_v39 }
 0xbbe   :  { %v1886_v7 = vpop.xlane.xlu1 %1885 }
 0xbbf   :  { %v1895_v57 = vadd.f32 1e-05, %v1891_v56  ;;  %v1892_v42 = vmul.f32 0.0078125, %v1886_v7 }
 0xbc1   :  { %12231 = vrsqrt.f32 %v1895_v57  ;;  %v1896_v44 = vadd.f32 1e-05, %v1892_v42 }
 0xbc3   :  { %12233 = vrsqrt.f32 %v1896_v44 }
 0xbcb   :  { %v12232_v4 = vpop.eup %12231 }
 0xbcc   :  { %v1903_v15 = vmul.f32 %v12232_v4, %v13346_v9 }
 0xbcd   :  { %v12234_v49 = vpop.eup %12233  ;;  %v1888_v50 = vpop.xlane.xlu0 %1887 }
 0xbce   :  { %v1911_v19 = vmul.f32 %v1910_v43, %v1903_v15  ;;  %v1904_v13 = vmul.f32 %v12234_v49, %v13351_v10  ;;  %v1893_v18 = vmul.f32 0.0078125, %v1888_v50 }
 0xbcf   :  { %v1890_v3 = vpop.xlane.xlu1 %1889 }
 0xbd0   :  { %v1912_v0 = vmul.f32 %v1910_v43, %v1904_v13  ;;  %v1897_v5 = vadd.f32 1e-05, %v1893_v18  ;;  %v1894_v47 = vmul.f32 0.0078125, %v1890_v3  ;;  %v1919_v16 = vadd.f32 %v1918_v61, %v1911_v19 }
 0xbd2   :  { %12235 = vrsqrt.f32 %v1897_v5  ;;  %v1898_v48 = vadd.f32 1e-05, %v1894_v47  ;;  %v1920_v25 = vadd.f32 %v1918_v61, %v1912_v0 }
 0xbd4   :  { %12237 = vrsqrt.f32 %v1898_v48  ;;  %v1923_v1 = vpack.c.bf16 %v1920_v25, %v1919_v16 }
 0xbd6   :  { %2137 = vmatmul.mubr.bf16.vlgmr.msra.gmra.mrb[28].mxu0 %v1923_v1  ;;  %11117 = vmatprep.mubr.bf16.mxu1 %v1923_v1 }
 0xbd7   :  { %2146 = vmatprep.mubr.bf16.mxu0 %v12839_v55 }
 0xbdc   :  { %v12236_v9 = vpop.eup %12235 }
 0xbdd   :  { %v1905_v10 = vmul.f32 %v12236_v9, %v13356_v28 }
 0xbde   :  { %v12238_v33 = vpop.eup %12237 }
 0xbdf   :  { %v1906_v17 = vmul.f32 %v12238_v33, %v13361_v59  ;;  %v1913_v34 = vmul.f32 %v1910_v43, %v1905_v10 }
 0xbe1   :  { %v1914_v30 = vmul.f32 %v1910_v43, %v1906_v17  ;;  %v1921_v52 = vadd.f32 %v1918_v61, %v1913_v34 }
 0xbe3   :  { %v1922_v14 = vadd.f32 %v1918_v61, %v1914_v30 }
 0xbe5   :  { %v1924_v22 = vpack.c.bf16 %v1922_v14, %v1921_v52 }
 0xbe7   :  { %2147 = vmatmul.mubr.bf16.gmra.mrb[32].mxu0 %v1924_v22  ;;  %11118 = vmatmul.mubr.bf16.vlgmr.msra.gmra.mrb[40].mxu1 %v1924_v22 }
 0xbe8   :  { %11123 = vmatprep.mubr.msk.bf16.mxu0 %vm12841_vm1, %v12840_v40  ;;  %11141 = vmatprep.mubr.msk.bf16.mxu1 %vm12841_vm1, %v12840_v40 }
 0xca9   :  { %v2138_v28 = vpop.f32.mrb[28].mxu0 }
 0xcaa   :  { %v2140_v59 = vpop.f32.mrb[29].mxu0  ;;  %v2139_v60 = vadd.f32 %v2138_v28, %v1964_v31 }
 0xcab   :  { %v2142_v63 = vpop.f32.mrb[30].mxu0  ;;  %v2141_v26 = vadd.f32 %v2140_v59, %v1968_v24 }
 0xcac   :  { %v2143_v58 = vadd.f32 %v2142_v63, %v1964_v31  ;;  %v2144_v62 = vpop.f32.mrb[31].mxu0 }
 0xcad   :  { %v2145_v27 = vadd.f32 %v2144_v62, %v1968_v24 }
 0xcae   :  { %v2206_v29 = vpack.c.bf16 %v2143_v58, %v2139_v60 }
 0xcaf   :  { %v2208_v12 = vpack.c.bf16 %v2145_v27, %v2141_v26 }
 0xcb1   :  { %11122 = vmatpush3.bf16.xpose.msra.mxu0 %v2208_v12 }
 0xcb2   :  { %11127 = vmatprep.subr.bf16.mxu0 %v12840_v40 }
 0xcb8   :  { %11124 = vmatmul.mubr.bf16.vlgmr.msra.gmra.mrb[36].mxu0 %v2206_v29 }
 0xcb9   :  { %11129 = vmatprep.mubr.msk.bf16.mxu0 %vm12841_vm1, %v12840_v40 }
 0xcba   :  { %v2148_v8 = vpop.f32.mrb[32].mxu0  ;;  %v11119_v38 = vpop.f32.mrb[40].mxu1 }
 0xcbb   :  { %v2150_v36 = vpop.f32.mrb[33].mxu0  ;;  %v2191_v35 = vpop.f32.mrb[41].mxu1  ;;  %v2149_v56 = vadd.f32 %v2148_v8, %v1964_v31  ;;  %v2200_v7 = vadd.f32 %v11119_v38, %v1972_v32 }
 0xcbc   :  { %v2152_v2 = vpop.f32.mrb[34].mxu0  ;;  %v11120_v39 = vpop.f32.mrb[42].mxu1  ;;  %v2151_v4 = vadd.f32 %v2150_v36, %v1968_v24  ;;  %v2192_v15 = vadd.f32 %v2191_v35, %v1972_v32 }
 0xcbd   :  { %v2153_v57 = vadd.f32 %v2152_v2, %v1964_v31  ;;  %v2203_v42 = vadd.f32 %v11120_v39, %v1972_v32  ;;  %v2154_v44 = vpop.f32.mrb[35].mxu0  ;;  %v2194_v43 = vpop.f32.mrb[43].mxu1  ;;  %v11599_v39 = vld [vmem:[#allocation11 + $0x40] sm:$0xff]  }
 0xcbe   :  { %v2155_v49 = vadd.f32 %v2154_v44, %v1968_v24  ;;  %v2195_v50 = vadd.f32 %v2194_v43, %v1972_v32 }
 0xcbf   :  { %v2207_v19 = vpack.c.bf16 %v2153_v57, %v2149_v56  ;;  %v2343_v13 = vpack.c.bf16 %v2203_v42, %v2200_v7 }
 0xcc0   :  { %v2209_v18 = vpack.c.bf16 %v2155_v49, %v2151_v4  ;;  %v2342_v61 = vpack.c.bf16 %v2195_v50, %v2192_v15  ;;  %v11600_v15 = vld [vmem:[#allocation11 + $0x48] sm:$0xff]  }
 0xcc1   :  { %11140 = vmatpush3.bf16.msra.mxu1 %v2343_v13  ;;  %v11602_v13 = vld [vmem:[#allocation11 + $0x58] sm:$0xff]  }
 0xcc2   :  { %11128 = vmatpush3.bf16.xpose.msra.mxu0 %v2209_v18 }
 0xcc3   :  { %11133 = vmatprep.subr.bf16.mxu0 %v12840_v40 }
 0xcc9   :  { %11130 = vmatmul.mubr.bf16.vlgmr.msra.gmra.mrb[40].mxu0 %v2207_v19  ;;  %v11601_v19 = vld [vmem:[#allocation11 + $0x50] sm:$0xff]  }
 0xcca   :  { %11134 = vmatpush3.bf16.msra.mxu0 %v2342_v61  ;;  %11135 = vmatprep.mubr.msk.bf16.mxu0 %vm12841_vm1, %v12840_v40  ;;  %v11603_v61 = vld [vmem:[#allocation11 + $0x60] sm:$0xff]  }
 0xccb   :  { %11145 = vmatprep.subr.bf16.mxu0 %v11599_v39 }
 0xd8b   :  { %v2244_v3 = vpop.f32.mrb[36].mxu0 }
 0xd8c   :  { %v2292_v0 = vmul.f32 0.088388346, %v2244_v3  ;;  %v11125_v5 = vpop.f32.mrb[37].mxu0 }
 0xd8d   :  { %v2247_v47 = vpop.f32.mrb[38].mxu0 }
 0xd8e   :  { %v2293_v48 = vmul.f32 0.088388346, %v2247_v47  ;;  %v11126_v16 = vpop.f32.mrb[39].mxu0  ;;  %v2296_v25 = vsel %vm705_vm2, %v2292_v0, -inf }
 0xd8f   :  { %2297 = vmax.xlane.f32.xlu0 %v2296_v25  ;;  %v11605_v16 = vld [vmem:[#allocation11 + $0x70] sm:$0xff]   ;;  %v11606_v25 = vld [vmem:[#allocation11 + $0x78] sm:$0xff]  }
 0xd90   :  { %v2299_v1 = vsel %vm705_vm2, %v2293_v48, -inf }
 0xd91   :  { %2300 = vmax.xlane.f32.xlu1 %v2299_v1 }
 0xd9c   :  { %v2285_v9 = vpop.f32.mrb[40].mxu0 }
 0xd9d   :  { %v2294_v10 = vmul.f32 0.088388346, %v2285_v9  ;;  %v11131_v33 = vpop.f32.mrb[41].mxu0 }
 0xd9e   :  { %v2288_v17 = vpop.f32.mrb[42].mxu0 }
 0xd9f   :  { %v2295_v34 = vmul.f32 0.088388346, %v2288_v17  ;;  %v11132_v30 = vpop.f32.mrb[43].mxu0  ;;  %v2302_v52 = vsel %vm705_vm2, %v2294_v10, -inf }
 0xda0   :  { %2303 = vmax.xlane.f32.xlu0 %v2302_v52 }
 0xda1   :  { %v2305_v14 = vsel %vm705_vm2, %v2295_v34, -inf }
 0xda2   :  { %2306 = vmax.xlane.f32.xlu1 %v2305_v14 }
 0xe1c   :  { %v2298_v22 = vpop.xlane.xlu0 %2297 }
 0xe1d   :  { %v2308_v23 = vsub.f32 %v2292_v0, %v2298_v22 }
 0xe1e   :  { %v2301_v31 = vpop.xlane.xlu1 %2300 }
 0xe1f   :  { %v2312_v28 = vmul.f32 1.442695, %v2308_v23  ;;  %v2309_v24 = vsub.f32 %v2293_v48, %v2301_v31  ;;  %v11604_v48 = vld [vmem:[#allocation11 + $0x68] sm:$0xff]   ;;  %v2454_v23 = vrot.slane %v13367_v45, %v13108_v41 }
 0xe21   :  { %12239 = vpow2.f32 %v2312_v28  ;;  %v2314_v59 = vmul.f32 1.442695, %v2309_v24 }
 0xe23   :  { %12241 = vpow2.f32 %v2314_v59 }
 0xe2b   :  { %v12240_v63 = vpop.eup %12239 }
 0xe2c   :  { %v2320_v60 = vsel %vm705_vm2, %v12240_v63, 0.0 }
 0xe2d   :  { %v12242_v58 = vpop.eup %12241  ;;  %v2304_v62 = vpop.xlane.xlu0 %2303  ;;  %2321 = vadd.xlane.f32.xlu0 %v2320_v60 }
 0xe2e   :  { %v2310_v26 = vsub.f32 %v2294_v10, %v2304_v62  ;;  %v2323_v27 = vsel %vm705_vm2, %v12242_v58, 0.0 }
 0xe2f   :  { %v2307_v29 = vpop.xlane.xlu1 %2306  ;;  %2324 = vadd.xlane.f32.xlu1 %v2323_v27 }
 0xe30   :  { %v2316_v12 = vmul.f32 1.442695, %v2310_v26  ;;  %v2311_v32 = vsub.f32 %v2295_v34, %v2307_v29 }
 0xe32   :  { %12243 = vpow2.f32 %v2316_v12  ;;  %v2318_v8 = vmul.f32 1.442695, %v2311_v32  ;;  %v11609_v32 = vld [vmem:[#allocation13 + $0x104] ss:$16 sps:$4 sm:$0xff]  }
 0xe33   :  { %2834 = vmatprep.subr.bf16.mxu1 %v11609_v32 }
 0xe34   :  { %12245 = vpow2.f32 %v2318_v8  ;;  %v11610_v8 = vld [vmem:[#allocation13 + $0x108] ss:$16 sps:$4 sm:$0xff]  }
 0xe3c   :  { %v12244_v38 = vpop.eup %12243 }
 0xe3d   :  { %v2326_v36 = vsel %vm705_vm2, %v12244_v38, 0.0 }
 0xe3e   :  { %v12246_v35 = vpop.eup %12245  ;;  %2327 = vadd.xlane.f32.xlu0 %v2326_v36  ;;  %v11618_v36 = vld [vmem:[#allocation13 + $0x12c] ss:$16 sps:$4 sm:$0xff]  }
 0xe3f   :  { %v2329_v2 = vsel %vm705_vm2, %v12246_v35, 0.0 }
 0xe40   :  { %2330 = vadd.xlane.f32.xlu1 %v2329_v2 }
 0xeba   :  { %v2322_v56 = vpop.xlane.xlu0 %2321 }
 0xebb   :  { %12247 = vrcp.f32 %v2322_v56 }
 0xebc   :  { %v2325_v7 = vpop.xlane.xlu1 %2324 }
 0xebd   :  { %12249 = vrcp.f32 %v2325_v7 }
 0xec5   :  { %v12248_v57 = vpop.eup %12247 }
 0xec6   :  { %v2336_v44 = vmul.f32 %v12248_v57, %v12240_v63 }
 0xec7   :  { %v12250_v42 = vpop.eup %12249 }
 0xec8   :  { %v2337_v43 = vmul.f32 %v12250_v42, %v12242_v58 }
 0xeca   :  { %v2340_v4 = vpack.c.bf16 %v2337_v43, %v2336_v44 }
 0xecb   :  { %v2328_v49 = vpop.xlane.xlu0 %2327 }
 0xecc   :  { %12251 = vrcp.f32 %v2328_v49  ;;  %11136 = vmatmul.mubr.msk.bf16.vlgmr.msra.gmra.mrb[44].mxu0 %vm705_vm2, %v2340_v4 }
 0xecd   :  { %v2331_v50 = vpop.xlane.xlu1 %2330  ;;  %11146 = vmatpush3.bf16.msra.mxu0 %v11599_v39 }
 0xece   :  { %12253 = vrcp.f32 %v2331_v50  ;;  %11147 = vmatprep.subr.bf16.mxu0 %v11600_v15 }
 0xed1   :  { %11148 = vmatpush3.bf16.msra.mxu0 %v11600_v15 }
 0xed2   :  { %11149 = vmatprep.subr.bf16.mxu0 %v11601_v19 }
 0xed5   :  { %11150 = vmatpush3.bf16.msra.mxu0 %v11601_v19 }
 0xed6   :  { %v12252_v18 = vpop.eup %12251  ;;  %11151 = vmatprep.subr.bf16.mxu0 %v11602_v13 }
 0xed7   :  { %v2338_v0 = vmul.f32 %v12252_v18, %v12244_v38  ;;  %v11612_v38 = vld [vmem:[#allocation13 + $0x10c] ss:$16 sps:$4 sm:$0xff]  }
 0xed8   :  { %v12254_v3 = vpop.eup %12253 }
 0xed9   :  { %v2339_v5 = vmul.f32 %v12254_v3, %v12246_v35  ;;  %11152 = vmatpush3.bf16.msra.mxu0 %v11602_v13  ;;  %v11616_v35 = vld [vmem:[#allocation13 + $0x128] ss:$16 sps:$4 sm:$0xff]   ;;  %v11624_v3 = vld [vmem:[#allocation13 + $0x14c] ss:$16 sps:$4 sm:$0xff]  }
 0xeda   :  { %11153 = vmatprep.subr.bf16.mxu0 %v11603_v61 }
 0xedb   :  { %v2341_v47 = vpack.c.bf16 %v2339_v5, %v2338_v0  ;;  %v11619_v0 = vld [vmem:[#allocation13 + $0x140] ss:$16 sps:$4 sm:$0xff]   ;;  %v11622_v5 = vld [vmem:[#allocation13 + $0x148] ss:$16 sps:$4 sm:$0xff]  }
 0xedd   :  { %11142 = vmatmul.mubr.msk.bf16.vlgmr.msra.gmra.mrb[44].mxu1 %vm705_vm2, %v2341_v47  ;;  %11154 = vmatpush3.bf16.msra.mxu0 %v11603_v61  ;;  %v11621_v61 = vld [vmem:[#allocation13 + $0x144] ss:$16 sps:$4 sm:$0xff]  }
 0xede   :  { %2866 = vmatprep.mubr.bf16.mxu1 %v12839_v55  ;;  %11155 = vmatprep.subr.bf16.mxu0 %v11604_v48  ;;  %v11627_v47 = vld [vmem:[#allocation13 + $0x164] ss:$16 sps:$4 sm:$0xff]  }
 0xee1   :  { %11156 = vmatpush3.bf16.msra.mxu0 %v11604_v48  ;;  %v11630_v48 = vld [vmem:[#allocation13 + $0x16c] ss:$16 sps:$4 sm:$0xff]  }
 0xee2   :  { %11157 = vmatprep.subr.bf16.mxu0 %v11605_v16 }
 0xee5   :  { %11158 = vmatpush3.bf16.msra.mxu0 %v11605_v16  ;;  %v11625_v16 = vld [vmem:[#allocation13 + $0x160] ss:$16 sps:$4 sm:$0xff]  }
 0xee6   :  { %11159 = vmatprep.subr.bf16.mxu0 %v11606_v25 }
 0xee9   :  { %11160 = vmatpush3.bf16.msra.mxu0 %v11606_v25  ;;  %v11628_v25 = vld [vmem:[#allocation13 + $0x168] ss:$16 sps:$4 sm:$0xff]  }
 0xeea   :  { %2887 = vmatprep.subr.bf16.mxu0 %v11612_v38 }
 0xf9f   :  { %v2381_v1 = vpop.f32.mrb[44].mxu0 }
 0xfa0   :  { %v11137_v9 = vpop.f32.mrb[45].mxu0 }
 0xfa1   :  { %v2384_v10 = vpop.f32.mrb[46].mxu0  ;;  %v11636_v9 = vld [vmem:[#allocation13 + $0x18c] ss:$16 sps:$4 sm:$0xff]  }
 0xfa2   :  { %v2432_v33 = vpack.c.bf16 %v2384_v10, %v2381_v1  ;;  %v11138_v17 = vpop.f32.mrb[47].mxu0  ;;  %v11633_v1 = vld [vmem:[#allocation13 + $0x184] ss:$16 sps:$4 sm:$0xff]   ;;  %v11631_v10 = vld [vmem:[#allocation13 + $0x180] ss:$16 sps:$4 sm:$0xff]  }
 0xfa3   :  { %v11639_v17 = vld [vmem:[#allocation13 + $0x1a4] ss:$16 sps:$4 sm:$0xff]  }
 0xfa4   :  { %11161 = vmatprep.mubr.bf16.mxu0 %v2432_v33  ;;  %v11634_v33 = vld [vmem:[#allocation13 + $0x188] ss:$16 sps:$4 sm:$0xff]  }
 0xfb0   :  { %v2425_v34 = vpop.f32.mrb[44].mxu1 }
 0xfb1   :  { %v11143_v30 = vpop.f32.mrb[45].mxu1 }
 0xfb2   :  { %v2428_v52 = vpop.f32.mrb[46].mxu1  ;;  %v11637_v30 = vld [vmem:[#allocation13 + $0x1a0] ss:$16 sps:$4 sm:$0xff]  }
 0xfb3   :  { %v2433_v14 = vpack.c.bf16 %v2428_v52, %v2425_v34  ;;  %v11144_v22 = vpop.f32.mrb[47].mxu1  ;;  %v11642_v34 = vld [vmem:[#allocation13 + $0x1ac] ss:$16 sps:$4 sm:$0xff]   ;;  %v11640_v52 = vld [vmem:[#allocation13 + $0x1a8] ss:$16 sps:$4 sm:$0xff]  }
 0xfb4   :  { %v11648_v22 = vld [vmem:[#allocation13 + $0x1cc] ss:$16 sps:$4 sm:$0xff]  }
 0xfb5   :  { %11162 = vmatmul.mubr.bf16.vlgmr.msra.gmra.mrb[48].mxu0 %v2433_v14  ;;  %v11645_v14 = vld [vmem:[#allocation13 + $0x1c4] ss:$16 sps:$4 sm:$0xff]  }
 0xfb6   :  { %2919 = vmatprep.mubr.bf16.mxu0 %v12839_v55  ;;  %2888 = vmatpush1.bf16.msra.mxu0 %v11610_v8 }
 0xfb7   :  { %2889 = vmatprep.subr.bf16.mxu0 %v11618_v36 }
 0xfba   :  { %2890 = vmatpush1.bf16.msra.mxu0 %v11616_v35 }
 0xfbb   :  { %2891 = vmatprep.subr.bf16.mxu0 %v11624_v3 }
 0xfbe   :  { %2892 = vmatpush1.bf16.msra.mxu0 %v11622_v5 }
 0xfbf   :  { %2893 = vmatprep.subr.bf16.mxu0 %v11630_v48 }
 0xfc2   :  { %2894 = vmatpush1.bf16.msra.mxu0 %v11628_v25  ;;  %v11656_v25 = vld [vmem:[#allocation16 + $0x1c0] sm:$0xff]  }
 0xfc3   :  { %2895 = vmatprep.subr.bf16.mxu0 %v11636_v9  ;;  %v11660_v9 = vld [vmem:[#allocation16 + $0x1c8] sm:$0xff]  }
 0xfc6   :  { %2896 = vmatpush1.bf16.msra.mxu0 %v11634_v33  ;;  %v11662_v33 = vld [vmem:[#allocation16 + $0x188] sm:$0xff]  }
 0xfc7   :  { %2897 = vmatprep.subr.bf16.mxu0 %v11642_v34  ;;  %v11664_v34 = vld [vmem:[#allocation16 + $0x1d0] sm:$0xff]  }
 0xfca   :  { %2898 = vmatpush1.bf16.msra.mxu0 %v11640_v52  ;;  %v11666_v52 = vld [vmem:[#allocation16 + $0x190] sm:$0xff]  }
 0xfcb   :  { %2899 = vmatprep.subr.bf16.mxu0 %v11648_v22  ;;  %v11668_v22 = vld [vmem:[#allocation16 + $0x1d8] sm:$0xff]  }
0x1088   :  { %v11163_v31 = vpop.f32.mrb[48].mxu0 }
0x1089   :  { %v2537_v28 = vpop.f32.mrb[49].mxu0  ;;  %v2546_v60 = vadd.f32 %v11163_v31, %v2454_v23  ;;  %v11646_v31 = vld [vmem:[#allocation13 + $0x1c8] ss:$16 sps:$4 sm:$0xff]  }
0x108a   :  { %v2538_v24 = vadd.f32 %v2537_v28, %v2454_v23  ;;  %v11164_v59 = vpop.f32.mrb[50].mxu0  ;;  %v11651_v28 = vld [vmem:[#allocation13 + $0x1e4] ss:$16 sps:$4 sm:$0xff]   ;;  %2900 = vmatpush1.bf16.msra.mxu0 %v11646_v31  ;;  %v11670_v31 = vld [vmem:[#allocation16 + $0x198] sm:$0xff]  }
0x108b   :  { %v2540_v63 = vpop.f32.mrb[51].mxu0  ;;  %v2549_v26 = vadd.f32 %v11164_v59, %v2454_v23  ;;  %v13413_v29 = vadd.f32 %v2546_v60, %v13338_v46  ;;  %v11613_v46 = vld [vmem:[#allocation13 + $0x120] ss:$16 sps:$4 sm:$0xff]  }
0x108c   :  { %v13406_v58 = vadd.f32 %v2538_v24, %v13330_v37  ;;  %v2541_v62 = vadd.f32 %v2540_v63, %v2454_v23  ;;  %v11607_v37 = vld [vmem:[#allocation13 + $0x100] ss:$16 sps:$4 sm:$0xff]   ;;  %v11654_v24 = vld [vmem:[#allocation13 + $0x1ec] ss:$16 sps:$4 sm:$0xff]   ;;  %v11652_v63 = vld [vmem:[#allocation13 + $0x1e8] ss:$16 sps:$4 sm:$0xff]  }
0x108d   :  { %v13417_v12 = vadd.f32 %v2549_v26, %v13342_v51  ;;  %2835 = vmatpush1.bf16.msra.mxu1 %v11607_v37  ;;  %v11643_v23 = vld [vmem:[#allocation13 + $0x1c0] ss:$16 sps:$4 sm:$0xff]   ;;  %2901 = vmatprep.subr.bf16.mxu0 %v11654_v24 }
0x108e   :  { %v13409_v27 = vadd.f32 %v2541_v62, %v13334_v6  ;;  %2556 = vadd.xlane.f32.xlu0 %v13406_v58  ;;  %v11615_v6 = vld [vmem:[#allocation13 + $0x124] ss:$16 sps:$4 sm:$0xff]   ;;  %v11649_v59 = vld [vmem:[#allocation13 + $0x1e0] ss:$16 sps:$4 sm:$0xff]   ;;  %2902 = vmatpush1.bf16.msra.mxu0 %v11652_v63 }
0x108f   :  { %2836 = vmatprep.subr.bf16.mxu1 %v11615_v6  ;;  %10661 = vmatprep.subr.bf16.mxu0 %v11656_v25  ;;  %v11672_v24 = vld [vmem:[#allocation16 + $0x1e0] sm:$0xff]  }
0x1090   :  { %2558 = vadd.xlane.f32.xlu1 %v13409_v27  ;;  %v11674_v63 = vld [vmem:[#allocation16 + $0x1a0] sm:$0xff]  }
0x1091   :  { %2837 = vmatpush1.bf16.msra.mxu1 %v11613_v46 }
0x1092   :  { %2560 = vadd.xlane.f32.xlu0 %v13413_v29  ;;  %2838 = vmatprep.subr.bf16.mxu1 %v11621_v61 }
0x1094   :  { %2562 = vadd.xlane.f32.xlu1 %v13417_v12 }
0x1095   :  { %2839 = vmatpush1.bf16.msra.mxu1 %v11619_v0 }
0x1096   :  { %2840 = vmatprep.subr.bf16.mxu1 %v11627_v47 }
0x1099   :  { %2841 = vmatpush1.bf16.msra.mxu1 %v11625_v16  ;;  %v11655_v16 = vld [vmem:[#allocation16 + $0x140] sm:$0xff]  }
0x109a   :  { %2842 = vmatprep.subr.bf16.mxu1 %v11633_v1  ;;  %v11657_v1 = vld [vmem:[#allocation16 + $0x100] sm:$0xff]  }
0x109d   :  { %2843 = vmatpush1.bf16.msra.mxu1 %v11631_v10  ;;  %v11661_v10 = vld [vmem:[#allocation16 + $0x108] sm:$0xff]  }
0x109e   :  { %2844 = vmatprep.subr.bf16.mxu1 %v11639_v17  ;;  %v11663_v17 = vld [vmem:[#allocation16 + $0x150] sm:$0xff]  }
0x10a1   :  { %2845 = vmatpush1.bf16.msra.mxu1 %v11637_v30  ;;  %v11665_v30 = vld [vmem:[#allocation16 + $0x110] sm:$0xff]  }
0x10a2   :  { %2846 = vmatprep.subr.bf16.mxu1 %v11645_v14  ;;  %v11667_v14 = vld [vmem:[#allocation16 + $0x158] sm:$0xff]  }
0x10a5   :  { %2847 = vmatpush1.bf16.msra.mxu1 %v11643_v23  ;;  %v11669_v23 = vld [vmem:[#allocation16 + $0x118] sm:$0xff]  }
0x10a6   :  { %2848 = vmatprep.subr.bf16.mxu1 %v11651_v28  ;;  %v11671_v28 = vld [vmem:[#allocation16 + $0x160] sm:$0xff]  }
0x10a9   :  { %2849 = vmatpush1.bf16.msra.mxu1 %v11649_v59  ;;  %v11673_v59 = vld [vmem:[#allocation16 + $0x120] sm:$0xff]  }
0x10aa   :  { %10633 = vmatprep.subr.bf16.mxu1 %v11655_v16 }
0x111b   :  { %v2557_v51 = vpop.xlane.xlu0 %2556 }
0x111c   :  { %v2564_v2 = vmul.f32 0.0078125, %v2557_v51 }
0x111d   :  { %v2559_v39 = vpop.xlane.xlu1 %2558 }
0x111e   :  { %v2565_v56 = vmul.f32 0.0078125, %v2559_v39  ;;  %v13422_v7 = vsub.f32 %v13406_v58, %v2564_v2  ;;  %v2603_v2 = vrot.slane %v13367_v45, %v13169_v53 }
0x111f   :  { %v2561_v57 = vpop.xlane.xlu0 %2560 }
0x1120   :  { %v2566_v42 = vmul.f32 0.0078125, %v2561_v57  ;;  %v2572_v44 = vmul.f32 %v13422_v7, %v13422_v7  ;;  %v13427_v43 = vsub.f32 %v13409_v27, %v2565_v56 }
0x1121   :  { %v2563_v4 = vpop.xlane.xlu1 %2562 }
0x1122   :  { %v2567_v15 = vmul.f32 0.0078125, %v2563_v4  ;;  %2576 = vadd.xlane.f32.xlu0 %v2572_v44  ;;  %v2573_v49 = vmul.f32 %v13427_v43, %v13427_v43  ;;  %v13432_v50 = vsub.f32 %v13413_v29, %v2566_v42  ;;  %v2611_v4 = vrot.slane %v13367_v45, %v13174_v54 }
0x1124   :  { %2578 = vadd.xlane.f32.xlu1 %v2573_v49  ;;  %v2574_v19 = vmul.f32 %v13432_v50, %v13432_v50  ;;  %v13437_v13 = vsub.f32 %v13417_v12, %v2567_v15 }
0x1126   :  { %2580 = vadd.xlane.f32.xlu0 %v2574_v19  ;;  %v2575_v18 = vmul.f32 %v13437_v13, %v13437_v13 }
0x1128   :  { %2582 = vadd.xlane.f32.xlu1 %v2575_v18 }
0x11af   :  { %v2577_v60 = vpop.xlane.xlu0 %2576 }
0x11b0   :  { %v2584_v62 = vmul.f32 0.0078125, %v2577_v60  ;;  %v11675_v60 = vld [vmem:[#allocation16 + $0x168] sm:$0xff]  }
0x11b1   :  { %v2579_v26 = vpop.xlane.xlu1 %2578 }
0x11b2   :  { %v2588_v37 = vadd.f32 1e-05, %v2584_v62  ;;  %v2585_v32 = vmul.f32 0.0078125, %v2579_v26  ;;  %v11676_v62 = vld [vmem:[#allocation16 + $0x1e8] sm:$0xff]  }
0x11b3   :  { %v2581_v8 = vpop.xlane.xlu0 %2580  ;;  %v11677_v26 = vld [vmem:[#allocation16 + $0x128] sm:$0xff]  }
0x11b4   :  { %12255 = vrsqrt.f32 %v2588_v37  ;;  %v2589_v38 = vadd.f32 1e-05, %v2585_v32  ;;  %v2586_v6 = vmul.f32 0.0078125, %v2581_v8  ;;  %v11678_v37 = vld [vmem:[#allocation16 + $0x1a8] sm:$0xff]   ;;  %v11679_v32 = vld [vmem:[#allocation16 + $0x170] sm:$0xff]  }
0x11b5   :  { %v2583_v36 = vpop.xlane.xlu1 %2582  ;;  %v11680_v8 = vld [vmem:[#allocation16 + $0x1f0] sm:$0xff]  }
0x11b6   :  { %12257 = vrsqrt.f32 %v2589_v38  ;;  %v2590_v46 = vadd.f32 1e-05, %v2586_v6  ;;  %v2587_v35 = vmul.f32 0.0078125, %v2583_v36  ;;  %v11681_v38 = vld [vmem:[#allocation16 + $0x130] sm:$0xff]   ;;  %v11683_v36 = vld [vmem:[#allocation16 + $0x178] sm:$0xff]  }
0x11b7   :  { %v11682_v6 = vld [vmem:[#allocation16 + $0x1b0] sm:$0xff]  }
0x11b8   :  { %12259 = vrsqrt.f32 %v2590_v46  ;;  %v2591_v51 = vadd.f32 1e-05, %v2587_v35  ;;  %v11684_v46 = vld [vmem:[#allocation16 + $0x1f8] sm:$0xff]  }
0x11b9   :  { %v11685_v35 = vld [vmem:[#allocation16 + $0x138] sm:$0xff]  }
0x11ba   :  { %12261 = vrsqrt.f32 %v2591_v51  ;;  %v11686_v51 = vld [vmem:[#allocation16 + $0x1b8] sm:$0xff]  }
0x11be   :  { %v12256_v39 = vpop.eup %12255 }
0x11bf   :  { %v2596_v56 = vmul.f32 %v12256_v39, %v13422_v7 }
0x11c0   :  { %v12258_v57 = vpop.eup %12257 }
0x11c1   :  { %v2597_v42 = vmul.f32 %v12258_v57, %v13427_v43  ;;  %v2604_v44 = vmul.f32 %v2603_v2, %v2596_v56 }
0x11c2   :  { %v12260_v15 = vpop.eup %12259 }
0x11c3   :  { %v2605_v49 = vmul.f32 %v2603_v2, %v2597_v42  ;;  %v2612_v18 = vadd.f32 %v2611_v4, %v2604_v44  ;;  %v2598_v3 = vmul.f32 %v12260_v15, %v13432_v50  ;;  %v11658_v50 = vld [vmem:[#allocation16 + $0x180] sm:$0xff]  }
0x11c4   :  { %v12262_v19 = vpop.eup %12261 }
0x11c5   :  { %v2613_v61 = vadd.f32 %v2611_v4, %v2605_v49  ;;  %v2599_v0 = vmul.f32 %v12262_v19, %v13437_v13  ;;  %v2606_v7 = vmul.f32 %v2603_v2, %v2598_v3  ;;  %v11659_v13 = vld [vmem:[#allocation16 + $0x148] sm:$0xff]  }
0x11c7   :  { %v2616_v5 = vpack.c.bf16 %v2613_v61, %v2612_v18  ;;  %v2607_v47 = vmul.f32 %v2603_v2, %v2599_v0  ;;  %v2614_v45 = vadd.f32 %v2611_v4, %v2606_v7  ;;  %v2652_v2 = vld [vmem:[#allocation14 + $0x1] ss:$8 sm:$0xf] }
0x11c8   :  { %v13452_v39 = vrot.slane %v2652_v2, %v13084_v11  ;;  %v13455_v56 = vrot.slane %v2652_v2, %v13108_v41  ;;  %v13458_v57 = vrot.slane %v2652_v2, %v13092_v20  ;;  %v13461_v42 = vrot.slane %v2652_v2, %v13169_v53 }
0x11c9   :  { %2867 = vmatmul.mubr.bf16.vlgmr.msra.gmra.mrb[48].mxu1 %v2616_v5  ;;  %2920 = vmatmul.mubr.bf16.vlgmr.msra.gmra.mrb[52].mxu0 %v2616_v5  ;;  %v2615_v43 = vadd.f32 %v2611_v4, %v2607_v47 }
0x11ca   :  { %2876 = vmatprep.mubr.bf16.mxu1 %v12839_v55  ;;  %2929 = vmatprep.mubr.bf16.mxu0 %v12839_v55 }
0x11cb   :  { %v2617_v48 = vpack.c.bf16 %v2615_v43, %v2614_v45  ;;  %10634 = vmatpush3.bf16.msra.mxu1 %v11657_v1  ;;  %10662 = vmatpush3.bf16.msra.mxu0 %v11658_v50 }
0x11cc   :  { %10635 = vmatprep.subr.bf16.mxu1 %v11659_v13  ;;  %10663 = vmatprep.subr.bf16.mxu0 %v11660_v9 }
0x11cf   :  { %10636 = vmatpush3.bf16.msra.mxu1 %v11661_v10  ;;  %10664 = vmatpush3.bf16.msra.mxu0 %v11662_v33 }
0x11d0   :  { %10637 = vmatprep.subr.bf16.mxu1 %v11663_v17  ;;  %10665 = vmatprep.subr.bf16.mxu0 %v11664_v34 }
0x11d1   :  { %2877 = vmatmul.mubr.bf16.gmra.mrb[52].mxu1 %v2617_v48  ;;  %2930 = vmatmul.mubr.bf16.gmra.mrb[56].mxu0 %v2617_v48 }
0x11d3   :  { %10638 = vmatpush3.bf16.msra.mxu1 %v11665_v30  ;;  %10666 = vmatpush3.bf16.msra.mxu0 %v11666_v52 }
0x11d4   :  { %10639 = vmatprep.subr.bf16.mxu1 %v11667_v14  ;;  %10667 = vmatprep.subr.bf16.mxu0 %v11668_v22 }
0x11d7   :  { %10640 = vmatpush3.bf16.msra.mxu1 %v11669_v23  ;;  %10668 = vmatpush3.bf16.msra.mxu0 %v11670_v31 }
0x11d8   :  { %10641 = vmatprep.subr.bf16.mxu1 %v11671_v28  ;;  %10669 = vmatprep.subr.bf16.mxu0 %v11672_v24 }
0x11db   :  { %10642 = vmatpush3.bf16.msra.mxu1 %v11673_v59  ;;  %10670 = vmatpush3.bf16.msra.mxu0 %v11674_v63 }
0x11dc   :  { %10643 = vmatprep.subr.bf16.mxu1 %v11675_v60  ;;  %10671 = vmatprep.subr.bf16.mxu0 %v11676_v62 }
0x11df   :  { %10644 = vmatpush3.bf16.msra.mxu1 %v11677_v26  ;;  %10672 = vmatpush3.bf16.msra.mxu0 %v11678_v37 }
0x11e0   :  { %10645 = vmatprep.subr.bf16.mxu1 %v11679_v32  ;;  %10673 = vmatprep.subr.bf16.mxu0 %v11680_v8 }
0x11e3   :  { %10646 = vmatpush3.bf16.msra.mxu1 %v11681_v38  ;;  %10674 = vmatpush3.bf16.msra.mxu0 %v11682_v6 }
0x11e4   :  { %10647 = vmatprep.subr.bf16.mxu1 %v11683_v36  ;;  %10675 = vmatprep.subr.bf16.mxu0 %v11684_v46 }
0x11e7   :  { %10648 = vmatpush3.bf16.msra.mxu1 %v11685_v35  ;;  %10676 = vmatpush3.bf16.msra.mxu0 %v11686_v51 }
0x129c   :  { %v2868_v44 = vpop.f32.mrb[48].mxu1  ;;  %v2921_v4 = vpop.f32.mrb[52].mxu0 }
0x129d   :  { %v13464_v15 = vadd.f32 %v2868_v44, %v13452_v39  ;;  %v13467_v49 = vadd.f32 %v2921_v4, %v13455_v56  ;;  %v2870_v19 = vpop.f32.mrb[49].mxu1  ;;  %v2923_v18 = vpop.f32.mrb[53].mxu0 }
0x129e   :  { %v13470_v61 = vadd.f32 %v2870_v19, %v13458_v57  ;;  %v13473_v3 = vadd.f32 %v2923_v18, %v13461_v42  ;;  %v2872_v0 = vpop.f32.mrb[50].mxu1  ;;  %v2925_v5 = vpop.f32.mrb[54].mxu0 }
0x129f   :  { %v2940_v47 = vmul.f32 %v13464_v15, %v13464_v15  ;;  %v2942_v7 = vmul.f32 %v13467_v49, %v13467_v49  ;;  %v13480_v43 = vadd.f32 %v2872_v0, %v13452_v39  ;;  %v13483_v45 = vadd.f32 %v2925_v5, %v13455_v56  ;;  %v2874_v48 = vpop.f32.mrb[51].mxu1  ;;  %v2927_v16 = vpop.f32.mrb[55].mxu0 }
0x12a0   :  { %v2941_v25 = vmul.f32 %v13470_v61, %v13470_v61  ;;  %v2943_v1 = vmul.f32 %v13473_v3, %v13473_v3  ;;  %v13490_v50 = vadd.f32 %v2874_v48, %v13458_v57  ;;  %v13493_v13 = vadd.f32 %v2927_v16, %v13461_v42 }
0x12a1   :  { %v2956_v9 = vmul.f32 %v2940_v47, %v13464_v15  ;;  %v2958_v10 = vmul.f32 %v2942_v7, %v13467_v49  ;;  %v2944_v33 = vmul.f32 %v13480_v43, %v13480_v43  ;;  %v2946_v17 = vmul.f32 %v13483_v45, %v13483_v45 }
0x12a2   :  { %v2957_v34 = vmul.f32 %v2941_v25, %v13470_v61  ;;  %v2959_v30 = vmul.f32 %v2943_v1, %v13473_v3  ;;  %v2945_v52 = vmul.f32 %v13490_v50, %v13490_v50  ;;  %v2947_v14 = vmul.f32 %v13493_v13, %v13493_v13 }
0x12a3   :  { %v2972_v22 = vmul.f32 0.044715, %v2956_v9  ;;  %v2974_v23 = vmul.f32 0.044715, %v2958_v10  ;;  %v2960_v31 = vmul.f32 %v2944_v33, %v13480_v43  ;;  %v2962_v28 = vmul.f32 %v2946_v17, %v13483_v45 }
0x12a4   :  { %v2973_v24 = vmul.f32 0.044715, %v2957_v34  ;;  %v2975_v59 = vmul.f32 0.044715, %v2959_v30  ;;  %v2961_v63 = vmul.f32 %v2945_v52, %v13490_v50  ;;  %v2963_v60 = vmul.f32 %v2947_v14, %v13493_v13  ;;  %v2878_v62 = vpop.f32.mrb[52].mxu1  ;;  %v2931_v26 = vpop.f32.mrb[56].mxu0 }
0x12a5   :  { %v2988_v37 = vadd.f32 %v2972_v22, %v13464_v15  ;;  %v2990_v32 = vadd.f32 %v2974_v23, %v13467_v49  ;;  %v2976_v8 = vmul.f32 0.044715, %v2960_v31  ;;  %v2978_v38 = vmul.f32 0.044715, %v2962_v28  ;;  %v2880_v6 = vpop.f32.mrb[53].mxu1  ;;  %v2933_v36 = vpop.f32.mrb[57].mxu0 }
0x12a6   :  { %v2989_v46 = vadd.f32 %v2973_v24, %v13470_v61  ;;  %v2991_v35 = vadd.f32 %v2975_v59, %v13473_v3  ;;  %v2977_v51 = vmul.f32 0.044715, %v2961_v63  ;;  %v2979_v2 = vmul.f32 0.044715, %v2963_v60  ;;  %v2882_v44 = vpop.f32.mrb[54].mxu1  ;;  %v2935_v4 = vpop.f32.mrb[58].mxu0 }
0x12a7   :  { %v3004_v19 = vmul.f32 0.7978846, %v2988_v37  ;;  %v3006_v18 = vmul.f32 0.7978846, %v2990_v32  ;;  %v2992_v0 = vadd.f32 %v2976_v8, %v13480_v43  ;;  %v2994_v5 = vadd.f32 %v2978_v38, %v13483_v45  ;;  %v2884_v47 = vpop.f32.mrb[55].mxu1  ;;  %v2937_v7 = vpop.f32.mrb[59].mxu0 }
0x12a8   :  { %v3005_v48 = vmul.f32 0.7978846, %v2989_v46  ;;  %v3007_v16 = vmul.f32 0.7978846, %v2991_v35  ;;  %v2993_v25 = vadd.f32 %v2977_v51, %v13490_v50  ;;  %v2995_v1 = vadd.f32 %v2979_v2, %v13493_v13 }
0x12a9   :  { %12263 = vtanh.f32 %v3004_v19  ;;  %v3008_v9 = vmul.f32 0.7978846, %v2992_v0  ;;  %v3010_v10 = vmul.f32 0.7978846, %v2994_v5  ;;  %v13520_v33 = vadd.f32 %v2878_v62, %v13452_v39 }
0x12aa   :  { %12265 = vtanh.f32 %v3006_v18  ;;  %v3009_v17 = vmul.f32 0.7978846, %v2993_v25  ;;  %v3011_v34 = vmul.f32 0.7978846, %v2995_v1  ;;  %v13523_v30 = vadd.f32 %v2931_v26, %v13455_v56 }
0x12ab   :  { %12267 = vtanh.f32 %v3005_v48  ;;  %v2948_v52 = vmul.f32 %v13520_v33, %v13520_v33  ;;  %v13528_v14 = vadd.f32 %v2880_v6, %v13458_v57  ;;  %v13531_v22 = vadd.f32 %v2933_v36, %v13461_v42 }
0x12ac   :  { %12269 = vtanh.f32 %v3007_v16  ;;  %v2950_v23 = vmul.f32 %v13523_v30, %v13523_v30  ;;  %v13536_v31 = vadd.f32 %v2882_v44, %v13452_v39  ;;  %v13539_v28 = vadd.f32 %v2935_v4, %v13455_v56 }
0x12ad   :  { %12271 = vtanh.f32 %v3008_v9  ;;  %v2964_v24 = vmul.f32 %v2948_v52, %v13520_v33  ;;  %v2949_v59 = vmul.f32 %v13528_v14, %v13528_v14  ;;  %v2951_v63 = vmul.f32 %v13531_v22, %v13531_v22 }
0x12ae   :  { %12273 = vtanh.f32 %v3010_v10  ;;  %v2966_v60 = vmul.f32 %v2950_v23, %v13523_v30  ;;  %v2952_v62 = vmul.f32 %v13536_v31, %v13536_v31  ;;  %v2954_v39 = vmul.f32 %v13539_v28, %v13539_v28 }
0x12af   :  { %12275 = vtanh.f32 %v3009_v17  ;;  %v2980_v56 = vmul.f32 0.044715, %v2964_v24  ;;  %v2965_v26 = vmul.f32 %v2949_v59, %v13528_v14  ;;  %v2967_v37 = vmul.f32 %v2951_v63, %v13531_v22 }
0x12b0   :  { %12277 = vtanh.f32 %v3011_v34  ;;  %v2982_v32 = vmul.f32 0.044715, %v2966_v60  ;;  %v2968_v8 = vmul.f32 %v2952_v62, %v13536_v31  ;;  %v2970_v38 = vmul.f32 %v2954_v39, %v13539_v28 }
0x12b1   :  { %v2996_v6 = vadd.f32 %v2980_v56, %v13520_v33  ;;  %v2981_v36 = vmul.f32 0.044715, %v2965_v26  ;;  %v2983_v46 = vmul.f32 0.044715, %v2967_v37  ;;  %v13557_v35 = vadd.f32 %v2884_v47, %v13458_v57 }
0x12b2   :  { %v2998_v51 = vadd.f32 %v2982_v32, %v13523_v30  ;;  %v2984_v2 = vmul.f32 0.044715, %v2968_v8  ;;  %v2986_v44 = vmul.f32 0.044715, %v2970_v38  ;;  %v13561_v4 = vadd.f32 %v2937_v7, %v13461_v42 }
0x12b3   :  { %v12264_v19 = vpop.eup %12263  ;;  %v3012_v18 = vmul.f32 0.7978846, %v2996_v6  ;;  %v2997_v0 = vadd.f32 %v2981_v36, %v13528_v14  ;;  %v2999_v5 = vadd.f32 %v2983_v46, %v13531_v22  ;;  %v2953_v48 = vmul.f32 %v13557_v35, %v13557_v35 }
0x12b4   :  { %v12266_v16 = vpop.eup %12265  ;;  %v3036_v25 = vadd.f32 1.0, %v12264_v19  ;;  %v3014_v57 = vmul.f32 0.7978846, %v2998_v51  ;;  %v3000_v47 = vadd.f32 %v2984_v2, %v13536_v31  ;;  %v3002_v1 = vadd.f32 %v2986_v44, %v13539_v28 }
0x12b5   :  { %v12268_v9 = vpop.eup %12267  ;;  %v3038_v10 = vadd.f32 1.0, %v12266_v16  ;;  %12279 = vtanh.f32 %v3012_v18  ;;  %v3013_v42 = vmul.f32 0.7978846, %v2997_v0  ;;  %v3015_v7 = vmul.f32 0.7978846, %v2999_v5 }
0x12b6   :  { %v12270_v17 = vpop.eup %12269  ;;  %v3052_v34 = vmul.f32 0.5, %v3036_v25  ;;  %12281 = vtanh.f32 %v3014_v57  ;;  %v3016_v52 = vmul.f32 0.7978846, %v3000_v47  ;;  %v3018_v23 = vmul.f32 0.7978846, %v3002_v1 }
0x12b7   :  { %v12272_v24 = vpop.eup %12271  ;;  %v3054_v59 = vmul.f32 0.5, %v3038_v10  ;;  %12283 = vtanh.f32 %v3013_v42  ;;  %v2969_v63 = vmul.f32 %v2953_v48, %v13557_v35  ;;  %v2955_v60 = vmul.f32 %v13561_v4, %v13561_v4 }
0x12b8   :  { %v12274_v62 = vpop.eup %12273  ;;  %v3068_v39 = vmul.f32 %v3052_v34, %v13464_v15  ;;  %v3040_v56 = vadd.f32 1.0, %v12272_v24  ;;  %12285 = vtanh.f32 %v3015_v7  ;;  %v3037_v26 = vadd.f32 1.0, %v12268_v9 }
0x12b9   :  { %v12276_v37 = vpop.eup %12275  ;;  %v3070_v32 = vmul.f32 %v3054_v59, %v13467_v49  ;;  %v3042_v8 = vadd.f32 1.0, %v12274_v62  ;;  %12287 = vtanh.f32 %v3016_v52  ;;  %v2985_v38 = vmul.f32 0.044715, %v2969_v63 }
0x12ba   :  { %v12278_v6 = vpop.eup %12277  ;;  %v3056_v36 = vmul.f32 0.5, %v3040_v56  ;;  %12289 = vtanh.f32 %v3018_v23  ;;  %v2971_v46 = vmul.f32 %v2955_v60, %v13561_v4  ;;  %v3041_v51 = vadd.f32 1.0, %v12276_v37 }
0x12bb   :  { %v3058_v2 = vmul.f32 0.5, %v3042_v8  ;;  %v3001_v44 = vadd.f32 %v2985_v38, %v13557_v35  ;;  %v3053_v19 = vmul.f32 0.5, %v3037_v26  ;;  %v3039_v15 = vadd.f32 1.0, %v12270_v17 }
0x12bc   :  { %v3072_v18 = vmul.f32 %v3056_v36, %v13480_v43  ;;  %v2987_v0 = vmul.f32 0.044715, %v2971_v46  ;;  %v3057_v5 = vmul.f32 0.5, %v3041_v51  ;;  %v3043_v48 = vadd.f32 1.0, %v12278_v6 }
0x12bd   :  { %v3074_v49 = vmul.f32 %v3058_v2, %v13483_v45  ;;  %v3017_v16 = vmul.f32 0.7978846, %v3001_v44  ;;  %v3069_v25 = vmul.f32 %v3053_v19, %v13470_v61  ;;  %v3055_v57 = vmul.f32 0.5, %v3039_v15 }
0x12be   :  { %v3084_v47 = vpack.c.bf16 %v3072_v18, %v3068_v39  ;;  %v3003_v1 = vadd.f32 %v2987_v0, %v13561_v4  ;;  %v3073_v9 = vmul.f32 %v3057_v5, %v13490_v50  ;;  %v3059_v10 = vmul.f32 0.5, %v3043_v48 }
0x12bf   :  { %v12280_v42 = vpop.eup %12279  ;;  %v3086_v7 = vpack.c.bf16 %v3074_v49, %v3070_v32  ;;  %12291 = vtanh.f32 %v3017_v16  ;;  %v3071_v43 = vmul.f32 %v3055_v57, %v13473_v3  ;;  %v12560_v57 = vld [vmem:[#allocation17 + $0x8] sm:$0x3f] }
0x12c0   :  { %v12282_v17 = vpop.eup %12281  ;;  %v3019_v34 = vmul.f32 0.7978846, %v3003_v1  ;;  %v3085_v52 = vpack.c.bf16 %v3073_v9, %v3069_v25  ;;  %v3075_v45 = vmul.f32 %v3059_v10, %v13493_v13  ;;  %v3044_v23 = vadd.f32 1.0, %v12280_v42 }
0x12c1   :  { %v12284_v24 = vpop.eup %12283  ;;  %v3046_v61 = vadd.f32 1.0, %v12282_v17 }
0x12c2   :  { %v12286_v59 = vpop.eup %12285  ;;  %12293 = vtanh.f32 %v3019_v34  ;;  %3385 = vmatprep.mubr.bf16.mxu1 %v3085_v52  ;;  %v3087_v63 = vpack.c.bf16 %v3075_v45, %v3071_v43  ;;  %v3060_v39 = vmul.f32 0.5, %v3044_v23  ;;  %v3045_v26 = vadd.f32 1.0, %v12284_v24 }
0x12c3   :  { %v12288_v60 = vpop.eup %12287  ;;  %3386 = vmatmul.mubr.bf16.vlgmr.msra.gmra.mrb[56].mxu1 %v3084_v47  ;;  %v3062_v56 = vmul.f32 0.5, %v3046_v61  ;;  %v3047_v6 = vadd.f32 1.0, %v12286_v59  ;;  %v3160_v47 = vrot.slane %v12560_v57, %v13326_v21 }
0x12c4   :  { %v12290_v50 = vpop.eup %12289  ;;  %3434 = vmatprep.mubr.bf16.mxu0 %v3087_v63  ;;  %v3048_v62 = vadd.f32 1.0, %v12288_v60  ;;  %v3076_v13 = vmul.f32 %v3060_v39, %v13520_v33  ;;  %v3061_v2 = vmul.f32 0.5, %v3045_v26 }
0x12c5   :  { %3435 = vmatmul.mubr.bf16.vlgmr.msra.gmra.mrb[60].mxu0 %v3086_v7  ;;  %v3050_v3 = vadd.f32 1.0, %v12290_v50  ;;  %v3078_v36 = vmul.f32 %v3062_v56, %v13523_v30  ;;  %v3063_v5 = vmul.f32 0.5, %v3047_v6 }
0x12c6   :  { %v3064_v37 = vmul.f32 0.5, %v3048_v62  ;;  %v3077_v48 = vmul.f32 %v3061_v2, %v13528_v14  ;;  %v11692_v2 = vld [vmem:[#allocation8 + $0x19c] ss:$12 sps:$4 sm:$0xff]  }
0x12c7   :  { %v3066_v32 = vmul.f32 0.5, %v3050_v3  ;;  %v3079_v16 = vmul.f32 %v3063_v5, %v13531_v22 }
0x12c8   :  { %v3080_v8 = vmul.f32 %v3064_v37, %v13536_v31 }
0x12c9   :  { %v12292_v38 = vpop.eup %12291  ;;  %v3082_v46 = vmul.f32 %v3066_v32, %v13539_v28 }
0x12ca   :  { %v3049_v51 = vadd.f32 1.0, %v12292_v38  ;;  %v3088_v44 = vpack.c.bf16 %v3080_v8, %v3076_v13 }
0x12cb   :  { %v3090_v19 = vpack.c.bf16 %v3082_v46, %v3078_v36  ;;  %v11687_v46 = vld [vmem:[#allocation8 + $0x180] ss:$12 sps:$4 sm:$0xff]  }
0x12cc   :  { %v12294_v15 = vpop.eup %12293  ;;  %v3065_v18 = vmul.f32 0.5, %v3049_v51  ;;  %v11689_v51 = vld [vmem:[#allocation8 + $0x184] ss:$12 sps:$4 sm:$0xff]  }
0x12cd   :  { %v3051_v0 = vadd.f32 1.0, %v12294_v15  ;;  %3698 = vmatprep.subr.bf16.mxu1 %v11689_v51 }
0x12ce   :  { %v3081_v33 = vmul.f32 %v3065_v18, %v13557_v35  ;;  %3699 = vmatpush1.bf16.msra.mxu1 %v11687_v46 }
0x12cf   :  { %v3067_v49 = vmul.f32 0.5, %v3051_v0  ;;  %3700 = vmatprep.subr.bf16.mxu1 %v11692_v2 }
0x12d0   :  { %v3089_v31 = vpack.c.bf16 %v3081_v33, %v3077_v48 }
0x12d1   :  { %v3083_v30 = vmul.f32 %v3067_v49, %v13561_v4 }
0x12d2   :  { %3393 = vmatprep.mubr.bf16.mxu1 %v3089_v31 }
0x12d3   :  { %v3091_v28 = vpack.c.bf16 %v3083_v30, %v3079_v16  ;;  %3394 = vmatmul.mubr.bf16.gmra.mrb[60].mxu1 %v3088_v44  ;;  %v11690_v44 = vld [vmem:[#allocation8 + $0x198] ss:$12 sps:$4 sm:$0xff]  }
0x12d4   :  { %3730 = vmatprep.mubr.bf16.mxu1 %v12839_v55  ;;  %3701 = vmatpush1.bf16.msra.mxu1 %v11690_v44 }
0x12d5   :  { %3442 = vmatprep.mubr.bf16.mxu0 %v3091_v28 }
0x12d6   :  { %3443 = vmatmul.mubr.bf16.gmra.mrb[64].mxu0 %v3090_v19 }
0x1396   :  { %v10649_v25 = vpop.f32.mrb[56].mxu1 }
0x1397   :  { %v10650_v14 = vpop.f32.mrb[57].mxu1 }
0x1398   :  { %v10677_v1 = vpop.f32.mrb[60].mxu0  ;;  %v10651_v35 = vadd.f32 %v10650_v14, %v10649_v25  ;;  %v10652_v9 = vpop.f32.mrb[58].mxu1  ;;  %v11696_v14 = vld [vmem:[#allocation8 + $0x188] ss:$12 sps:$4 sm:$0xff]  }
0x1399   :  { %v10678_v10 = vpop.f32.mrb[61].mxu0  ;;  %v10653_v42 = vpop.f32.mrb[59].mxu1  ;;  %11165 = vmatprep.subr.bf16.mxu0 %v11696_v14 }
0x139a   :  { %v3388_v22 = vadd.f32 %v10651_v35, %v3160_v47  ;;  %v10679_v7 = vadd.f32 %v10678_v10, %v10677_v1  ;;  %v10680_v4 = vpop.f32.mrb[62].mxu0  ;;  %v10654_v43 = vadd.f32 %v10653_v42, %v10652_v9  ;;  %v11693_v1 = vld [vmem:[#allocation8 + $0x1b0] ss:$12 sps:$4 sm:$0xff]   ;;  %11166 = vmatpush3.bf16.msra.mxu0 %v11696_v14  ;;  %v11699_v35 = vld [vmem:[#allocation8 + $0x1cc] ss:$12 sps:$4 sm:$0xff]  }
0x139b   :  { %v10681_v17 = vpop.f32.mrb[63].mxu0  ;;  %v11700_v9 = vld [vmem:[#allocation8 + $0x1a0] ss:$12 sps:$4 sm:$0xff]   ;;  %v11697_v10 = vld [vmem:[#allocation8 + $0x1c8] ss:$12 sps:$4 sm:$0xff]  }
0x139c   :  { %v3437_v34 = vadd.f32 %v10679_v7, %v3388_v22  ;;  %v3391_v52 = vadd.f32 %v10654_v43, %v3160_v47  ;;  %v10682_v45 = vadd.f32 %v10681_v17, %v10680_v4  ;;  %11167 = vmatprep.subr.bf16.mxu0 %v11700_v9  ;;  %v11703_v42 = vld [vmem:[#allocation8 + $0x1e4] ss:$12 sps:$4 sm:$0xff]   ;;  %v11701_v7 = vld [vmem:[#allocation8 + $0x1e0] ss:$12 sps:$4 sm:$0xff]   ;;  %v11707_v4 = vld [vmem:[#allocation8 + $0x1fc] ss:$12 sps:$4 sm:$0xff]  }
0x139d   :  { %v11704_v22 = vld [vmem:[#allocation8 + $0x1b8] ss:$12 sps:$4 sm:$0xff]   ;;  %v11708_v43 = vld [vmem:[#allocation8 + $0x1d0] ss:$12 sps:$4 sm:$0xff]  }
0x139e   :  { %v3440_v23 = vadd.f32 %v10682_v45, %v3391_v52  ;;  %v13594_v24 = vadd.f32 %v3437_v34, %v13406_v58  ;;  %11168 = vmatpush3.bf16.msra.mxu0 %v11700_v9  ;;  %v11705_v17 = vld [vmem:[#allocation8 + $0x1f8] ss:$12 sps:$4 sm:$0xff]   ;;  %v11711_v34 = vld [vmem:[#allocation8 + $0x214] ss:$12 sps:$4 sm:$0xff]   ;;  %v11709_v45 = vld [vmem:[#allocation8 + $0x210] ss:$12 sps:$4 sm:$0xff]  }
0x139f   :  { %11169 = vmatprep.subr.bf16.mxu0 %v11704_v22  ;;  %v11712_v52 = vld [vmem:[#allocation8 + $0x1e8] ss:$12 sps:$4 sm:$0xff]  }
0x13a0   :  { %3457 = vadd.xlane.f32.xlu0 %v13594_v24  ;;  %v13598_v61 = vadd.f32 %v3440_v23, %v13409_v27  ;;  %v11715_v23 = vld [vmem:[#allocation8 + $0x22c] ss:$12 sps:$4 sm:$0xff]  }
0x13a2   :  { %3459 = vadd.xlane.f32.xlu1 %v13598_v61  ;;  %11170 = vmatpush3.bf16.msra.mxu0 %v11704_v22 }
0x13a3   :  { %11171 = vmatprep.subr.bf16.mxu0 %v11708_v43 }
0x13a6   :  { %v10655_v59 = vpop.f32.mrb[60].mxu1  ;;  %11172 = vmatpush3.bf16.msra.mxu0 %v11708_v43 }
0x13a7   :  { %v10656_v63 = vpop.f32.mrb[61].mxu1  ;;  %11173 = vmatprep.subr.bf16.mxu0 %v11712_v52 }
0x13a8   :  { %v10657_v60 = vadd.f32 %v10656_v63, %v10655_v59  ;;  %v10658_v50 = vpop.f32.mrb[62].mxu1  ;;  %v11716_v59 = vld [vmem:[#allocation8 + $0x200] ss:$12 sps:$4 sm:$0xff]   ;;  %v11713_v63 = vld [vmem:[#allocation8 + $0x228] ss:$12 sps:$4 sm:$0xff]  }
0x13a9   :  { %v10683_v62 = vpop.f32.mrb[64].mxu0  ;;  %v10659_v39 = vpop.f32.mrb[63].mxu1 }
0x13aa   :  { %v3396_v3 = vadd.f32 %v10657_v60, %v3160_v47  ;;  %v10684_v56 = vpop.f32.mrb[65].mxu0  ;;  %v10660_v26 = vadd.f32 %v10659_v39, %v10658_v50  ;;  %11174 = vmatpush3.bf16.msra.mxu0 %v11712_v52  ;;  %v11717_v60 = vld [vmem:[#allocation8 + $0x218] ss:$12 sps:$4 sm:$0xff]   ;;  %v11718_v50 = vld [vmem:[#allocation8 + $0x230] ss:$12 sps:$4 sm:$0xff]  }
0x13ab   :  { %v10685_v37 = vadd.f32 %v10684_v56, %v10683_v62  ;;  %v10686_v32 = vpop.f32.mrb[66].mxu0  ;;  %11175 = vmatprep.subr.bf16.mxu0 %v11716_v59 }
0x13ac   :  { %v3399_v58 = vadd.f32 %v10660_v26, %v3160_v47  ;;  %v10687_v13 = vpop.f32.mrb[67].mxu0  ;;  %v11695_v47 = vld [vmem:[#allocation8 + $0x1b4] ss:$12 sps:$4 sm:$0xff]  }
0x13ad   :  { %v3445_v8 = vadd.f32 %v10685_v37, %v3396_v3  ;;  %v10688_v38 = vadd.f32 %v10687_v13, %v10686_v32  ;;  %3702 = vmatprep.subr.bf16.mxu1 %v11695_v47  ;;  %v13631_v32 = vld [vmem:[#allocation17 + $0x10] sm:$0x3f] }
0x13ae   :  { %3703 = vmatpush1.bf16.msra.mxu1 %v11693_v1  ;;  %11176 = vmatpush3.bf16.msra.mxu0 %v11716_v59  ;;  %v3512_v44 = vrot.slane %v13631_v32, %v13092_v20 }
0x13af   :  { %v3448_v6 = vadd.f32 %v10688_v38, %v3399_v58  ;;  %v13602_v27 = vadd.f32 %v3445_v8, %v13413_v29  ;;  %3704 = vmatprep.subr.bf16.mxu1 %v11699_v35  ;;  %11177 = vmatprep.subr.bf16.mxu0 %v11717_v60  ;;  %v3504_v58 = vrot.slane %v13631_v32, %v13084_v11  ;;  %v3553_v35 = vld [vmem:[#allocation10 + $0x2] ss:$8 sm:$0x7] }
0x13b0   :  { %v3558_v9 = vrot.slane %v3553_v35, %v13084_v11 }
0x13b1   :  { %3461 = vadd.xlane.f32.xlu0 %v13602_v27  ;;  %v13606_v36 = vadd.f32 %v3448_v6, %v13417_v12 }
0x13b2   :  { %3705 = vmatpush1.bf16.msra.mxu1 %v11697_v10  ;;  %11178 = vmatpush3.bf16.msra.mxu0 %v11717_v60  ;;  %v3562_v10 = vrot.slane %v3553_v35, %v13092_v20 }
0x13b3   :  { %3463 = vadd.xlane.f32.xlu1 %v13606_v36  ;;  %3706 = vmatprep.subr.bf16.mxu1 %v11703_v42 }
0x13b4   :  { %11179 = vmatprep.subr.bf16.mxu0 %v11718_v50 }
0x13b6   :  { %3707 = vmatpush1.bf16.msra.mxu1 %v11701_v7  ;;  %11180 = vmatpush3.bf16.msra.mxu0 %v11718_v50 }
0x13b7   :  { %3708 = vmatprep.subr.bf16.mxu1 %v11707_v4  ;;  %11203 = vmatprep.subr.bf16.mxu0 %v12840_v40 }
0x13ba   :  { %3709 = vmatpush1.bf16.msra.mxu1 %v11705_v17 }
0x13bb   :  { %3710 = vmatprep.subr.bf16.mxu1 %v11711_v34 }
0x13be   :  { %3711 = vmatpush1.bf16.msra.mxu1 %v11709_v45  ;;  %v3566_v45 = vrot.slane %v3553_v35, %v13108_v41 }
0x13bf   :  { %3712 = vmatprep.subr.bf16.mxu1 %v11715_v23 }
0x13c2   :  { %3713 = vmatpush1.bf16.msra.mxu1 %v11713_v63 }
0x13c3   :  { %11185 = vmatprep.subr.bf16.mxu1 %v12840_v40 }
0x142d   :  { %v3458_v19 = vpop.xlane.xlu0 %3457 }
0x142e   :  { %v3465_v15 = vmul.f32 0.0078125, %v3458_v19 }
0x142f   :  { %v3460_v18 = vpop.xlane.xlu1 %3459 }
0x1430   :  { %v3466_v29 = vmul.f32 0.0078125, %v3460_v18  ;;  %v13610_v0 = vsub.f32 %v13594_v24, %v3465_v15 }
0x1432   :  { %v3473_v12 = vmul.f32 %v13610_v0, %v13610_v0  ;;  %v13615_v5 = vsub.f32 %v13598_v61, %v3466_v29 }
0x1434   :  { %3477 = vadd.xlane.f32.xlu0 %v3473_v12  ;;  %v3474_v48 = vmul.f32 %v13615_v5, %v13615_v5 }
0x1436   :  { %3479 = vadd.xlane.f32.xlu1 %v3474_v48 }
0x143e   :  { %v3462_v33 = vpop.xlane.xlu0 %3461 }
0x143f   :  { %v3467_v49 = vmul.f32 0.0078125, %v3462_v33 }
0x1440   :  { %v3464_v31 = vpop.xlane.xlu1 %3463 }
0x1441   :  { %v3468_v16 = vmul.f32 0.0078125, %v3464_v31  ;;  %v13620_v30 = vsub.f32 %v13602_v27, %v3467_v49 }
0x1443   :  { %v3475_v28 = vmul.f32 %v13620_v30, %v13620_v30  ;;  %v13625_v25 = vsub.f32 %v13606_v36, %v3468_v16 }
0x1445   :  { %3481 = vadd.xlane.f32.xlu0 %v3475_v28  ;;  %v3476_v57 = vmul.f32 %v13625_v25, %v13625_v25 }
0x1447   :  { %3483 = vadd.xlane.f32.xlu1 %v3476_v57 }
0x14c1   :  { %v3478_v62 = vpop.xlane.xlu0 %3477 }
0x14c2   :  { %v3485_v39 = vmul.f32 0.0078125, %v3478_v62 }
0x14c3   :  { %v3480_v3 = vpop.xlane.xlu1 %3479 }
0x14c4   :  { %v3489_v56 = vadd.f32 1e-05, %v3485_v39  ;;  %v3486_v26 = vmul.f32 0.0078125, %v3480_v3 }
0x14c6   :  { %12295 = vrsqrt.f32 %v3489_v56  ;;  %v3490_v37 = vadd.f32 1e-05, %v3486_v26 }
0x14c8   :  { %12297 = vrsqrt.f32 %v3490_v37 }
0x14d0   :  { %v12296_v13 = vpop.eup %12295 }
0x14d1   :  { %v3497_v8 = vmul.f32 %v12296_v13, %v13610_v0 }
0x14d2   :  { %v12298_v38 = vpop.eup %12297  ;;  %v3482_v6 = vpop.xlane.xlu0 %3481 }
0x14d3   :  { %v3505_v46 = vmul.f32 %v3504_v58, %v3497_v8  ;;  %v3498_v51 = vmul.f32 %v12298_v38, %v13615_v5  ;;  %v3487_v2 = vmul.f32 0.0078125, %v3482_v6 }
0x14d4   :  { %v3484_v19 = vpop.xlane.xlu1 %3483 }
0x14d5   :  { %v3506_v15 = vmul.f32 %v3504_v58, %v3498_v51  ;;  %v3491_v18 = vadd.f32 1e-05, %v3487_v2  ;;  %v3488_v29 = vmul.f32 0.0078125, %v3484_v19  ;;  %v3513_v48 = vadd.f32 %v3512_v44, %v3505_v46 }
0x14d7   :  { %12299 = vrsqrt.f32 %v3491_v18  ;;  %v3492_v12 = vadd.f32 1e-05, %v3488_v29  ;;  %v3514_v33 = vadd.f32 %v3512_v44, %v3506_v15 }
0x14d9   :  { %12301 = vrsqrt.f32 %v3492_v12  ;;  %v3517_v49 = vpack.c.bf16 %v3514_v33, %v3513_v48 }
0x14db   :  { %3731 = vmatmul.mubr.bf16.vlgmr.msra.gmra.mrb[64].mxu1 %v3517_v49  ;;  %11181 = vmatprep.mubr.bf16.mxu0 %v3517_v49 }
0x14dc   :  { %3740 = vmatprep.mubr.bf16.mxu1 %v12839_v55 }
0x14e1   :  { %v12300_v0 = vpop.eup %12299 }
0x14e2   :  { %v3499_v5 = vmul.f32 %v12300_v0, %v13620_v30 }
0x14e3   :  { %v12302_v31 = vpop.eup %12301 }
0x14e4   :  { %v3500_v16 = vmul.f32 %v12302_v31, %v13625_v25  ;;  %v3507_v28 = vmul.f32 %v3504_v58, %v3499_v5 }
0x14e6   :  { %v3508_v57 = vmul.f32 %v3504_v58, %v3500_v16  ;;  %v3515_v47 = vadd.f32 %v3512_v44, %v3507_v28 }
0x14e8   :  { %v3516_v14 = vadd.f32 %v3512_v44, %v3508_v57 }
0x14ea   :  { %v3518_v1 = vpack.c.bf16 %v3516_v14, %v3515_v47 }
0x14ec   :  { %3741 = vmatmul.mubr.bf16.gmra.mrb[68].mxu1 %v3518_v1  ;;  %11182 = vmatmul.mubr.bf16.vlgmr.msra.gmra.mrb[68].mxu0 %v3518_v1 }
0x14ed   :  { %11187 = vmatprep.mubr.msk.bf16.mxu1 %vm12841_vm1, %v12840_v40  ;;  %11205 = vmatprep.mubr.msk.bf16.mxu0 %vm12841_vm1, %v12840_v40 }
0x15ae   :  { %v3732_v30 = vpop.f32.mrb[64].mxu1 }
0x15af   :  { %v3734_v25 = vpop.f32.mrb[65].mxu1  ;;  %v3733_v22 = vadd.f32 %v3732_v30, %v3558_v9 }
0x15b0   :  { %v3736_v42 = vpop.f32.mrb[66].mxu1  ;;  %v3735_v43 = vadd.f32 %v3734_v25, %v3562_v10 }
0x15b1   :  { %v3737_v7 = vadd.f32 %v3736_v42, %v3558_v9  ;;  %v3738_v4 = vpop.f32.mrb[67].mxu1 }
0x15b2   :  { %v3739_v17 = vadd.f32 %v3738_v4, %v3562_v10 }
0x15b3   :  { %v3800_v34 = vpack.c.bf16 %v3737_v7, %v3733_v22 }
0x15b4   :  { %v3802_v52 = vpack.c.bf16 %v3739_v17, %v3735_v43 }
0x15b6   :  { %11186 = vmatpush3.bf16.xpose.msra.mxu1 %v3802_v52 }
0x15b7   :  { %11191 = vmatprep.subr.bf16.mxu1 %v12840_v40 }
0x15bd   :  { %11188 = vmatmul.mubr.bf16.vlgmr.msra.gmra.mrb[72].mxu1 %v3800_v34 }
0x15be   :  { %11193 = vmatprep.mubr.msk.bf16.mxu1 %vm12841_vm1, %v12840_v40 }
0x15bf   :  { %v3742_v23 = vpop.f32.mrb[68].mxu1  ;;  %v11183_v59 = vpop.f32.mrb[68].mxu0 }
0x15c0   :  { %v3744_v63 = vpop.f32.mrb[69].mxu1  ;;  %v3785_v60 = vpop.f32.mrb[69].mxu0  ;;  %v3743_v39 = vadd.f32 %v3742_v23, %v3558_v9  ;;  %v3794_v3 = vadd.f32 %v11183_v59, %v3566_v45 }
0x15c1   :  { %v3746_v50 = vpop.f32.mrb[70].mxu1  ;;  %v11184_v62 = vpop.f32.mrb[70].mxu0  ;;  %v3745_v13 = vadd.f32 %v3744_v63, %v3562_v10  ;;  %v3786_v8 = vadd.f32 %v3785_v60, %v3566_v45 }
0x15c2   :  { %v3747_v56 = vadd.f32 %v3746_v50, %v3558_v9  ;;  %v3797_v26 = vadd.f32 %v11184_v62, %v3566_v45  ;;  %v3748_v37 = vpop.f32.mrb[71].mxu1  ;;  %v3788_v58 = vpop.f32.mrb[71].mxu0  ;;  %v11719_v62 = vld [vmem:[#allocation11 + $0x80] sm:$0xff]  }
0x15c3   :  { %v3749_v38 = vadd.f32 %v3748_v37, %v3562_v10  ;;  %v3789_v6 = vadd.f32 %v3788_v58, %v3566_v45 }
0x15c4   :  { %v3801_v46 = vpack.c.bf16 %v3747_v56, %v3743_v39  ;;  %v3937_v51 = vpack.c.bf16 %v3797_v26, %v3794_v3 }
0x15c5   :  { %v3803_v2 = vpack.c.bf16 %v3749_v38, %v3745_v13  ;;  %v3936_v44 = vpack.c.bf16 %v3789_v6, %v3786_v8  ;;  %v11720_v8 = vld [vmem:[#allocation11 + $0x88] sm:$0xff]  }
0x15c6   :  { %11204 = vmatpush3.bf16.msra.mxu0 %v3937_v51  ;;  %v11722_v51 = vld [vmem:[#allocation11 + $0x98] sm:$0xff]  }
0x15c7   :  { %11192 = vmatpush3.bf16.xpose.msra.mxu1 %v3803_v2 }
0x15c8   :  { %11197 = vmatprep.subr.bf16.mxu1 %v12840_v40 }
0x15ce   :  { %11194 = vmatmul.mubr.bf16.vlgmr.msra.gmra.mrb[76].mxu1 %v3801_v46  ;;  %v11721_v46 = vld [vmem:[#allocation11 + $0x90] sm:$0xff]  }
0x15cf   :  { %11198 = vmatpush3.bf16.msra.mxu1 %v3936_v44  ;;  %11199 = vmatprep.mubr.msk.bf16.mxu1 %vm12841_vm1, %v12840_v40  ;;  %v11723_v44 = vld [vmem:[#allocation11 + $0xa0] sm:$0xff]  }
0x15d0   :  { %11209 = vmatprep.subr.bf16.mxu1 %v11719_v62 }
0x1690   :  { %v3838_v19 = vpop.f32.mrb[72].mxu1 }
0x1691   :  { %v3886_v15 = vmul.f32 0.088388346, %v3838_v19  ;;  %v11189_v18 = vpop.f32.mrb[73].mxu1 }
0x1692   :  { %v3841_v29 = vpop.f32.mrb[74].mxu1 }
0x1693   :  { %v3887_v12 = vmul.f32 0.088388346, %v3841_v29  ;;  %v11190_v48 = vpop.f32.mrb[75].mxu1  ;;  %v3890_v33 = vsel %vm705_vm2, %v3886_v15, -inf }
0x1694   :  { %3891 = vmax.xlane.f32.xlu0 %v3890_v33  ;;  %v11725_v48 = vld [vmem:[#allocation11 + $0xb0] sm:$0xff]   ;;  %v11726_v33 = vld [vmem:[#allocation11 + $0xb8] sm:$0xff]  }
0x1695   :  { %v3893_v49 = vsel %vm705_vm2, %v3887_v12, -inf }
0x1696   :  { %3894 = vmax.xlane.f32.xlu1 %v3893_v49 }
0x16a1   :  { %v3879_v0 = vpop.f32.mrb[76].mxu1 }
0x16a2   :  { %v3888_v5 = vmul.f32 0.088388346, %v3879_v0  ;;  %v11195_v31 = vpop.f32.mrb[77].mxu1 }
0x16a3   :  { %v3882_v16 = vpop.f32.mrb[78].mxu1 }
0x16a4   :  { %v3889_v28 = vmul.f32 0.088388346, %v3882_v16  ;;  %v11196_v57 = vpop.f32.mrb[79].mxu1  ;;  %v3896_v47 = vsel %vm705_vm2, %v3888_v5, -inf }
0x16a5   :  { %3897 = vmax.xlane.f32.xlu0 %v3896_v47 }
0x16a6   :  { %v3899_v14 = vsel %vm705_vm2, %v3889_v28, -inf }
0x16a7   :  { %3900 = vmax.xlane.f32.xlu1 %v3899_v14 }
0x1721   :  { %v3892_v1 = vpop.xlane.xlu0 %3891 }
0x1722   :  { %v3902_v35 = vsub.f32 %v3886_v15, %v3892_v1 }
0x1723   :  { %v3895_v9 = vpop.xlane.xlu1 %3894 }
0x1724   :  { %v3906_v30 = vmul.f32 1.442695, %v3902_v35  ;;  %v3903_v10 = vsub.f32 %v3887_v12, %v3895_v9  ;;  %v11724_v12 = vld [vmem:[#allocation11 + $0xa8] sm:$0xff]   ;;  %v4048_v35 = vrot.slane %v13631_v32, %v13108_v41 }
0x1726   :  { %12303 = vpow2.f32 %v3906_v30  ;;  %v3908_v25 = vmul.f32 1.442695, %v3903_v10 }
0x1728   :  { %12305 = vpow2.f32 %v3908_v25 }
0x1730   :  { %v12304_v42 = vpop.eup %12303 }
0x1731   :  { %v3914_v22 = vsel %vm705_vm2, %v12304_v42, 0.0 }
0x1732   :  { %v12306_v7 = vpop.eup %12305  ;;  %v3898_v4 = vpop.xlane.xlu0 %3897  ;;  %3915 = vadd.xlane.f32.xlu0 %v3914_v22 }
0x1733   :  { %v3904_v43 = vsub.f32 %v3888_v5, %v3898_v4  ;;  %v3917_v17 = vsel %vm705_vm2, %v12306_v7, 0.0 }
0x1734   :  { %v3901_v34 = vpop.xlane.xlu1 %3900  ;;  %3918 = vadd.xlane.f32.xlu1 %v3917_v17 }
0x1735   :  { %v3910_v52 = vmul.f32 1.442695, %v3904_v43  ;;  %v3905_v45 = vsub.f32 %v3889_v28, %v3901_v34 }
0x1737   :  { %12307 = vpow2.f32 %v3910_v52  ;;  %v3912_v23 = vmul.f32 1.442695, %v3905_v45  ;;  %v11729_v45 = vld [vmem:[#allocation13 + $0x204] ss:$16 sps:$4 sm:$0xff]  }
0x1738   :  { %4428 = vmatprep.subr.bf16.mxu0 %v11729_v45 }
0x1739   :  { %12309 = vpow2.f32 %v3912_v23  ;;  %v11730_v23 = vld [vmem:[#allocation13 + $0x208] ss:$16 sps:$4 sm:$0xff]  }
0x1741   :  { %v12308_v59 = vpop.eup %12307 }
0x1742   :  { %v3920_v63 = vsel %vm705_vm2, %v12308_v59, 0.0 }
0x1743   :  { %v12310_v60 = vpop.eup %12309  ;;  %3921 = vadd.xlane.f32.xlu0 %v3920_v63  ;;  %v11738_v63 = vld [vmem:[#allocation13 + $0x22c] ss:$16 sps:$4 sm:$0xff]  }
0x1744   :  { %v3923_v50 = vsel %vm705_vm2, %v12310_v60, 0.0 }
0x1745   :  { %3924 = vadd.xlane.f32.xlu1 %v3923_v50 }
0x17bf   :  { %v3916_v39 = vpop.xlane.xlu0 %3915 }
0x17c0   :  { %12311 = vrcp.f32 %v3916_v39 }
0x17c1   :  { %v3919_v3 = vpop.xlane.xlu1 %3918 }
0x17c2   :  { %12313 = vrcp.f32 %v3919_v3 }
0x17ca   :  { %v12312_v56 = vpop.eup %12311 }
0x17cb   :  { %v3930_v37 = vmul.f32 %v12312_v56, %v12304_v42 }
0x17cc   :  { %v12314_v26 = vpop.eup %12313 }
0x17cd   :  { %v3931_v58 = vmul.f32 %v12314_v26, %v12306_v7 }
0x17cf   :  { %v3934_v13 = vpack.c.bf16 %v3931_v58, %v3930_v37 }
0x17d0   :  { %v3922_v38 = vpop.xlane.xlu0 %3921 }
0x17d1   :  { %12315 = vrcp.f32 %v3922_v38  ;;  %11200 = vmatmul.mubr.msk.bf16.vlgmr.msra.gmra.mrb[80].mxu1 %vm705_vm2, %v3934_v13 }
0x17d2   :  { %v3925_v6 = vpop.xlane.xlu1 %3924  ;;  %11210 = vmatpush3.bf16.msra.mxu1 %v11719_v62 }
0x17d3   :  { %12317 = vrcp.f32 %v3925_v6  ;;  %11211 = vmatprep.subr.bf16.mxu1 %v11720_v8 }
0x17d6   :  { %11212 = vmatpush3.bf16.msra.mxu1 %v11720_v8 }
0x17d7   :  { %11213 = vmatprep.subr.bf16.mxu1 %v11721_v46 }
0x17da   :  { %11214 = vmatpush3.bf16.msra.mxu1 %v11721_v46 }
0x17db   :  { %v12316_v2 = vpop.eup %12315  ;;  %11215 = vmatprep.subr.bf16.mxu1 %v11722_v51 }
0x17dc   :  { %v3932_v15 = vmul.f32 %v12316_v2, %v12308_v59  ;;  %v11732_v59 = vld [vmem:[#allocation13 + $0x20c] ss:$16 sps:$4 sm:$0xff]  }
0x17dd   :  { %v12318_v19 = vpop.eup %12317 }
0x17de   :  { %v3933_v18 = vmul.f32 %v12318_v19, %v12310_v60  ;;  %11216 = vmatpush3.bf16.msra.mxu1 %v11722_v51  ;;  %v11736_v60 = vld [vmem:[#allocation13 + $0x228] ss:$16 sps:$4 sm:$0xff]   ;;  %v11744_v19 = vld [vmem:[#allocation13 + $0x24c] ss:$16 sps:$4 sm:$0xff]  }
0x17df   :  { %11217 = vmatprep.subr.bf16.mxu1 %v11723_v44 }
0x17e0   :  { %v3935_v29 = vpack.c.bf16 %v3933_v18, %v3932_v15  ;;  %v11739_v15 = vld [vmem:[#allocation13 + $0x240] ss:$16 sps:$4 sm:$0xff]   ;;  %v11742_v18 = vld [vmem:[#allocation13 + $0x248] ss:$16 sps:$4 sm:$0xff]  }
0x17e2   :  { %11206 = vmatmul.mubr.msk.bf16.vlgmr.msra.gmra.mrb[72].mxu0 %vm705_vm2, %v3935_v29  ;;  %11218 = vmatpush3.bf16.msra.mxu1 %v11723_v44  ;;  %v11741_v44 = vld [vmem:[#allocation13 + $0x244] ss:$16 sps:$4 sm:$0xff]  }
0x17e3   :  { %4460 = vmatprep.mubr.bf16.mxu0 %v12839_v55  ;;  %11219 = vmatprep.subr.bf16.mxu1 %v11724_v12  ;;  %v11747_v29 = vld [vmem:[#allocation13 + $0x264] ss:$16 sps:$4 sm:$0xff]  }
0x17e6   :  { %11220 = vmatpush3.bf16.msra.mxu1 %v11724_v12  ;;  %v11750_v12 = vld [vmem:[#allocation13 + $0x26c] ss:$16 sps:$4 sm:$0xff]  }
0x17e7   :  { %11221 = vmatprep.subr.bf16.mxu1 %v11725_v48 }
0x17ea   :  { %11222 = vmatpush3.bf16.msra.mxu1 %v11725_v48  ;;  %v11745_v48 = vld [vmem:[#allocation13 + $0x260] ss:$16 sps:$4 sm:$0xff]  }
0x17eb   :  { %11223 = vmatprep.subr.bf16.mxu1 %v11726_v33 }
0x17ee   :  { %11224 = vmatpush3.bf16.msra.mxu1 %v11726_v33  ;;  %v11748_v33 = vld [vmem:[#allocation13 + $0x268] ss:$16 sps:$4 sm:$0xff]  }
0x17ef   :  { %4481 = vmatprep.subr.bf16.mxu1 %v11732_v59 }
0x18a4   :  { %v3975_v49 = vpop.f32.mrb[80].mxu1 }
0x18a5   :  { %v11201_v0 = vpop.f32.mrb[81].mxu1 }
0x18a6   :  { %v3978_v5 = vpop.f32.mrb[82].mxu1  ;;  %v11756_v0 = vld [vmem:[#allocation13 + $0x28c] ss:$16 sps:$4 sm:$0xff]  }
0x18a7   :  { %v4026_v31 = vpack.c.bf16 %v3978_v5, %v3975_v49  ;;  %v11202_v16 = vpop.f32.mrb[83].mxu1  ;;  %v11753_v49 = vld [vmem:[#allocation13 + $0x284] ss:$16 sps:$4 sm:$0xff]   ;;  %v11751_v5 = vld [vmem:[#allocation13 + $0x280] ss:$16 sps:$4 sm:$0xff]  }
0x18a8   :  { %v11759_v16 = vld [vmem:[#allocation13 + $0x2a4] ss:$16 sps:$4 sm:$0xff]  }
0x18a9   :  { %11225 = vmatprep.mubr.bf16.mxu1 %v4026_v31  ;;  %v11754_v31 = vld [vmem:[#allocation13 + $0x288] ss:$16 sps:$4 sm:$0xff]  }
0x18b5   :  { %v4019_v28 = vpop.f32.mrb[72].mxu0 }
0x18b6   :  { %v11207_v57 = vpop.f32.mrb[73].mxu0 }
0x18b7   :  { %v4022_v47 = vpop.f32.mrb[74].mxu0  ;;  %v11757_v57 = vld [vmem:[#allocation13 + $0x2a0] ss:$16 sps:$4 sm:$0xff]  }
0x18b8   :  { %v4027_v14 = vpack.c.bf16 %v4022_v47, %v4019_v28  ;;  %v11208_v1 = vpop.f32.mrb[75].mxu0  ;;  %v11762_v28 = vld [vmem:[#allocation13 + $0x2ac] ss:$16 sps:$4 sm:$0xff]   ;;  %v11760_v47 = vld [vmem:[#allocation13 + $0x2a8] ss:$16 sps:$4 sm:$0xff]  }
0x18b9   :  { %v11765_v1 = vld [vmem:[#allocation13 + $0x2c4] ss:$16 sps:$4 sm:$0xff]  }
0x18ba   :  { %11226 = vmatmul.mubr.bf16.vlgmr.msra.gmra.mrb[84].mxu1 %v4027_v14  ;;  %v11763_v14 = vld [vmem:[#allocation13 + $0x2c0] ss:$16 sps:$4 sm:$0xff]  }
0x18bb   :  { %4513 = vmatprep.mubr.bf16.mxu1 %v12839_v55  ;;  %4482 = vmatpush1.bf16.msra.mxu1 %v11730_v23 }
0x18bc   :  { %4483 = vmatprep.subr.bf16.mxu1 %v11738_v63 }
0x18bf   :  { %4484 = vmatpush1.bf16.msra.mxu1 %v11736_v60 }
0x18c0   :  { %4485 = vmatprep.subr.bf16.mxu1 %v11744_v19 }
0x18c3   :  { %4486 = vmatpush1.bf16.msra.mxu1 %v11742_v18 }
0x18c4   :  { %4487 = vmatprep.subr.bf16.mxu1 %v11750_v12 }
0x18c7   :  { %4488 = vmatpush1.bf16.msra.mxu1 %v11748_v33  ;;  %v11776_v33 = vld [vmem:[#allocation16 + $0x2c0] sm:$0xff]  }
0x18c8   :  { %4489 = vmatprep.subr.bf16.mxu1 %v11756_v0  ;;  %v11780_v0 = vld [vmem:[#allocation16 + $0x2c8] sm:$0xff]  }
0x18cb   :  { %4490 = vmatpush1.bf16.msra.mxu1 %v11754_v31  ;;  %v11782_v31 = vld [vmem:[#allocation16 + $0x288] sm:$0xff]  }
0x18cc   :  { %4491 = vmatprep.subr.bf16.mxu1 %v11762_v28  ;;  %v11784_v28 = vld [vmem:[#allocation16 + $0x2d0] sm:$0xff]  }
0x18cf   :  { %4492 = vmatpush1.bf16.msra.mxu1 %v11760_v47  ;;  %v11786_v47 = vld [vmem:[#allocation16 + $0x290] sm:$0xff]  }
0x198d   :  { %v11227_v9 = vpop.f32.mrb[84].mxu1 }
0x198e   :  { %v4131_v30 = vpop.f32.mrb[85].mxu1  ;;  %v4140_v22 = vadd.f32 %v11227_v9, %v4048_v35  ;;  %v11768_v9 = vld [vmem:[#allocation13 + $0x2cc] ss:$16 sps:$4 sm:$0xff]  }
0x198f   :  { %v4132_v10 = vadd.f32 %v4131_v30, %v4048_v35  ;;  %v11228_v25 = vpop.f32.mrb[86].mxu1  ;;  %v11771_v30 = vld [vmem:[#allocation13 + $0x2e4] ss:$16 sps:$4 sm:$0xff]   ;;  %4493 = vmatprep.subr.bf16.mxu1 %v11768_v9  ;;  %v11790_v9 = vld [vmem:[#allocation16 + $0x298] sm:$0xff]  }
0x1990   :  { %v4134_v42 = vpop.f32.mrb[87].mxu1  ;;  %v4143_v43 = vadd.f32 %v11228_v25, %v4048_v35  ;;  %v13677_v34 = vadd.f32 %v4140_v22, %v13602_v27  ;;  %v11733_v27 = vld [vmem:[#allocation13 + $0x220] ss:$16 sps:$4 sm:$0xff]  }
0x1991   :  { %v13670_v7 = vadd.f32 %v4132_v10, %v13594_v24  ;;  %v4135_v4 = vadd.f32 %v4134_v42, %v4048_v35  ;;  %v11727_v24 = vld [vmem:[#allocation13 + $0x200] ss:$16 sps:$4 sm:$0xff]   ;;  %v11766_v35 = vld [vmem:[#allocation13 + $0x2c8] ss:$16 sps:$4 sm:$0xff]   ;;  %v11774_v10 = vld [vmem:[#allocation13 + $0x2ec] ss:$16 sps:$4 sm:$0xff]  }
0x1992   :  { %v13681_v52 = vadd.f32 %v4143_v43, %v13606_v36  ;;  %4429 = vmatpush1.bf16.msra.mxu0 %v11727_v24  ;;  %v11769_v25 = vld [vmem:[#allocation13 + $0x2e0] ss:$16 sps:$4 sm:$0xff]   ;;  %4494 = vmatpush1.bf16.msra.mxu1 %v11766_v35  ;;  %v11772_v42 = vld [vmem:[#allocation13 + $0x2e8] ss:$16 sps:$4 sm:$0xff]  }
0x1993   :  { %v13673_v17 = vadd.f32 %v4135_v4, %v13598_v61  ;;  %4150 = vadd.xlane.f32.xlu0 %v13670_v7  ;;  %v11735_v61 = vld [vmem:[#allocation13 + $0x224] ss:$16 sps:$4 sm:$0xff]   ;;  %4495 = vmatprep.subr.bf16.mxu1 %v11774_v10  ;;  %v11789_v35 = vld [vmem:[#allocation16 + $0x218] sm:$0xff]  }
0x1994   :  { %4430 = vmatprep.subr.bf16.mxu0 %v11735_v61  ;;  %v11792_v10 = vld [vmem:[#allocation16 + $0x2e0] sm:$0xff]  }
0x1995   :  { %4152 = vadd.xlane.f32.xlu1 %v13673_v17 }
0x1996   :  { %4431 = vmatpush1.bf16.msra.mxu0 %v11733_v27  ;;  %4496 = vmatpush1.bf16.msra.mxu1 %v11772_v42  ;;  %v11794_v42 = vld [vmem:[#allocation16 + $0x2a0] sm:$0xff]  }
0x1997   :  { %4154 = vadd.xlane.f32.xlu0 %v13677_v34  ;;  %4432 = vmatprep.subr.bf16.mxu0 %v11741_v44 }
0x1998   :  { %10745 = vmatprep.subr.bf16.mxu1 %v11776_v33 }
0x1999   :  { %4156 = vadd.xlane.f32.xlu1 %v13681_v52 }
0x199a   :  { %4433 = vmatpush1.bf16.msra.mxu0 %v11739_v15 }
0x199b   :  { %4434 = vmatprep.subr.bf16.mxu0 %v11747_v29 }
0x199e   :  { %4435 = vmatpush1.bf16.msra.mxu0 %v11745_v48  ;;  %v11775_v48 = vld [vmem:[#allocation16 + $0x240] sm:$0xff]  }
0x199f   :  { %4436 = vmatprep.subr.bf16.mxu0 %v11753_v49  ;;  %v11777_v49 = vld [vmem:[#allocation16 + $0x200] sm:$0xff]  }
0x19a2   :  { %4437 = vmatpush1.bf16.msra.mxu0 %v11751_v5  ;;  %v11781_v5 = vld [vmem:[#allocation16 + $0x208] sm:$0xff]  }
0x19a3   :  { %4438 = vmatprep.subr.bf16.mxu0 %v11759_v16  ;;  %v11783_v16 = vld [vmem:[#allocation16 + $0x250] sm:$0xff]  }
0x19a6   :  { %4439 = vmatpush1.bf16.msra.mxu0 %v11757_v57  ;;  %v11785_v57 = vld [vmem:[#allocation16 + $0x210] sm:$0xff]  }
0x19a7   :  { %4440 = vmatprep.subr.bf16.mxu0 %v11765_v1  ;;  %v11788_v1 = vld [vmem:[#allocation16 + $0x2d8] sm:$0xff]  }
0x19aa   :  { %4441 = vmatpush1.bf16.msra.mxu0 %v11763_v14  ;;  %v11787_v14 = vld [vmem:[#allocation16 + $0x258] sm:$0xff]  }
0x19ab   :  { %4442 = vmatprep.subr.bf16.mxu0 %v11771_v30  ;;  %v11791_v30 = vld [vmem:[#allocation16 + $0x260] sm:$0xff]  }
0x19ae   :  { %4443 = vmatpush1.bf16.msra.mxu0 %v11769_v25  ;;  %v11793_v25 = vld [vmem:[#allocation16 + $0x220] sm:$0xff]  }
0x19af   :  { %10717 = vmatprep.subr.bf16.mxu0 %v11775_v48 }
0x1a20   :  { %v4151_v36 = vpop.xlane.xlu0 %4150 }
0x1a21   :  { %v4158_v50 = vmul.f32 0.0078125, %v4151_v36 }
0x1a22   :  { %v4153_v62 = vpop.xlane.xlu1 %4152 }
0x1a23   :  { %v13686_v39 = vsub.f32 %v13670_v7, %v4158_v50  ;;  %v4159_v3 = vmul.f32 0.0078125, %v4153_v62  ;;  %v4197_v50 = vrot.slane %v13631_v32, %v13169_v53 }
0x1a24   :  { %v4155_v56 = vpop.xlane.xlu0 %4154 }
0x1a25   :  { %v13689_v26 = vsub.f32 %v13673_v17, %v4159_v3  ;;  %v4160_v37 = vmul.f32 0.0078125, %v4155_v56  ;;  %v4166_v58 = vmul.f32 %v13686_v39, %v13686_v39 }
0x1a26   :  { %v4157_v13 = vpop.xlane.xlu1 %4156 }
0x1a27   :  { %v13694_v8 = vsub.f32 %v13677_v34, %v4160_v37  ;;  %v4161_v38 = vmul.f32 0.0078125, %v4157_v13  ;;  %4170 = vadd.xlane.f32.xlu0 %v4166_v58  ;;  %v4167_v6 = vmul.f32 %v13689_v26, %v13689_v26  ;;  %v4205_v13 = vrot.slane %v13631_v32, %v13174_v54 }
0x1a29   :  { %v13699_v46 = vsub.f32 %v13681_v52, %v4161_v38  ;;  %4172 = vadd.xlane.f32.xlu1 %v4167_v6  ;;  %v4168_v51 = vmul.f32 %v13694_v8, %v13694_v8 }
0x1a2b   :  { %4174 = vadd.xlane.f32.xlu0 %v4168_v51  ;;  %v4169_v2 = vmul.f32 %v13699_v46, %v13699_v46 }
0x1a2d   :  { %4176 = vadd.xlane.f32.xlu1 %v4169_v2 }
0x1ab4   :  { %v4171_v22 = vpop.xlane.xlu0 %4170 }
0x1ab5   :  { %v4178_v4 = vmul.f32 0.0078125, %v4171_v22  ;;  %v11795_v22 = vld [vmem:[#allocation16 + $0x268] sm:$0xff]  }
0x1ab6   :  { %v4173_v43 = vpop.xlane.xlu1 %4172 }
0x1ab7   :  { %v4182_v24 = vadd.f32 1e-05, %v4178_v4  ;;  %v4179_v45 = vmul.f32 0.0078125, %v4173_v43  ;;  %v11796_v4 = vld [vmem:[#allocation16 + $0x2e8] sm:$0xff]  }
0x1ab8   :  { %v4175_v23 = vpop.xlane.xlu0 %4174  ;;  %v11797_v43 = vld [vmem:[#allocation16 + $0x228] sm:$0xff]  }
0x1ab9   :  { %12319 = vrsqrt.f32 %v4182_v24  ;;  %v4183_v59 = vadd.f32 1e-05, %v4179_v45  ;;  %v4180_v61 = vmul.f32 0.0078125, %v4175_v23  ;;  %v11798_v24 = vld [vmem:[#allocation16 + $0x2a8] sm:$0xff]   ;;  %v11799_v45 = vld [vmem:[#allocation16 + $0x270] sm:$0xff]  }
0x1aba   :  { %v4177_v63 = vpop.xlane.xlu1 %4176  ;;  %v11800_v23 = vld [vmem:[#allocation16 + $0x2f0] sm:$0xff]  }
0x1abb   :  { %12321 = vrsqrt.f32 %v4183_v59  ;;  %v4184_v27 = vadd.f32 1e-05, %v4180_v61  ;;  %v4181_v60 = vmul.f32 0.0078125, %v4177_v63  ;;  %v11801_v59 = vld [vmem:[#allocation16 + $0x230] sm:$0xff]   ;;  %v11803_v63 = vld [vmem:[#allocation16 + $0x278] sm:$0xff]  }
0x1abc   :  { %v11802_v61 = vld [vmem:[#allocation16 + $0x2b0] sm:$0xff]  }
0x1abd   :  { %12323 = vrsqrt.f32 %v4184_v27  ;;  %v4185_v36 = vadd.f32 1e-05, %v4181_v60  ;;  %v11804_v27 = vld [vmem:[#allocation16 + $0x2f8] sm:$0xff]  }
0x1abe   :  { %v11805_v60 = vld [vmem:[#allocation16 + $0x238] sm:$0xff]  }
0x1abf   :  { %12325 = vrsqrt.f32 %v4185_v36  ;;  %v11806_v36 = vld [vmem:[#allocation16 + $0x2b8] sm:$0xff]  }
0x1ac3   :  { %v12320_v62 = vpop.eup %12319 }
0x1ac4   :  { %v4190_v3 = vmul.f32 %v12320_v62, %v13686_v39 }
0x1ac5   :  { %v12322_v56 = vpop.eup %12321 }
0x1ac6   :  { %v4191_v37 = vmul.f32 %v12322_v56, %v13689_v26  ;;  %v4198_v58 = vmul.f32 %v4197_v50, %v4190_v3 }
0x1ac7   :  { %v12324_v38 = vpop.eup %12323 }
0x1ac8   :  { %v4199_v6 = vmul.f32 %v4197_v50, %v4191_v37  ;;  %v4206_v2 = vadd.f32 %v4205_v13, %v4198_v58  ;;  %v4192_v19 = vmul.f32 %v12324_v38, %v13694_v8  ;;  %v11778_v8 = vld [vmem:[#allocation16 + $0x280] sm:$0xff]  }
0x1ac9   :  { %v12326_v51 = vpop.eup %12325 }
0x1aca   :  { %v4207_v44 = vadd.f32 %v4205_v13, %v4199_v6  ;;  %v4193_v15 = vmul.f32 %v12326_v51, %v13699_v46  ;;  %v4200_v39 = vmul.f32 %v4197_v50, %v4192_v19  ;;  %v11779_v46 = vld [vmem:[#allocation16 + $0x248] sm:$0xff]  }
0x1acc   :  { %v4210_v18 = vpack.c.bf16 %v4207_v44, %v4206_v2  ;;  %v4201_v29 = vmul.f32 %v4197_v50, %v4193_v15  ;;  %v4208_v32 = vadd.f32 %v4205_v13, %v4200_v39  ;;  %v4246_v50 = vld [vmem:[#allocation14 + $0x2] ss:$8 sm:$0xf] }
0x1acd   :  { %v13716_v62 = vrot.slane %v4246_v50, %v13084_v11  ;;  %v13719_v3 = vrot.slane %v4246_v50, %v13108_v41  ;;  %v13722_v56 = vrot.slane %v4246_v50, %v13092_v20  ;;  %v13725_v37 = vrot.slane %v4246_v50, %v13169_v53 }
0x1ace   :  { %4461 = vmatmul.mubr.bf16.vlgmr.msra.gmra.mrb[76].mxu0 %v4210_v18  ;;  %4514 = vmatmul.mubr.bf16.vlgmr.msra.gmra.mrb[88].mxu1 %v4210_v18  ;;  %v4209_v26 = vadd.f32 %v4205_v13, %v4201_v29 }
0x1acf   :  { %4470 = vmatprep.mubr.bf16.mxu0 %v12839_v55  ;;  %4523 = vmatprep.mubr.bf16.mxu1 %v12839_v55 }
0x1ad0   :  { %v4211_v12 = vpack.c.bf16 %v4209_v26, %v4208_v32  ;;  %10718 = vmatpush3.bf16.msra.mxu0 %v11777_v49  ;;  %10746 = vmatpush3.bf16.msra.mxu1 %v11778_v8 }
0x1ad1   :  { %10719 = vmatprep.subr.bf16.mxu0 %v11779_v46  ;;  %10747 = vmatprep.subr.bf16.mxu1 %v11780_v0 }
0x1ad4   :  { %10720 = vmatpush3.bf16.msra.mxu0 %v11781_v5  ;;  %10748 = vmatpush3.bf16.msra.mxu1 %v11782_v31 }
0x1ad5   :  { %10721 = vmatprep.subr.bf16.mxu0 %v11783_v16  ;;  %10749 = vmatprep.subr.bf16.mxu1 %v11784_v28 }
0x1ad6   :  { %4471 = vmatmul.mubr.bf16.gmra.mrb[80].mxu0 %v4211_v12  ;;  %4524 = vmatmul.mubr.bf16.gmra.mrb[92].mxu1 %v4211_v12 }
0x1ad8   :  { %10722 = vmatpush3.bf16.msra.mxu0 %v11785_v57  ;;  %10750 = vmatpush3.bf16.msra.mxu1 %v11786_v47 }
0x1ad9   :  { %10723 = vmatprep.subr.bf16.mxu0 %v11787_v14  ;;  %10751 = vmatprep.subr.bf16.mxu1 %v11788_v1 }
0x1adc   :  { %10724 = vmatpush3.bf16.msra.mxu0 %v11789_v35  ;;  %10752 = vmatpush3.bf16.msra.mxu1 %v11790_v9 }
0x1add   :  { %10725 = vmatprep.subr.bf16.mxu0 %v11791_v30  ;;  %10753 = vmatprep.subr.bf16.mxu1 %v11792_v10 }
0x1ae0   :  { %10726 = vmatpush3.bf16.msra.mxu0 %v11793_v25  ;;  %10754 = vmatpush3.bf16.msra.mxu1 %v11794_v42 }
0x1ae1   :  { %10727 = vmatprep.subr.bf16.mxu0 %v11795_v22  ;;  %10755 = vmatprep.subr.bf16.mxu1 %v11796_v4 }
0x1ae4   :  { %10728 = vmatpush3.bf16.msra.mxu0 %v11797_v43  ;;  %10756 = vmatpush3.bf16.msra.mxu1 %v11798_v24 }
0x1ae5   :  { %10729 = vmatprep.subr.bf16.mxu0 %v11799_v45  ;;  %10757 = vmatprep.subr.bf16.mxu1 %v11800_v23 }
0x1ae8   :  { %10730 = vmatpush3.bf16.msra.mxu0 %v11801_v59  ;;  %10758 = vmatpush3.bf16.msra.mxu1 %v11802_v61 }
0x1ae9   :  { %10731 = vmatprep.subr.bf16.mxu0 %v11803_v63  ;;  %10759 = vmatprep.subr.bf16.mxu1 %v11804_v27 }
0x1aec   :  { %10732 = vmatpush3.bf16.msra.mxu0 %v11805_v60  ;;  %10760 = vmatpush3.bf16.msra.mxu1 %v11806_v36 }
0x1ba1   :  { %v4462_v58 = vpop.f32.mrb[76].mxu0  ;;  %v4515_v13 = vpop.f32.mrb[88].mxu1 }
0x1ba2   :  { %v13728_v38 = vadd.f32 %v4462_v58, %v13716_v62  ;;  %v13731_v6 = vadd.f32 %v4515_v13, %v13719_v3  ;;  %v4464_v51 = vpop.f32.mrb[77].mxu0  ;;  %v4517_v2 = vpop.f32.mrb[89].mxu1 }
0x1ba3   :  { %v13734_v44 = vadd.f32 %v4464_v51, %v13722_v56  ;;  %v13737_v19 = vadd.f32 %v4517_v2, %v13725_v37  ;;  %v4466_v15 = vpop.f32.mrb[78].mxu0  ;;  %v4519_v18 = vpop.f32.mrb[90].mxu1 }
0x1ba4   :  { %v4534_v29 = vmul.f32 %v13728_v38, %v13728_v38  ;;  %v4536_v39 = vmul.f32 %v13731_v6, %v13731_v6  ;;  %v13744_v26 = vadd.f32 %v4466_v15, %v13716_v62  ;;  %v13747_v32 = vadd.f32 %v4519_v18, %v13719_v3  ;;  %v4468_v12 = vpop.f32.mrb[79].mxu0  ;;  %v4521_v48 = vpop.f32.mrb[91].mxu1 }
0x1ba5   :  { %v4535_v33 = vmul.f32 %v13734_v44, %v13734_v44  ;;  %v4537_v49 = vmul.f32 %v13737_v19, %v13737_v19  ;;  %v13754_v8 = vadd.f32 %v4468_v12, %v13722_v56  ;;  %v13757_v46 = vadd.f32 %v4521_v48, %v13725_v37 }
0x1ba6   :  { %v4550_v0 = vmul.f32 %v4534_v29, %v13728_v38  ;;  %v4552_v5 = vmul.f32 %v4536_v39, %v13731_v6  ;;  %v4538_v31 = vmul.f32 %v13744_v26, %v13744_v26  ;;  %v4540_v16 = vmul.f32 %v13747_v32, %v13747_v32 }
0x1ba7   :  { %v4551_v28 = vmul.f32 %v4535_v33, %v13734_v44  ;;  %v4553_v57 = vmul.f32 %v4537_v49, %v13737_v19  ;;  %v4539_v47 = vmul.f32 %v13754_v8, %v13754_v8  ;;  %v4541_v14 = vmul.f32 %v13757_v46, %v13757_v46 }
0x1ba8   :  { %v4566_v1 = vmul.f32 0.044715, %v4550_v0  ;;  %v4568_v35 = vmul.f32 0.044715, %v4552_v5  ;;  %v4554_v9 = vmul.f32 %v4538_v31, %v13744_v26  ;;  %v4556_v30 = vmul.f32 %v4540_v16, %v13747_v32 }
0x1ba9   :  { %v4567_v10 = vmul.f32 0.044715, %v4551_v28  ;;  %v4569_v25 = vmul.f32 0.044715, %v4553_v57  ;;  %v4555_v42 = vmul.f32 %v4539_v47, %v13754_v8  ;;  %v4557_v22 = vmul.f32 %v4541_v14, %v13757_v46  ;;  %v4472_v4 = vpop.f32.mrb[80].mxu0  ;;  %v4525_v43 = vpop.f32.mrb[92].mxu1 }
0x1baa   :  { %v4582_v24 = vadd.f32 %v4566_v1, %v13728_v38  ;;  %v4584_v45 = vadd.f32 %v4568_v35, %v13731_v6  ;;  %v4570_v23 = vmul.f32 0.044715, %v4554_v9  ;;  %v4572_v59 = vmul.f32 0.044715, %v4556_v30  ;;  %v4474_v61 = vpop.f32.mrb[81].mxu0  ;;  %v4527_v63 = vpop.f32.mrb[93].mxu1 }
0x1bab   :  { %v4583_v27 = vadd.f32 %v4567_v10, %v13734_v44  ;;  %v4585_v60 = vadd.f32 %v4569_v25, %v13737_v19  ;;  %v4571_v36 = vmul.f32 0.044715, %v4555_v42  ;;  %v4573_v50 = vmul.f32 0.044715, %v4557_v22  ;;  %v4476_v58 = vpop.f32.mrb[82].mxu0  ;;  %v4529_v13 = vpop.f32.mrb[94].mxu1 }
0x1bac   :  { %v4598_v51 = vmul.f32 0.7978846, %v4582_v24  ;;  %v4600_v2 = vmul.f32 0.7978846, %v4584_v45  ;;  %v4586_v15 = vadd.f32 %v4570_v23, %v13744_v26  ;;  %v4588_v18 = vadd.f32 %v4572_v59, %v13747_v32  ;;  %v4478_v29 = vpop.f32.mrb[83].mxu0  ;;  %v4531_v39 = vpop.f32.mrb[95].mxu1 }
0x1bad   :  { %v4599_v12 = vmul.f32 0.7978846, %v4583_v27  ;;  %v4601_v48 = vmul.f32 0.7978846, %v4585_v60  ;;  %v4587_v33 = vadd.f32 %v4571_v36, %v13754_v8  ;;  %v4589_v49 = vadd.f32 %v4573_v50, %v13757_v46 }
0x1bae   :  { %12327 = vtanh.f32 %v4598_v51  ;;  %v4602_v0 = vmul.f32 0.7978846, %v4586_v15  ;;  %v4604_v5 = vmul.f32 0.7978846, %v4588_v18  ;;  %v13784_v31 = vadd.f32 %v4472_v4, %v13716_v62 }
0x1baf   :  { %12329 = vtanh.f32 %v4600_v2  ;;  %v4603_v16 = vmul.f32 0.7978846, %v4587_v33  ;;  %v4605_v28 = vmul.f32 0.7978846, %v4589_v49  ;;  %v13787_v57 = vadd.f32 %v4525_v43, %v13719_v3 }
0x1bb0   :  { %12331 = vtanh.f32 %v4599_v12  ;;  %v4542_v47 = vmul.f32 %v13784_v31, %v13784_v31  ;;  %v13792_v14 = vadd.f32 %v4474_v61, %v13722_v56  ;;  %v13795_v1 = vadd.f32 %v4527_v63, %v13725_v37 }
0x1bb1   :  { %12333 = vtanh.f32 %v4601_v48  ;;  %v4544_v35 = vmul.f32 %v13787_v57, %v13787_v57  ;;  %v13800_v9 = vadd.f32 %v4476_v58, %v13716_v62  ;;  %v13803_v30 = vadd.f32 %v4529_v13, %v13719_v3 }
0x1bb2   :  { %12335 = vtanh.f32 %v4602_v0  ;;  %v4558_v10 = vmul.f32 %v4542_v47, %v13784_v31  ;;  %v4543_v25 = vmul.f32 %v13792_v14, %v13792_v14  ;;  %v4545_v42 = vmul.f32 %v13795_v1, %v13795_v1 }
0x1bb3   :  { %12337 = vtanh.f32 %v4604_v5  ;;  %v4560_v22 = vmul.f32 %v4544_v35, %v13787_v57  ;;  %v4546_v4 = vmul.f32 %v13800_v9, %v13800_v9  ;;  %v4548_v62 = vmul.f32 %v13803_v30, %v13803_v30 }
0x1bb4   :  { %12339 = vtanh.f32 %v4603_v16  ;;  %v4574_v3 = vmul.f32 0.044715, %v4558_v10  ;;  %v4559_v43 = vmul.f32 %v4543_v25, %v13792_v14  ;;  %v4561_v24 = vmul.f32 %v4545_v42, %v13795_v1 }
0x1bb5   :  { %12341 = vtanh.f32 %v4605_v28  ;;  %v4576_v45 = vmul.f32 0.044715, %v4560_v22  ;;  %v4562_v23 = vmul.f32 %v4546_v4, %v13800_v9  ;;  %v4564_v59 = vmul.f32 %v4548_v62, %v13803_v30 }
0x1bb6   :  { %v4590_v61 = vadd.f32 %v4574_v3, %v13784_v31  ;;  %v4575_v63 = vmul.f32 0.044715, %v4559_v43  ;;  %v4577_v27 = vmul.f32 0.044715, %v4561_v24  ;;  %v13821_v60 = vadd.f32 %v4478_v29, %v13722_v56 }
0x1bb7   :  { %v4592_v36 = vadd.f32 %v4576_v45, %v13787_v57  ;;  %v4578_v50 = vmul.f32 0.044715, %v4562_v23  ;;  %v4580_v58 = vmul.f32 0.044715, %v4564_v59  ;;  %v13825_v13 = vadd.f32 %v4531_v39, %v13725_v37 }
0x1bb8   :  { %v12328_v51 = vpop.eup %12327  ;;  %v4606_v2 = vmul.f32 0.7978846, %v4590_v61  ;;  %v4591_v15 = vadd.f32 %v4575_v63, %v13792_v14  ;;  %v4593_v18 = vadd.f32 %v4577_v27, %v13795_v1  ;;  %v4547_v12 = vmul.f32 %v13821_v60, %v13821_v60 }
0x1bb9   :  { %v12330_v48 = vpop.eup %12329  ;;  %v4630_v33 = vadd.f32 1.0, %v12328_v51  ;;  %v4608_v56 = vmul.f32 0.7978846, %v4592_v36  ;;  %v4594_v29 = vadd.f32 %v4578_v50, %v13800_v9  ;;  %v4596_v49 = vadd.f32 %v4580_v58, %v13803_v30 }
0x1bba   :  { %v12332_v0 = vpop.eup %12331  ;;  %v4632_v5 = vadd.f32 1.0, %v12330_v48  ;;  %12343 = vtanh.f32 %v4606_v2  ;;  %v4607_v37 = vmul.f32 0.7978846, %v4591_v15  ;;  %v4609_v39 = vmul.f32 0.7978846, %v4593_v18 }
0x1bbb   :  { %v12334_v16 = vpop.eup %12333  ;;  %v4646_v28 = vmul.f32 0.5, %v4630_v33  ;;  %12345 = vtanh.f32 %v4608_v56  ;;  %v4610_v47 = vmul.f32 0.7978846, %v4594_v29  ;;  %v4612_v35 = vmul.f32 0.7978846, %v4596_v49 }
0x1bbc   :  { %v12336_v10 = vpop.eup %12335  ;;  %v4648_v25 = vmul.f32 0.5, %v4632_v5  ;;  %12347 = vtanh.f32 %v4607_v37  ;;  %v4563_v42 = vmul.f32 %v4547_v12, %v13821_v60  ;;  %v4549_v22 = vmul.f32 %v13825_v13, %v13825_v13 }
0x1bbd   :  { %v12338_v4 = vpop.eup %12337  ;;  %v4662_v62 = vmul.f32 %v4646_v28, %v13728_v38  ;;  %v4634_v3 = vadd.f32 1.0, %v12336_v10  ;;  %12349 = vtanh.f32 %v4609_v39  ;;  %v4631_v43 = vadd.f32 1.0, %v12332_v0 }
0x1bbe   :  { %v12340_v24 = vpop.eup %12339  ;;  %v4664_v45 = vmul.f32 %v4648_v25, %v13731_v6  ;;  %v4636_v23 = vadd.f32 1.0, %v12338_v4  ;;  %12351 = vtanh.f32 %v4610_v47  ;;  %v4579_v59 = vmul.f32 0.044715, %v4563_v42 }
0x1bbf   :  { %v12342_v61 = vpop.eup %12341  ;;  %v4650_v63 = vmul.f32 0.5, %v4634_v3  ;;  %12353 = vtanh.f32 %v4612_v35  ;;  %v4565_v27 = vmul.f32 %v4549_v22, %v13825_v13  ;;  %v4635_v36 = vadd.f32 1.0, %v12340_v24 }
0x1bc0   :  { %v4652_v50 = vmul.f32 0.5, %v4636_v23  ;;  %v4595_v58 = vadd.f32 %v4579_v59, %v13821_v60  ;;  %v4647_v51 = vmul.f32 0.5, %v4631_v43  ;;  %v4633_v38 = vadd.f32 1.0, %v12334_v16 }
0x1bc1   :  { %v4666_v2 = vmul.f32 %v4650_v63, %v13744_v26  ;;  %v4581_v15 = vmul.f32 0.044715, %v4565_v27  ;;  %v4651_v18 = vmul.f32 0.5, %v4635_v36  ;;  %v4637_v12 = vadd.f32 1.0, %v12342_v61 }
0x1bc2   :  { %v4668_v6 = vmul.f32 %v4652_v50, %v13747_v32  ;;  %v4611_v48 = vmul.f32 0.7978846, %v4595_v58  ;;  %v4663_v33 = vmul.f32 %v4647_v51, %v13734_v44  ;;  %v4649_v56 = vmul.f32 0.5, %v4633_v38 }
0x1bc3   :  { %v4678_v29 = vpack.c.bf16 %v4666_v2, %v4662_v62  ;;  %v4597_v49 = vadd.f32 %v4581_v15, %v13825_v13  ;;  %v4667_v0 = vmul.f32 %v4651_v18, %v13754_v8  ;;  %v4653_v5 = vmul.f32 0.5, %v4637_v12 }
0x1bc4   :  { %v12344_v37 = vpop.eup %12343  ;;  %v4680_v39 = vpack.c.bf16 %v4668_v6, %v4664_v45  ;;  %12355 = vtanh.f32 %v4611_v48  ;;  %v4665_v26 = vmul.f32 %v4649_v56, %v13737_v19  ;;  %v12561_v56 = vld [vmem:[#allocation17 + $0x10] sm:$0x3f] }
0x1bc5   :  { %v12346_v16 = vpop.eup %12345  ;;  %v4613_v28 = vmul.f32 0.7978846, %v4597_v49  ;;  %v4679_v47 = vpack.c.bf16 %v4667_v0, %v4663_v33  ;;  %v4669_v32 = vmul.f32 %v4653_v5, %v13757_v46  ;;  %v4638_v35 = vadd.f32 1.0, %v12344_v37 }
0x1bc6   :  { %v12348_v10 = vpop.eup %12347  ;;  %v4640_v44 = vadd.f32 1.0, %v12346_v16 }
0x1bc7   :  { %v12350_v25 = vpop.eup %12349  ;;  %12357 = vtanh.f32 %v4613_v28  ;;  %4979 = vmatprep.mubr.bf16.mxu0 %v4679_v47  ;;  %v4681_v42 = vpack.c.bf16 %v4669_v32, %v4665_v26  ;;  %v4654_v62 = vmul.f32 0.5, %v4638_v35  ;;  %v4639_v43 = vadd.f32 1.0, %v12348_v10 }
0x1bc8   :  { %v12352_v22 = vpop.eup %12351  ;;  %4980 = vmatmul.mubr.bf16.vlgmr.msra.gmra.mrb[84].mxu0 %v4678_v29  ;;  %v4656_v3 = vmul.f32 0.5, %v4640_v44  ;;  %v4641_v61 = vadd.f32 1.0, %v12350_v25  ;;  %v4754_v29 = vrot.slane %v12561_v56, %v13326_v21 }
0x1bc9   :  { %v12354_v8 = vpop.eup %12353  ;;  %5028 = vmatprep.mubr.bf16.mxu1 %v4681_v42  ;;  %v4642_v4 = vadd.f32 1.0, %v12352_v22  ;;  %v4670_v46 = vmul.f32 %v4654_v62, %v13784_v31  ;;  %v4655_v50 = vmul.f32 0.5, %v4639_v43 }
0x1bca   :  { %5029 = vmatmul.mubr.bf16.vlgmr.msra.gmra.mrb[96].mxu1 %v4680_v39  ;;  %v4644_v19 = vadd.f32 1.0, %v12354_v8  ;;  %v4672_v63 = vmul.f32 %v4656_v3, %v13787_v57  ;;  %v4657_v18 = vmul.f32 0.5, %v4641_v61 }
0x1bcb   :  { %v4658_v24 = vmul.f32 0.5, %v4642_v4  ;;  %v4671_v12 = vmul.f32 %v4655_v50, %v13792_v14  ;;  %v11812_v50 = vld [vmem:[#allocation8 + $0x25c] ss:$12 sps:$4 sm:$0xff]  }
0x1bcc   :  { %v4660_v45 = vmul.f32 0.5, %v4644_v19  ;;  %v4673_v48 = vmul.f32 %v4657_v18, %v13795_v1 }
0x1bcd   :  { %v4674_v23 = vmul.f32 %v4658_v24, %v13800_v9 }
0x1bce   :  { %v12356_v59 = vpop.eup %12355  ;;  %v4676_v27 = vmul.f32 %v4660_v45, %v13803_v30 }
0x1bcf   :  { %v4643_v36 = vadd.f32 1.0, %v12356_v59  ;;  %v4682_v58 = vpack.c.bf16 %v4674_v23, %v4670_v46 }
0x1bd0   :  { %v4684_v51 = vpack.c.bf16 %v4676_v27, %v4672_v63  ;;  %v11807_v27 = vld [vmem:[#allocation8 + $0x240] ss:$12 sps:$4 sm:$0xff]  }
0x1bd1   :  { %v12358_v38 = vpop.eup %12357  ;;  %v4659_v2 = vmul.f32 0.5, %v4643_v36  ;;  %v11809_v36 = vld [vmem:[#allocation8 + $0x244] ss:$12 sps:$4 sm:$0xff]  }
0x1bd2   :  { %v4645_v15 = vadd.f32 1.0, %v12358_v38  ;;  %5292 = vmatprep.subr.bf16.mxu0 %v11809_v36 }
0x1bd3   :  { %v4675_v31 = vmul.f32 %v4659_v2, %v13821_v60  ;;  %5293 = vmatpush1.bf16.msra.mxu0 %v11807_v27 }
0x1bd4   :  { %v4661_v6 = vmul.f32 0.5, %v4645_v15  ;;  %5294 = vmatprep.subr.bf16.mxu0 %v11812_v50 }
0x1bd5   :  { %v4683_v9 = vpack.c.bf16 %v4675_v31, %v4671_v12 }
0x1bd6   :  { %v4677_v57 = vmul.f32 %v4661_v6, %v13825_v13 }
0x1bd7   :  { %4987 = vmatprep.mubr.bf16.mxu0 %v4683_v9 }
0x1bd8   :  { %v4685_v30 = vpack.c.bf16 %v4677_v57, %v4673_v48  ;;  %4988 = vmatmul.mubr.bf16.gmra.mrb[88].mxu0 %v4682_v58  ;;  %v11810_v58 = vld [vmem:[#allocation8 + $0x258] ss:$12 sps:$4 sm:$0xff]  }
0x1bd9   :  { %5324 = vmatprep.mubr.bf16.mxu0 %v12839_v55  ;;  %5295 = vmatpush1.bf16.msra.mxu0 %v11810_v58 }
0x1bda   :  { %5036 = vmatprep.mubr.bf16.mxu1 %v4685_v30 }
0x1bdb   :  { %5037 = vmatmul.mubr.bf16.gmra.mrb[100].mxu1 %v4684_v51 }
0x1c9b   :  { %v10733_v33 = vpop.f32.mrb[84].mxu0 }
0x1c9c   :  { %v10734_v14 = vpop.f32.mrb[85].mxu0 }
0x1c9d   :  { %v10761_v49 = vpop.f32.mrb[96].mxu1  ;;  %v10735_v60 = vadd.f32 %v10734_v14, %v10733_v33  ;;  %v10736_v0 = vpop.f32.mrb[86].mxu0  ;;  %v11816_v14 = vld [vmem:[#allocation8 + $0x248] ss:$12 sps:$4 sm:$0xff]  }
0x1c9e   :  { %v10762_v5 = vpop.f32.mrb[97].mxu1  ;;  %v10737_v37 = vpop.f32.mrb[87].mxu0  ;;  %11229 = vmatprep.subr.bf16.mxu1 %v11816_v14 }
0x1c9f   :  { %v4982_v1 = vadd.f32 %v10735_v60, %v4754_v29  ;;  %v10763_v39 = vadd.f32 %v10762_v5, %v10761_v49  ;;  %v10764_v13 = vpop.f32.mrb[98].mxu1  ;;  %v10738_v26 = vadd.f32 %v10737_v37, %v10736_v0  ;;  %v11813_v49 = vld [vmem:[#allocation8 + $0x270] ss:$12 sps:$4 sm:$0xff]   ;;  %11230 = vmatpush3.bf16.msra.mxu1 %v11816_v14  ;;  %v11819_v60 = vld [vmem:[#allocation8 + $0x28c] ss:$12 sps:$4 sm:$0xff]  }
0x1ca0   :  { %v10765_v16 = vpop.f32.mrb[99].mxu1  ;;  %v11820_v0 = vld [vmem:[#allocation8 + $0x260] ss:$12 sps:$4 sm:$0xff]   ;;  %v11817_v5 = vld [vmem:[#allocation8 + $0x288] ss:$12 sps:$4 sm:$0xff]  }
0x1ca1   :  { %v5031_v28 = vadd.f32 %v10763_v39, %v4982_v1  ;;  %v4985_v47 = vadd.f32 %v10738_v26, %v4754_v29  ;;  %v10766_v32 = vadd.f32 %v10765_v16, %v10764_v13  ;;  %11231 = vmatprep.subr.bf16.mxu1 %v11820_v0  ;;  %v11823_v37 = vld [vmem:[#allocation8 + $0x2a4] ss:$12 sps:$4 sm:$0xff]   ;;  %v11821_v39 = vld [vmem:[#allocation8 + $0x2a0] ss:$12 sps:$4 sm:$0xff]   ;;  %v11827_v13 = vld [vmem:[#allocation8 + $0x2bc] ss:$12 sps:$4 sm:$0xff]  }
0x1ca2   :  { %v11824_v1 = vld [vmem:[#allocation8 + $0x278] ss:$12 sps:$4 sm:$0xff]   ;;  %v11828_v26 = vld [vmem:[#allocation8 + $0x290] ss:$12 sps:$4 sm:$0xff]  }
0x1ca3   :  { %v5034_v35 = vadd.f32 %v10766_v32, %v4985_v47  ;;  %v13858_v10 = vadd.f32 %v5031_v28, %v13670_v7  ;;  %11232 = vmatpush3.bf16.msra.mxu1 %v11820_v0  ;;  %v11825_v16 = vld [vmem:[#allocation8 + $0x2b8] ss:$12 sps:$4 sm:$0xff]   ;;  %v11831_v28 = vld [vmem:[#allocation8 + $0x2d4] ss:$12 sps:$4 sm:$0xff]   ;;  %v11829_v32 = vld [vmem:[#allocation8 + $0x2d0] ss:$12 sps:$4 sm:$0xff]  }
0x1ca4   :  { %11233 = vmatprep.subr.bf16.mxu1 %v11824_v1  ;;  %v11832_v47 = vld [vmem:[#allocation8 + $0x2a8] ss:$12 sps:$4 sm:$0xff]  }
0x1ca5   :  { %5051 = vadd.xlane.f32.xlu0 %v13858_v10  ;;  %v13862_v44 = vadd.f32 %v5034_v35, %v13673_v17  ;;  %v11835_v35 = vld [vmem:[#allocation8 + $0x2ec] ss:$12 sps:$4 sm:$0xff]  }
0x1ca7   :  { %5053 = vadd.xlane.f32.xlu1 %v13862_v44  ;;  %11234 = vmatpush3.bf16.msra.mxu1 %v11824_v1 }
0x1ca8   :  { %11235 = vmatprep.subr.bf16.mxu1 %v11828_v26 }
0x1cab   :  { %v10739_v25 = vpop.f32.mrb[88].mxu0  ;;  %11236 = vmatpush3.bf16.msra.mxu1 %v11828_v26 }
0x1cac   :  { %v10740_v42 = vpop.f32.mrb[89].mxu0  ;;  %11237 = vmatprep.subr.bf16.mxu1 %v11832_v47 }
0x1cad   :  { %v10741_v22 = vadd.f32 %v10740_v42, %v10739_v25  ;;  %v10742_v8 = vpop.f32.mrb[90].mxu0  ;;  %v11836_v25 = vld [vmem:[#allocation8 + $0x2c0] ss:$12 sps:$4 sm:$0xff]   ;;  %v11833_v42 = vld [vmem:[#allocation8 + $0x2e8] ss:$12 sps:$4 sm:$0xff]  }
0x1cae   :  { %v10767_v4 = vpop.f32.mrb[100].mxu1  ;;  %v10743_v62 = vpop.f32.mrb[91].mxu0 }
0x1caf   :  { %v4990_v19 = vadd.f32 %v10741_v22, %v4754_v29  ;;  %v10768_v3 = vpop.f32.mrb[101].mxu1  ;;  %v10744_v43 = vadd.f32 %v10743_v62, %v10742_v8  ;;  %11238 = vmatpush3.bf16.msra.mxu1 %v11832_v47  ;;  %v11837_v22 = vld [vmem:[#allocation8 + $0x2d8] ss:$12 sps:$4 sm:$0xff]   ;;  %v11838_v8 = vld [vmem:[#allocation8 + $0x2f0] ss:$12 sps:$4 sm:$0xff]  }
0x1cb0   :  { %v10769_v24 = vadd.f32 %v10768_v3, %v10767_v4  ;;  %v10770_v45 = vpop.f32.mrb[102].mxu1  ;;  %11239 = vmatprep.subr.bf16.mxu1 %v11836_v25 }
0x1cb1   :  { %v4993_v7 = vadd.f32 %v10744_v43, %v4754_v29  ;;  %v10771_v46 = vpop.f32.mrb[103].mxu1  ;;  %v11815_v29 = vld [vmem:[#allocation8 + $0x274] ss:$12 sps:$4 sm:$0xff]  }
0x1cb2   :  { %v5039_v23 = vadd.f32 %v10769_v24, %v4990_v19  ;;  %v10772_v59 = vadd.f32 %v10771_v46, %v10770_v45  ;;  %5296 = vmatprep.subr.bf16.mxu0 %v11815_v29  ;;  %v13895_v45 = vld [vmem:[#allocation17 + $0x18] sm:$0x3f] }
0x1cb3   :  { %5297 = vmatpush1.bf16.msra.mxu0 %v11813_v49  ;;  %11240 = vmatpush3.bf16.msra.mxu1 %v11836_v25  ;;  %v5106_v58 = vrot.slane %v13895_v45, %v13092_v20 }
0x1cb4   :  { %v5042_v61 = vadd.f32 %v10772_v59, %v4993_v7  ;;  %v13866_v17 = vadd.f32 %v5039_v23, %v13677_v34  ;;  %5298 = vmatprep.subr.bf16.mxu0 %v11819_v60  ;;  %11241 = vmatprep.subr.bf16.mxu1 %v11837_v22  ;;  %v5098_v7 = vrot.slane %v13895_v45, %v13084_v11  ;;  %v5147_v60 = vld [vmem:[#allocation10 + $0x3] ss:$8 sm:$0x7] }
0x1cb5   :  { %v5152_v0 = vrot.slane %v5147_v60, %v13084_v11 }
0x1cb6   :  { %5055 = vadd.xlane.f32.xlu0 %v13866_v17  ;;  %v13870_v63 = vadd.f32 %v5042_v61, %v13681_v52 }
0x1cb7   :  { %5299 = vmatpush1.bf16.msra.mxu0 %v11817_v5  ;;  %11242 = vmatpush3.bf16.msra.mxu1 %v11837_v22  ;;  %v5156_v5 = vrot.slane %v5147_v60, %v13092_v20 }
0x1cb8   :  { %5057 = vadd.xlane.f32.xlu1 %v13870_v63  ;;  %5300 = vmatprep.subr.bf16.mxu0 %v11823_v37 }
0x1cb9   :  { %11243 = vmatprep.subr.bf16.mxu1 %v11838_v8 }
0x1cbb   :  { %5301 = vmatpush1.bf16.msra.mxu0 %v11821_v39  ;;  %11244 = vmatpush3.bf16.msra.mxu1 %v11838_v8 }
0x1cbc   :  { %5302 = vmatprep.subr.bf16.mxu0 %v11827_v13  ;;  %11267 = vmatprep.subr.bf16.mxu1 %v12840_v40 }
0x1cbf   :  { %5303 = vmatpush1.bf16.msra.mxu0 %v11825_v16 }
0x1cc0   :  { %5304 = vmatprep.subr.bf16.mxu0 %v11831_v28 }
0x1cc3   :  { %5305 = vmatpush1.bf16.msra.mxu0 %v11829_v32  ;;  %v5160_v32 = vrot.slane %v5147_v60, %v13108_v41 }
0x1cc4   :  { %5306 = vmatprep.subr.bf16.mxu0 %v11835_v35 }
0x1cc7   :  { %5307 = vmatpush1.bf16.msra.mxu0 %v11833_v42 }
0x1cc8   :  { %11249 = vmatprep.subr.bf16.mxu0 %v12840_v40 }
0x1d32   :  { %v5052_v51 = vpop.xlane.xlu0 %5051 }
0x1d33   :  { %v5059_v38 = vmul.f32 0.0078125, %v5052_v51 }
0x1d34   :  { %v5054_v2 = vpop.xlane.xlu1 %5053 }
0x1d35   :  { %v13874_v34 = vsub.f32 %v13858_v10, %v5059_v38  ;;  %v5060_v15 = vmul.f32 0.0078125, %v5054_v2 }
0x1d37   :  { %v13877_v52 = vsub.f32 %v13862_v44, %v5060_v15  ;;  %v5067_v18 = vmul.f32 %v13874_v34, %v13874_v34 }
0x1d39   :  { %5071 = vadd.xlane.f32.xlu0 %v5067_v18  ;;  %v5068_v12 = vmul.f32 %v13877_v52, %v13877_v52 }
0x1d3b   :  { %5073 = vadd.xlane.f32.xlu1 %v5068_v12 }
0x1d43   :  { %v5056_v31 = vpop.xlane.xlu0 %5055 }
0x1d44   :  { %v5061_v6 = vmul.f32 0.0078125, %v5056_v31 }
0x1d45   :  { %v5058_v9 = vpop.xlane.xlu1 %5057 }
0x1d46   :  { %v13884_v48 = vsub.f32 %v13866_v17, %v5061_v6  ;;  %v5062_v57 = vmul.f32 0.0078125, %v5058_v9 }
0x1d48   :  { %v13887_v30 = vsub.f32 %v13870_v63, %v5062_v57  ;;  %v5069_v33 = vmul.f32 %v13884_v48, %v13884_v48 }
0x1d4a   :  { %5075 = vadd.xlane.f32.xlu0 %v5069_v33  ;;  %v5070_v56 = vmul.f32 %v13887_v30, %v13887_v30 }
0x1d4c   :  { %5077 = vadd.xlane.f32.xlu1 %v5070_v56 }
0x1dc6   :  { %v5072_v4 = vpop.xlane.xlu0 %5071 }
0x1dc7   :  { %v5079_v62 = vmul.f32 0.0078125, %v5072_v4 }
0x1dc8   :  { %v5074_v19 = vpop.xlane.xlu1 %5073 }
0x1dc9   :  { %v5083_v3 = vadd.f32 1e-05, %v5079_v62  ;;  %v5080_v43 = vmul.f32 0.0078125, %v5074_v19 }
0x1dcb   :  { %12359 = vrsqrt.f32 %v5083_v3  ;;  %v5084_v24 = vadd.f32 1e-05, %v5080_v43 }
0x1dcd   :  { %12361 = vrsqrt.f32 %v5084_v24 }
0x1dd5   :  { %v12360_v46 = vpop.eup %12359 }
0x1dd6   :  { %v5091_v23 = vmul.f32 %v12360_v46, %v13874_v34 }
0x1dd7   :  { %v12362_v59 = vpop.eup %12361  ;;  %v5076_v61 = vpop.xlane.xlu0 %5075 }
0x1dd8   :  { %v5099_v27 = vmul.f32 %v5098_v7, %v5091_v23  ;;  %v5092_v36 = vmul.f32 %v12362_v59, %v13877_v52  ;;  %v5081_v50 = vmul.f32 0.0078125, %v5076_v61 }
0x1dd9   :  { %v5078_v51 = vpop.xlane.xlu1 %5077 }
0x1dda   :  { %v5100_v38 = vmul.f32 %v5098_v7, %v5092_v36  ;;  %v5085_v2 = vadd.f32 1e-05, %v5081_v50  ;;  %v5082_v15 = vmul.f32 0.0078125, %v5078_v51  ;;  %v5107_v12 = vadd.f32 %v5106_v58, %v5099_v27 }
0x1ddc   :  { %12363 = vrsqrt.f32 %v5085_v2  ;;  %v5086_v18 = vadd.f32 1e-05, %v5082_v15  ;;  %v5108_v31 = vadd.f32 %v5106_v58, %v5100_v38 }
0x1dde   :  { %12365 = vrsqrt.f32 %v5086_v18  ;;  %v5111_v6 = vpack.c.bf16 %v5108_v31, %v5107_v12 }
0x1de0   :  { %5325 = vmatmul.mubr.bf16.vlgmr.msra.gmra.mrb[92].mxu0 %v5111_v6  ;;  %11245 = vmatprep.mubr.bf16.mxu1 %v5111_v6 }
0x1de1   :  { %5334 = vmatprep.mubr.bf16.mxu0 %v12839_v55 }
0x1de6   :  { %v12364_v34 = vpop.eup %12363 }
0x1de7   :  { %v5093_v52 = vmul.f32 %v12364_v34, %v13884_v48 }
0x1de8   :  { %v12366_v9 = vpop.eup %12365 }
0x1de9   :  { %v5094_v57 = vmul.f32 %v12366_v9, %v13887_v30  ;;  %v5101_v33 = vmul.f32 %v5098_v7, %v5093_v52 }
0x1deb   :  { %v5102_v56 = vmul.f32 %v5098_v7, %v5094_v57  ;;  %v5109_v29 = vadd.f32 %v5106_v58, %v5101_v33 }
0x1ded   :  { %v5110_v14 = vadd.f32 %v5106_v58, %v5102_v56 }
0x1def   :  { %v5112_v49 = vpack.c.bf16 %v5110_v14, %v5109_v29 }
0x1df1   :  { %5335 = vmatmul.mubr.bf16.gmra.mrb[96].mxu0 %v5112_v49  ;;  %11246 = vmatmul.mubr.bf16.vlgmr.msra.gmra.mrb[104].mxu1 %v5112_v49 }
0x1df2   :  { %11251 = vmatprep.mubr.msk.bf16.mxu0 %vm12841_vm1, %v12840_v40  ;;  %11269 = vmatprep.mubr.msk.bf16.mxu1 %vm12841_vm1, %v12840_v40 }
0x1eb3   :  { %v5326_v48 = vpop.f32.mrb[92].mxu0 }
0x1eb4   :  { %v5328_v30 = vpop.f32.mrb[93].mxu0  ;;  %v5327_v1 = vadd.f32 %v5326_v48, %v5152_v0 }
0x1eb5   :  { %v5330_v37 = vpop.f32.mrb[94].mxu0  ;;  %v5329_v26 = vadd.f32 %v5328_v30, %v5156_v5 }
0x1eb6   :  { %v5331_v39 = vadd.f32 %v5330_v37, %v5152_v0  ;;  %v5332_v13 = vpop.f32.mrb[95].mxu0 }
0x1eb7   :  { %v5333_v16 = vadd.f32 %v5332_v13, %v5156_v5 }
0x1eb8   :  { %v5394_v28 = vpack.c.bf16 %v5331_v39, %v5327_v1 }
0x1eb9   :  { %v5396_v47 = vpack.c.bf16 %v5333_v16, %v5329_v26 }
0x1ebb   :  { %11250 = vmatpush3.bf16.xpose.msra.mxu0 %v5396_v47 }
0x1ebc   :  { %11255 = vmatprep.subr.bf16.mxu0 %v12840_v40 }
0x1ec2   :  { %11252 = vmatmul.mubr.bf16.vlgmr.msra.gmra.mrb[100].mxu0 %v5394_v28 }
0x1ec3   :  { %11257 = vmatprep.mubr.msk.bf16.mxu0 %vm12841_vm1, %v12840_v40 }
0x1ec4   :  { %v5336_v35 = vpop.f32.mrb[96].mxu0  ;;  %v11247_v25 = vpop.f32.mrb[104].mxu1 }
0x1ec5   :  { %v5338_v42 = vpop.f32.mrb[97].mxu0  ;;  %v5379_v22 = vpop.f32.mrb[105].mxu1  ;;  %v5337_v62 = vadd.f32 %v5336_v35, %v5152_v0  ;;  %v5388_v19 = vadd.f32 %v11247_v25, %v5160_v32 }
0x1ec6   :  { %v5340_v8 = vpop.f32.mrb[98].mxu0  ;;  %v11248_v4 = vpop.f32.mrb[106].mxu1  ;;  %v5339_v46 = vadd.f32 %v5338_v42, %v5156_v5  ;;  %v5380_v23 = vadd.f32 %v5379_v22, %v5160_v32 }
0x1ec7   :  { %v5341_v3 = vadd.f32 %v5340_v8, %v5152_v0  ;;  %v5391_v43 = vadd.f32 %v11248_v4, %v5160_v32  ;;  %v5342_v24 = vpop.f32.mrb[99].mxu0  ;;  %v5382_v7 = vpop.f32.mrb[107].mxu1  ;;  %v11839_v4 = vld [vmem:[#allocation11 + $0xc0] sm:$0xff]  }
0x1ec8   :  { %v5343_v59 = vadd.f32 %v5342_v24, %v5156_v5  ;;  %v5383_v61 = vadd.f32 %v5382_v7, %v5160_v32 }
0x1ec9   :  { %v5395_v27 = vpack.c.bf16 %v5341_v3, %v5337_v62  ;;  %v5531_v36 = vpack.c.bf16 %v5391_v43, %v5388_v19 }
0x1eca   :  { %v5397_v50 = vpack.c.bf16 %v5343_v59, %v5339_v46  ;;  %v5530_v58 = vpack.c.bf16 %v5383_v61, %v5380_v23  ;;  %v11840_v23 = vld [vmem:[#allocation11 + $0xc8] sm:$0xff]  }
0x1ecb   :  { %11268 = vmatpush3.bf16.msra.mxu1 %v5531_v36  ;;  %v11842_v36 = vld [vmem:[#allocation11 + $0xd8] sm:$0xff]  }
0x1ecc   :  { %11256 = vmatpush3.bf16.xpose.msra.mxu0 %v5397_v50 }
0x1ecd   :  { %11261 = vmatprep.subr.bf16.mxu0 %v12840_v40 }
0x1ed3   :  { %11258 = vmatmul.mubr.bf16.vlgmr.msra.gmra.mrb[104].mxu0 %v5395_v27  ;;  %v11841_v27 = vld [vmem:[#allocation11 + $0xd0] sm:$0xff]  }
0x1ed4   :  { %11262 = vmatpush3.bf16.msra.mxu0 %v5530_v58  ;;  %11263 = vmatprep.mubr.msk.bf16.mxu0 %vm12841_vm1, %v12840_v40  ;;  %v11843_v58 = vld [vmem:[#allocation11 + $0xe0] sm:$0xff]  }
0x1ed5   :  { %11273 = vmatprep.subr.bf16.mxu0 %v11839_v4 }
0x1f95   :  { %v5432_v51 = vpop.f32.mrb[100].mxu0 }
0x1f96   :  { %v5480_v38 = vmul.f32 0.088388346, %v5432_v51  ;;  %v11253_v2 = vpop.f32.mrb[101].mxu0 }
0x1f97   :  { %v5435_v15 = vpop.f32.mrb[102].mxu0 }
0x1f98   :  { %v5481_v18 = vmul.f32 0.088388346, %v5435_v15  ;;  %v11254_v12 = vpop.f32.mrb[103].mxu0  ;;  %v5484_v31 = vsel %vm705_vm2, %v5480_v38, -inf }
0x1f99   :  { %5485 = vmax.xlane.f32.xlu0 %v5484_v31  ;;  %v11845_v12 = vld [vmem:[#allocation11 + $0xf0] sm:$0xff]   ;;  %v11846_v31 = vld [vmem:[#allocation11 + $0xf8] sm:$0xff]  }
0x1f9a   :  { %v5487_v6 = vsel %vm705_vm2, %v5481_v18, -inf }
0x1f9b   :  { %5488 = vmax.xlane.f32.xlu1 %v5487_v6 }
0x1fa6   :  { %v5473_v34 = vpop.f32.mrb[104].mxu0 }
0x1fa7   :  { %v5482_v52 = vmul.f32 0.088388346, %v5473_v34  ;;  %v11259_v9 = vpop.f32.mrb[105].mxu0 }
0x1fa8   :  { %v5476_v57 = vpop.f32.mrb[106].mxu0 }
0x1fa9   :  { %v5483_v33 = vmul.f32 0.088388346, %v5476_v57  ;;  %v11260_v56 = vpop.f32.mrb[107].mxu0  ;;  %v5490_v29 = vsel %vm705_vm2, %v5482_v52, -inf }
0x1faa   :  { %5491 = vmax.xlane.f32.xlu0 %v5490_v29 }
0x1fab   :  { %v5493_v14 = vsel %vm705_vm2, %v5483_v33, -inf }
0x1fac   :  { %5494 = vmax.xlane.f32.xlu1 %v5493_v14 }
0x2026   :  { %v5486_v49 = vpop.xlane.xlu0 %5485 }
0x2027   :  { %v5496_v60 = vsub.f32 %v5480_v38, %v5486_v49 }
0x2028   :  { %v5489_v0 = vpop.xlane.xlu1 %5488 }
0x2029   :  { %v5500_v48 = vmul.f32 1.442695, %v5496_v60  ;;  %v5497_v5 = vsub.f32 %v5481_v18, %v5489_v0  ;;  %v11844_v18 = vld [vmem:[#allocation11 + $0xe8] sm:$0xff]   ;;  %v5642_v60 = vrot.slane %v13895_v45, %v13108_v41 }
0x202b   :  { %12367 = vpow2.f32 %v5500_v48  ;;  %v5502_v30 = vmul.f32 1.442695, %v5497_v5 }
0x202d   :  { %12369 = vpow2.f32 %v5502_v30 }
0x2035   :  { %v12368_v37 = vpop.eup %12367 }
0x2036   :  { %v5508_v1 = vsel %vm705_vm2, %v12368_v37, 0.0 }
0x2037   :  { %v12370_v39 = vpop.eup %12369  ;;  %v5492_v13 = vpop.xlane.xlu0 %5491  ;;  %5509 = vadd.xlane.f32.xlu0 %v5508_v1 }
0x2038   :  { %v5498_v26 = vsub.f32 %v5482_v52, %v5492_v13  ;;  %v5511_v16 = vsel %vm705_vm2, %v12370_v39, 0.0 }
0x2039   :  { %v5495_v28 = vpop.xlane.xlu1 %5494  ;;  %5512 = vadd.xlane.f32.xlu1 %v5511_v16 }
0x203a   :  { %v5504_v47 = vmul.f32 1.442695, %v5498_v26  ;;  %v5499_v32 = vsub.f32 %v5483_v33, %v5495_v28 }
0x203c   :  { %12371 = vpow2.f32 %v5504_v47  ;;  %v5506_v35 = vmul.f32 1.442695, %v5499_v32  ;;  %v11849_v32 = vld [vmem:[#allocation13 + $0x304] ss:$16 sps:$4 sm:$0xff]  }
0x203d   :  { %6022 = vmatprep.subr.bf16.mxu1 %v11849_v32 }
0x203e   :  { %12373 = vpow2.f32 %v5506_v35  ;;  %v11850_v35 = vld [vmem:[#allocation13 + $0x308] ss:$16 sps:$4 sm:$0xff]  }
0x2046   :  { %v12372_v25 = vpop.eup %12371 }
0x2047   :  { %v5514_v42 = vsel %vm705_vm2, %v12372_v25, 0.0 }
0x2048   :  { %v12374_v22 = vpop.eup %12373  ;;  %5515 = vadd.xlane.f32.xlu0 %v5514_v42  ;;  %v11858_v42 = vld [vmem:[#allocation13 + $0x32c] ss:$16 sps:$4 sm:$0xff]  }
0x2049   :  { %v5517_v8 = vsel %vm705_vm2, %v12374_v22, 0.0 }
0x204a   :  { %5518 = vadd.xlane.f32.xlu1 %v5517_v8 }
0x20c4   :  { %v5510_v62 = vpop.xlane.xlu0 %5509 }
0x20c5   :  { %12375 = vrcp.f32 %v5510_v62 }
0x20c6   :  { %v5513_v19 = vpop.xlane.xlu1 %5512 }
0x20c7   :  { %12377 = vrcp.f32 %v5513_v19 }
0x20cf   :  { %v12376_v3 = vpop.eup %12375 }
0x20d0   :  { %v5524_v24 = vmul.f32 %v12376_v3, %v12368_v37 }
0x20d1   :  { %v12378_v43 = vpop.eup %12377 }
0x20d2   :  { %v5525_v7 = vmul.f32 %v12378_v43, %v12370_v39 }
0x20d4   :  { %v5528_v46 = vpack.c.bf16 %v5525_v7, %v5524_v24 }
0x20d5   :  { %v5516_v59 = vpop.xlane.xlu0 %5515 }
0x20d6   :  { %12379 = vrcp.f32 %v5516_v59  ;;  %11264 = vmatmul.mubr.msk.bf16.vlgmr.msra.gmra.mrb[108].mxu0 %vm705_vm2, %v5528_v46 }
0x20d7   :  { %v5519_v61 = vpop.xlane.xlu1 %5518  ;;  %11274 = vmatpush3.bf16.msra.mxu0 %v11839_v4 }
0x20d8   :  { %12381 = vrcp.f32 %v5519_v61  ;;  %11275 = vmatprep.subr.bf16.mxu0 %v11840_v23 }
0x20db   :  { %11276 = vmatpush3.bf16.msra.mxu0 %v11840_v23 }
0x20dc   :  { %11277 = vmatprep.subr.bf16.mxu0 %v11841_v27 }
0x20df   :  { %11278 = vmatpush3.bf16.msra.mxu0 %v11841_v27 }
0x20e0   :  { %v12380_v50 = vpop.eup %12379  ;;  %11279 = vmatprep.subr.bf16.mxu0 %v11842_v36 }
0x20e1   :  { %v5526_v38 = vmul.f32 %v12380_v50, %v12372_v25  ;;  %v11852_v25 = vld [vmem:[#allocation13 + $0x30c] ss:$16 sps:$4 sm:$0xff]  }
0x20e2   :  { %v12382_v51 = vpop.eup %12381 }
0x20e3   :  { %v5527_v2 = vmul.f32 %v12382_v51, %v12374_v22  ;;  %11280 = vmatpush3.bf16.msra.mxu0 %v11842_v36  ;;  %v11856_v22 = vld [vmem:[#allocation13 + $0x328] ss:$16 sps:$4 sm:$0xff]   ;;  %v11864_v51 = vld [vmem:[#allocation13 + $0x34c] ss:$16 sps:$4 sm:$0xff]  }
0x20e4   :  { %11281 = vmatprep.subr.bf16.mxu0 %v11843_v58 }
0x20e5   :  { %v5529_v15 = vpack.c.bf16 %v5527_v2, %v5526_v38  ;;  %v11859_v38 = vld [vmem:[#allocation13 + $0x340] ss:$16 sps:$4 sm:$0xff]   ;;  %v11862_v2 = vld [vmem:[#allocation13 + $0x348] ss:$16 sps:$4 sm:$0xff]  }
0x20e7   :  { %11270 = vmatmul.mubr.msk.bf16.vlgmr.msra.gmra.mrb[108].mxu1 %vm705_vm2, %v5529_v15  ;;  %11282 = vmatpush3.bf16.msra.mxu0 %v11843_v58  ;;  %v11861_v58 = vld [vmem:[#allocation13 + $0x344] ss:$16 sps:$4 sm:$0xff]  }
0x20e8   :  { %6054 = vmatprep.mubr.bf16.mxu1 %v12839_v55  ;;  %11283 = vmatprep.subr.bf16.mxu0 %v11844_v18  ;;  %v11867_v15 = vld [vmem:[#allocation13 + $0x364] ss:$16 sps:$4 sm:$0xff]  }
0x20eb   :  { %11284 = vmatpush3.bf16.msra.mxu0 %v11844_v18  ;;  %v11870_v18 = vld [vmem:[#allocation13 + $0x36c] ss:$16 sps:$4 sm:$0xff]  }
0x20ec   :  { %11285 = vmatprep.subr.bf16.mxu0 %v11845_v12 }
0x20ef   :  { %11286 = vmatpush3.bf16.msra.mxu0 %v11845_v12  ;;  %v11865_v12 = vld [vmem:[#allocation13 + $0x360] ss:$16 sps:$4 sm:$0xff]  }
0x20f0   :  { %11287 = vmatprep.subr.bf16.mxu0 %v11846_v31 }
0x20f3   :  { %11288 = vmatpush3.bf16.msra.mxu0 %v11846_v31  ;;  %v11868_v31 = vld [vmem:[#allocation13 + $0x368] ss:$16 sps:$4 sm:$0xff]  }
0x20f4   :  { %6075 = vmatprep.subr.bf16.mxu0 %v11852_v25 }
0x21a9   :  { %v5569_v6 = vpop.f32.mrb[108].mxu0 }
0x21aa   :  { %v11265_v34 = vpop.f32.mrb[109].mxu0 }
0x21ab   :  { %v5572_v52 = vpop.f32.mrb[110].mxu0  ;;  %v11876_v34 = vld [vmem:[#allocation13 + $0x38c] ss:$16 sps:$4 sm:$0xff]  }
0x21ac   :  { %v5620_v9 = vpack.c.bf16 %v5572_v52, %v5569_v6  ;;  %v11266_v57 = vpop.f32.mrb[111].mxu0  ;;  %v11873_v6 = vld [vmem:[#allocation13 + $0x384] ss:$16 sps:$4 sm:$0xff]   ;;  %v11871_v52 = vld [vmem:[#allocation13 + $0x380] ss:$16 sps:$4 sm:$0xff]  }
0x21ad   :  { %v11879_v57 = vld [vmem:[#allocation13 + $0x3a4] ss:$16 sps:$4 sm:$0xff]  }
0x21ae   :  { %11289 = vmatprep.mubr.bf16.mxu0 %v5620_v9  ;;  %v11874_v9 = vld [vmem:[#allocation13 + $0x388] ss:$16 sps:$4 sm:$0xff]  }
0x21ba   :  { %v5613_v33 = vpop.f32.mrb[108].mxu1 }
0x21bb   :  { %v11271_v56 = vpop.f32.mrb[109].mxu1 }
0x21bc   :  { %v5616_v29 = vpop.f32.mrb[110].mxu1  ;;  %v11877_v56 = vld [vmem:[#allocation13 + $0x3a0] ss:$16 sps:$4 sm:$0xff]  }
0x21bd   :  { %v5621_v14 = vpack.c.bf16 %v5616_v29, %v5613_v33  ;;  %v11272_v49 = vpop.f32.mrb[111].mxu1  ;;  %v11882_v33 = vld [vmem:[#allocation13 + $0x3ac] ss:$16 sps:$4 sm:$0xff]   ;;  %v11880_v29 = vld [vmem:[#allocation13 + $0x3a8] ss:$16 sps:$4 sm:$0xff]  }
0x21be   :  { %v11885_v49 = vld [vmem:[#allocation13 + $0x3c4] ss:$16 sps:$4 sm:$0xff]  }
0x21bf   :  { %11290 = vmatmul.mubr.bf16.vlgmr.msra.gmra.mrb[112].mxu0 %v5621_v14  ;;  %v11883_v14 = vld [vmem:[#allocation13 + $0x3c0] ss:$16 sps:$4 sm:$0xff]  }
0x21c0   :  { %6107 = vmatprep.mubr.bf16.mxu0 %v12839_v55  ;;  %6076 = vmatpush1.bf16.msra.mxu0 %v11850_v35 }
0x21c1   :  { %6077 = vmatprep.subr.bf16.mxu0 %v11858_v42 }
0x21c4   :  { %6078 = vmatpush1.bf16.msra.mxu0 %v11856_v22 }
0x21c5   :  { %6079 = vmatprep.subr.bf16.mxu0 %v11864_v51 }
0x21c8   :  { %6080 = vmatpush1.bf16.msra.mxu0 %v11862_v2 }
0x21c9   :  { %6081 = vmatprep.subr.bf16.mxu0 %v11870_v18 }
0x21cc   :  { %6082 = vmatpush1.bf16.msra.mxu0 %v11868_v31  ;;  %v11896_v31 = vld [vmem:[#allocation16 + $0x3c0] sm:$0xff]  }
0x21cd   :  { %6083 = vmatprep.subr.bf16.mxu0 %v11876_v34  ;;  %v11900_v34 = vld [vmem:[#allocation16 + $0x3c8] sm:$0xff]  }
0x21d0   :  { %6084 = vmatpush1.bf16.msra.mxu0 %v11874_v9  ;;  %v11902_v9 = vld [vmem:[#allocation16 + $0x388] sm:$0xff]  }
0x21d1   :  { %6085 = vmatprep.subr.bf16.mxu0 %v11882_v33  ;;  %v11904_v33 = vld [vmem:[#allocation16 + $0x3d0] sm:$0xff]  }
0x21d4   :  { %6086 = vmatpush1.bf16.msra.mxu0 %v11880_v29  ;;  %v11906_v29 = vld [vmem:[#allocation16 + $0x390] sm:$0xff]  }
0x2292   :  { %v11291_v0 = vpop.f32.mrb[112].mxu0 }
0x2293   :  { %v5725_v48 = vpop.f32.mrb[113].mxu0  ;;  %v5734_v1 = vadd.f32 %v11291_v0, %v5642_v60  ;;  %v11888_v0 = vld [vmem:[#allocation13 + $0x3cc] ss:$16 sps:$4 sm:$0xff]  }
0x2294   :  { %v5726_v5 = vadd.f32 %v5725_v48, %v5642_v60  ;;  %v11292_v30 = vpop.f32.mrb[114].mxu0  ;;  %v11891_v48 = vld [vmem:[#allocation13 + $0x3e4] ss:$16 sps:$4 sm:$0xff]   ;;  %6087 = vmatprep.subr.bf16.mxu0 %v11888_v0  ;;  %v11910_v0 = vld [vmem:[#allocation16 + $0x398] sm:$0xff]  }
0x2295   :  { %v5728_v37 = vpop.f32.mrb[115].mxu0  ;;  %v5737_v26 = vadd.f32 %v11292_v30, %v5642_v60  ;;  %v13941_v28 = vadd.f32 %v5734_v1, %v13866_v17  ;;  %v11853_v17 = vld [vmem:[#allocation13 + $0x320] ss:$16 sps:$4 sm:$0xff]  }
0x2296   :  { %v13934_v39 = vadd.f32 %v5726_v5, %v13858_v10  ;;  %v5729_v13 = vadd.f32 %v5728_v37, %v5642_v60  ;;  %v11847_v10 = vld [vmem:[#allocation13 + $0x300] ss:$16 sps:$4 sm:$0xff]   ;;  %v11886_v60 = vld [vmem:[#allocation13 + $0x3c8] ss:$16 sps:$4 sm:$0xff]   ;;  %v11894_v5 = vld [vmem:[#allocation13 + $0x3ec] ss:$16 sps:$4 sm:$0xff]  }
0x2297   :  { %v13945_v47 = vadd.f32 %v5737_v26, %v13870_v63  ;;  %6023 = vmatpush1.bf16.msra.mxu1 %v11847_v10  ;;  %v11889_v30 = vld [vmem:[#allocation13 + $0x3e0] ss:$16 sps:$4 sm:$0xff]   ;;  %6088 = vmatpush1.bf16.msra.mxu0 %v11886_v60  ;;  %v11892_v37 = vld [vmem:[#allocation13 + $0x3e8] ss:$16 sps:$4 sm:$0xff]  }
0x2298   :  { %v13937_v16 = vadd.f32 %v5729_v13, %v13862_v44  ;;  %5744 = vadd.xlane.f32.xlu0 %v13934_v39  ;;  %v11855_v44 = vld [vmem:[#allocation13 + $0x324] ss:$16 sps:$4 sm:$0xff]   ;;  %6089 = vmatprep.subr.bf16.mxu0 %v11894_v5  ;;  %v11909_v60 = vld [vmem:[#allocation16 + $0x318] sm:$0xff]  }
0x2299   :  { %6024 = vmatprep.subr.bf16.mxu1 %v11855_v44  ;;  %v11912_v5 = vld [vmem:[#allocation16 + $0x3e0] sm:$0xff]  }
0x229a   :  { %5746 = vadd.xlane.f32.xlu1 %v13937_v16 }
0x229b   :  { %6025 = vmatpush1.bf16.msra.mxu1 %v11853_v17  ;;  %6090 = vmatpush1.bf16.msra.mxu0 %v11892_v37  ;;  %v11914_v37 = vld [vmem:[#allocation16 + $0x3a0] sm:$0xff]  }
0x229c   :  { %5748 = vadd.xlane.f32.xlu0 %v13941_v28  ;;  %6026 = vmatprep.subr.bf16.mxu1 %v11861_v58 }
0x229d   :  { %10829 = vmatprep.subr.bf16.mxu0 %v11896_v31 }
0x229e   :  { %5750 = vadd.xlane.f32.xlu1 %v13945_v47 }
0x229f   :  { %6027 = vmatpush1.bf16.msra.mxu1 %v11859_v38 }
0x22a0   :  { %6028 = vmatprep.subr.bf16.mxu1 %v11867_v15 }
0x22a3   :  { %6029 = vmatpush1.bf16.msra.mxu1 %v11865_v12  ;;  %v11895_v12 = vld [vmem:[#allocation16 + $0x340] sm:$0xff]  }
0x22a4   :  { %6030 = vmatprep.subr.bf16.mxu1 %v11873_v6  ;;  %v11897_v6 = vld [vmem:[#allocation16 + $0x300] sm:$0xff]  }
0x22a7   :  { %6031 = vmatpush1.bf16.msra.mxu1 %v11871_v52  ;;  %v11901_v52 = vld [vmem:[#allocation16 + $0x308] sm:$0xff]  }
0x22a8   :  { %6032 = vmatprep.subr.bf16.mxu1 %v11879_v57  ;;  %v11903_v57 = vld [vmem:[#allocation16 + $0x350] sm:$0xff]  }
0x22ab   :  { %6033 = vmatpush1.bf16.msra.mxu1 %v11877_v56  ;;  %v11905_v56 = vld [vmem:[#allocation16 + $0x310] sm:$0xff]  }
0x22ac   :  { %6034 = vmatprep.subr.bf16.mxu1 %v11885_v49  ;;  %v11908_v49 = vld [vmem:[#allocation16 + $0x3d8] sm:$0xff]  }
0x22af   :  { %6035 = vmatpush1.bf16.msra.mxu1 %v11883_v14  ;;  %v11907_v14 = vld [vmem:[#allocation16 + $0x358] sm:$0xff]  }
0x22b0   :  { %6036 = vmatprep.subr.bf16.mxu1 %v11891_v48  ;;  %v11911_v48 = vld [vmem:[#allocation16 + $0x360] sm:$0xff]  }
0x22b3   :  { %6037 = vmatpush1.bf16.msra.mxu1 %v11889_v30  ;;  %v11913_v30 = vld [vmem:[#allocation16 + $0x320] sm:$0xff]  }
0x22b4   :  { %10801 = vmatprep.subr.bf16.mxu1 %v11895_v12 }
0x2325   :  { %v5745_v63 = vpop.xlane.xlu0 %5744 }
0x2326   :  { %v5752_v8 = vmul.f32 0.0078125, %v5745_v63 }
0x2327   :  { %v5747_v4 = vpop.xlane.xlu1 %5746 }
0x2328   :  { %v13950_v62 = vsub.f32 %v13934_v39, %v5752_v8  ;;  %v5753_v19 = vmul.f32 0.0078125, %v5747_v4  ;;  %v5791_v8 = vrot.slane %v13895_v45, %v13169_v53 }
0x2329   :  { %v5749_v3 = vpop.xlane.xlu0 %5748 }
0x232a   :  { %v13953_v43 = vsub.f32 %v13937_v16, %v5753_v19  ;;  %v5754_v24 = vmul.f32 0.0078125, %v5749_v3  ;;  %v5760_v7 = vmul.f32 %v13950_v62, %v13950_v62 }
0x232b   :  { %v5751_v46 = vpop.xlane.xlu1 %5750 }
0x232c   :  { %v13958_v23 = vsub.f32 %v13941_v28, %v5754_v24  ;;  %v5755_v59 = vmul.f32 0.0078125, %v5751_v46  ;;  %5764 = vadd.xlane.f32.xlu0 %v5760_v7  ;;  %v5761_v61 = vmul.f32 %v13953_v43, %v13953_v43  ;;  %v5799_v46 = vrot.slane %v13895_v45, %v13174_v54 }
0x232e   :  { %v13963_v27 = vsub.f32 %v13945_v47, %v5755_v59  ;;  %5766 = vadd.xlane.f32.xlu1 %v5761_v61  ;;  %v5762_v36 = vmul.f32 %v13958_v23, %v13958_v23 }
0x2330   :  { %5768 = vadd.xlane.f32.xlu0 %v5762_v36  ;;  %v5763_v50 = vmul.f32 %v13963_v27, %v13963_v27 }
0x2332   :  { %5770 = vadd.xlane.f32.xlu1 %v5763_v50 }
0x23b9   :  { %v5765_v1 = vpop.xlane.xlu0 %5764 }
0x23ba   :  { %v5772_v13 = vmul.f32 0.0078125, %v5765_v1  ;;  %v11915_v1 = vld [vmem:[#allocation16 + $0x368] sm:$0xff]  }
0x23bb   :  { %v5767_v26 = vpop.xlane.xlu1 %5766 }
0x23bc   :  { %v5776_v10 = vadd.f32 1e-05, %v5772_v13  ;;  %v5773_v32 = vmul.f32 0.0078125, %v5767_v26  ;;  %v11916_v13 = vld [vmem:[#allocation16 + $0x3e8] sm:$0xff]  }
0x23bd   :  { %v5769_v35 = vpop.xlane.xlu0 %5768  ;;  %v11917_v26 = vld [vmem:[#allocation16 + $0x328] sm:$0xff]  }
0x23be   :  { %12383 = vrsqrt.f32 %v5776_v10  ;;  %v5777_v25 = vadd.f32 1e-05, %v5773_v32  ;;  %v5774_v44 = vmul.f32 0.0078125, %v5769_v35  ;;  %v11918_v10 = vld [vmem:[#allocation16 + $0x3a8] sm:$0xff]   ;;  %v11919_v32 = vld [vmem:[#allocation16 + $0x370] sm:$0xff]  }
0x23bf   :  { %v5771_v42 = vpop.xlane.xlu1 %5770  ;;  %v11920_v35 = vld [vmem:[#allocation16 + $0x3f0] sm:$0xff]  }
0x23c0   :  { %12385 = vrsqrt.f32 %v5777_v25  ;;  %v5778_v17 = vadd.f32 1e-05, %v5774_v44  ;;  %v5775_v22 = vmul.f32 0.0078125, %v5771_v42  ;;  %v11921_v25 = vld [vmem:[#allocation16 + $0x330] sm:$0xff]   ;;  %v11923_v42 = vld [vmem:[#allocation16 + $0x378] sm:$0xff]  }
0x23c1   :  { %v11922_v44 = vld [vmem:[#allocation16 + $0x3b0] sm:$0xff]  }
0x23c2   :  { %12387 = vrsqrt.f32 %v5778_v17  ;;  %v5779_v63 = vadd.f32 1e-05, %v5775_v22  ;;  %v11924_v17 = vld [vmem:[#allocation16 + $0x3f8] sm:$0xff]  }
0x23c3   :  { %v11925_v22 = vld [vmem:[#allocation16 + $0x338] sm:$0xff]  }
0x23c4   :  { %12389 = vrsqrt.f32 %v5779_v63  ;;  %v11926_v63 = vld [vmem:[#allocation16 + $0x3b8] sm:$0xff]  }
0x23c8   :  { %v12384_v4 = vpop.eup %12383 }
0x23c9   :  { %v5784_v19 = vmul.f32 %v12384_v4, %v13950_v62 }
0x23ca   :  { %v12386_v3 = vpop.eup %12385 }
0x23cb   :  { %v5785_v24 = vmul.f32 %v12386_v3, %v13953_v43  ;;  %v5792_v7 = vmul.f32 %v5791_v8, %v5784_v19 }
0x23cc   :  { %v12388_v59 = vpop.eup %12387 }
0x23cd   :  { %v5793_v61 = vmul.f32 %v5791_v8, %v5785_v24  ;;  %v5800_v50 = vadd.f32 %v5799_v46, %v5792_v7  ;;  %v5786_v51 = vmul.f32 %v12388_v59, %v13958_v23  ;;  %v11898_v23 = vld [vmem:[#allocation16 + $0x380] sm:$0xff]  }
0x23ce   :  { %v12390_v36 = vpop.eup %12389 }
0x23cf   :  { %v5801_v58 = vadd.f32 %v5799_v46, %v5793_v61  ;;  %v5787_v38 = vmul.f32 %v12390_v36, %v13963_v27  ;;  %v5794_v62 = vmul.f32 %v5791_v8, %v5786_v51  ;;  %v11899_v27 = vld [vmem:[#allocation16 + $0x348] sm:$0xff]  }
0x23d1   :  { %v5804_v2 = vpack.c.bf16 %v5801_v58, %v5800_v50  ;;  %v5795_v15 = vmul.f32 %v5791_v8, %v5787_v38  ;;  %v5802_v45 = vadd.f32 %v5799_v46, %v5794_v62  ;;  %v5840_v8 = vld [vmem:[#allocation14 + $0x3] ss:$8 sm:$0xf] }
0x23d2   :  { %v13980_v4 = vrot.slane %v5840_v8, %v13084_v11  ;;  %v13983_v19 = vrot.slane %v5840_v8, %v13108_v41  ;;  %v13986_v3 = vrot.slane %v5840_v8, %v13092_v20  ;;  %v13989_v24 = vrot.slane %v5840_v8, %v13169_v53 }
0x23d3   :  { %6055 = vmatmul.mubr.bf16.vlgmr.msra.gmra.mrb[112].mxu1 %v5804_v2  ;;  %6108 = vmatmul.mubr.bf16.vlgmr.msra.gmra.mrb[116].mxu0 %v5804_v2  ;;  %v5803_v43 = vadd.f32 %v5799_v46, %v5795_v15 }
0x23d4   :  { %6064 = vmatprep.mubr.bf16.mxu1 %v12839_v55  ;;  %6117 = vmatprep.mubr.bf16.mxu0 %v12839_v55 }
0x23d5   :  { %v5805_v18 = vpack.c.bf16 %v5803_v43, %v5802_v45  ;;  %10802 = vmatpush3.bf16.msra.mxu1 %v11897_v6  ;;  %10830 = vmatpush3.bf16.msra.mxu0 %v11898_v23 }
0x23d6   :  { %10803 = vmatprep.subr.bf16.mxu1 %v11899_v27  ;;  %10831 = vmatprep.subr.bf16.mxu0 %v11900_v34 }
0x23d9   :  { %10804 = vmatpush3.bf16.msra.mxu1 %v11901_v52  ;;  %10832 = vmatpush3.bf16.msra.mxu0 %v11902_v9 }
0x23da   :  { %10805 = vmatprep.subr.bf16.mxu1 %v11903_v57  ;;  %10833 = vmatprep.subr.bf16.mxu0 %v11904_v33 }
0x23db   :  { %6065 = vmatmul.mubr.bf16.gmra.mrb[116].mxu1 %v5805_v18  ;;  %6118 = vmatmul.mubr.bf16.gmra.mrb[120].mxu0 %v5805_v18 }
0x23dd   :  { %10806 = vmatpush3.bf16.msra.mxu1 %v11905_v56  ;;  %10834 = vmatpush3.bf16.msra.mxu0 %v11906_v29 }
0x23de   :  { %10807 = vmatprep.subr.bf16.mxu1 %v11907_v14  ;;  %10835 = vmatprep.subr.bf16.mxu0 %v11908_v49 }
0x23e1   :  { %10808 = vmatpush3.bf16.msra.mxu1 %v11909_v60  ;;  %10836 = vmatpush3.bf16.msra.mxu0 %v11910_v0 }
0x23e2   :  { %10809 = vmatprep.subr.bf16.mxu1 %v11911_v48  ;;  %10837 = vmatprep.subr.bf16.mxu0 %v11912_v5 }
0x23e5   :  { %10810 = vmatpush3.bf16.msra.mxu1 %v11913_v30  ;;  %10838 = vmatpush3.bf16.msra.mxu0 %v11914_v37 }
0x23e6   :  { %10811 = vmatprep.subr.bf16.mxu1 %v11915_v1  ;;  %10839 = vmatprep.subr.bf16.mxu0 %v11916_v13 }
0x23e9   :  { %10812 = vmatpush3.bf16.msra.mxu1 %v11917_v26  ;;  %10840 = vmatpush3.bf16.msra.mxu0 %v11918_v10 }
0x23ea   :  { %10813 = vmatprep.subr.bf16.mxu1 %v11919_v32  ;;  %10841 = vmatprep.subr.bf16.mxu0 %v11920_v35 }
0x23ed   :  { %10814 = vmatpush3.bf16.msra.mxu1 %v11921_v25  ;;  %10842 = vmatpush3.bf16.msra.mxu0 %v11922_v44 }
0x23ee   :  { %10815 = vmatprep.subr.bf16.mxu1 %v11923_v42  ;;  %10843 = vmatprep.subr.bf16.mxu0 %v11924_v17 }
0x23f1   :  { %10816 = vmatpush3.bf16.msra.mxu1 %v11925_v22  ;;  %10844 = vmatpush3.bf16.msra.mxu0 %v11926_v63 }
0x24a6   :  { %v6056_v7 = vpop.f32.mrb[112].mxu1  ;;  %v6109_v46 = vpop.f32.mrb[116].mxu0 }
0x24a7   :  { %v13992_v59 = vadd.f32 %v6056_v7, %v13980_v4  ;;  %v13995_v61 = vadd.f32 %v6109_v46, %v13983_v19  ;;  %v6058_v36 = vpop.f32.mrb[113].mxu1  ;;  %v6111_v50 = vpop.f32.mrb[117].mxu0 }
0x24a8   :  { %v13998_v58 = vadd.f32 %v6058_v36, %v13986_v3  ;;  %v14001_v51 = vadd.f32 %v6111_v50, %v13989_v24  ;;  %v6060_v38 = vpop.f32.mrb[114].mxu1  ;;  %v6113_v2 = vpop.f32.mrb[118].mxu0 }
0x24a9   :  { %v6128_v15 = vmul.f32 %v13992_v59, %v13992_v59  ;;  %v6130_v62 = vmul.f32 %v13995_v61, %v13995_v61  ;;  %v14008_v43 = vadd.f32 %v6060_v38, %v13980_v4  ;;  %v14011_v45 = vadd.f32 %v6113_v2, %v13983_v19  ;;  %v6062_v18 = vpop.f32.mrb[115].mxu1  ;;  %v6115_v12 = vpop.f32.mrb[119].mxu0 }
0x24aa   :  { %v6129_v31 = vmul.f32 %v13998_v58, %v13998_v58  ;;  %v6131_v6 = vmul.f32 %v14001_v51, %v14001_v51  ;;  %v14018_v23 = vadd.f32 %v6062_v18, %v13986_v3  ;;  %v14021_v27 = vadd.f32 %v6115_v12, %v13989_v24 }
0x24ab   :  { %v6144_v34 = vmul.f32 %v6128_v15, %v13992_v59  ;;  %v6146_v52 = vmul.f32 %v6130_v62, %v13995_v61  ;;  %v6132_v9 = vmul.f32 %v14008_v43, %v14008_v43  ;;  %v6134_v57 = vmul.f32 %v14011_v45, %v14011_v45 }
0x24ac   :  { %v6145_v33 = vmul.f32 %v6129_v31, %v13998_v58  ;;  %v6147_v56 = vmul.f32 %v6131_v6, %v14001_v51  ;;  %v6133_v29 = vmul.f32 %v14018_v23, %v14018_v23  ;;  %v6135_v14 = vmul.f32 %v14021_v27, %v14021_v27 }
0x24ad   :  { %v6160_v49 = vmul.f32 0.044715, %v6144_v34  ;;  %v6162_v60 = vmul.f32 0.044715, %v6146_v52  ;;  %v6148_v0 = vmul.f32 %v6132_v9, %v14008_v43  ;;  %v6150_v48 = vmul.f32 %v6134_v57, %v14011_v45 }
0x24ae   :  { %v6161_v5 = vmul.f32 0.044715, %v6145_v33  ;;  %v6163_v30 = vmul.f32 0.044715, %v6147_v56  ;;  %v6149_v37 = vmul.f32 %v6133_v29, %v14018_v23  ;;  %v6151_v1 = vmul.f32 %v6135_v14, %v14021_v27  ;;  %v6066_v13 = vpop.f32.mrb[116].mxu1  ;;  %v6119_v26 = vpop.f32.mrb[120].mxu0 }
0x24af   :  { %v6176_v10 = vadd.f32 %v6160_v49, %v13992_v59  ;;  %v6178_v32 = vadd.f32 %v6162_v60, %v13995_v61  ;;  %v6164_v35 = vmul.f32 0.044715, %v6148_v0  ;;  %v6166_v25 = vmul.f32 0.044715, %v6150_v48  ;;  %v6068_v44 = vpop.f32.mrb[117].mxu1  ;;  %v6121_v42 = vpop.f32.mrb[121].mxu0 }
0x24b0   :  { %v6177_v17 = vadd.f32 %v6161_v5, %v13998_v58  ;;  %v6179_v22 = vadd.f32 %v6163_v30, %v14001_v51  ;;  %v6165_v63 = vmul.f32 0.044715, %v6149_v37  ;;  %v6167_v8 = vmul.f32 0.044715, %v6151_v1  ;;  %v6070_v7 = vpop.f32.mrb[118].mxu1  ;;  %v6123_v46 = vpop.f32.mrb[122].mxu0 }
0x24b1   :  { %v6192_v36 = vmul.f32 0.7978846, %v6176_v10  ;;  %v6194_v50 = vmul.f32 0.7978846, %v6178_v32  ;;  %v6180_v38 = vadd.f32 %v6164_v35, %v14008_v43  ;;  %v6182_v2 = vadd.f32 %v6166_v25, %v14011_v45  ;;  %v6072_v15 = vpop.f32.mrb[119].mxu1  ;;  %v6125_v62 = vpop.f32.mrb[123].mxu0 }
0x24b2   :  { %v6193_v18 = vmul.f32 0.7978846, %v6177_v17  ;;  %v6195_v12 = vmul.f32 0.7978846, %v6179_v22  ;;  %v6181_v31 = vadd.f32 %v6165_v63, %v14018_v23  ;;  %v6183_v6 = vadd.f32 %v6167_v8, %v14021_v27 }
0x24b3   :  { %12391 = vtanh.f32 %v6192_v36  ;;  %v6196_v34 = vmul.f32 0.7978846, %v6180_v38  ;;  %v6198_v52 = vmul.f32 0.7978846, %v6182_v2  ;;  %v14048_v9 = vadd.f32 %v6066_v13, %v13980_v4 }
0x24b4   :  { %12393 = vtanh.f32 %v6194_v50  ;;  %v6197_v57 = vmul.f32 0.7978846, %v6181_v31  ;;  %v6199_v33 = vmul.f32 0.7978846, %v6183_v6  ;;  %v14051_v56 = vadd.f32 %v6119_v26, %v13983_v19 }
0x24b5   :  { %12395 = vtanh.f32 %v6193_v18  ;;  %v6136_v29 = vmul.f32 %v14048_v9, %v14048_v9  ;;  %v14056_v14 = vadd.f32 %v6068_v44, %v13986_v3  ;;  %v14059_v49 = vadd.f32 %v6121_v42, %v13989_v24 }
0x24b6   :  { %12397 = vtanh.f32 %v6195_v12  ;;  %v6138_v60 = vmul.f32 %v14051_v56, %v14051_v56  ;;  %v14064_v0 = vadd.f32 %v6070_v7, %v13980_v4  ;;  %v14067_v48 = vadd.f32 %v6123_v46, %v13983_v19 }
0x24b7   :  { %12399 = vtanh.f32 %v6196_v34  ;;  %v6152_v5 = vmul.f32 %v6136_v29, %v14048_v9  ;;  %v6137_v30 = vmul.f32 %v14056_v14, %v14056_v14  ;;  %v6139_v37 = vmul.f32 %v14059_v49, %v14059_v49 }
0x24b8   :  { %12401 = vtanh.f32 %v6198_v52  ;;  %v6154_v1 = vmul.f32 %v6138_v60, %v14051_v56  ;;  %v6140_v13 = vmul.f32 %v14064_v0, %v14064_v0  ;;  %v6142_v4 = vmul.f32 %v14067_v48, %v14067_v48 }
0x24b9   :  { %12403 = vtanh.f32 %v6197_v57  ;;  %v6168_v19 = vmul.f32 0.044715, %v6152_v5  ;;  %v6153_v26 = vmul.f32 %v6137_v30, %v14056_v14  ;;  %v6155_v10 = vmul.f32 %v6139_v37, %v14059_v49 }
0x24ba   :  { %12405 = vtanh.f32 %v6199_v33  ;;  %v6170_v32 = vmul.f32 0.044715, %v6154_v1  ;;  %v6156_v35 = vmul.f32 %v6140_v13, %v14064_v0  ;;  %v6158_v25 = vmul.f32 %v6142_v4, %v14067_v48 }
0x24bb   :  { %v6184_v44 = vadd.f32 %v6168_v19, %v14048_v9  ;;  %v6169_v42 = vmul.f32 0.044715, %v6153_v26  ;;  %v6171_v17 = vmul.f32 0.044715, %v6155_v10  ;;  %v14085_v22 = vadd.f32 %v6072_v15, %v13986_v3 }
0x24bc   :  { %v6186_v63 = vadd.f32 %v6170_v32, %v14051_v56  ;;  %v6172_v8 = vmul.f32 0.044715, %v6156_v35  ;;  %v6174_v7 = vmul.f32 0.044715, %v6158_v25  ;;  %v14089_v46 = vadd.f32 %v6125_v62, %v13989_v24 }
0x24bd   :  { %v12392_v36 = vpop.eup %12391  ;;  %v6200_v50 = vmul.f32 0.7978846, %v6184_v44  ;;  %v6185_v38 = vadd.f32 %v6169_v42, %v14056_v14  ;;  %v6187_v2 = vadd.f32 %v6171_v17, %v14059_v49  ;;  %v6141_v18 = vmul.f32 %v14085_v22, %v14085_v22 }
0x24be   :  { %v12394_v12 = vpop.eup %12393  ;;  %v6224_v31 = vadd.f32 1.0, %v12392_v36  ;;  %v6202_v3 = vmul.f32 0.7978846, %v6186_v63  ;;  %v6188_v15 = vadd.f32 %v6172_v8, %v14064_v0  ;;  %v6190_v6 = vadd.f32 %v6174_v7, %v14067_v48 }
0x24bf   :  { %v12396_v34 = vpop.eup %12395  ;;  %v6226_v52 = vadd.f32 1.0, %v12394_v12  ;;  %12407 = vtanh.f32 %v6200_v50  ;;  %v6201_v24 = vmul.f32 0.7978846, %v6185_v38  ;;  %v6203_v62 = vmul.f32 0.7978846, %v6187_v2 }
0x24c0   :  { %v12398_v57 = vpop.eup %12397  ;;  %v6240_v33 = vmul.f32 0.5, %v6224_v31  ;;  %12409 = vtanh.f32 %v6202_v3  ;;  %v6204_v29 = vmul.f32 0.7978846, %v6188_v15  ;;  %v6206_v60 = vmul.f32 0.7978846, %v6190_v6 }
0x24c1   :  { %v12400_v5 = vpop.eup %12399  ;;  %v6242_v30 = vmul.f32 0.5, %v6226_v52  ;;  %12411 = vtanh.f32 %v6201_v24  ;;  %v6157_v37 = vmul.f32 %v6141_v18, %v14085_v22  ;;  %v6143_v1 = vmul.f32 %v14089_v46, %v14089_v46 }
0x24c2   :  { %v12402_v13 = vpop.eup %12401  ;;  %v6256_v4 = vmul.f32 %v6240_v33, %v13992_v59  ;;  %v6228_v19 = vadd.f32 1.0, %v12400_v5  ;;  %12413 = vtanh.f32 %v6203_v62  ;;  %v6225_v26 = vadd.f32 1.0, %v12396_v34 }
0x24c3   :  { %v12404_v10 = vpop.eup %12403  ;;  %v6258_v32 = vmul.f32 %v6242_v30, %v13995_v61  ;;  %v6230_v35 = vadd.f32 1.0, %v12402_v13  ;;  %12415 = vtanh.f32 %v6204_v29  ;;  %v6173_v25 = vmul.f32 0.044715, %v6157_v37 }
0x24c4   :  { %v12406_v44 = vpop.eup %12405  ;;  %v6244_v42 = vmul.f32 0.5, %v6228_v19  ;;  %12417 = vtanh.f32 %v6206_v60  ;;  %v6159_v17 = vmul.f32 %v6143_v1, %v14089_v46  ;;  %v6229_v63 = vadd.f32 1.0, %v12404_v10 }
0x24c5   :  { %v6246_v8 = vmul.f32 0.5, %v6230_v35  ;;  %v6189_v7 = vadd.f32 %v6173_v25, %v14085_v22  ;;  %v6241_v36 = vmul.f32 0.5, %v6225_v26  ;;  %v6227_v59 = vadd.f32 1.0, %v12398_v57 }
0x24c6   :  { %v6260_v50 = vmul.f32 %v6244_v42, %v14008_v43  ;;  %v6175_v38 = vmul.f32 0.044715, %v6159_v17  ;;  %v6245_v2 = vmul.f32 0.5, %v6229_v63  ;;  %v6231_v18 = vadd.f32 1.0, %v12406_v44 }
0x24c7   :  { %v6262_v61 = vmul.f32 %v6246_v8, %v14011_v45  ;;  %v6205_v12 = vmul.f32 0.7978846, %v6189_v7  ;;  %v6257_v31 = vmul.f32 %v6241_v36, %v13998_v58  ;;  %v6243_v3 = vmul.f32 0.5, %v6227_v59 }
0x24c8   :  { %v6272_v15 = vpack.c.bf16 %v6260_v50, %v6256_v4  ;;  %v6191_v6 = vadd.f32 %v6175_v38, %v14089_v46  ;;  %v6261_v34 = vmul.f32 %v6245_v2, %v14018_v23  ;;  %v6247_v52 = vmul.f32 0.5, %v6231_v18 }
0x24c9   :  { %v12408_v24 = vpop.eup %12407  ;;  %v6274_v62 = vpack.c.bf16 %v6262_v61, %v6258_v32  ;;  %12419 = vtanh.f32 %v6205_v12  ;;  %v6259_v43 = vmul.f32 %v6243_v3, %v14001_v51  ;;  %v12562_v3 = vld [vmem:[#allocation17 + $0x18] sm:$0x3f] }
0x24ca   :  { %v12410_v57 = vpop.eup %12409  ;;  %v6207_v33 = vmul.f32 0.7978846, %v6191_v6  ;;  %v6273_v29 = vpack.c.bf16 %v6261_v34, %v6257_v31  ;;  %v6263_v45 = vmul.f32 %v6247_v52, %v14021_v27  ;;  %v6232_v60 = vadd.f32 1.0, %v12408_v24 }
0x24cb   :  { %v12412_v5 = vpop.eup %12411  ;;  %v6234_v58 = vadd.f32 1.0, %v12410_v57 }
0x24cc   :  { %v12414_v30 = vpop.eup %12413  ;;  %12421 = vtanh.f32 %v6207_v33  ;;  %6573 = vmatprep.mubr.bf16.mxu1 %v6273_v29  ;;  %v6275_v37 = vpack.c.bf16 %v6263_v45, %v6259_v43  ;;  %v6248_v4 = vmul.f32 0.5, %v6232_v60  ;;  %v6233_v26 = vadd.f32 1.0, %v12412_v5 }
0x24cd   :  { %v12416_v1 = vpop.eup %12415  ;;  %6574 = vmatmul.mubr.bf16.vlgmr.msra.gmra.mrb[120].mxu1 %v6272_v15  ;;  %v6250_v19 = vmul.f32 0.5, %v6234_v58  ;;  %v6235_v44 = vadd.f32 1.0, %v12414_v30  ;;  %v6348_v15 = vrot.slane %v12562_v3, %v13326_v21 }
0x24ce   :  { %v12418_v23 = vpop.eup %12417  ;;  %6622 = vmatprep.mubr.bf16.mxu0 %v6275_v37  ;;  %v6236_v13 = vadd.f32 1.0, %v12416_v1  ;;  %v6264_v27 = vmul.f32 %v6248_v4, %v14048_v9  ;;  %v6249_v8 = vmul.f32 0.5, %v6233_v26 }
0x24cf   :  { %6623 = vmatmul.mubr.bf16.vlgmr.msra.gmra.mrb[124].mxu0 %v6274_v62  ;;  %v6238_v51 = vadd.f32 1.0, %v12418_v23  ;;  %v6266_v42 = vmul.f32 %v6250_v19, %v14051_v56  ;;  %v6251_v2 = vmul.f32 0.5, %v6235_v44 }
0x24d0   :  { %v6252_v10 = vmul.f32 0.5, %v6236_v13  ;;  %v6265_v18 = vmul.f32 %v6249_v8, %v14056_v14  ;;  %v11932_v8 = vld [vmem:[#allocation8 + $0x31c] ss:$12 sps:$4 sm:$0xff]  }
0x24d1   :  { %v6254_v32 = vmul.f32 0.5, %v6238_v51  ;;  %v6267_v12 = vmul.f32 %v6251_v2, %v14059_v49 }
0x24d2   :  { %v6268_v35 = vmul.f32 %v6252_v10, %v14064_v0 }
0x24d3   :  { %v12420_v25 = vpop.eup %12419  ;;  %v6270_v17 = vmul.f32 %v6254_v32, %v14067_v48 }
0x24d4   :  { %v6237_v63 = vadd.f32 1.0, %v12420_v25  ;;  %v6276_v7 = vpack.c.bf16 %v6268_v35, %v6264_v27 }
0x24d5   :  { %v6278_v36 = vpack.c.bf16 %v6270_v17, %v6266_v42  ;;  %v11927_v17 = vld [vmem:[#allocation8 + $0x300] ss:$12 sps:$4 sm:$0xff]  }
0x24d6   :  { %v12422_v59 = vpop.eup %12421  ;;  %v6253_v50 = vmul.f32 0.5, %v6237_v63  ;;  %v11929_v63 = vld [vmem:[#allocation8 + $0x304] ss:$12 sps:$4 sm:$0xff]  }
0x24d7   :  { %v6239_v38 = vadd.f32 1.0, %v12422_v59  ;;  %6886 = vmatprep.subr.bf16.mxu1 %v11929_v63 }
0x24d8   :  { %v6269_v9 = vmul.f32 %v6253_v50, %v14085_v22  ;;  %6887 = vmatpush1.bf16.msra.mxu1 %v11927_v17 }
0x24d9   :  { %v6255_v61 = vmul.f32 0.5, %v6239_v38  ;;  %6888 = vmatprep.subr.bf16.mxu1 %v11932_v8 }
0x24da   :  { %v6277_v0 = vpack.c.bf16 %v6269_v9, %v6265_v18 }
0x24db   :  { %v6271_v56 = vmul.f32 %v6255_v61, %v14089_v46 }
0x24dc   :  { %6581 = vmatprep.mubr.bf16.mxu1 %v6277_v0 }
0x24dd   :  { %v6279_v48 = vpack.c.bf16 %v6271_v56, %v6267_v12  ;;  %6582 = vmatmul.mubr.bf16.gmra.mrb[124].mxu1 %v6276_v7  ;;  %v11930_v7 = vld [vmem:[#allocation8 + $0x318] ss:$12 sps:$4 sm:$0xff]  }
0x24de   :  { %6918 = vmatprep.mubr.bf16.mxu1 %v12839_v55  ;;  %6889 = vmatpush1.bf16.msra.mxu1 %v11930_v7 }
0x24df   :  { %6630 = vmatprep.mubr.bf16.mxu0 %v6279_v48 }
0x24e0   :  { %6631 = vmatmul.mubr.bf16.gmra.mrb[128].mxu0 %v6278_v36 }
0x25a0   :  { %v10817_v31 = vpop.f32.mrb[120].mxu1 }
0x25a1   :  { %v10818_v14 = vpop.f32.mrb[121].mxu1 }
0x25a2   :  { %v10845_v6 = vpop.f32.mrb[124].mxu0  ;;  %v10819_v22 = vadd.f32 %v10818_v14, %v10817_v31  ;;  %v10820_v34 = vpop.f32.mrb[122].mxu1  ;;  %v11936_v14 = vld [vmem:[#allocation8 + $0x308] ss:$12 sps:$4 sm:$0xff]  }
0x25a3   :  { %v10846_v52 = vpop.f32.mrb[125].mxu0  ;;  %v10821_v24 = vpop.f32.mrb[123].mxu1  ;;  %11293 = vmatprep.subr.bf16.mxu0 %v11936_v14 }
0x25a4   :  { %v6576_v49 = vadd.f32 %v10819_v22, %v6348_v15  ;;  %v10847_v62 = vadd.f32 %v10846_v52, %v10845_v6  ;;  %v10848_v46 = vpop.f32.mrb[126].mxu0  ;;  %v10822_v43 = vadd.f32 %v10821_v24, %v10820_v34  ;;  %v11933_v6 = vld [vmem:[#allocation8 + $0x330] ss:$12 sps:$4 sm:$0xff]   ;;  %11294 = vmatpush3.bf16.msra.mxu0 %v11936_v14  ;;  %v11939_v22 = vld [vmem:[#allocation8 + $0x34c] ss:$12 sps:$4 sm:$0xff]  }
0x25a5   :  { %v10849_v57 = vpop.f32.mrb[127].mxu0  ;;  %v11940_v34 = vld [vmem:[#allocation8 + $0x320] ss:$12 sps:$4 sm:$0xff]   ;;  %v11937_v52 = vld [vmem:[#allocation8 + $0x348] ss:$12 sps:$4 sm:$0xff]  }
0x25a6   :  { %v6625_v33 = vadd.f32 %v10847_v62, %v6576_v49  ;;  %v6579_v29 = vadd.f32 %v10822_v43, %v6348_v15  ;;  %v10850_v45 = vadd.f32 %v10849_v57, %v10848_v46  ;;  %11295 = vmatprep.subr.bf16.mxu0 %v11940_v34  ;;  %v11943_v24 = vld [vmem:[#allocation8 + $0x364] ss:$12 sps:$4 sm:$0xff]   ;;  %v11941_v62 = vld [vmem:[#allocation8 + $0x360] ss:$12 sps:$4 sm:$0xff]   ;;  %v11947_v46 = vld [vmem:[#allocation8 + $0x37c] ss:$12 sps:$4 sm:$0xff]  }
0x25a7   :  { %v11944_v49 = vld [vmem:[#allocation8 + $0x338] ss:$12 sps:$4 sm:$0xff]   ;;  %v11948_v43 = vld [vmem:[#allocation8 + $0x350] ss:$12 sps:$4 sm:$0xff]  }
0x25a8   :  { %v6628_v60 = vadd.f32 %v10850_v45, %v6579_v29  ;;  %v14122_v5 = vadd.f32 %v6625_v33, %v13934_v39  ;;  %11296 = vmatpush3.bf16.msra.mxu0 %v11940_v34  ;;  %v11945_v57 = vld [vmem:[#allocation8 + $0x378] ss:$12 sps:$4 sm:$0xff]   ;;  %v11951_v33 = vld [vmem:[#allocation8 + $0x394] ss:$12 sps:$4 sm:$0xff]   ;;  %v11949_v45 = vld [vmem:[#allocation8 + $0x390] ss:$12 sps:$4 sm:$0xff]  }
0x25a9   :  { %11297 = vmatprep.subr.bf16.mxu0 %v11944_v49  ;;  %v11952_v29 = vld [vmem:[#allocation8 + $0x368] ss:$12 sps:$4 sm:$0xff]  }
0x25aa   :  { %6645 = vadd.xlane.f32.xlu0 %v14122_v5  ;;  %v14126_v58 = vadd.f32 %v6628_v60, %v13937_v16  ;;  %v11955_v60 = vld [vmem:[#allocation8 + $0x3ac] ss:$12 sps:$4 sm:$0xff]  }
0x25ac   :  { %6647 = vadd.xlane.f32.xlu1 %v14126_v58  ;;  %11298 = vmatpush3.bf16.msra.mxu0 %v11944_v49 }
0x25ad   :  { %11299 = vmatprep.subr.bf16.mxu0 %v11948_v43 }
0x25b0   :  { %v10823_v30 = vpop.f32.mrb[124].mxu1  ;;  %11300 = vmatpush3.bf16.msra.mxu0 %v11948_v43 }
0x25b1   :  { %v10824_v37 = vpop.f32.mrb[125].mxu1  ;;  %11301 = vmatprep.subr.bf16.mxu0 %v11952_v29 }
0x25b2   :  { %v10825_v1 = vadd.f32 %v10824_v37, %v10823_v30  ;;  %v10826_v23 = vpop.f32.mrb[126].mxu1  ;;  %v11956_v30 = vld [vmem:[#allocation8 + $0x380] ss:$12 sps:$4 sm:$0xff]   ;;  %v11953_v37 = vld [vmem:[#allocation8 + $0x3a8] ss:$12 sps:$4 sm:$0xff]  }
0x25b3   :  { %v10851_v13 = vpop.f32.mrb[128].mxu0  ;;  %v10827_v4 = vpop.f32.mrb[127].mxu1 }
0x25b4   :  { %v6584_v51 = vadd.f32 %v10825_v1, %v6348_v15  ;;  %v10852_v19 = vpop.f32.mrb[129].mxu0  ;;  %v10828_v26 = vadd.f32 %v10827_v4, %v10826_v23  ;;  %11302 = vmatpush3.bf16.msra.mxu0 %v11952_v29  ;;  %v11957_v1 = vld [vmem:[#allocation8 + $0x398] ss:$12 sps:$4 sm:$0xff]   ;;  %v11958_v23 = vld [vmem:[#allocation8 + $0x3b0] ss:$12 sps:$4 sm:$0xff]  }
0x25b5   :  { %v10853_v10 = vadd.f32 %v10852_v19, %v10851_v13  ;;  %v10854_v32 = vpop.f32.mrb[130].mxu0  ;;  %11303 = vmatprep.subr.bf16.mxu0 %v11956_v30 }
0x25b6   :  { %v6587_v39 = vadd.f32 %v10828_v26, %v6348_v15  ;;  %v10855_v27 = vpop.f32.mrb[131].mxu0  ;;  %v11935_v15 = vld [vmem:[#allocation8 + $0x334] ss:$12 sps:$4 sm:$0xff]  }
0x25b7   :  { %v6633_v35 = vadd.f32 %v10853_v10, %v6584_v51  ;;  %v10856_v25 = vadd.f32 %v10855_v27, %v10854_v32  ;;  %6890 = vmatprep.subr.bf16.mxu1 %v11935_v15  ;;  %v14159_v32 = vld [vmem:[#allocation17 + $0x20] sm:$0x3f] }
0x25b8   :  { %6891 = vmatpush1.bf16.msra.mxu1 %v11933_v6  ;;  %11304 = vmatpush3.bf16.msra.mxu0 %v11956_v30  ;;  %v6700_v7 = vrot.slane %v14159_v32, %v13092_v20 }
0x25b9   :  { %v6636_v44 = vadd.f32 %v10856_v25, %v6587_v39  ;;  %v14130_v16 = vadd.f32 %v6633_v35, %v13941_v28  ;;  %6892 = vmatprep.subr.bf16.mxu1 %v11939_v22  ;;  %11305 = vmatprep.subr.bf16.mxu0 %v11957_v1  ;;  %v6692_v39 = vrot.slane %v14159_v32, %v13084_v11  ;;  %v6741_v22 = vld [vmem:[#allocation10 + $0x4] ss:$8 sm:$0x7] }
0x25ba   :  { %v6746_v34 = vrot.slane %v6741_v22, %v13084_v11 }
0x25bb   :  { %6649 = vadd.xlane.f32.xlu0 %v14130_v16  ;;  %v14134_v42 = vadd.f32 %v6636_v44, %v13945_v47 }
0x25bc   :  { %6893 = vmatpush1.bf16.msra.mxu1 %v11937_v52  ;;  %11306 = vmatpush3.bf16.msra.mxu0 %v11957_v1  ;;  %v6750_v52 = vrot.slane %v6741_v22, %v13092_v20 }
0x25bd   :  { %6651 = vadd.xlane.f32.xlu1 %v14134_v42  ;;  %6894 = vmatprep.subr.bf16.mxu1 %v11943_v24 }
0x25be   :  { %11307 = vmatprep.subr.bf16.mxu0 %v11958_v23 }
0x25c0   :  { %6895 = vmatpush1.bf16.msra.mxu1 %v11941_v62  ;;  %11308 = vmatpush3.bf16.msra.mxu0 %v11958_v23 }
0x25c1   :  { %6896 = vmatprep.subr.bf16.mxu1 %v11947_v46  ;;  %11331 = vmatprep.subr.bf16.mxu0 %v12840_v40 }
0x25c4   :  { %6897 = vmatpush1.bf16.msra.mxu1 %v11945_v57 }
0x25c5   :  { %6898 = vmatprep.subr.bf16.mxu1 %v11951_v33 }
0x25c8   :  { %6899 = vmatpush1.bf16.msra.mxu1 %v11949_v45  ;;  %v6754_v45 = vrot.slane %v6741_v22, %v13108_v41 }
0x25c9   :  { %6900 = vmatprep.subr.bf16.mxu1 %v11955_v60 }
0x25cc   :  { %6901 = vmatpush1.bf16.msra.mxu1 %v11953_v37 }
0x25cd   :  { %11313 = vmatprep.subr.bf16.mxu1 %v12840_v40 }
0x2637   :  { %v6646_v36 = vpop.xlane.xlu0 %6645 }
0x2638   :  { %v6653_v59 = vmul.f32 0.0078125, %v6646_v36 }
0x2639   :  { %v6648_v50 = vpop.xlane.xlu1 %6647 }
0x263a   :  { %v14138_v28 = vsub.f32 %v14122_v5, %v6653_v59  ;;  %v6654_v38 = vmul.f32 0.0078125, %v6648_v50 }
0x263c   :  { %v14141_v47 = vsub.f32 %v14126_v58, %v6654_v38  ;;  %v6661_v2 = vmul.f32 %v14138_v28, %v14138_v28 }
0x263e   :  { %6665 = vadd.xlane.f32.xlu0 %v6661_v2  ;;  %v6662_v18 = vmul.f32 %v14141_v47, %v14141_v47 }
0x2640   :  { %6667 = vadd.xlane.f32.xlu1 %v6662_v18 }
0x2648   :  { %v6650_v9 = vpop.xlane.xlu0 %6649 }
0x2649   :  { %v6655_v61 = vmul.f32 0.0078125, %v6650_v9 }
0x264a   :  { %v6652_v0 = vpop.xlane.xlu1 %6651 }
0x264b   :  { %v14148_v12 = vsub.f32 %v14130_v16, %v6655_v61  ;;  %v6656_v56 = vmul.f32 0.0078125, %v6652_v0 }
0x264d   :  { %v14151_v48 = vsub.f32 %v14134_v42, %v6656_v56  ;;  %v6663_v31 = vmul.f32 %v14148_v12, %v14148_v12 }
0x264f   :  { %6669 = vadd.xlane.f32.xlu0 %v6663_v31  ;;  %v6664_v3 = vmul.f32 %v14151_v48, %v14151_v48 }
0x2651   :  { %6671 = vadd.xlane.f32.xlu1 %v6664_v3 }
0x26cb   :  { %v6666_v13 = vpop.xlane.xlu0 %6665 }
0x26cc   :  { %v6673_v4 = vmul.f32 0.0078125, %v6666_v13 }
0x26cd   :  { %v6668_v51 = vpop.xlane.xlu1 %6667 }
0x26ce   :  { %v6677_v19 = vadd.f32 1e-05, %v6673_v4  ;;  %v6674_v26 = vmul.f32 0.0078125, %v6668_v51 }
0x26d0   :  { %12423 = vrsqrt.f32 %v6677_v19  ;;  %v6678_v10 = vadd.f32 1e-05, %v6674_v26 }
0x26d2   :  { %12425 = vrsqrt.f32 %v6678_v10 }
0x26da   :  { %v12424_v27 = vpop.eup %12423 }
0x26db   :  { %v6685_v35 = vmul.f32 %v12424_v27, %v14138_v28 }
0x26dc   :  { %v12426_v25 = vpop.eup %12425  ;;  %v6670_v44 = vpop.xlane.xlu0 %6669 }
0x26dd   :  { %v6693_v17 = vmul.f32 %v6692_v39, %v6685_v35  ;;  %v6686_v63 = vmul.f32 %v12426_v25, %v14141_v47  ;;  %v6675_v8 = vmul.f32 0.0078125, %v6670_v44 }
0x26de   :  { %v6672_v36 = vpop.xlane.xlu1 %6671 }
0x26df   :  { %v6694_v59 = vmul.f32 %v6692_v39, %v6686_v63  ;;  %v6679_v50 = vadd.f32 1e-05, %v6675_v8  ;;  %v6676_v38 = vmul.f32 0.0078125, %v6672_v36  ;;  %v6701_v18 = vadd.f32 %v6700_v7, %v6693_v17 }
0x26e1   :  { %12427 = vrsqrt.f32 %v6679_v50  ;;  %v6680_v2 = vadd.f32 1e-05, %v6676_v38  ;;  %v6702_v9 = vadd.f32 %v6700_v7, %v6694_v59 }
0x26e3   :  { %12429 = vrsqrt.f32 %v6680_v2  ;;  %v6705_v61 = vpack.c.bf16 %v6702_v9, %v6701_v18 }
0x26e5   :  { %6919 = vmatmul.mubr.bf16.vlgmr.msra.gmra.mrb[128].mxu1 %v6705_v61  ;;  %11309 = vmatprep.mubr.bf16.mxu0 %v6705_v61 }
0x26e6   :  { %6928 = vmatprep.mubr.bf16.mxu1 %v12839_v55 }
0x26eb   :  { %v12428_v28 = vpop.eup %12427 }
0x26ec   :  { %v6687_v47 = vmul.f32 %v12428_v28, %v14148_v12 }
0x26ed   :  { %v12430_v0 = vpop.eup %12429 }
0x26ee   :  { %v6688_v56 = vmul.f32 %v12430_v0, %v14151_v48  ;;  %v6695_v31 = vmul.f32 %v6692_v39, %v6687_v47 }
0x26f0   :  { %v6696_v3 = vmul.f32 %v6692_v39, %v6688_v56  ;;  %v6703_v15 = vadd.f32 %v6700_v7, %v6695_v31 }
0x26f2   :  { %v6704_v14 = vadd.f32 %v6700_v7, %v6696_v3 }
0x26f4   :  { %v6706_v6 = vpack.c.bf16 %v6704_v14, %v6703_v15 }
0x26f6   :  { %6929 = vmatmul.mubr.bf16.gmra.mrb[132].mxu1 %v6706_v6  ;;  %11310 = vmatmul.mubr.bf16.vlgmr.msra.gmra.mrb[132].mxu0 %v6706_v6 }
0x26f7   :  { %11315 = vmatprep.mubr.msk.bf16.mxu1 %vm12841_vm1, %v12840_v40  ;;  %11333 = vmatprep.mubr.msk.bf16.mxu0 %vm12841_vm1, %v12840_v40 }
0x27b8   :  { %v6920_v12 = vpop.f32.mrb[128].mxu1 }
0x27b9   :  { %v6922_v48 = vpop.f32.mrb[129].mxu1  ;;  %v6921_v49 = vadd.f32 %v6920_v12, %v6746_v34 }
0x27ba   :  { %v6924_v24 = vpop.f32.mrb[130].mxu1  ;;  %v6923_v43 = vadd.f32 %v6922_v48, %v6750_v52 }
0x27bb   :  { %v6925_v62 = vadd.f32 %v6924_v24, %v6746_v34  ;;  %v6926_v46 = vpop.f32.mrb[131].mxu1 }
0x27bc   :  { %v6927_v57 = vadd.f32 %v6926_v46, %v6750_v52 }
0x27bd   :  { %v6988_v33 = vpack.c.bf16 %v6925_v62, %v6921_v49 }
0x27be   :  { %v6990_v29 = vpack.c.bf16 %v6927_v57, %v6923_v43 }
0x27c0   :  { %11314 = vmatpush3.bf16.xpose.msra.mxu1 %v6990_v29 }
0x27c1   :  { %11319 = vmatprep.subr.bf16.mxu1 %v12840_v40 }
0x27c7   :  { %11316 = vmatmul.mubr.bf16.vlgmr.msra.gmra.mrb[136].mxu1 %v6988_v33 }
0x27c8   :  { %11321 = vmatprep.mubr.msk.bf16.mxu1 %vm12841_vm1, %v12840_v40 }
0x27c9   :  { %v6930_v60 = vpop.f32.mrb[132].mxu1  ;;  %v11311_v30 = vpop.f32.mrb[132].mxu0 }
0x27ca   :  { %v6932_v37 = vpop.f32.mrb[133].mxu1  ;;  %v6973_v1 = vpop.f32.mrb[133].mxu0  ;;  %v6931_v4 = vadd.f32 %v6930_v60, %v6746_v34  ;;  %v6982_v51 = vadd.f32 %v11311_v30, %v6754_v45 }
0x27cb   :  { %v6934_v23 = vpop.f32.mrb[134].mxu1  ;;  %v11312_v13 = vpop.f32.mrb[134].mxu0  ;;  %v6933_v27 = vadd.f32 %v6932_v37, %v6750_v52  ;;  %v6974_v35 = vadd.f32 %v6973_v1, %v6754_v45 }
0x27cc   :  { %v6935_v19 = vadd.f32 %v6934_v23, %v6746_v34  ;;  %v6985_v26 = vadd.f32 %v11312_v13, %v6754_v45  ;;  %v6936_v10 = vpop.f32.mrb[135].mxu1  ;;  %v6976_v39 = vpop.f32.mrb[135].mxu0  ;;  %v11959_v13 = vld [vmem:[#allocation11 + $0x100] sm:$0xff]  }
0x27cd   :  { %v6937_v25 = vadd.f32 %v6936_v10, %v6750_v52  ;;  %v6977_v44 = vadd.f32 %v6976_v39, %v6754_v45 }
0x27ce   :  { %v6989_v17 = vpack.c.bf16 %v6935_v19, %v6931_v4  ;;  %v7125_v63 = vpack.c.bf16 %v6985_v26, %v6982_v51 }
0x27cf   :  { %v6991_v8 = vpack.c.bf16 %v6937_v25, %v6933_v27  ;;  %v7124_v7 = vpack.c.bf16 %v6977_v44, %v6974_v35  ;;  %v11960_v35 = vld [vmem:[#allocation11 + $0x108] sm:$0xff]  }
0x27d0   :  { %11332 = vmatpush3.bf16.msra.mxu0 %v7125_v63  ;;  %v11962_v63 = vld [vmem:[#allocation11 + $0x118] sm:$0xff]  }
0x27d1   :  { %11320 = vmatpush3.bf16.xpose.msra.mxu1 %v6991_v8 }
0x27d2   :  { %11325 = vmatprep.subr.bf16.mxu1 %v12840_v40 }
0x27d8   :  { %11322 = vmatmul.mubr.bf16.vlgmr.msra.gmra.mrb[140].mxu1 %v6989_v17  ;;  %v11961_v17 = vld [vmem:[#allocation11 + $0x110] sm:$0xff]  }
0x27d9   :  { %11326 = vmatpush3.bf16.msra.mxu1 %v7124_v7  ;;  %11327 = vmatprep.mubr.msk.bf16.mxu1 %vm12841_vm1, %v12840_v40  ;;  %v11963_v7 = vld [vmem:[#allocation11 + $0x120] sm:$0xff]  }
0x27da   :  { %11337 = vmatprep.subr.bf16.mxu1 %v11959_v13 }
0x289a   :  { %v7026_v36 = vpop.f32.mrb[136].mxu1 }
0x289b   :  { %v7074_v59 = vmul.f32 0.088388346, %v7026_v36  ;;  %v11317_v50 = vpop.f32.mrb[137].mxu1 }
0x289c   :  { %v7029_v38 = vpop.f32.mrb[138].mxu1 }
0x289d   :  { %v7075_v2 = vmul.f32 0.088388346, %v7029_v38  ;;  %v11318_v18 = vpop.f32.mrb[139].mxu1  ;;  %v7078_v9 = vsel %vm705_vm2, %v7074_v59, -inf }
0x289e   :  { %7079 = vmax.xlane.f32.xlu0 %v7078_v9  ;;  %v11965_v18 = vld [vmem:[#allocation11 + $0x130] sm:$0xff]   ;;  %v11966_v9 = vld [vmem:[#allocation11 + $0x138] sm:$0xff]  }
0x289f   :  { %v7081_v61 = vsel %vm705_vm2, %v7075_v2, -inf }
0x28a0   :  { %7082 = vmax.xlane.f32.xlu1 %v7081_v61 }
0x28ab   :  { %v7067_v28 = vpop.f32.mrb[140].mxu1 }
0x28ac   :  { %v7076_v47 = vmul.f32 0.088388346, %v7067_v28  ;;  %v11323_v0 = vpop.f32.mrb[141].mxu1 }
0x28ad   :  { %v7070_v56 = vpop.f32.mrb[142].mxu1 }
0x28ae   :  { %v7077_v31 = vmul.f32 0.088388346, %v7070_v56  ;;  %v11324_v3 = vpop.f32.mrb[143].mxu1  ;;  %v7084_v15 = vsel %vm705_vm2, %v7076_v47, -inf }
0x28af   :  { %7085 = vmax.xlane.f32.xlu0 %v7084_v15 }
0x28b0   :  { %v7087_v14 = vsel %vm705_vm2, %v7077_v31, -inf }
0x28b1   :  { %7088 = vmax.xlane.f32.xlu1 %v7087_v14 }
0x292b   :  { %v7080_v6 = vpop.xlane.xlu0 %7079 }
0x292c   :  { %v7090_v22 = vsub.f32 %v7074_v59, %v7080_v6 }
0x292d   :  { %v7083_v34 = vpop.xlane.xlu1 %7082 }
0x292e   :  { %v7094_v12 = vmul.f32 1.442695, %v7090_v22  ;;  %v7091_v52 = vsub.f32 %v7075_v2, %v7083_v34  ;;  %v11964_v2 = vld [vmem:[#allocation11 + $0x128] sm:$0xff]   ;;  %v7236_v22 = vrot.slane %v14159_v32, %v13108_v41 }
0x2930   :  { %12431 = vpow2.f32 %v7094_v12  ;;  %v7096_v48 = vmul.f32 1.442695, %v7091_v52 }
0x2932   :  { %12433 = vpow2.f32 %v7096_v48 }
0x293a   :  { %v12432_v24 = vpop.eup %12431 }
0x293b   :  { %v7102_v49 = vsel %vm705_vm2, %v12432_v24, 0.0 }
0x293c   :  { %v12434_v62 = vpop.eup %12433  ;;  %v7086_v46 = vpop.xlane.xlu0 %7085  ;;  %7103 = vadd.xlane.f32.xlu0 %v7102_v49 }
0x293d   :  { %v7092_v43 = vsub.f32 %v7076_v47, %v7086_v46  ;;  %v7105_v57 = vsel %vm705_vm2, %v12434_v62, 0.0 }
0x293e   :  { %v7089_v33 = vpop.xlane.xlu1 %7088  ;;  %7106 = vadd.xlane.f32.xlu1 %v7105_v57 }
0x293f   :  { %v7098_v29 = vmul.f32 1.442695, %v7092_v43  ;;  %v7093_v45 = vsub.f32 %v7077_v31, %v7089_v33 }
0x2941   :  { %12435 = vpow2.f32 %v7098_v29  ;;  %v7100_v60 = vmul.f32 1.442695, %v7093_v45  ;;  %v11969_v45 = vld [vmem:[#allocation13 + $0x404] ss:$16 sps:$4 sm:$0xff]  }
0x2942   :  { %7616 = vmatprep.subr.bf16.mxu0 %v11969_v45 }
0x2943   :  { %12437 = vpow2.f32 %v7100_v60  ;;  %v11970_v60 = vld [vmem:[#allocation13 + $0x408] ss:$16 sps:$4 sm:$0xff]  }
0x294b   :  { %v12436_v30 = vpop.eup %12435 }
0x294c   :  { %v7108_v37 = vsel %vm705_vm2, %v12436_v30, 0.0 }
0x294d   :  { %v12438_v1 = vpop.eup %12437  ;;  %7109 = vadd.xlane.f32.xlu0 %v7108_v37  ;;  %v11978_v37 = vld [vmem:[#allocation13 + $0x42c] ss:$16 sps:$4 sm:$0xff]  }
0x294e   :  { %v7111_v23 = vsel %vm705_vm2, %v12438_v1, 0.0 }
0x294f   :  { %7112 = vadd.xlane.f32.xlu1 %v7111_v23 }
0x29c9   :  { %v7104_v4 = vpop.xlane.xlu0 %7103 }
0x29ca   :  { %12439 = vrcp.f32 %v7104_v4 }
0x29cb   :  { %v7107_v51 = vpop.xlane.xlu1 %7106 }
0x29cc   :  { %12441 = vrcp.f32 %v7107_v51 }
0x29d4   :  { %v12440_v19 = vpop.eup %12439 }
0x29d5   :  { %v7118_v10 = vmul.f32 %v12440_v19, %v12432_v24 }
0x29d6   :  { %v12442_v26 = vpop.eup %12441 }
0x29d7   :  { %v7119_v39 = vmul.f32 %v12442_v26, %v12434_v62 }
0x29d9   :  { %v7122_v27 = vpack.c.bf16 %v7119_v39, %v7118_v10 }
0x29da   :  { %v7110_v25 = vpop.xlane.xlu0 %7109 }
0x29db   :  { %12443 = vrcp.f32 %v7110_v25  ;;  %11328 = vmatmul.mubr.msk.bf16.vlgmr.msra.gmra.mrb[144].mxu1 %vm705_vm2, %v7122_v27 }
0x29dc   :  { %v7113_v44 = vpop.xlane.xlu1 %7112  ;;  %11338 = vmatpush3.bf16.msra.mxu1 %v11959_v13 }
0x29dd   :  { %12445 = vrcp.f32 %v7113_v44  ;;  %11339 = vmatprep.subr.bf16.mxu1 %v11960_v35 }
0x29e0   :  { %11340 = vmatpush3.bf16.msra.mxu1 %v11960_v35 }
0x29e1   :  { %11341 = vmatprep.subr.bf16.mxu1 %v11961_v17 }
0x29e4   :  { %11342 = vmatpush3.bf16.msra.mxu1 %v11961_v17 }
0x29e5   :  { %v12444_v8 = vpop.eup %12443  ;;  %11343 = vmatprep.subr.bf16.mxu1 %v11962_v63 }
0x29e6   :  { %v7120_v59 = vmul.f32 %v12444_v8, %v12436_v30  ;;  %v11972_v30 = vld [vmem:[#allocation13 + $0x40c] ss:$16 sps:$4 sm:$0xff]  }
0x29e7   :  { %v12446_v36 = vpop.eup %12445 }
0x29e8   :  { %v7121_v50 = vmul.f32 %v12446_v36, %v12438_v1  ;;  %11344 = vmatpush3.bf16.msra.mxu1 %v11962_v63  ;;  %v11976_v1 = vld [vmem:[#allocation13 + $0x428] ss:$16 sps:$4 sm:$0xff]   ;;  %v11984_v36 = vld [vmem:[#allocation13 + $0x44c] ss:$16 sps:$4 sm:$0xff]  }
0x29e9   :  { %11345 = vmatprep.subr.bf16.mxu1 %v11963_v7 }
0x29ea   :  { %v7123_v38 = vpack.c.bf16 %v7121_v50, %v7120_v59  ;;  %v11979_v59 = vld [vmem:[#allocation13 + $0x440] ss:$16 sps:$4 sm:$0xff]   ;;  %v11982_v50 = vld [vmem:[#allocation13 + $0x448] ss:$16 sps:$4 sm:$0xff]  }
0x29ec   :  { %11334 = vmatmul.mubr.msk.bf16.vlgmr.msra.gmra.mrb[136].mxu0 %vm705_vm2, %v7123_v38  ;;  %11346 = vmatpush3.bf16.msra.mxu1 %v11963_v7  ;;  %v11981_v7 = vld [vmem:[#allocation13 + $0x444] ss:$16 sps:$4 sm:$0xff]  }
0x29ed   :  { %7648 = vmatprep.mubr.bf16.mxu0 %v12839_v55  ;;  %11347 = vmatprep.subr.bf16.mxu1 %v11964_v2  ;;  %v11987_v38 = vld [vmem:[#allocation13 + $0x464] ss:$16 sps:$4 sm:$0xff]  }
0x29f0   :  { %11348 = vmatpush3.bf16.msra.mxu1 %v11964_v2  ;;  %v11990_v2 = vld [vmem:[#allocation13 + $0x46c] ss:$16 sps:$4 sm:$0xff]  }
0x29f1   :  { %11349 = vmatprep.subr.bf16.mxu1 %v11965_v18 }
0x29f4   :  { %11350 = vmatpush3.bf16.msra.mxu1 %v11965_v18  ;;  %v11985_v18 = vld [vmem:[#allocation13 + $0x460] ss:$16 sps:$4 sm:$0xff]  }
0x29f5   :  { %11351 = vmatprep.subr.bf16.mxu1 %v11966_v9 }
0x29f8   :  { %11352 = vmatpush3.bf16.msra.mxu1 %v11966_v9  ;;  %v11988_v9 = vld [vmem:[#allocation13 + $0x468] ss:$16 sps:$4 sm:$0xff]  }
0x29f9   :  { %7669 = vmatprep.subr.bf16.mxu1 %v11972_v30 }
0x2aae   :  { %v7163_v61 = vpop.f32.mrb[144].mxu1 }
0x2aaf   :  { %v11329_v28 = vpop.f32.mrb[145].mxu1 }
0x2ab0   :  { %v7166_v47 = vpop.f32.mrb[146].mxu1  ;;  %v11996_v28 = vld [vmem:[#allocation13 + $0x48c] ss:$16 sps:$4 sm:$0xff]  }
0x2ab1   :  { %v7214_v0 = vpack.c.bf16 %v7166_v47, %v7163_v61  ;;  %v11330_v56 = vpop.f32.mrb[147].mxu1  ;;  %v11993_v61 = vld [vmem:[#allocation13 + $0x484] ss:$16 sps:$4 sm:$0xff]   ;;  %v11991_v47 = vld [vmem:[#allocation13 + $0x480] ss:$16 sps:$4 sm:$0xff]  }
0x2ab2   :  { %v11999_v56 = vld [vmem:[#allocation13 + $0x4a4] ss:$16 sps:$4 sm:$0xff]  }
0x2ab3   :  { %11353 = vmatprep.mubr.bf16.mxu1 %v7214_v0  ;;  %v11994_v0 = vld [vmem:[#allocation13 + $0x488] ss:$16 sps:$4 sm:$0xff]  }
0x2abf   :  { %v7207_v31 = vpop.f32.mrb[136].mxu0 }
0x2ac0   :  { %v11335_v3 = vpop.f32.mrb[137].mxu0 }
0x2ac1   :  { %v7210_v15 = vpop.f32.mrb[138].mxu0  ;;  %v11997_v3 = vld [vmem:[#allocation13 + $0x4a0] ss:$16 sps:$4 sm:$0xff]  }
0x2ac2   :  { %v7215_v14 = vpack.c.bf16 %v7210_v15, %v7207_v31  ;;  %v11336_v6 = vpop.f32.mrb[139].mxu0  ;;  %v12002_v31 = vld [vmem:[#allocation13 + $0x4ac] ss:$16 sps:$4 sm:$0xff]   ;;  %v12000_v15 = vld [vmem:[#allocation13 + $0x4a8] ss:$16 sps:$4 sm:$0xff]  }
0x2ac3   :  { %v12005_v6 = vld [vmem:[#allocation13 + $0x4c4] ss:$16 sps:$4 sm:$0xff]  }
0x2ac4   :  { %11354 = vmatmul.mubr.bf16.vlgmr.msra.gmra.mrb[148].mxu1 %v7215_v14  ;;  %v12003_v14 = vld [vmem:[#allocation13 + $0x4c0] ss:$16 sps:$4 sm:$0xff]  }
0x2ac5   :  { %7701 = vmatprep.mubr.bf16.mxu1 %v12839_v55  ;;  %7670 = vmatpush1.bf16.msra.mxu1 %v11970_v60 }
0x2ac6   :  { %7671 = vmatprep.subr.bf16.mxu1 %v11978_v37 }
0x2ac9   :  { %7672 = vmatpush1.bf16.msra.mxu1 %v11976_v1 }
0x2aca   :  { %7673 = vmatprep.subr.bf16.mxu1 %v11984_v36 }
0x2acd   :  { %7674 = vmatpush1.bf16.msra.mxu1 %v11982_v50 }
0x2ace   :  { %7675 = vmatprep.subr.bf16.mxu1 %v11990_v2 }
0x2ad1   :  { %7676 = vmatpush1.bf16.msra.mxu1 %v11988_v9  ;;  %v12016_v9 = vld [vmem:[#allocation16 + $0x4c0] sm:$0xff]  }
0x2ad2   :  { %7677 = vmatprep.subr.bf16.mxu1 %v11996_v28  ;;  %v12020_v28 = vld [vmem:[#allocation16 + $0x4c8] sm:$0xff]  }
0x2ad5   :  { %7678 = vmatpush1.bf16.msra.mxu1 %v11994_v0  ;;  %v12022_v0 = vld [vmem:[#allocation16 + $0x488] sm:$0xff]  }
0x2ad6   :  { %7679 = vmatprep.subr.bf16.mxu1 %v12002_v31  ;;  %v12024_v31 = vld [vmem:[#allocation16 + $0x4d0] sm:$0xff]  }
0x2ad9   :  { %7680 = vmatpush1.bf16.msra.mxu1 %v12000_v15  ;;  %v12026_v15 = vld [vmem:[#allocation16 + $0x490] sm:$0xff]  }
0x2b97   :  { %v11355_v34 = vpop.f32.mrb[148].mxu1 }
0x2b98   :  { %v7319_v12 = vpop.f32.mrb[149].mxu1  ;;  %v7328_v49 = vadd.f32 %v11355_v34, %v7236_v22  ;;  %v12008_v34 = vld [vmem:[#allocation13 + $0x4cc] ss:$16 sps:$4 sm:$0xff]  }
0x2b99   :  { %v7320_v52 = vadd.f32 %v7319_v12, %v7236_v22  ;;  %v11356_v48 = vpop.f32.mrb[150].mxu1  ;;  %v12011_v12 = vld [vmem:[#allocation13 + $0x4e4] ss:$16 sps:$4 sm:$0xff]   ;;  %7681 = vmatprep.subr.bf16.mxu1 %v12008_v34  ;;  %v12030_v34 = vld [vmem:[#allocation16 + $0x498] sm:$0xff]  }
0x2b9a   :  { %v7322_v24 = vpop.f32.mrb[151].mxu1  ;;  %v7331_v43 = vadd.f32 %v11356_v48, %v7236_v22  ;;  %v14205_v33 = vadd.f32 %v7328_v49, %v14130_v16  ;;  %v11973_v16 = vld [vmem:[#allocation13 + $0x420] ss:$16 sps:$4 sm:$0xff]  }
0x2b9b   :  { %v14198_v62 = vadd.f32 %v7320_v52, %v14122_v5  ;;  %v7323_v46 = vadd.f32 %v7322_v24, %v7236_v22  ;;  %v11967_v5 = vld [vmem:[#allocation13 + $0x400] ss:$16 sps:$4 sm:$0xff]   ;;  %v12006_v22 = vld [vmem:[#allocation13 + $0x4c8] ss:$16 sps:$4 sm:$0xff]   ;;  %v12014_v52 = vld [vmem:[#allocation13 + $0x4ec] ss:$16 sps:$4 sm:$0xff]  }
0x2b9c   :  { %v14209_v29 = vadd.f32 %v7331_v43, %v14134_v42  ;;  %7617 = vmatpush1.bf16.msra.mxu0 %v11967_v5  ;;  %v12009_v48 = vld [vmem:[#allocation13 + $0x4e0] ss:$16 sps:$4 sm:$0xff]   ;;  %7682 = vmatpush1.bf16.msra.mxu1 %v12006_v22  ;;  %v12012_v24 = vld [vmem:[#allocation13 + $0x4e8] ss:$16 sps:$4 sm:$0xff]  }
0x2b9d   :  { %v14201_v57 = vadd.f32 %v7323_v46, %v14126_v58  ;;  %7338 = vadd.xlane.f32.xlu0 %v14198_v62  ;;  %v11975_v58 = vld [vmem:[#allocation13 + $0x424] ss:$16 sps:$4 sm:$0xff]   ;;  %7683 = vmatprep.subr.bf16.mxu1 %v12014_v52  ;;  %v12029_v22 = vld [vmem:[#allocation16 + $0x418] sm:$0xff]  }
0x2b9e   :  { %7618 = vmatprep.subr.bf16.mxu0 %v11975_v58  ;;  %v12032_v52 = vld [vmem:[#allocation16 + $0x4e0] sm:$0xff]  }
0x2b9f   :  { %7340 = vadd.xlane.f32.xlu1 %v14201_v57 }
0x2ba0   :  { %7619 = vmatpush1.bf16.msra.mxu0 %v11973_v16  ;;  %7684 = vmatpush1.bf16.msra.mxu1 %v12012_v24  ;;  %v12034_v24 = vld [vmem:[#allocation16 + $0x4a0] sm:$0xff]  }
0x2ba1   :  { %7342 = vadd.xlane.f32.xlu0 %v14205_v33  ;;  %7620 = vmatprep.subr.bf16.mxu0 %v11981_v7 }
0x2ba2   :  { %10913 = vmatprep.subr.bf16.mxu1 %v12016_v9 }
0x2ba3   :  { %7344 = vadd.xlane.f32.xlu1 %v14209_v29 }
0x2ba4   :  { %7621 = vmatpush1.bf16.msra.mxu0 %v11979_v59 }
0x2ba5   :  { %7622 = vmatprep.subr.bf16.mxu0 %v11987_v38 }
0x2ba8   :  { %7623 = vmatpush1.bf16.msra.mxu0 %v11985_v18  ;;  %v12015_v18 = vld [vmem:[#allocation16 + $0x440] sm:$0xff]  }
0x2ba9   :  { %7624 = vmatprep.subr.bf16.mxu0 %v11993_v61  ;;  %v12017_v61 = vld [vmem:[#allocation16 + $0x400] sm:$0xff]  }
0x2bac   :  { %7625 = vmatpush1.bf16.msra.mxu0 %v11991_v47  ;;  %v12021_v47 = vld [vmem:[#allocation16 + $0x408] sm:$0xff]  }
0x2bad   :  { %7626 = vmatprep.subr.bf16.mxu0 %v11999_v56  ;;  %v12023_v56 = vld [vmem:[#allocation16 + $0x450] sm:$0xff]  }
0x2bb0   :  { %7627 = vmatpush1.bf16.msra.mxu0 %v11997_v3  ;;  %v12025_v3 = vld [vmem:[#allocation16 + $0x410] sm:$0xff]  }
0x2bb1   :  { %7628 = vmatprep.subr.bf16.mxu0 %v12005_v6  ;;  %v12028_v6 = vld [vmem:[#allocation16 + $0x4d8] sm:$0xff]  }
0x2bb4   :  { %7629 = vmatpush1.bf16.msra.mxu0 %v12003_v14  ;;  %v12027_v14 = vld [vmem:[#allocation16 + $0x458] sm:$0xff]  }
0x2bb5   :  { %7630 = vmatprep.subr.bf16.mxu0 %v12011_v12  ;;  %v12031_v12 = vld [vmem:[#allocation16 + $0x460] sm:$0xff]  }
0x2bb8   :  { %7631 = vmatpush1.bf16.msra.mxu0 %v12009_v48  ;;  %v12033_v48 = vld [vmem:[#allocation16 + $0x420] sm:$0xff]  }
0x2bb9   :  { %10885 = vmatprep.subr.bf16.mxu0 %v12015_v18 }
0x2c2a   :  { %v7339_v42 = vpop.xlane.xlu0 %7338 }
0x2c2b   :  { %v7346_v23 = vmul.f32 0.0078125, %v7339_v42 }
0x2c2c   :  { %v7341_v13 = vpop.xlane.xlu1 %7340 }
0x2c2d   :  { %v14214_v4 = vsub.f32 %v14198_v62, %v7346_v23  ;;  %v7347_v51 = vmul.f32 0.0078125, %v7341_v13  ;;  %v7385_v23 = vrot.slane %v14159_v32, %v13169_v53 }
0x2c2e   :  { %v7343_v19 = vpop.xlane.xlu0 %7342 }
0x2c2f   :  { %v14217_v26 = vsub.f32 %v14201_v57, %v7347_v51  ;;  %v7348_v10 = vmul.f32 0.0078125, %v7343_v19  ;;  %v7354_v39 = vmul.f32 %v14214_v4, %v14214_v4 }
0x2c30   :  { %v7345_v27 = vpop.xlane.xlu1 %7344 }
0x2c31   :  { %v14222_v35 = vsub.f32 %v14205_v33, %v7348_v10  ;;  %v7349_v25 = vmul.f32 0.0078125, %v7345_v27  ;;  %7358 = vadd.xlane.f32.xlu0 %v7354_v39  ;;  %v7355_v44 = vmul.f32 %v14217_v26, %v14217_v26  ;;  %v7393_v27 = vrot.slane %v14159_v32, %v13174_v54 }
0x2c33   :  { %v14227_v17 = vsub.f32 %v14209_v29, %v7349_v25  ;;  %7360 = vadd.xlane.f32.xlu1 %v7355_v44  ;;  %v7356_v63 = vmul.f32 %v14222_v35, %v14222_v35 }
0x2c35   :  { %7362 = vadd.xlane.f32.xlu0 %v7356_v63  ;;  %v7357_v8 = vmul.f32 %v14227_v17, %v14227_v17 }
0x2c37   :  { %7364 = vadd.xlane.f32.xlu1 %v7357_v8 }
0x2cbe   :  { %v7359_v49 = vpop.xlane.xlu0 %7358 }
0x2cbf   :  { %v7366_v46 = vmul.f32 0.0078125, %v7359_v49  ;;  %v12035_v49 = vld [vmem:[#allocation16 + $0x468] sm:$0xff]  }
0x2cc0   :  { %v7361_v43 = vpop.xlane.xlu1 %7360 }
0x2cc1   :  { %v7370_v5 = vadd.f32 1e-05, %v7366_v46  ;;  %v7367_v45 = vmul.f32 0.0078125, %v7361_v43  ;;  %v12036_v46 = vld [vmem:[#allocation16 + $0x4e8] sm:$0xff]  }
0x2cc2   :  { %v7363_v60 = vpop.xlane.xlu0 %7362  ;;  %v12037_v43 = vld [vmem:[#allocation16 + $0x428] sm:$0xff]  }
0x2cc3   :  { %12447 = vrsqrt.f32 %v7370_v5  ;;  %v7371_v30 = vadd.f32 1e-05, %v7367_v45  ;;  %v7368_v58 = vmul.f32 0.0078125, %v7363_v60  ;;  %v12038_v5 = vld [vmem:[#allocation16 + $0x4a8] sm:$0xff]   ;;  %v12039_v45 = vld [vmem:[#allocation16 + $0x470] sm:$0xff]  }
0x2cc4   :  { %v7365_v37 = vpop.xlane.xlu1 %7364  ;;  %v12040_v60 = vld [vmem:[#allocation16 + $0x4f0] sm:$0xff]  }
0x2cc5   :  { %12449 = vrsqrt.f32 %v7371_v30  ;;  %v7372_v16 = vadd.f32 1e-05, %v7368_v58  ;;  %v7369_v1 = vmul.f32 0.0078125, %v7365_v37  ;;  %v12041_v30 = vld [vmem:[#allocation16 + $0x430] sm:$0xff]   ;;  %v12043_v37 = vld [vmem:[#allocation16 + $0x478] sm:$0xff]  }
0x2cc6   :  { %v12042_v58 = vld [vmem:[#allocation16 + $0x4b0] sm:$0xff]  }
0x2cc7   :  { %12451 = vrsqrt.f32 %v7372_v16  ;;  %v7373_v42 = vadd.f32 1e-05, %v7369_v1  ;;  %v12044_v16 = vld [vmem:[#allocation16 + $0x4f8] sm:$0xff]  }
0x2cc8   :  { %v12045_v1 = vld [vmem:[#allocation16 + $0x438] sm:$0xff]  }
0x2cc9   :  { %12453 = vrsqrt.f32 %v7373_v42  ;;  %v12046_v42 = vld [vmem:[#allocation16 + $0x4b8] sm:$0xff]  }
0x2ccd   :  { %v12448_v13 = vpop.eup %12447 }
0x2cce   :  { %v7378_v51 = vmul.f32 %v12448_v13, %v14214_v4 }
0x2ccf   :  { %v12450_v19 = vpop.eup %12449 }
0x2cd0   :  { %v7379_v10 = vmul.f32 %v12450_v19, %v14217_v26  ;;  %v7386_v39 = vmul.f32 %v7385_v23, %v7378_v51 }
0x2cd1   :  { %v12452_v25 = vpop.eup %12451 }
0x2cd2   :  { %v7387_v44 = vmul.f32 %v7385_v23, %v7379_v10  ;;  %v7394_v8 = vadd.f32 %v7393_v27, %v7386_v39  ;;  %v7380_v36 = vmul.f32 %v12452_v25, %v14222_v35  ;;  %v12018_v35 = vld [vmem:[#allocation16 + $0x480] sm:$0xff]  }
0x2cd3   :  { %v12454_v63 = vpop.eup %12453 }
0x2cd4   :  { %v7395_v7 = vadd.f32 %v7393_v27, %v7387_v44  ;;  %v7381_v59 = vmul.f32 %v12454_v63, %v14227_v17  ;;  %v7388_v4 = vmul.f32 %v7385_v23, %v7380_v36  ;;  %v12019_v17 = vld [vmem:[#allocation16 + $0x448] sm:$0xff]  }
0x2cd6   :  { %v7398_v50 = vpack.c.bf16 %v7395_v7, %v7394_v8  ;;  %v7389_v38 = vmul.f32 %v7385_v23, %v7381_v59  ;;  %v7396_v32 = vadd.f32 %v7393_v27, %v7388_v4  ;;  %v7434_v23 = vld [vmem:[#allocation14 + $0x4] ss:$8 sm:$0xf] }
0x2cd7   :  { %v14244_v13 = vrot.slane %v7434_v23, %v13084_v11  ;;  %v14247_v51 = vrot.slane %v7434_v23, %v13108_v41  ;;  %v14250_v19 = vrot.slane %v7434_v23, %v13092_v20  ;;  %v14253_v10 = vrot.slane %v7434_v23, %v13169_v53 }
0x2cd8   :  { %7649 = vmatmul.mubr.bf16.vlgmr.msra.gmra.mrb[140].mxu0 %v7398_v50  ;;  %7702 = vmatmul.mubr.bf16.vlgmr.msra.gmra.mrb[152].mxu1 %v7398_v50  ;;  %v7397_v26 = vadd.f32 %v7393_v27, %v7389_v38 }
0x2cd9   :  { %7658 = vmatprep.mubr.bf16.mxu0 %v12839_v55  ;;  %7711 = vmatprep.mubr.bf16.mxu1 %v12839_v55 }
0x2cda   :  { %v7399_v2 = vpack.c.bf16 %v7397_v26, %v7396_v32  ;;  %10886 = vmatpush3.bf16.msra.mxu0 %v12017_v61  ;;  %10914 = vmatpush3.bf16.msra.mxu1 %v12018_v35 }
0x2cdb   :  { %10887 = vmatprep.subr.bf16.mxu0 %v12019_v17  ;;  %10915 = vmatprep.subr.bf16.mxu1 %v12020_v28 }
0x2cde   :  { %10888 = vmatpush3.bf16.msra.mxu0 %v12021_v47  ;;  %10916 = vmatpush3.bf16.msra.mxu1 %v12022_v0 }
0x2cdf   :  { %10889 = vmatprep.subr.bf16.mxu0 %v12023_v56  ;;  %10917 = vmatprep.subr.bf16.mxu1 %v12024_v31 }
0x2ce0   :  { %7659 = vmatmul.mubr.bf16.gmra.mrb[144].mxu0 %v7399_v2  ;;  %7712 = vmatmul.mubr.bf16.gmra.mrb[156].mxu1 %v7399_v2 }
0x2ce2   :  { %10890 = vmatpush3.bf16.msra.mxu0 %v12025_v3  ;;  %10918 = vmatpush3.bf16.msra.mxu1 %v12026_v15 }
0x2ce3   :  { %10891 = vmatprep.subr.bf16.mxu0 %v12027_v14  ;;  %10919 = vmatprep.subr.bf16.mxu1 %v12028_v6 }
0x2ce6   :  { %10892 = vmatpush3.bf16.msra.mxu0 %v12029_v22  ;;  %10920 = vmatpush3.bf16.msra.mxu1 %v12030_v34 }
0x2ce7   :  { %10893 = vmatprep.subr.bf16.mxu0 %v12031_v12  ;;  %10921 = vmatprep.subr.bf16.mxu1 %v12032_v52 }
0x2cea   :  { %10894 = vmatpush3.bf16.msra.mxu0 %v12033_v48  ;;  %10922 = vmatpush3.bf16.msra.mxu1 %v12034_v24 }
0x2ceb   :  { %10895 = vmatprep.subr.bf16.mxu0 %v12035_v49  ;;  %10923 = vmatprep.subr.bf16.mxu1 %v12036_v46 }
0x2cee   :  { %10896 = vmatpush3.bf16.msra.mxu0 %v12037_v43  ;;  %10924 = vmatpush3.bf16.msra.mxu1 %v12038_v5 }
0x2cef   :  { %10897 = vmatprep.subr.bf16.mxu0 %v12039_v45  ;;  %10925 = vmatprep.subr.bf16.mxu1 %v12040_v60 }
0x2cf2   :  { %10898 = vmatpush3.bf16.msra.mxu0 %v12041_v30  ;;  %10926 = vmatpush3.bf16.msra.mxu1 %v12042_v58 }
0x2cf3   :  { %10899 = vmatprep.subr.bf16.mxu0 %v12043_v37  ;;  %10927 = vmatprep.subr.bf16.mxu1 %v12044_v16 }
0x2cf6   :  { %10900 = vmatpush3.bf16.msra.mxu0 %v12045_v1  ;;  %10928 = vmatpush3.bf16.msra.mxu1 %v12046_v42 }
0x2dab   :  { %v7650_v39 = vpop.f32.mrb[140].mxu0  ;;  %v7703_v27 = vpop.f32.mrb[152].mxu1 }
0x2dac   :  { %v14256_v25 = vadd.f32 %v7650_v39, %v14244_v13  ;;  %v14259_v44 = vadd.f32 %v7703_v27, %v14247_v51  ;;  %v7652_v63 = vpop.f32.mrb[141].mxu0  ;;  %v7705_v8 = vpop.f32.mrb[153].mxu1 }
0x2dad   :  { %v14262_v7 = vadd.f32 %v7652_v63, %v14250_v19  ;;  %v14265_v36 = vadd.f32 %v7705_v8, %v14253_v10  ;;  %v7654_v59 = vpop.f32.mrb[142].mxu0  ;;  %v7707_v50 = vpop.f32.mrb[154].mxu1 }
0x2dae   :  { %v7722_v38 = vmul.f32 %v14256_v25, %v14256_v25  ;;  %v7724_v4 = vmul.f32 %v14259_v44, %v14259_v44  ;;  %v14272_v26 = vadd.f32 %v7654_v59, %v14244_v13  ;;  %v14275_v32 = vadd.f32 %v7707_v50, %v14247_v51  ;;  %v7656_v2 = vpop.f32.mrb[143].mxu0  ;;  %v7709_v18 = vpop.f32.mrb[155].mxu1 }
0x2daf   :  { %v7723_v9 = vmul.f32 %v14262_v7, %v14262_v7  ;;  %v7725_v61 = vmul.f32 %v14265_v36, %v14265_v36  ;;  %v14282_v35 = vadd.f32 %v7656_v2, %v14250_v19  ;;  %v14285_v17 = vadd.f32 %v7709_v18, %v14253_v10 }
0x2db0   :  { %v7738_v28 = vmul.f32 %v7722_v38, %v14256_v25  ;;  %v7740_v47 = vmul.f32 %v7724_v4, %v14259_v44  ;;  %v7726_v0 = vmul.f32 %v14272_v26, %v14272_v26  ;;  %v7728_v56 = vmul.f32 %v14275_v32, %v14275_v32 }
0x2db1   :  { %v7739_v31 = vmul.f32 %v7723_v9, %v14262_v7  ;;  %v7741_v3 = vmul.f32 %v7725_v61, %v14265_v36  ;;  %v7727_v15 = vmul.f32 %v14282_v35, %v14282_v35  ;;  %v7729_v14 = vmul.f32 %v14285_v17, %v14285_v17 }
0x2db2   :  { %v7754_v6 = vmul.f32 0.044715, %v7738_v28  ;;  %v7756_v22 = vmul.f32 0.044715, %v7740_v47  ;;  %v7742_v34 = vmul.f32 %v7726_v0, %v14272_v26  ;;  %v7744_v12 = vmul.f32 %v7728_v56, %v14275_v32 }
0x2db3   :  { %v7755_v52 = vmul.f32 0.044715, %v7739_v31  ;;  %v7757_v48 = vmul.f32 0.044715, %v7741_v3  ;;  %v7743_v24 = vmul.f32 %v7727_v15, %v14282_v35  ;;  %v7745_v49 = vmul.f32 %v7729_v14, %v14285_v17  ;;  %v7660_v46 = vpop.f32.mrb[144].mxu0  ;;  %v7713_v43 = vpop.f32.mrb[156].mxu1 }
0x2db4   :  { %v7770_v5 = vadd.f32 %v7754_v6, %v14256_v25  ;;  %v7772_v45 = vadd.f32 %v7756_v22, %v14259_v44  ;;  %v7758_v60 = vmul.f32 0.044715, %v7742_v34  ;;  %v7760_v30 = vmul.f32 0.044715, %v7744_v12  ;;  %v7662_v58 = vpop.f32.mrb[145].mxu0  ;;  %v7715_v37 = vpop.f32.mrb[157].mxu1 }
0x2db5   :  { %v7771_v16 = vadd.f32 %v7755_v52, %v14262_v7  ;;  %v7773_v1 = vadd.f32 %v7757_v48, %v14265_v36  ;;  %v7759_v42 = vmul.f32 0.044715, %v7743_v24  ;;  %v7761_v23 = vmul.f32 0.044715, %v7745_v49  ;;  %v7664_v39 = vpop.f32.mrb[146].mxu0  ;;  %v7717_v27 = vpop.f32.mrb[158].mxu1 }
0x2db6   :  { %v7786_v63 = vmul.f32 0.7978846, %v7770_v5  ;;  %v7788_v8 = vmul.f32 0.7978846, %v7772_v45  ;;  %v7774_v59 = vadd.f32 %v7758_v60, %v14272_v26  ;;  %v7776_v50 = vadd.f32 %v7760_v30, %v14275_v32  ;;  %v7666_v38 = vpop.f32.mrb[147].mxu0  ;;  %v7719_v4 = vpop.f32.mrb[159].mxu1 }
0x2db7   :  { %v7787_v2 = vmul.f32 0.7978846, %v7771_v16  ;;  %v7789_v18 = vmul.f32 0.7978846, %v7773_v1  ;;  %v7775_v9 = vadd.f32 %v7759_v42, %v14282_v35  ;;  %v7777_v61 = vadd.f32 %v7761_v23, %v14285_v17 }
0x2db8   :  { %12455 = vtanh.f32 %v7786_v63  ;;  %v7790_v28 = vmul.f32 0.7978846, %v7774_v59  ;;  %v7792_v47 = vmul.f32 0.7978846, %v7776_v50  ;;  %v14312_v0 = vadd.f32 %v7660_v46, %v14244_v13 }
0x2db9   :  { %12457 = vtanh.f32 %v7788_v8  ;;  %v7791_v56 = vmul.f32 0.7978846, %v7775_v9  ;;  %v7793_v31 = vmul.f32 0.7978846, %v7777_v61  ;;  %v14315_v3 = vadd.f32 %v7713_v43, %v14247_v51 }
0x2dba   :  { %12459 = vtanh.f32 %v7787_v2  ;;  %v7730_v15 = vmul.f32 %v14312_v0, %v14312_v0  ;;  %v14320_v14 = vadd.f32 %v7662_v58, %v14250_v19  ;;  %v14323_v6 = vadd.f32 %v7715_v37, %v14253_v10 }
0x2dbb   :  { %12461 = vtanh.f32 %v7789_v18  ;;  %v7732_v22 = vmul.f32 %v14315_v3, %v14315_v3  ;;  %v14328_v34 = vadd.f32 %v7664_v39, %v14244_v13  ;;  %v14331_v12 = vadd.f32 %v7717_v27, %v14247_v51 }
0x2dbc   :  { %12463 = vtanh.f32 %v7790_v28  ;;  %v7746_v52 = vmul.f32 %v7730_v15, %v14312_v0  ;;  %v7731_v48 = vmul.f32 %v14320_v14, %v14320_v14  ;;  %v7733_v24 = vmul.f32 %v14323_v6, %v14323_v6 }
0x2dbd   :  { %12465 = vtanh.f32 %v7792_v47  ;;  %v7748_v49 = vmul.f32 %v7732_v22, %v14315_v3  ;;  %v7734_v46 = vmul.f32 %v14328_v34, %v14328_v34  ;;  %v7736_v13 = vmul.f32 %v14331_v12, %v14331_v12 }
0x2dbe   :  { %12467 = vtanh.f32 %v7791_v56  ;;  %v7762_v51 = vmul.f32 0.044715, %v7746_v52  ;;  %v7747_v43 = vmul.f32 %v7731_v48, %v14320_v14  ;;  %v7749_v5 = vmul.f32 %v7733_v24, %v14323_v6 }
0x2dbf   :  { %12469 = vtanh.f32 %v7793_v31  ;;  %v7764_v45 = vmul.f32 0.044715, %v7748_v49  ;;  %v7750_v60 = vmul.f32 %v7734_v46, %v14328_v34  ;;  %v7752_v30 = vmul.f32 %v7736_v13, %v14331_v12 }
0x2dc0   :  { %v7778_v58 = vadd.f32 %v7762_v51, %v14312_v0  ;;  %v7763_v37 = vmul.f32 0.044715, %v7747_v43  ;;  %v7765_v16 = vmul.f32 0.044715, %v7749_v5  ;;  %v14349_v1 = vadd.f32 %v7666_v38, %v14250_v19 }
0x2dc1   :  { %v7780_v42 = vadd.f32 %v7764_v45, %v14315_v3  ;;  %v7766_v23 = vmul.f32 0.044715, %v7750_v60  ;;  %v7768_v39 = vmul.f32 0.044715, %v7752_v30  ;;  %v14353_v27 = vadd.f32 %v7719_v4, %v14253_v10 }
0x2dc2   :  { %v12456_v63 = vpop.eup %12455  ;;  %v7794_v8 = vmul.f32 0.7978846, %v7778_v58  ;;  %v7779_v59 = vadd.f32 %v7763_v37, %v14320_v14  ;;  %v7781_v50 = vadd.f32 %v7765_v16, %v14323_v6  ;;  %v7735_v2 = vmul.f32 %v14349_v1, %v14349_v1 }
0x2dc3   :  { %v12458_v18 = vpop.eup %12457  ;;  %v7818_v9 = vadd.f32 1.0, %v12456_v63  ;;  %v7796_v19 = vmul.f32 0.7978846, %v7780_v42  ;;  %v7782_v38 = vadd.f32 %v7766_v23, %v14328_v34  ;;  %v7784_v61 = vadd.f32 %v7768_v39, %v14331_v12 }
0x2dc4   :  { %v12460_v28 = vpop.eup %12459  ;;  %v7820_v47 = vadd.f32 1.0, %v12458_v18  ;;  %12471 = vtanh.f32 %v7794_v8  ;;  %v7795_v10 = vmul.f32 0.7978846, %v7779_v59  ;;  %v7797_v4 = vmul.f32 0.7978846, %v7781_v50 }
0x2dc5   :  { %v12462_v56 = vpop.eup %12461  ;;  %v7834_v31 = vmul.f32 0.5, %v7818_v9  ;;  %12473 = vtanh.f32 %v7796_v19  ;;  %v7798_v15 = vmul.f32 0.7978846, %v7782_v38  ;;  %v7800_v22 = vmul.f32 0.7978846, %v7784_v61 }
0x2dc6   :  { %v12464_v52 = vpop.eup %12463  ;;  %v7836_v48 = vmul.f32 0.5, %v7820_v47  ;;  %12475 = vtanh.f32 %v7795_v10  ;;  %v7751_v24 = vmul.f32 %v7735_v2, %v14349_v1  ;;  %v7737_v49 = vmul.f32 %v14353_v27, %v14353_v27 }
0x2dc7   :  { %v12466_v46 = vpop.eup %12465  ;;  %v7850_v13 = vmul.f32 %v7834_v31, %v14256_v25  ;;  %v7822_v51 = vadd.f32 1.0, %v12464_v52  ;;  %12477 = vtanh.f32 %v7797_v4  ;;  %v7819_v43 = vadd.f32 1.0, %v12460_v28 }
0x2dc8   :  { %v12468_v5 = vpop.eup %12467  ;;  %v7852_v45 = vmul.f32 %v7836_v48, %v14259_v44  ;;  %v7824_v60 = vadd.f32 1.0, %v12466_v46  ;;  %12479 = vtanh.f32 %v7798_v15  ;;  %v7767_v30 = vmul.f32 0.044715, %v7751_v24 }
0x2dc9   :  { %v12470_v58 = vpop.eup %12469  ;;  %v7838_v37 = vmul.f32 0.5, %v7822_v51  ;;  %12481 = vtanh.f32 %v7800_v22  ;;  %v7753_v16 = vmul.f32 %v7737_v49, %v14353_v27  ;;  %v7823_v42 = vadd.f32 1.0, %v12468_v5 }
0x2dca   :  { %v7840_v23 = vmul.f32 0.5, %v7824_v60  ;;  %v7783_v39 = vadd.f32 %v7767_v30, %v14349_v1  ;;  %v7835_v63 = vmul.f32 0.5, %v7819_v43  ;;  %v7821_v25 = vadd.f32 1.0, %v12462_v56 }
0x2dcb   :  { %v7854_v8 = vmul.f32 %v7838_v37, %v14272_v26  ;;  %v7769_v59 = vmul.f32 0.044715, %v7753_v16  ;;  %v7839_v50 = vmul.f32 0.5, %v7823_v42  ;;  %v7825_v2 = vadd.f32 1.0, %v12470_v58 }
0x2dcc   :  { %v7856_v44 = vmul.f32 %v7840_v23, %v14275_v32  ;;  %v7799_v18 = vmul.f32 0.7978846, %v7783_v39  ;;  %v7851_v9 = vmul.f32 %v7835_v63, %v14262_v7  ;;  %v7837_v19 = vmul.f32 0.5, %v7821_v25 }
0x2dcd   :  { %v7866_v38 = vpack.c.bf16 %v7854_v8, %v7850_v13  ;;  %v7785_v61 = vadd.f32 %v7769_v59, %v14353_v27  ;;  %v7855_v28 = vmul.f32 %v7839_v50, %v14282_v35  ;;  %v7841_v47 = vmul.f32 0.5, %v7825_v2 }
0x2dce   :  { %v12472_v10 = vpop.eup %12471  ;;  %v7868_v4 = vpack.c.bf16 %v7856_v44, %v7852_v45  ;;  %12483 = vtanh.f32 %v7799_v18  ;;  %v7853_v26 = vmul.f32 %v7837_v19, %v14265_v36  ;;  %v12563_v19 = vld [vmem:[#allocation17 + $0x20] sm:$0x3f] }
0x2dcf   :  { %v12474_v56 = vpop.eup %12473  ;;  %v7801_v31 = vmul.f32 0.7978846, %v7785_v61  ;;  %v7867_v15 = vpack.c.bf16 %v7855_v28, %v7851_v9  ;;  %v7857_v32 = vmul.f32 %v7841_v47, %v14285_v17  ;;  %v7826_v22 = vadd.f32 1.0, %v12472_v10 }
0x2dd0   :  { %v12476_v52 = vpop.eup %12475  ;;  %v7828_v7 = vadd.f32 1.0, %v12474_v56 }
0x2dd1   :  { %v12478_v48 = vpop.eup %12477  ;;  %12485 = vtanh.f32 %v7801_v31  ;;  %8167 = vmatprep.mubr.bf16.mxu0 %v7867_v15  ;;  %v7869_v24 = vpack.c.bf16 %v7857_v32, %v7853_v26  ;;  %v7842_v13 = vmul.f32 0.5, %v7826_v22  ;;  %v7827_v43 = vadd.f32 1.0, %v12476_v52 }
0x2dd2   :  { %v12480_v49 = vpop.eup %12479  ;;  %8168 = vmatmul.mubr.bf16.vlgmr.msra.gmra.mrb[148].mxu0 %v7866_v38  ;;  %v7844_v51 = vmul.f32 0.5, %v7828_v7  ;;  %v7829_v58 = vadd.f32 1.0, %v12478_v48  ;;  %v7942_v38 = vrot.slane %v12563_v19, %v13326_v21 }
0x2dd3   :  { %v12482_v35 = vpop.eup %12481  ;;  %8216 = vmatprep.mubr.bf16.mxu1 %v7869_v24  ;;  %v7830_v46 = vadd.f32 1.0, %v12480_v49  ;;  %v7858_v17 = vmul.f32 %v7842_v13, %v14312_v0  ;;  %v7843_v23 = vmul.f32 0.5, %v7827_v43 }
0x2dd4   :  { %8217 = vmatmul.mubr.bf16.vlgmr.msra.gmra.mrb[160].mxu1 %v7868_v4  ;;  %v7832_v36 = vadd.f32 1.0, %v12482_v35  ;;  %v7860_v37 = vmul.f32 %v7844_v51, %v14315_v3  ;;  %v7845_v50 = vmul.f32 0.5, %v7829_v58 }
0x2dd5   :  { %v7846_v5 = vmul.f32 0.5, %v7830_v46  ;;  %v7859_v2 = vmul.f32 %v7843_v23, %v14320_v14  ;;  %v12052_v23 = vld [vmem:[#allocation8 + $0x3dc] ss:$12 sps:$4 sm:$0xff]  }
0x2dd6   :  { %v7848_v45 = vmul.f32 0.5, %v7832_v36  ;;  %v7861_v18 = vmul.f32 %v7845_v50, %v14323_v6 }
0x2dd7   :  { %v7862_v60 = vmul.f32 %v7846_v5, %v14328_v34 }
0x2dd8   :  { %v12484_v30 = vpop.eup %12483  ;;  %v7864_v16 = vmul.f32 %v7848_v45, %v14331_v12 }
0x2dd9   :  { %v7831_v42 = vadd.f32 1.0, %v12484_v30  ;;  %v7870_v39 = vpack.c.bf16 %v7862_v60, %v7858_v17 }
0x2dda   :  { %v7872_v63 = vpack.c.bf16 %v7864_v16, %v7860_v37  ;;  %v12047_v16 = vld [vmem:[#allocation8 + $0x3c0] ss:$12 sps:$4 sm:$0xff]  }
0x2ddb   :  { %v12486_v25 = vpop.eup %12485  ;;  %v7847_v8 = vmul.f32 0.5, %v7831_v42  ;;  %v12049_v42 = vld [vmem:[#allocation8 + $0x3c4] ss:$12 sps:$4 sm:$0xff]  }
0x2ddc   :  { %v7833_v59 = vadd.f32 1.0, %v12486_v25  ;;  %8480 = vmatprep.subr.bf16.mxu0 %v12049_v42 }
0x2ddd   :  { %v7863_v0 = vmul.f32 %v7847_v8, %v14349_v1  ;;  %8481 = vmatpush1.bf16.msra.mxu0 %v12047_v16 }
0x2dde   :  { %v7849_v44 = vmul.f32 0.5, %v7833_v59  ;;  %8482 = vmatprep.subr.bf16.mxu0 %v12052_v23 }
0x2ddf   :  { %v7871_v34 = vpack.c.bf16 %v7863_v0, %v7859_v2 }
0x2de0   :  { %v7865_v3 = vmul.f32 %v7849_v44, %v14353_v27 }
0x2de1   :  { %8175 = vmatprep.mubr.bf16.mxu0 %v7871_v34 }
0x2de2   :  { %v7873_v12 = vpack.c.bf16 %v7865_v3, %v7861_v18  ;;  %8176 = vmatmul.mubr.bf16.gmra.mrb[152].mxu0 %v7870_v39  ;;  %v12050_v39 = vld [vmem:[#allocation8 + $0x3d8] ss:$12 sps:$4 sm:$0xff]  }
0x2de3   :  { %8512 = vmatprep.mubr.bf16.mxu0 %v12839_v55  ;;  %8483 = vmatpush1.bf16.msra.mxu0 %v12050_v39 }
0x2de4   :  { %8224 = vmatprep.mubr.bf16.mxu1 %v7873_v12 }
0x2de5   :  { %8225 = vmatmul.mubr.bf16.gmra.mrb[164].mxu1 %v7872_v63 }
0x2ea5   :  { %v10901_v9 = vpop.f32.mrb[148].mxu0 }
0x2ea6   :  { %v10902_v14 = vpop.f32.mrb[149].mxu0 }
0x2ea7   :  { %v10929_v61 = vpop.f32.mrb[160].mxu1  ;;  %v10903_v1 = vadd.f32 %v10902_v14, %v10901_v9  ;;  %v10904_v28 = vpop.f32.mrb[150].mxu0  ;;  %v12056_v14 = vld [vmem:[#allocation8 + $0x3c8] ss:$12 sps:$4 sm:$0xff]  }
0x2ea8   :  { %v10930_v47 = vpop.f32.mrb[161].mxu1  ;;  %v10905_v10 = vpop.f32.mrb[151].mxu0  ;;  %11357 = vmatprep.subr.bf16.mxu1 %v12056_v14 }
0x2ea9   :  { %v8170_v6 = vadd.f32 %v10903_v1, %v7942_v38  ;;  %v10931_v4 = vadd.f32 %v10930_v47, %v10929_v61  ;;  %v10932_v27 = vpop.f32.mrb[162].mxu1  ;;  %v10906_v26 = vadd.f32 %v10905_v10, %v10904_v28  ;;  %v12053_v61 = vld [vmem:[#allocation8 + $0x3f0] ss:$12 sps:$4 sm:$0xff]   ;;  %11358 = vmatpush3.bf16.msra.mxu1 %v12056_v14  ;;  %v12059_v1 = vld [vmem:[#allocation8 + $0x40c] ss:$12 sps:$4 sm:$0xff]  }
0x2eaa   :  { %v10933_v56 = vpop.f32.mrb[163].mxu1  ;;  %v12060_v28 = vld [vmem:[#allocation8 + $0x3e0] ss:$12 sps:$4 sm:$0xff]   ;;  %v12057_v47 = vld [vmem:[#allocation8 + $0x408] ss:$12 sps:$4 sm:$0xff]  }
0x2eab   :  { %v8219_v31 = vadd.f32 %v10931_v4, %v8170_v6  ;;  %v8173_v15 = vadd.f32 %v10906_v26, %v7942_v38  ;;  %v10934_v32 = vadd.f32 %v10933_v56, %v10932_v27  ;;  %11359 = vmatprep.subr.bf16.mxu1 %v12060_v28  ;;  %v12063_v10 = vld [vmem:[#allocation8 + $0x424] ss:$12 sps:$4 sm:$0xff]   ;;  %v12061_v4 = vld [vmem:[#allocation8 + $0x420] ss:$12 sps:$4 sm:$0xff]   ;;  %v12067_v27 = vld [vmem:[#allocation8 + $0x43c] ss:$12 sps:$4 sm:$0xff]  }
0x2eac   :  { %v12064_v6 = vld [vmem:[#allocation8 + $0x3f8] ss:$12 sps:$4 sm:$0xff]   ;;  %v12068_v26 = vld [vmem:[#allocation8 + $0x410] ss:$12 sps:$4 sm:$0xff]  }
0x2ead   :  { %v8222_v22 = vadd.f32 %v10934_v32, %v8173_v15  ;;  %v14386_v52 = vadd.f32 %v8219_v31, %v14198_v62  ;;  %11360 = vmatpush3.bf16.msra.mxu1 %v12060_v28  ;;  %v12065_v56 = vld [vmem:[#allocation8 + $0x438] ss:$12 sps:$4 sm:$0xff]   ;;  %v12071_v31 = vld [vmem:[#allocation8 + $0x454] ss:$12 sps:$4 sm:$0xff]   ;;  %v12069_v32 = vld [vmem:[#allocation8 + $0x450] ss:$12 sps:$4 sm:$0xff]  }
0x2eae   :  { %11361 = vmatprep.subr.bf16.mxu1 %v12064_v6  ;;  %v12072_v15 = vld [vmem:[#allocation8 + $0x428] ss:$12 sps:$4 sm:$0xff]  }
0x2eaf   :  { %8239 = vadd.xlane.f32.xlu0 %v14386_v52  ;;  %v14390_v7 = vadd.f32 %v8222_v22, %v14201_v57  ;;  %v12075_v22 = vld [vmem:[#allocation8 + $0x46c] ss:$12 sps:$4 sm:$0xff]  }
0x2eb1   :  { %8241 = vadd.xlane.f32.xlu1 %v14390_v7  ;;  %11362 = vmatpush3.bf16.msra.mxu1 %v12064_v6 }
0x2eb2   :  { %11363 = vmatprep.subr.bf16.mxu1 %v12068_v26 }
0x2eb5   :  { %v10907_v48 = vpop.f32.mrb[152].mxu0  ;;  %11364 = vmatpush3.bf16.msra.mxu1 %v12068_v26 }
0x2eb6   :  { %v10908_v24 = vpop.f32.mrb[153].mxu0  ;;  %11365 = vmatprep.subr.bf16.mxu1 %v12072_v15 }
0x2eb7   :  { %v10909_v49 = vadd.f32 %v10908_v24, %v10907_v48  ;;  %v10910_v35 = vpop.f32.mrb[154].mxu0  ;;  %v12076_v48 = vld [vmem:[#allocation8 + $0x440] ss:$12 sps:$4 sm:$0xff]   ;;  %v12073_v24 = vld [vmem:[#allocation8 + $0x468] ss:$12 sps:$4 sm:$0xff]  }
0x2eb8   :  { %v10935_v46 = vpop.f32.mrb[164].mxu1  ;;  %v10911_v13 = vpop.f32.mrb[155].mxu0 }
0x2eb9   :  { %v8178_v36 = vadd.f32 %v10909_v49, %v7942_v38  ;;  %v10936_v51 = vpop.f32.mrb[165].mxu1  ;;  %v10912_v43 = vadd.f32 %v10911_v13, %v10910_v35  ;;  %11366 = vmatpush3.bf16.msra.mxu1 %v12072_v15  ;;  %v12077_v49 = vld [vmem:[#allocation8 + $0x458] ss:$12 sps:$4 sm:$0xff]   ;;  %v12078_v35 = vld [vmem:[#allocation8 + $0x470] ss:$12 sps:$4 sm:$0xff]  }
0x2eba   :  { %v10937_v5 = vadd.f32 %v10936_v51, %v10935_v46  ;;  %v10938_v45 = vpop.f32.mrb[166].mxu1  ;;  %11367 = vmatprep.subr.bf16.mxu1 %v12076_v48 }
0x2ebb   :  { %v8181_v62 = vadd.f32 %v10912_v43, %v7942_v38  ;;  %v10939_v17 = vpop.f32.mrb[167].mxu1  ;;  %v12055_v38 = vld [vmem:[#allocation8 + $0x3f4] ss:$12 sps:$4 sm:$0xff]  }
0x2ebc   :  { %v8227_v60 = vadd.f32 %v10937_v5, %v8178_v36  ;;  %v10940_v30 = vadd.f32 %v10939_v17, %v10938_v45  ;;  %8484 = vmatprep.subr.bf16.mxu0 %v12055_v38  ;;  %v14423_v45 = vld [vmem:[#allocation17 + $0x28] sm:$0x3f] }
0x2ebd   :  { %8485 = vmatpush1.bf16.msra.mxu0 %v12053_v61  ;;  %11368 = vmatpush3.bf16.msra.mxu1 %v12076_v48  ;;  %v8294_v39 = vrot.slane %v14423_v45, %v13092_v20 }
0x2ebe   :  { %v8230_v58 = vadd.f32 %v10940_v30, %v8181_v62  ;;  %v14394_v57 = vadd.f32 %v8227_v60, %v14205_v33  ;;  %8486 = vmatprep.subr.bf16.mxu0 %v12059_v1  ;;  %11369 = vmatprep.subr.bf16.mxu1 %v12077_v49  ;;  %v8286_v62 = vrot.slane %v14423_v45, %v13084_v11  ;;  %v8335_v1 = vld [vmem:[#allocation10 + $0x5] ss:$8 sm:$0x7] }
0x2ebf   :  { %v8340_v28 = vrot.slane %v8335_v1, %v13084_v11 }
0x2ec0   :  { %8243 = vadd.xlane.f32.xlu0 %v14394_v57  ;;  %v14398_v37 = vadd.f32 %v8230_v58, %v14209_v29 }
0x2ec1   :  { %8487 = vmatpush1.bf16.msra.mxu0 %v12057_v47  ;;  %11370 = vmatpush3.bf16.msra.mxu1 %v12077_v49  ;;  %v8344_v47 = vrot.slane %v8335_v1, %v13092_v20 }
0x2ec2   :  { %8245 = vadd.xlane.f32.xlu1 %v14398_v37  ;;  %8488 = vmatprep.subr.bf16.mxu0 %v12063_v10 }
0x2ec3   :  { %11371 = vmatprep.subr.bf16.mxu1 %v12078_v35 }
0x2ec5   :  { %8489 = vmatpush1.bf16.msra.mxu0 %v12061_v4  ;;  %11372 = vmatpush3.bf16.msra.mxu1 %v12078_v35 }
0x2ec6   :  { %8490 = vmatprep.subr.bf16.mxu0 %v12067_v27  ;;  %11395 = vmatprep.subr.bf16.mxu1 %v12840_v40 }
0x2ec9   :  { %8491 = vmatpush1.bf16.msra.mxu0 %v12065_v56 }
0x2eca   :  { %8492 = vmatprep.subr.bf16.mxu0 %v12071_v31 }
0x2ecd   :  { %8493 = vmatpush1.bf16.msra.mxu0 %v12069_v32  ;;  %v8348_v32 = vrot.slane %v8335_v1, %v13108_v41 }
0x2ece   :  { %8494 = vmatprep.subr.bf16.mxu0 %v12075_v22 }
0x2ed1   :  { %8495 = vmatpush1.bf16.msra.mxu0 %v12073_v24 }
0x2ed2   :  { %11377 = vmatprep.subr.bf16.mxu0 %v12840_v40 }
0x2f3c   :  { %v8240_v63 = vpop.xlane.xlu0 %8239 }
0x2f3d   :  { %v8247_v25 = vmul.f32 0.0078125, %v8240_v63 }
0x2f3e   :  { %v8242_v8 = vpop.xlane.xlu1 %8241 }
0x2f3f   :  { %v14402_v33 = vsub.f32 %v14386_v52, %v8247_v25  ;;  %v8248_v59 = vmul.f32 0.0078125, %v8242_v8 }
0x2f41   :  { %v14405_v29 = vsub.f32 %v14390_v7, %v8248_v59  ;;  %v8255_v50 = vmul.f32 %v14402_v33, %v14402_v33 }
0x2f43   :  { %8259 = vadd.xlane.f32.xlu0 %v8255_v50  ;;  %v8256_v2 = vmul.f32 %v14405_v29, %v14405_v29 }
0x2f45   :  { %8261 = vadd.xlane.f32.xlu1 %v8256_v2 }
0x2f4d   :  { %v8244_v0 = vpop.xlane.xlu0 %8243 }
0x2f4e   :  { %v8249_v44 = vmul.f32 0.0078125, %v8244_v0 }
0x2f4f   :  { %v8246_v34 = vpop.xlane.xlu1 %8245 }
0x2f50   :  { %v14412_v18 = vsub.f32 %v14394_v57, %v8249_v44  ;;  %v8250_v3 = vmul.f32 0.0078125, %v8246_v34 }
0x2f52   :  { %v14415_v12 = vsub.f32 %v14398_v37, %v8250_v3  ;;  %v8257_v9 = vmul.f32 %v14412_v18, %v14412_v18 }
0x2f54   :  { %8263 = vadd.xlane.f32.xlu0 %v8257_v9  ;;  %v8258_v19 = vmul.f32 %v14415_v12, %v14415_v12 }
0x2f56   :  { %8265 = vadd.xlane.f32.xlu1 %v8258_v19 }
0x2fd0   :  { %v8260_v46 = vpop.xlane.xlu0 %8259 }
0x2fd1   :  { %v8267_v13 = vmul.f32 0.0078125, %v8260_v46 }
0x2fd2   :  { %v8262_v36 = vpop.xlane.xlu1 %8261 }
0x2fd3   :  { %v8271_v51 = vadd.f32 1e-05, %v8267_v13  ;;  %v8268_v43 = vmul.f32 0.0078125, %v8262_v36 }
0x2fd5   :  { %12487 = vrsqrt.f32 %v8271_v51  ;;  %v8272_v5 = vadd.f32 1e-05, %v8268_v43 }
0x2fd7   :  { %12489 = vrsqrt.f32 %v8272_v5 }
0x2fdf   :  { %v12488_v17 = vpop.eup %12487 }
0x2fe0   :  { %v8279_v60 = vmul.f32 %v12488_v17, %v14402_v33 }
0x2fe1   :  { %v12490_v30 = vpop.eup %12489  ;;  %v8264_v58 = vpop.xlane.xlu0 %8263 }
0x2fe2   :  { %v8287_v16 = vmul.f32 %v8286_v62, %v8279_v60  ;;  %v8280_v42 = vmul.f32 %v12490_v30, %v14405_v29  ;;  %v8269_v23 = vmul.f32 0.0078125, %v8264_v58 }
0x2fe3   :  { %v8266_v63 = vpop.xlane.xlu1 %8265 }
0x2fe4   :  { %v8288_v25 = vmul.f32 %v8286_v62, %v8280_v42  ;;  %v8273_v8 = vadd.f32 1e-05, %v8269_v23  ;;  %v8270_v59 = vmul.f32 0.0078125, %v8266_v63  ;;  %v8295_v2 = vadd.f32 %v8294_v39, %v8287_v16 }
0x2fe6   :  { %12491 = vrsqrt.f32 %v8273_v8  ;;  %v8274_v50 = vadd.f32 1e-05, %v8270_v59  ;;  %v8296_v0 = vadd.f32 %v8294_v39, %v8288_v25 }
0x2fe8   :  { %12493 = vrsqrt.f32 %v8274_v50  ;;  %v8299_v44 = vpack.c.bf16 %v8296_v0, %v8295_v2 }
0x2fea   :  { %8513 = vmatmul.mubr.bf16.vlgmr.msra.gmra.mrb[156].mxu0 %v8299_v44  ;;  %11373 = vmatprep.mubr.bf16.mxu1 %v8299_v44 }
0x2feb   :  { %8522 = vmatprep.mubr.bf16.mxu0 %v12839_v55 }
0x2ff0   :  { %v12492_v33 = vpop.eup %12491 }
0x2ff1   :  { %v8281_v29 = vmul.f32 %v12492_v33, %v14412_v18 }
0x2ff2   :  { %v12494_v34 = vpop.eup %12493 }
0x2ff3   :  { %v8282_v3 = vmul.f32 %v12494_v34, %v14415_v12  ;;  %v8289_v9 = vmul.f32 %v8286_v62, %v8281_v29 }
0x2ff5   :  { %v8290_v19 = vmul.f32 %v8286_v62, %v8282_v3  ;;  %v8297_v38 = vadd.f32 %v8294_v39, %v8289_v9 }
0x2ff7   :  { %v8298_v14 = vadd.f32 %v8294_v39, %v8290_v19 }
0x2ff9   :  { %v8300_v61 = vpack.c.bf16 %v8298_v14, %v8297_v38 }
0x2ffb   :  { %8523 = vmatmul.mubr.bf16.gmra.mrb[160].mxu0 %v8300_v61  ;;  %11374 = vmatmul.mubr.bf16.vlgmr.msra.gmra.mrb[168].mxu1 %v8300_v61 }
0x2ffc   :  { %11379 = vmatprep.mubr.msk.bf16.mxu0 %vm12841_vm1, %v12840_v40  ;;  %11397 = vmatprep.mubr.msk.bf16.mxu1 %vm12841_vm1, %v12840_v40 }
0x30bd   :  { %v8514_v18 = vpop.f32.mrb[156].mxu0 }
0x30be   :  { %v8516_v12 = vpop.f32.mrb[157].mxu0  ;;  %v8515_v6 = vadd.f32 %v8514_v18, %v8340_v28 }
0x30bf   :  { %v8518_v10 = vpop.f32.mrb[158].mxu0  ;;  %v8517_v26 = vadd.f32 %v8516_v12, %v8344_v47 }
0x30c0   :  { %v8519_v4 = vadd.f32 %v8518_v10, %v8340_v28  ;;  %v8520_v27 = vpop.f32.mrb[159].mxu0 }
0x30c1   :  { %v8521_v56 = vadd.f32 %v8520_v27, %v8344_v47 }
0x30c2   :  { %v8582_v31 = vpack.c.bf16 %v8519_v4, %v8515_v6 }
0x30c3   :  { %v8584_v15 = vpack.c.bf16 %v8521_v56, %v8517_v26 }
0x30c5   :  { %11378 = vmatpush3.bf16.xpose.msra.mxu0 %v8584_v15 }
0x30c6   :  { %11383 = vmatprep.subr.bf16.mxu0 %v12840_v40 }
0x30cc   :  { %11380 = vmatmul.mubr.bf16.vlgmr.msra.gmra.mrb[164].mxu0 %v8582_v31 }
0x30cd   :  { %11385 = vmatprep.mubr.msk.bf16.mxu0 %vm12841_vm1, %v12840_v40 }
0x30ce   :  { %v8524_v22 = vpop.f32.mrb[160].mxu0  ;;  %v11375_v48 = vpop.f32.mrb[168].mxu1 }
0x30cf   :  { %v8526_v24 = vpop.f32.mrb[161].mxu0  ;;  %v8567_v49 = vpop.f32.mrb[169].mxu1  ;;  %v8525_v13 = vadd.f32 %v8524_v22, %v8340_v28  ;;  %v8576_v36 = vadd.f32 %v11375_v48, %v8348_v32 }
0x30d0   :  { %v8528_v35 = vpop.f32.mrb[162].mxu0  ;;  %v11376_v46 = vpop.f32.mrb[170].mxu1  ;;  %v8527_v17 = vadd.f32 %v8526_v24, %v8344_v47  ;;  %v8568_v60 = vadd.f32 %v8567_v49, %v8348_v32 }
0x30d1   :  { %v8529_v51 = vadd.f32 %v8528_v35, %v8340_v28  ;;  %v8579_v43 = vadd.f32 %v11376_v46, %v8348_v32  ;;  %v8530_v5 = vpop.f32.mrb[163].mxu0  ;;  %v8570_v62 = vpop.f32.mrb[171].mxu1  ;;  %v12079_v35 = vld [vmem:[#allocation11 + $0x140] sm:$0xff]  }
0x30d2   :  { %v8531_v30 = vadd.f32 %v8530_v5, %v8344_v47  ;;  %v8571_v58 = vadd.f32 %v8570_v62, %v8348_v32 }
0x30d3   :  { %v8583_v16 = vpack.c.bf16 %v8529_v51, %v8525_v13  ;;  %v8719_v42 = vpack.c.bf16 %v8579_v43, %v8576_v36 }
0x30d4   :  { %v8585_v23 = vpack.c.bf16 %v8531_v30, %v8527_v17  ;;  %v8718_v39 = vpack.c.bf16 %v8571_v58, %v8568_v60  ;;  %v12080_v17 = vld [vmem:[#allocation11 + $0x148] sm:$0xff]   ;;  %v12081_v58 = vld [vmem:[#allocation11 + $0x150] sm:$0xff]  }
0x30d5   :  { %11396 = vmatpush3.bf16.msra.mxu1 %v8719_v42 }
0x30d6   :  { %11384 = vmatpush3.bf16.xpose.msra.mxu0 %v8585_v23  ;;  %v12083_v23 = vld [vmem:[#allocation11 + $0x160] sm:$0xff]  }
0x30d7   :  { %11389 = vmatprep.subr.bf16.mxu0 %v12840_v40 }
0x30dd   :  { %11386 = vmatmul.mubr.bf16.vlgmr.msra.gmra.mrb[168].mxu0 %v8583_v16  ;;  %v12082_v16 = vld [vmem:[#allocation11 + $0x158] sm:$0xff]  }
0x30de   :  { %11390 = vmatpush3.bf16.msra.mxu0 %v8718_v39  ;;  %11391 = vmatprep.mubr.msk.bf16.mxu0 %vm12841_vm1, %v12840_v40 }
0x30df   :  { %11401 = vmatprep.subr.bf16.mxu0 %v12079_v35 }
0x319f   :  { %v8620_v63 = vpop.f32.mrb[164].mxu0 }
0x31a0   :  { %v8668_v25 = vmul.f32 0.088388346, %v8620_v63  ;;  %v11381_v8 = vpop.f32.mrb[165].mxu0 }
0x31a1   :  { %v8623_v59 = vpop.f32.mrb[166].mxu0 }
0x31a2   :  { %v8669_v50 = vmul.f32 0.088388346, %v8623_v59  ;;  %v11382_v2 = vpop.f32.mrb[167].mxu0  ;;  %v8672_v0 = vsel %vm705_vm2, %v8668_v25, -inf  ;;  %v12084_v59 = vld [vmem:[#allocation11 + $0x168] sm:$0xff]  }
0x31a3   :  { %8673 = vmax.xlane.f32.xlu0 %v8672_v0  ;;  %v12086_v2 = vld [vmem:[#allocation11 + $0x178] sm:$0xff]  }
0x31a4   :  { %v8675_v44 = vsel %vm705_vm2, %v8669_v50, -inf }
0x31a5   :  { %8676 = vmax.xlane.f32.xlu1 %v8675_v44 }
0x31b0   :  { %v8661_v33 = vpop.f32.mrb[168].mxu0 }
0x31b1   :  { %v8670_v29 = vmul.f32 0.088388346, %v8661_v33  ;;  %v11387_v34 = vpop.f32.mrb[169].mxu0 }
0x31b2   :  { %v8664_v3 = vpop.f32.mrb[170].mxu0 }
0x31b3   :  { %v8671_v9 = vmul.f32 0.088388346, %v8664_v3  ;;  %v11388_v19 = vpop.f32.mrb[171].mxu0  ;;  %v8678_v40 = vsel %vm705_vm2, %v8670_v29, -inf }
0x31b4   :  { %8679 = vmax.xlane.f32.xlu0 %v8678_v40 }
0x31b5   :  { %v8681_v38 = vsel %vm705_vm2, %v8671_v9, -inf }
0x31b6   :  { %8682 = vmax.xlane.f32.xlu1 %v8681_v38 }
0x3230   :  { %v8674_v14 = vpop.xlane.xlu0 %8673 }
0x3231   :  { %v8684_v61 = vsub.f32 %v8668_v25, %v8674_v14  ;;  %v8830_v14 = vrot.slane %v14423_v45, %v13108_v41 }
0x3232   :  { %v8677_v1 = vpop.xlane.xlu1 %8676 }
0x3233   :  { %v8688_v28 = vmul.f32 1.442695, %v8684_v61  ;;  %v8685_v18 = vsub.f32 %v8669_v50, %v8677_v1  ;;  %v12085_v50 = vld [vmem:[#allocation11 + $0x170] sm:$0xff]  }
0x3235   :  { %12495 = vpow2.f32 %v8688_v28  ;;  %v8690_v47 = vmul.f32 1.442695, %v8685_v18 }
0x3237   :  { %12497 = vpow2.f32 %v8690_v47 }
0x323f   :  { %v12496_v12 = vpop.eup %12495 }
0x3240   :  { %v8696_v10 = vsel %vm705_vm2, %v12496_v12, 0.0 }
0x3241   :  { %v12498_v6 = vpop.eup %12497  ;;  %v8680_v4 = vpop.xlane.xlu0 %8679  ;;  %8697 = vadd.xlane.f32.xlu0 %v8696_v10 }
0x3242   :  { %v8686_v27 = vsub.f32 %v8670_v29, %v8680_v4  ;;  %v8699_v26 = vsel %vm705_vm2, %v12498_v6, 0.0 }
0x3243   :  { %v8683_v56 = vpop.xlane.xlu1 %8682  ;;  %8700 = vadd.xlane.f32.xlu1 %v8699_v26 }
0x3244   :  { %v8692_v31 = vmul.f32 1.442695, %v8686_v27  ;;  %v8687_v15 = vsub.f32 %v8671_v9, %v8683_v56 }
0x3246   :  { %12499 = vpow2.f32 %v8692_v31  ;;  %v8694_v32 = vmul.f32 1.442695, %v8687_v15  ;;  %v12089_v31 = vld [vmem:[#allocation13 + $0x504] ss:$16 sps:$4 sm:$0xff]   ;;  %v12090_v15 = vld [vmem:[#allocation13 + $0x508] ss:$16 sps:$4 sm:$0xff]  }
0x3247   :  { %9210 = vmatprep.subr.bf16.mxu1 %v12089_v31 }
0x3248   :  { %12501 = vpow2.f32 %v8694_v32  ;;  %v12092_v32 = vld [vmem:[#allocation13 + $0x50c] ss:$16 sps:$4 sm:$0xff]  }
0x3250   :  { %v12500_v22 = vpop.eup %12499 }
0x3251   :  { %v8702_v48 = vsel %vm705_vm2, %v12500_v22, 0.0 }
0x3252   :  { %v12502_v24 = vpop.eup %12501  ;;  %8703 = vadd.xlane.f32.xlu0 %v8702_v48  ;;  %v12096_v48 = vld [vmem:[#allocation13 + $0x528] ss:$16 sps:$4 sm:$0xff]  }
0x3253   :  { %v8705_v49 = vsel %vm705_vm2, %v12502_v24, 0.0 }
0x3254   :  { %8706 = vadd.xlane.f32.xlu1 %v8705_v49 }
0x32ce   :  { %v8698_v46 = vpop.xlane.xlu0 %8697 }
0x32cf   :  { %12503 = vrcp.f32 %v8698_v46 }
0x32d0   :  { %v8701_v13 = vpop.xlane.xlu1 %8700 }
0x32d1   :  { %12505 = vrcp.f32 %v8701_v13 }
0x32d9   :  { %v12504_v36 = vpop.eup %12503 }
0x32da   :  { %v8712_v43 = vmul.f32 %v12504_v36, %v12496_v12 }
0x32db   :  { %v12506_v51 = vpop.eup %12505 }
0x32dc   :  { %v8713_v5 = vmul.f32 %v12506_v51, %v12498_v6 }
0x32de   :  { %v8716_v62 = vpack.c.bf16 %v8713_v5, %v8712_v43 }
0x32df   :  { %v8704_v60 = vpop.xlane.xlu0 %8703 }
0x32e0   :  { %12507 = vrcp.f32 %v8704_v60  ;;  %11392 = vmatmul.mubr.msk.bf16.vlgmr.msra.gmra.mrb[172].mxu0 %vm705_vm2, %v8716_v62 }
0x32e1   :  { %v8707_v30 = vpop.xlane.xlu1 %8706  ;;  %11402 = vmatpush3.bf16.msra.mxu0 %v12079_v35 }
0x32e2   :  { %12509 = vrcp.f32 %v8707_v30  ;;  %11403 = vmatprep.subr.bf16.mxu0 %v12080_v17 }
0x32e5   :  { %11404 = vmatpush3.bf16.msra.mxu0 %v12080_v17 }
0x32e6   :  { %11405 = vmatprep.subr.bf16.mxu0 %v12081_v58 }
0x32e9   :  { %11406 = vmatpush3.bf16.msra.mxu0 %v12081_v58 }
0x32ea   :  { %v12508_v42 = vpop.eup %12507  ;;  %11407 = vmatprep.subr.bf16.mxu0 %v12082_v16 }
0x32eb   :  { %v8714_v63 = vmul.f32 %v12508_v42, %v12500_v22  ;;  %v12098_v22 = vld [vmem:[#allocation13 + $0x52c] ss:$16 sps:$4 sm:$0xff]   ;;  %v12101_v42 = vld [vmem:[#allocation13 + $0x544] ss:$16 sps:$4 sm:$0xff]  }
0x32ec   :  { %v12510_v39 = vpop.eup %12509 }
0x32ed   :  { %v8715_v25 = vmul.f32 %v12510_v39, %v12502_v24  ;;  %11408 = vmatpush3.bf16.msra.mxu0 %v12082_v16  ;;  %v12099_v39 = vld [vmem:[#allocation13 + $0x540] ss:$16 sps:$4 sm:$0xff]  }
0x32ee   :  { %11409 = vmatprep.subr.bf16.mxu0 %v12083_v23 }
0x32ef   :  { %v8717_v8 = vpack.c.bf16 %v8715_v25, %v8714_v63  ;;  %v12102_v63 = vld [vmem:[#allocation13 + $0x548] ss:$16 sps:$4 sm:$0xff]   ;;  %v12107_v25 = vld [vmem:[#allocation13 + $0x564] ss:$16 sps:$4 sm:$0xff]  }
0x32f1   :  { %11398 = vmatmul.mubr.msk.bf16.vlgmr.msra.gmra.mrb[172].mxu1 %vm705_vm2, %v8717_v8  ;;  %11410 = vmatpush3.bf16.msra.mxu0 %v12083_v23  ;;  %v12104_v23 = vld [vmem:[#allocation13 + $0x54c] ss:$16 sps:$4 sm:$0xff]  }
0x32f2   :  { %9242 = vmatprep.mubr.bf16.mxu1 %v12839_v55  ;;  %11411 = vmatprep.subr.bf16.mxu0 %v12084_v59  ;;  %v12110_v8 = vld [vmem:[#allocation13 + $0x56c] ss:$16 sps:$4 sm:$0xff]  }
0x32f5   :  { %11412 = vmatpush3.bf16.msra.mxu0 %v12084_v59  ;;  %v12105_v59 = vld [vmem:[#allocation13 + $0x560] ss:$16 sps:$4 sm:$0xff]  }
0x32f6   :  { %11413 = vmatprep.subr.bf16.mxu0 %v12085_v50 }
0x32f9   :  { %11414 = vmatpush3.bf16.msra.mxu0 %v12085_v50  ;;  %v12108_v50 = vld [vmem:[#allocation13 + $0x568] ss:$16 sps:$4 sm:$0xff]  }
0x32fa   :  { %11415 = vmatprep.subr.bf16.mxu0 %v12086_v2 }
0x32fd   :  { %11416 = vmatpush3.bf16.msra.mxu0 %v12086_v2  ;;  %v12113_v2 = vld [vmem:[#allocation13 + $0x584] ss:$16 sps:$4 sm:$0xff]  }
0x32fe   :  { %9263 = vmatprep.subr.bf16.mxu0 %v12092_v32 }
0x33b3   :  { %v8757_v0 = vpop.f32.mrb[172].mxu0 }
0x33b4   :  { %v11393_v44 = vpop.f32.mrb[173].mxu0 }
0x33b5   :  { %v8760_v33 = vpop.f32.mrb[174].mxu0  ;;  %v12111_v44 = vld [vmem:[#allocation13 + $0x580] ss:$16 sps:$4 sm:$0xff]  }
0x33b6   :  { %v8808_v29 = vpack.c.bf16 %v8760_v33, %v8757_v0  ;;  %v11394_v34 = vpop.f32.mrb[175].mxu0  ;;  %v12116_v0 = vld [vmem:[#allocation13 + $0x58c] ss:$16 sps:$4 sm:$0xff]   ;;  %v12114_v33 = vld [vmem:[#allocation13 + $0x588] ss:$16 sps:$4 sm:$0xff]  }
0x33b7   :  { %v12122_v34 = vld [vmem:[#allocation13 + $0x5ac] ss:$16 sps:$4 sm:$0xff]  }
0x33b8   :  { %11417 = vmatprep.mubr.bf16.mxu0 %v8808_v29  ;;  %v12119_v29 = vld [vmem:[#allocation13 + $0x5a4] ss:$16 sps:$4 sm:$0xff]  }
0x33c4   :  { %v8801_v3 = vpop.f32.mrb[172].mxu1 }
0x33c5   :  { %v11399_v9 = vpop.f32.mrb[173].mxu1 }
0x33c6   :  { %v8804_v19 = vpop.f32.mrb[174].mxu1  ;;  %v12120_v9 = vld [vmem:[#allocation13 + $0x5a8] ss:$16 sps:$4 sm:$0xff]  }
0x33c7   :  { %v8809_v40 = vpack.c.bf16 %v8804_v19, %v8801_v3  ;;  %v11400_v38 = vpop.f32.mrb[175].mxu1  ;;  %v12117_v3 = vld [vmem:[#allocation13 + $0x5a0] ss:$16 sps:$4 sm:$0xff]  }
0x33c8   :  { %v12123_v19 = vld [vmem:[#allocation13 + $0x5c0] ss:$16 sps:$4 sm:$0xff]   ;;  %v12126_v38 = vld [vmem:[#allocation13 + $0x5c8] ss:$16 sps:$4 sm:$0xff]  }
0x33c9   :  { %11418 = vmatmul.mubr.bf16.vlgmr.msra.gmra.mrb[176].mxu0 %v8809_v40  ;;  %v12125_v40 = vld [vmem:[#allocation13 + $0x5c4] ss:$16 sps:$4 sm:$0xff]  }
0x33ca   :  { %9295 = vmatprep.mubr.bf16.mxu0 %v12839_v55  ;;  %9264 = vmatpush1.bf16.msra.mxu0 %v12090_v15 }
0x33cb   :  { %9265 = vmatprep.subr.bf16.mxu0 %v12098_v22 }
0x33ce   :  { %9266 = vmatpush1.bf16.msra.mxu0 %v12096_v48 }
0x33cf   :  { %9267 = vmatprep.subr.bf16.mxu0 %v12104_v23 }
0x33d2   :  { %9268 = vmatpush1.bf16.msra.mxu0 %v12102_v63 }
0x33d3   :  { %9269 = vmatprep.subr.bf16.mxu0 %v12110_v8  ;;  %v12136_v8 = vld [vmem:[#allocation16 + $0x5c0] sm:$0xff]  }
0x33d6   :  { %9270 = vmatpush1.bf16.msra.mxu0 %v12108_v50  ;;  %v12140_v50 = vld [vmem:[#allocation16 + $0x5c8] sm:$0xff]  }
0x33d7   :  { %9271 = vmatprep.subr.bf16.mxu0 %v12116_v0  ;;  %v12142_v0 = vld [vmem:[#allocation16 + $0x588] sm:$0xff]  }
0x33da   :  { %9272 = vmatpush1.bf16.msra.mxu0 %v12114_v33  ;;  %v12145_v33 = vld [vmem:[#allocation16 + $0x510] sm:$0xff]  }
0x33db   :  { %9273 = vmatprep.subr.bf16.mxu0 %v12122_v34  ;;  %v12147_v34 = vld [vmem:[#allocation16 + $0x558] sm:$0xff]  }
0x33de   :  { %9274 = vmatpush1.bf16.msra.mxu0 %v12120_v9  ;;  %v12149_v9 = vld [vmem:[#allocation16 + $0x518] sm:$0xff]  }
0x349c   :  { %v11419_v61 = vpop.f32.mrb[176].mxu0 }
0x349d   :  { %v8913_v1 = vpop.f32.mrb[177].mxu0  ;;  %v8922_v12 = vadd.f32 %v11419_v61, %v8830_v14  ;;  %v12131_v61 = vld [vmem:[#allocation13 + $0x5e4] ss:$16 sps:$4 sm:$0xff]  }
0x349e   :  { %v8914_v28 = vadd.f32 %v8913_v1, %v8830_v14  ;;  %v11420_v18 = vpop.f32.mrb[178].mxu0  ;;  %v12134_v1 = vld [vmem:[#allocation13 + $0x5ec] ss:$16 sps:$4 sm:$0xff]  }
0x349f   :  { %v8916_v47 = vpop.f32.mrb[179].mxu0  ;;  %v8925_v4 = vadd.f32 %v11420_v18, %v8830_v14  ;;  %v14469_v26 = vadd.f32 %v8922_v12, %v14394_v57  ;;  %v12093_v57 = vld [vmem:[#allocation13 + $0x520] ss:$16 sps:$4 sm:$0xff]   ;;  %v12132_v18 = vld [vmem:[#allocation13 + $0x5e8] ss:$16 sps:$4 sm:$0xff]  }
0x34a0   :  { %v14462_v10 = vadd.f32 %v8914_v28, %v14386_v52  ;;  %v8917_v6 = vadd.f32 %v8916_v47, %v8830_v14  ;;  %v12087_v52 = vld [vmem:[#allocation13 + $0x500] ss:$16 sps:$4 sm:$0xff]   ;;  %v12128_v14 = vld [vmem:[#allocation13 + $0x5cc] ss:$16 sps:$4 sm:$0xff]  }
0x34a1   :  { %v14473_v56 = vadd.f32 %v8925_v4, %v14398_v37  ;;  %9211 = vmatpush1.bf16.msra.mxu1 %v12087_v52  ;;  %9275 = vmatprep.subr.bf16.mxu0 %v12128_v14  ;;  %v12129_v28 = vld [vmem:[#allocation13 + $0x5e0] ss:$16 sps:$4 sm:$0xff]  }
0x34a2   :  { %v14465_v27 = vadd.f32 %v8917_v6, %v14390_v7  ;;  %8932 = vadd.xlane.f32.xlu0 %v14462_v10  ;;  %v12095_v7 = vld [vmem:[#allocation13 + $0x524] ss:$16 sps:$4 sm:$0xff]   ;;  %9276 = vmatpush1.bf16.msra.mxu0 %v12126_v38 }
0x34a3   :  { %9212 = vmatprep.subr.bf16.mxu1 %v12095_v7  ;;  %9277 = vmatprep.subr.bf16.mxu0 %v12134_v1  ;;  %v12152_v38 = vld [vmem:[#allocation16 + $0x5e0] sm:$0xff]   ;;  %v12155_v1 = vld [vmem:[#allocation16 + $0x568] sm:$0xff]  }
0x34a4   :  { %8934 = vadd.xlane.f32.xlu1 %v14465_v27  ;;  %v12153_v14 = vld [vmem:[#allocation16 + $0x520] sm:$0xff]  }
0x34a5   :  { %9213 = vmatpush1.bf16.msra.mxu1 %v12093_v57 }
0x34a6   :  { %8936 = vadd.xlane.f32.xlu0 %v14469_v26  ;;  %9214 = vmatprep.subr.bf16.mxu1 %v12101_v42 }
0x34a7   :  { %9278 = vmatpush1.bf16.msra.mxu0 %v12132_v18  ;;  %v12157_v18 = vld [vmem:[#allocation16 + $0x528] sm:$0xff]  }
0x34a8   :  { %8938 = vadd.xlane.f32.xlu1 %v14473_v56  ;;  %10997 = vmatprep.subr.bf16.mxu0 %v12136_v8 }
0x34a9   :  { %9215 = vmatpush1.bf16.msra.mxu1 %v12099_v39 }
0x34aa   :  { %9216 = vmatprep.subr.bf16.mxu1 %v12107_v25  ;;  %v12135_v25 = vld [vmem:[#allocation16 + $0x540] sm:$0xff]  }
0x34ad   :  { %9217 = vmatpush1.bf16.msra.mxu1 %v12105_v59  ;;  %v12137_v59 = vld [vmem:[#allocation16 + $0x500] sm:$0xff]  }
0x34ae   :  { %9218 = vmatprep.subr.bf16.mxu1 %v12113_v2  ;;  %v12141_v2 = vld [vmem:[#allocation16 + $0x508] sm:$0xff]  }
0x34b1   :  { %9219 = vmatpush1.bf16.msra.mxu1 %v12111_v44  ;;  %v12144_v44 = vld [vmem:[#allocation16 + $0x5d0] sm:$0xff]  }
0x34b2   :  { %9220 = vmatprep.subr.bf16.mxu1 %v12119_v29  ;;  %v12146_v29 = vld [vmem:[#allocation16 + $0x590] sm:$0xff]  }
0x34b5   :  { %9221 = vmatpush1.bf16.msra.mxu1 %v12117_v3  ;;  %v12148_v3 = vld [vmem:[#allocation16 + $0x5d8] sm:$0xff]  }
0x34b6   :  { %9222 = vmatprep.subr.bf16.mxu1 %v12125_v40  ;;  %v12151_v40 = vld [vmem:[#allocation16 + $0x560] sm:$0xff]  }
0x34b9   :  { %9223 = vmatpush1.bf16.msra.mxu1 %v12123_v19  ;;  %v12150_v19 = vld [vmem:[#allocation16 + $0x598] sm:$0xff]  }
0x34ba   :  { %9224 = vmatprep.subr.bf16.mxu1 %v12131_v61  ;;  %v12154_v61 = vld [vmem:[#allocation16 + $0x5a0] sm:$0xff]  }
0x34bd   :  { %9225 = vmatpush1.bf16.msra.mxu1 %v12129_v28  ;;  %v12156_v28 = vld [vmem:[#allocation16 + $0x5e8] sm:$0xff]  }
0x34be   :  { %10969 = vmatprep.subr.bf16.mxu1 %v12135_v25 }
0x352f   :  { %v8933_v37 = vpop.xlane.xlu0 %8932 }
0x3530   :  { %v8940_v24 = vmul.f32 0.0078125, %v8933_v37  ;;  %v8979_v37 = vrot.slane %v14423_v45, %v13169_v53 }
0x3531   :  { %v8935_v49 = vpop.xlane.xlu1 %8934 }
0x3532   :  { %v14478_v35 = vsub.f32 %v14462_v10, %v8940_v24  ;;  %v8941_v46 = vmul.f32 0.0078125, %v8935_v49 }
0x3533   :  { %v8937_v13 = vpop.xlane.xlu0 %8936 }
0x3534   :  { %v14481_v36 = vsub.f32 %v14465_v27, %v8941_v46  ;;  %v8942_v51 = vmul.f32 0.0078125, %v8937_v13  ;;  %v8948_v43 = vmul.f32 %v14478_v35, %v14478_v35 }
0x3535   :  { %v8939_v5 = vpop.xlane.xlu1 %8938 }
0x3536   :  { %v14486_v62 = vsub.f32 %v14469_v26, %v8942_v51  ;;  %v8943_v17 = vmul.f32 0.0078125, %v8939_v5  ;;  %8952 = vadd.xlane.f32.xlu0 %v8948_v43  ;;  %v8949_v60 = vmul.f32 %v14481_v36, %v14481_v36  ;;  %v8987_v43 = vrot.slane %v14423_v45, %v13174_v54 }
0x3538   :  { %v14491_v30 = vsub.f32 %v14473_v56, %v8943_v17  ;;  %8954 = vadd.xlane.f32.xlu1 %v8949_v60  ;;  %v8950_v58 = vmul.f32 %v14486_v62, %v14486_v62 }
0x353a   :  { %8956 = vadd.xlane.f32.xlu0 %v8950_v58  ;;  %v8951_v16 = vmul.f32 %v14491_v30, %v14491_v30 }
0x353c   :  { %8958 = vadd.xlane.f32.xlu1 %v8951_v16 }
0x35c3   :  { %v8953_v47 = vpop.xlane.xlu0 %8952 }
0x35c4   :  { %v8960_v12 = vmul.f32 0.0078125, %v8953_v47  ;;  %v12158_v47 = vld [vmem:[#allocation16 + $0x5a8] sm:$0xff]  }
0x35c5   :  { %v8955_v6 = vpop.xlane.xlu1 %8954 }
0x35c6   :  { %v8964_v4 = vadd.f32 1e-05, %v8960_v12  ;;  %v8961_v52 = vmul.f32 0.0078125, %v8955_v6  ;;  %v12159_v12 = vld [vmem:[#allocation16 + $0x570] sm:$0xff]  }
0x35c7   :  { %v8957_v31 = vpop.xlane.xlu0 %8956  ;;  %v12160_v6 = vld [vmem:[#allocation16 + $0x5f0] sm:$0xff]  }
0x35c8   :  { %12511 = vrsqrt.f32 %v8964_v4  ;;  %v8965_v15 = vadd.f32 1e-05, %v8961_v52  ;;  %v8962_v32 = vmul.f32 0.0078125, %v8957_v31  ;;  %v12161_v4 = vld [vmem:[#allocation16 + $0x530] sm:$0xff]   ;;  %v12163_v31 = vld [vmem:[#allocation16 + $0x578] sm:$0xff]  }
0x35c9   :  { %v8959_v7 = vpop.xlane.xlu1 %8958  ;;  %v12162_v52 = vld [vmem:[#allocation16 + $0x5b0] sm:$0xff]  }
0x35ca   :  { %12513 = vrsqrt.f32 %v8965_v15  ;;  %v8966_v22 = vadd.f32 1e-05, %v8962_v32  ;;  %v8963_v57 = vmul.f32 0.0078125, %v8959_v7  ;;  %v12164_v15 = vld [vmem:[#allocation16 + $0x5f8] sm:$0xff]  }
0x35cb   :  { %v12165_v32 = vld [vmem:[#allocation16 + $0x538] sm:$0xff]  }
0x35cc   :  { %12515 = vrsqrt.f32 %v8966_v22  ;;  %v8967_v48 = vadd.f32 1e-05, %v8963_v57  ;;  %v12166_v7 = vld [vmem:[#allocation16 + $0x5b8] sm:$0xff]  }
0x35cd   :  { %v9028_v22 = vld [vmem:[#allocation14 + $0x5] ss:$8 sm:$0xf] }
0x35ce   :  { %12517 = vrsqrt.f32 %v8967_v48  ;;  %v14508_v57 = vrot.slane %v9028_v22, %v13084_v11  ;;  %v14511_v48 = vrot.slane %v9028_v22, %v13108_v41 }
0x35d2   :  { %v12512_v24 = vpop.eup %12511 }
0x35d3   :  { %v8972_v49 = vmul.f32 %v12512_v24, %v14478_v35  ;;  %v14517_v24 = vrot.slane %v9028_v22, %v13169_v53 }
0x35d4   :  { %v12514_v46 = vpop.eup %12513 }
0x35d5   :  { %v8973_v13 = vmul.f32 %v12514_v46, %v14481_v36  ;;  %v8980_v51 = vmul.f32 %v8979_v37, %v8972_v49 }
0x35d6   :  { %v12516_v5 = vpop.eup %12515 }
0x35d7   :  { %v8981_v17 = vmul.f32 %v8979_v37, %v8973_v13  ;;  %v8988_v58 = vadd.f32 %v8987_v43, %v8980_v51  ;;  %v8974_v42 = vmul.f32 %v12516_v5, %v14486_v62  ;;  %v12138_v62 = vld [vmem:[#allocation16 + $0x580] sm:$0xff]  }
0x35d8   :  { %v12518_v60 = vpop.eup %12517 }
0x35d9   :  { %v8989_v16 = vadd.f32 %v8987_v43, %v8981_v17  ;;  %v8975_v23 = vmul.f32 %v12518_v60, %v14491_v30  ;;  %v8982_v35 = vmul.f32 %v8979_v37, %v8974_v42  ;;  %v12139_v30 = vld [vmem:[#allocation16 + $0x548] sm:$0xff]  }
0x35db   :  { %v8992_v39 = vpack.c.bf16 %v8989_v16, %v8988_v58  ;;  %v8983_v63 = vmul.f32 %v8979_v37, %v8975_v23  ;;  %v8990_v54 = vadd.f32 %v8987_v43, %v8982_v35  ;;  %v14514_v37 = vrot.slane %v9028_v22, %v13092_v20 }
0x35dd   :  { %9243 = vmatmul.mubr.bf16.vlgmr.msra.gmra.mrb[176].mxu1 %v8992_v39  ;;  %9296 = vmatmul.mubr.bf16.vlgmr.msra.gmra.mrb[180].mxu0 %v8992_v39  ;;  %v8991_v36 = vadd.f32 %v8987_v43, %v8983_v63 }
0x35de   :  { %9252 = vmatprep.mubr.bf16.mxu1 %v12839_v55  ;;  %9305 = vmatprep.mubr.bf16.mxu0 %v12839_v55  ;;  %v12143_v55 = vld [vmem:[#allocation16 + $0x550] sm:$0xff]  }
0x35df   :  { %v8993_v45 = vpack.c.bf16 %v8991_v36, %v8990_v54  ;;  %10970 = vmatpush3.bf16.msra.mxu1 %v12137_v59  ;;  %10998 = vmatpush3.bf16.msra.mxu0 %v12138_v62 }
0x35e0   :  { %10971 = vmatprep.subr.bf16.mxu1 %v12139_v30  ;;  %10999 = vmatprep.subr.bf16.mxu0 %v12140_v50 }
0x35e3   :  { %10972 = vmatpush3.bf16.msra.mxu1 %v12141_v2  ;;  %11000 = vmatpush3.bf16.msra.mxu0 %v12142_v0 }
0x35e4   :  { %10973 = vmatprep.subr.bf16.mxu1 %v12143_v55  ;;  %11001 = vmatprep.subr.bf16.mxu0 %v12144_v44 }
0x35e5   :  { %9253 = vmatmul.mubr.bf16.gmra.mrb[180].mxu1 %v8993_v45  ;;  %9306 = vmatmul.mubr.bf16.gmra.mrb[184].mxu0 %v8993_v45 }
0x35e7   :  { %10974 = vmatpush3.bf16.msra.mxu1 %v12145_v33  ;;  %11002 = vmatpush3.bf16.msra.mxu0 %v12146_v29 }
0x35e8   :  { %10975 = vmatprep.subr.bf16.mxu1 %v12147_v34  ;;  %11003 = vmatprep.subr.bf16.mxu0 %v12148_v3 }
0x35eb   :  { %10976 = vmatpush3.bf16.msra.mxu1 %v12149_v9  ;;  %11004 = vmatpush3.bf16.msra.mxu0 %v12150_v19 }
0x35ec   :  { %10977 = vmatprep.subr.bf16.mxu1 %v12151_v40  ;;  %11005 = vmatprep.subr.bf16.mxu0 %v12152_v38 }
0x35ef   :  { %10978 = vmatpush3.bf16.msra.mxu1 %v12153_v14  ;;  %11006 = vmatpush3.bf16.msra.mxu0 %v12154_v61 }
0x35f0   :  { %10979 = vmatprep.subr.bf16.mxu1 %v12155_v1  ;;  %11007 = vmatprep.subr.bf16.mxu0 %v12156_v28 }
0x35f3   :  { %10980 = vmatpush3.bf16.msra.mxu1 %v12157_v18  ;;  %11008 = vmatpush3.bf16.msra.mxu0 %v12158_v47 }
0x35f4   :  { %10981 = vmatprep.subr.bf16.mxu1 %v12159_v12  ;;  %11009 = vmatprep.subr.bf16.mxu0 %v12160_v6 }
0x35f7   :  { %10982 = vmatpush3.bf16.msra.mxu1 %v12161_v4  ;;  %11010 = vmatpush3.bf16.msra.mxu0 %v12162_v52 }
0x35f8   :  { %10983 = vmatprep.subr.bf16.mxu1 %v12163_v31  ;;  %11011 = vmatprep.subr.bf16.mxu0 %v12164_v15 }
0x35fb   :  { %10984 = vmatpush3.bf16.msra.mxu1 %v12165_v32  ;;  %11012 = vmatpush3.bf16.msra.mxu0 %v12166_v7 }
0x36b0   :  { %v9244_v49 = vpop.f32.mrb[176].mxu1  ;;  %v9297_v46 = vpop.f32.mrb[180].mxu0 }
0x36b1   :  { %v14520_v13 = vadd.f32 %v9244_v49, %v14508_v57  ;;  %v14523_v51 = vadd.f32 %v9297_v46, %v14511_v48  ;;  %v9246_v43 = vpop.f32.mrb[177].mxu1  ;;  %v9299_v11 = vpop.f32.mrb[181].mxu0 }
0x36b2   :  { %v14526_v5 = vadd.f32 %v9246_v43, %v14514_v37  ;;  %v14529_v41 = vadd.f32 %v9299_v11, %v14517_v24  ;;  %v9248_v20 = vpop.f32.mrb[178].mxu1  ;;  %v9301_v17 = vpop.f32.mrb[182].mxu0 }
0x36b3   :  { %v9316_v53 = vmul.f32 %v14520_v13, %v14520_v13  ;;  %v9318_v60 = vmul.f32 %v14523_v51, %v14523_v51  ;;  %v14536_v58 = vadd.f32 %v9248_v20, %v14508_v57  ;;  %v14539_v16 = vadd.f32 %v9301_v17, %v14511_v48  ;;  %v9250_v42 = vpop.f32.mrb[179].mxu1  ;;  %v9303_v23 = vpop.f32.mrb[183].mxu0 }
0x36b4   :  { %v9317_v39 = vmul.f32 %v14526_v5, %v14526_v5  ;;  %v9319_v63 = vmul.f32 %v14529_v41, %v14529_v41  ;;  %v14546_v35 = vadd.f32 %v9250_v42, %v14514_v37  ;;  %v14549_v36 = vadd.f32 %v9303_v23, %v14517_v24 }
0x36b5   :  { %v9332_v54 = vmul.f32 %v9316_v53, %v14520_v13  ;;  %v9334_v45 = vmul.f32 %v9318_v60, %v14523_v51  ;;  %v9320_v25 = vmul.f32 %v14536_v58, %v14536_v58  ;;  %v9322_v8 = vmul.f32 %v14539_v16, %v14539_v16 }
0x36b6   :  { %v9333_v59 = vmul.f32 %v9317_v39, %v14526_v5  ;;  %v9335_v62 = vmul.f32 %v9319_v63, %v14529_v41  ;;  %v9321_v30 = vmul.f32 %v14546_v35, %v14546_v35  ;;  %v9323_v50 = vmul.f32 %v14549_v36, %v14549_v36 }
0x36b7   :  { %v9348_v2 = vmul.f32 0.044715, %v9332_v54  ;;  %v9350_v0 = vmul.f32 0.044715, %v9334_v45  ;;  %v9336_v55 = vmul.f32 %v9320_v25, %v14536_v58  ;;  %v9338_v44 = vmul.f32 %v9322_v8, %v14539_v16 }
0x36b8   :  { %v9349_v33 = vmul.f32 0.044715, %v9333_v59  ;;  %v9351_v29 = vmul.f32 0.044715, %v9335_v62  ;;  %v9337_v34 = vmul.f32 %v9321_v30, %v14546_v35  ;;  %v9339_v3 = vmul.f32 %v9323_v50, %v14549_v36  ;;  %v9254_v9 = vpop.f32.mrb[180].mxu1  ;;  %v9307_v19 = vpop.f32.mrb[184].mxu0 }
0x36b9   :  { %v9364_v40 = vadd.f32 %v9348_v2, %v14520_v13  ;;  %v9366_v38 = vadd.f32 %v9350_v0, %v14523_v51  ;;  %v9352_v14 = vmul.f32 0.044715, %v9336_v55  ;;  %v9354_v61 = vmul.f32 0.044715, %v9338_v44  ;;  %v9256_v1 = vpop.f32.mrb[181].mxu1  ;;  %v9309_v28 = vpop.f32.mrb[185].mxu0 }
0x36ba   :  { %v9365_v18 = vadd.f32 %v9349_v33, %v14526_v5  ;;  %v9367_v47 = vadd.f32 %v9351_v29, %v14529_v41  ;;  %v9353_v12 = vmul.f32 0.044715, %v9337_v34  ;;  %v9355_v6 = vmul.f32 0.044715, %v9339_v3  ;;  %v9258_v4 = vpop.f32.mrb[182].mxu1  ;;  %v9311_v52 = vpop.f32.mrb[186].mxu0 }
0x36bb   :  { %v9380_v31 = vmul.f32 0.7978846, %v9364_v40  ;;  %v9382_v15 = vmul.f32 0.7978846, %v9366_v38  ;;  %v9368_v32 = vadd.f32 %v9352_v14, %v14536_v58  ;;  %v9370_v7 = vadd.f32 %v9354_v61, %v14539_v16  ;;  %v9260_v22 = vpop.f32.mrb[183].mxu1  ;;  %v9313_v49 = vpop.f32.mrb[187].mxu0 }
0x36bc   :  { %v9381_v46 = vmul.f32 0.7978846, %v9365_v18  ;;  %v9383_v43 = vmul.f32 0.7978846, %v9367_v47  ;;  %v9369_v11 = vadd.f32 %v9353_v12, %v14546_v35  ;;  %v9371_v20 = vadd.f32 %v9355_v6, %v14549_v36 }
0x36bd   :  { %12519 = vtanh.f32 %v9380_v31  ;;  %v9384_v17 = vmul.f32 0.7978846, %v9368_v32  ;;  %v9386_v53 = vmul.f32 0.7978846, %v9370_v7  ;;  %v14576_v60 = vadd.f32 %v9254_v9, %v14508_v57 }
0x36be   :  { %12521 = vtanh.f32 %v9382_v15  ;;  %v9385_v42 = vmul.f32 0.7978846, %v9369_v11  ;;  %v9387_v23 = vmul.f32 0.7978846, %v9371_v20  ;;  %v14579_v39 = vadd.f32 %v9307_v19, %v14511_v48 }
0x36bf   :  { %12523 = vtanh.f32 %v9381_v46  ;;  %v9324_v63 = vmul.f32 %v14576_v60, %v14576_v60  ;;  %v14584_v54 = vadd.f32 %v9256_v1, %v14514_v37  ;;  %v14587_v45 = vadd.f32 %v9309_v28, %v14517_v24 }
0x36c0   :  { %12525 = vtanh.f32 %v9383_v43  ;;  %v9326_v25 = vmul.f32 %v14579_v39, %v14579_v39  ;;  %v14592_v8 = vadd.f32 %v9258_v4, %v14508_v57  ;;  %v14595_v59 = vadd.f32 %v9311_v52, %v14511_v48 }
0x36c1   :  { %12527 = vtanh.f32 %v9384_v17  ;;  %v9340_v62 = vmul.f32 %v9324_v63, %v14576_v60  ;;  %v9325_v30 = vmul.f32 %v14584_v54, %v14584_v54  ;;  %v9327_v50 = vmul.f32 %v14587_v45, %v14587_v45 }
0x36c2   :  { %12529 = vtanh.f32 %v9386_v53  ;;  %v9342_v2 = vmul.f32 %v9326_v25, %v14579_v39  ;;  %v9328_v0 = vmul.f32 %v14592_v8, %v14592_v8  ;;  %v9330_v57 = vmul.f32 %v14595_v59, %v14595_v59 }
0x36c3   :  { %12531 = vtanh.f32 %v9385_v42  ;;  %v9356_v48 = vmul.f32 0.044715, %v9340_v62  ;;  %v9341_v55 = vmul.f32 %v9325_v30, %v14584_v54  ;;  %v9343_v44 = vmul.f32 %v9327_v50, %v14587_v45 }
0x36c4   :  { %12533 = vtanh.f32 %v9387_v23  ;;  %v9358_v33 = vmul.f32 0.044715, %v9342_v2  ;;  %v9344_v29 = vmul.f32 %v9328_v0, %v14592_v8  ;;  %v9346_v34 = vmul.f32 %v9330_v57, %v14595_v59 }
0x36c5   :  { %v9372_v3 = vadd.f32 %v9356_v48, %v14576_v60  ;;  %v9357_v9 = vmul.f32 0.044715, %v9341_v55  ;;  %v9359_v19 = vmul.f32 0.044715, %v9343_v44  ;;  %v14613_v40 = vadd.f32 %v9260_v22, %v14514_v37 }
0x36c6   :  { %v9374_v38 = vadd.f32 %v9358_v33, %v14579_v39  ;;  %v9360_v14 = vmul.f32 0.044715, %v9344_v29  ;;  %v9362_v61 = vmul.f32 0.044715, %v9346_v34  ;;  %v14617_v1 = vadd.f32 %v9313_v49, %v14517_v24 }
0x36c7   :  { %v12520_v28 = vpop.eup %12519  ;;  %v9388_v18 = vmul.f32 0.7978846, %v9372_v3  ;;  %v9373_v47 = vadd.f32 %v9357_v9, %v14584_v54  ;;  %v9375_v12 = vadd.f32 %v9359_v19, %v14587_v45  ;;  %v9329_v6 = vmul.f32 %v14613_v40, %v14613_v40 }
0x36c8   :  { %v12522_v4 = vpop.eup %12521  ;;  %v9412_v52 = vadd.f32 1.0, %v12520_v28  ;;  %v9390_v37 = vmul.f32 0.7978846, %v9374_v38  ;;  %v9376_v31 = vadd.f32 %v9360_v14, %v14592_v8  ;;  %v9378_v15 = vadd.f32 %v9362_v61, %v14595_v59 }
0x36c9   :  { %v12524_v32 = vpop.eup %12523  ;;  %v9414_v7 = vadd.f32 1.0, %v12522_v4  ;;  %12535 = vtanh.f32 %v9388_v18  ;;  %v9389_v24 = vmul.f32 0.7978846, %v9373_v47  ;;  %v9391_v22 = vmul.f32 0.7978846, %v9375_v12 }
0x36ca   :  { %v12526_v49 = vpop.eup %12525  ;;  %v9428_v46 = vmul.f32 0.5, %v9412_v52  ;;  %12537 = vtanh.f32 %v9390_v37  ;;  %v9392_v43 = vmul.f32 0.7978846, %v9376_v31  ;;  %v9394_v11 = vmul.f32 0.7978846, %v9378_v15 }
0x36cb   :  { %v12528_v20 = vpop.eup %12527  ;;  %v9430_v17 = vmul.f32 0.5, %v9414_v7  ;;  %12539 = vtanh.f32 %v9389_v24  ;;  %v9345_v53 = vmul.f32 %v9329_v6, %v14613_v40  ;;  %v9331_v42 = vmul.f32 %v14617_v1, %v14617_v1 }
0x36cc   :  { %v12530_v23 = vpop.eup %12529  ;;  %v9444_v63 = vmul.f32 %v9428_v46, %v14520_v13  ;;  %v9416_v25 = vadd.f32 1.0, %v12528_v20  ;;  %12541 = vtanh.f32 %v9391_v22  ;;  %v9413_v62 = vadd.f32 1.0, %v12524_v32 }
0x36cd   :  { %v12532_v30 = vpop.eup %12531  ;;  %v9446_v50 = vmul.f32 %v9430_v17, %v14523_v51  ;;  %v9418_v2 = vadd.f32 1.0, %v12530_v23  ;;  %12543 = vtanh.f32 %v9392_v43  ;;  %v9361_v0 = vmul.f32 0.044715, %v9345_v53 }
0x36ce   :  { %v12534_v57 = vpop.eup %12533  ;;  %v9432_v48 = vmul.f32 0.5, %v9416_v25  ;;  %12545 = vtanh.f32 %v9394_v11  ;;  %v9347_v55 = vmul.f32 %v9331_v42, %v14617_v1  ;;  %v9417_v44 = vadd.f32 1.0, %v12532_v30 }
0x36cf   :  { %v9434_v33 = vmul.f32 0.5, %v9418_v2  ;;  %v9377_v29 = vadd.f32 %v9361_v0, %v14613_v40  ;;  %v9429_v34 = vmul.f32 0.5, %v9413_v62  ;;  %v9415_v13 = vadd.f32 1.0, %v12526_v49 }
0x36d0   :  { %v9448_v3 = vmul.f32 %v9432_v48, %v14536_v58  ;;  %v9363_v9 = vmul.f32 0.044715, %v9347_v55  ;;  %v9433_v19 = vmul.f32 0.5, %v9417_v44  ;;  %v9419_v38 = vadd.f32 1.0, %v12534_v57 }
0x36d1   :  { %v9450_v51 = vmul.f32 %v9434_v33, %v14539_v16  ;;  %v9393_v14 = vmul.f32 0.7978846, %v9377_v29  ;;  %v9445_v61 = vmul.f32 %v9429_v34, %v14526_v5  ;;  %v9431_v28 = vmul.f32 0.5, %v9415_v13 }
0x36d2   :  { %v9460_v18 = vpack.c.bf16 %v9448_v3, %v9444_v63  ;;  %v9379_v47 = vadd.f32 %v9363_v9, %v14617_v1  ;;  %v9449_v12 = vmul.f32 %v9433_v19, %v14546_v35  ;;  %v9435_v6 = vmul.f32 0.5, %v9419_v38  ;;  %v12564_v3 = vld [vmem:[#allocation17 + $0x28] sm:$0x3f] }
0x36d3   :  { %v12536_v4 = vpop.eup %12535  ;;  %v9462_v52 = vpack.c.bf16 %v9450_v51, %v9446_v50  ;;  %12547 = vtanh.f32 %v9393_v14  ;;  %v9447_v58 = vmul.f32 %v9431_v28, %v14529_v41  ;;  %v9536_v9 = vrot.slane %v12564_v3, %v13326_v21  ;;  %v10514_v3 = vld [vmem:[%s14683_s10 + $0x1] ss:$0 sm:$0xff] }
0x36d4   :  { %v12538_v37 = vpop.eup %12537  ;;  %v9395_v31 = vmul.f32 0.7978846, %v9379_v47  ;;  %v9461_v15 = vpack.c.bf16 %v9449_v12, %v9445_v61  ;;  %v9451_v16 = vmul.f32 %v9435_v6, %v14549_v36  ;;  %v9420_v32 = vadd.f32 1.0, %v12536_v4 }
0x36d5   :  { %v12540_v7 = vpop.eup %12539  ;;  %v9422_v5 = vadd.f32 1.0, %v12538_v37 }
0x36d6   :  { %v12542_v24 = vpop.eup %12541  ;;  %12549 = vtanh.f32 %v9395_v31  ;;  %9761 = vmatprep.mubr.bf16.mxu1 %v9461_v15  ;;  %v9463_v22 = vpack.c.bf16 %v9451_v16, %v9447_v58  ;;  %v9436_v43 = vmul.f32 0.5, %v9420_v32  ;;  %v9421_v20 = vadd.f32 1.0, %v12540_v7 }
0x36d7   :  { %v12544_v49 = vpop.eup %12543  ;;  %9762 = vmatmul.mubr.bf16.vlgmr.msra.gmra.mrb[184].mxu1 %v9460_v18  ;;  %v9438_v11 = vmul.f32 0.5, %v9422_v5  ;;  %v9423_v63 = vadd.f32 1.0, %v12542_v24 }
0x36d8   :  { %v12546_v35 = vpop.eup %12545  ;;  %9810 = vmatprep.mubr.bf16.mxu0 %v9463_v22  ;;  %v9424_v46 = vadd.f32 1.0, %v12544_v49  ;;  %v9452_v36 = vmul.f32 %v9436_v43, %v14576_v60  ;;  %v9437_v50 = vmul.f32 0.5, %v9421_v20 }
0x36d9   :  { %9811 = vmatmul.mubr.bf16.vlgmr.msra.gmra.mrb[188].mxu0 %v9462_v52  ;;  %v9426_v41 = vadd.f32 1.0, %v12546_v35  ;;  %v9454_v25 = vmul.f32 %v9438_v11, %v14579_v39  ;;  %v9439_v44 = vmul.f32 0.5, %v9423_v63 }
0x36da   :  { %v9440_v17 = vmul.f32 0.5, %v9424_v46  ;;  %v9453_v33 = vmul.f32 %v9437_v50, %v14584_v54 }
0x36db   :  { %v9442_v53 = vmul.f32 0.5, %v9426_v41  ;;  %v9455_v34 = vmul.f32 %v9439_v44, %v14587_v45 }
0x36dc   :  { %v9456_v42 = vmul.f32 %v9440_v17, %v14592_v8 }
0x36dd   :  { %v12548_v23 = vpop.eup %12547  ;;  %v9458_v62 = vmul.f32 %v9442_v53, %v14595_v59 }
0x36de   :  { %v9425_v30 = vadd.f32 1.0, %v12548_v23  ;;  %v9464_v2 = vpack.c.bf16 %v9456_v42, %v9452_v36 }
0x36df   :  { %v9466_v0 = vpack.c.bf16 %v9458_v62, %v9454_v25 }
0x36e0   :  { %v12550_v57 = vpop.eup %12549  ;;  %v9441_v48 = vmul.f32 0.5, %v9425_v30 }
0x36e1   :  { %v9427_v55 = vadd.f32 1.0, %v12550_v57 }
0x36e2   :  { %v9457_v60 = vmul.f32 %v9441_v48, %v14613_v40 }
0x36e3   :  { %v9443_v29 = vmul.f32 0.5, %v9427_v55 }
0x36e4   :  { %v9465_v8 = vpack.c.bf16 %v9457_v60, %v9453_v33 }
0x36e5   :  { %v9459_v39 = vmul.f32 %v9443_v29, %v14617_v1 }
0x36e6   :  { %9769 = vmatprep.mubr.bf16.mxu1 %v9465_v8 }
0x36e7   :  { %v9467_v59 = vpack.c.bf16 %v9459_v39, %v9455_v34  ;;  %9770 = vmatmul.mubr.bf16.gmra.mrb[188].mxu1 %v9464_v2  ;;  %v10513_v34 = vld [vmem:[%s14683_s10] ss:$0 sm:$0xff]  ;;  %s12842_s10 = smov [#allocation19]  }
0x36e8   :  { %s9902_s22 = sshll.u32 %s12842_s10, 4  ;;  %s9903_s22 = int_to_ptr.vmem [resolvable:$true] %s9902_s22 }
0x36e9   :  { %9818 = vmatprep.mubr.bf16.mxu0 %v9467_v59  ;;  %s12785_s1 = scalar_lea.vmem %s9903_s22, 512  ;;  %p12790_p11 = scmp.lt.s32.totalorder %s9903_s22, %s9903_s22 }
0x36ea   :  { %9819 = vmatmul.mubr.bf16.gmra.mrb[192].mxu0 %v9466_v0  ;;  %p12786_p10 = scmp.ne.s32.totalorder %s9903_s22, %s12785_s1  ;;  %p12791_p12 = scmp.lt.s32.totalorder %s12785_s1, %s12785_s1 }
0x36ec   :  { %p12792_p13 = por %p12791_p12, %p12790_p11 }
0x36ee   :  { %p12793_p0 = pnand %p12792_p13, %p12786_p10 }
0x37aa   :  { %v10985_v13 = vpop.f32.mrb[184].mxu1 }
0x37ab   :  { %v10986_v19 = vpop.f32.mrb[185].mxu1 }
0x37ac   :  { %v11013_v38 = vpop.f32.mrb[188].mxu0  ;;  %v10987_v54 = vadd.f32 %v10986_v19, %v10985_v13  ;;  %v10988_v51 = vpop.f32.mrb[186].mxu1 }
0x37ad   :  { %v11014_v40 = vpop.f32.mrb[189].mxu0  ;;  %v10989_v14 = vpop.f32.mrb[187].mxu1 }
0x37ae   :  { %v9764_v61 = vadd.f32 %v10987_v54, %v9536_v9  ;;  %v11015_v28 = vadd.f32 %v11014_v40, %v11013_v38  ;;  %v11016_v45 = vpop.f32.mrb[190].mxu0  ;;  %v10990_v18 = vadd.f32 %v10989_v14, %v10988_v51 }
0x37af   :  { %v11017_v1 = vpop.f32.mrb[191].mxu0 }
0x37b0   :  { %v9813_v47 = vadd.f32 %v11015_v28, %v9764_v61  ;;  %v9767_v12 = vadd.f32 %v10990_v18, %v9536_v9  ;;  %v11018_v6 = vadd.f32 %v11017_v1, %v11016_v45 }
0x37b2   :  { %v9816_v4 = vadd.f32 %v11018_v6, %v9767_v12  ;;  %v9827_v52 = vadd.f32 %v9813_v47, %v14462_v10 }
0x37b4   :  { %9833 = vadd.xlane.f32.xlu0 %v9827_v52  ;;  %v9828_v21 = vadd.f32 %v9816_v4, %v14465_v27 }
0x37b6   :  { %9835 = vadd.xlane.f32.xlu1 %v9828_v21 }
0x37ba   :  { %v10991_v58 = vpop.f32.mrb[188].mxu1 }
0x37bb   :  { %v10992_v37 = vpop.f32.mrb[189].mxu1 }
0x37bc   :  { %v10993_v31 = vadd.f32 %v10992_v37, %v10991_v58  ;;  %v10994_v15 = vpop.f32.mrb[190].mxu1 }
0x37bd   :  { %v11019_v16 = vpop.f32.mrb[192].mxu0  ;;  %v10995_v32 = vpop.f32.mrb[191].mxu1 }
0x37be   :  { %v9772_v7 = vadd.f32 %v10993_v31, %v9536_v9  ;;  %v11020_v5 = vpop.f32.mrb[193].mxu0  ;;  %v10996_v24 = vadd.f32 %v10995_v32, %v10994_v15 }
0x37bf   :  { %v11021_v22 = vadd.f32 %v11020_v5, %v11019_v16  ;;  %v11022_v49 = vpop.f32.mrb[194].mxu0 }
0x37c0   :  { %v9775_v35 = vadd.f32 %v10996_v24, %v9536_v9  ;;  %v11023_v46 = vpop.f32.mrb[195].mxu0 }
0x37c1   :  { %v9821_v43 = vadd.f32 %v11021_v22, %v9772_v7  ;;  %v11024_v41 = vadd.f32 %v11023_v46, %v11022_v49 }
0x37c3   :  { %v9824_v10 = vadd.f32 %v11024_v41, %v9775_v35  ;;  %v9829_v11 = vadd.f32 %v9821_v43, %v14469_v26 }
0x37c5   :  { %9837 = vadd.xlane.f32.xlu0 %v9829_v11  ;;  %v9830_v27 = vadd.f32 %v9824_v10, %v14473_v56 }
0x37c7   :  { %9839 = vadd.xlane.f32.xlu1 %v9830_v27 }
0x3841   :  { %v9834_v20 = vpop.xlane.xlu0 %9833 }
0x3842   :  { %v9841_v17 = vmul.f32 0.0078125, %v9834_v20 }
0x3843   :  { %v9836_v53 = vpop.xlane.xlu1 %9835 }
0x3844   :  { %v9845_v36 = vsub.f32 %v9827_v52, %v9841_v17  ;;  %v9842_v42 = vmul.f32 0.0078125, %v9836_v53 }
0x3846   :  { %v9846_v23 = vsub.f32 %v9828_v21, %v9842_v42  ;;  %v9849_v63 = vmul.f32 %v9845_v36, %v9845_v36 }
0x3848   :  { %9853 = vadd.xlane.f32.xlu0 %v9849_v63  ;;  %v9850_v25 = vmul.f32 %v9846_v23, %v9846_v23 }
0x384a   :  { %9855 = vadd.xlane.f32.xlu1 %v9850_v25 }
0x3852   :  { %v9838_v62 = vpop.xlane.xlu0 %9837 }
0x3853   :  { %v9843_v30 = vmul.f32 0.0078125, %v9838_v62 }
0x3854   :  { %v9840_v50 = vpop.xlane.xlu1 %9839 }
0x3855   :  { %v9847_v2 = vsub.f32 %v9829_v11, %v9843_v30  ;;  %v9844_v0 = vmul.f32 0.0078125, %v9840_v50 }
0x3857   :  { %v9848_v26 = vsub.f32 %v9830_v27, %v9844_v0  ;;  %v9851_v57 = vmul.f32 %v9847_v2, %v9847_v2 }
0x3859   :  { %9857 = vadd.xlane.f32.xlu0 %v9851_v57  ;;  %v9852_v56 = vmul.f32 %v9848_v26, %v9848_v26 }
0x385b   :  { %9859 = vadd.xlane.f32.xlu1 %v9852_v56 }
0x38d5   :  { %v9854_v48 = vpop.xlane.xlu0 %9853 }
0x38d6   :  { %v9861_v55 = vmul.f32 0.0078125, %v9854_v48 }
0x38d7   :  { %v9856_v44 = vpop.xlane.xlu1 %9855 }
0x38d8   :  { %v9865_v33 = vadd.f32 1e-05, %v9861_v55  ;;  %v9862_v60 = vmul.f32 0.0078125, %v9856_v44 }
0x38da   :  { %12551 = vrsqrt.f32 %v9865_v33  ;;  %v9866_v29 = vadd.f32 1e-05, %v9862_v60 }
0x38dc   :  { %12553 = vrsqrt.f32 %v9866_v29 }
0x38e4   :  { %v12552_v8 = vpop.eup %12551 }
0x38e5   :  { %v9873_v39 = vmul.f32 %v12552_v8, %v9845_v36 }
0x38e6   :  { %v12554_v59 = vpop.eup %12553  ;;  %v9858_v13 = vpop.xlane.xlu0 %9857 }
0x38e7   :  { %v9874_v9 = vmul.f32 %v12554_v59, %v9846_v23  ;;  %v9863_v19 = vmul.f32 0.0078125, %v9858_v13  ;;  %v9881_v38 = vmul.f32 %v10513_v34, %v9873_v39 }
0x38e8   :  { %v9860_v54 = vpop.xlane.xlu1 %9859 }
0x38e9   :  { %v9867_v51 = vadd.f32 1e-05, %v9863_v19  ;;  %v9864_v40 = vmul.f32 0.0078125, %v9860_v54  ;;  %v9882_v14 = vmul.f32 %v10513_v34, %v9874_v9  ;;  %v9889_v61 = vadd.f32 %v10514_v3, %v9881_v38 }
0x38eb   :  { %12555 = vrsqrt.f32 %v9867_v51  ;;  %v9868_v28 = vadd.f32 1e-05, %v9864_v40  ;;  %v9890_v45 = vadd.f32 %v10514_v3, %v9882_v14  ;;  %9893 = vst [vmem:[#allocation19] sm:$0xff] %v9889_v61 }
0x38ed   :  { %12557 = vrsqrt.f32 %v9868_v28  ;;  %9894 = vst [vmem:[#allocation19 + $0x8] sm:$0xff] %v9890_v45 }
0x38f5   :  { %v12556_v18 = vpop.eup %12555 }
0x38f6   :  { %v9875_v1 = vmul.f32 %v12556_v18, %v9847_v2 }
0x38f7   :  { %v12558_v47 = vpop.eup %12557 }
0x38f8   :  { %v9876_v12 = vmul.f32 %v12558_v47, %v9848_v26  ;;  %v9883_v6 = vmul.f32 %v10513_v34, %v9875_v1 }
0x38fa   :  { %v9884_v4 = vmul.f32 %v10513_v34, %v9876_v12  ;;  %v9891_v52 = vadd.f32 %v10514_v3, %v9883_v6 }
0x38fc   :  { %v9892_v21 = vadd.f32 %v10514_v3, %v9884_v4  ;;  %9895 = vst [vmem:[#allocation19 + $0x10] sm:$0xff] %v9891_v52 }
0x38fe   :  { %9896 = vst [vmem:[#allocation19 + $0x18] sm:$0xff] %v9892_v21 }
0x38ff   :  { %12796 = shalt.err (!%p12793_p0)
}
0x3900   :  { %s12797_s25 = scalar_lea.hbm %s14684_s11, 512 }
0x3901   :  { %p12798_p1 = scmp.ne.s32.totalorder %s14684_s11, %s12797_s25  ;;  %p12801_p2 = scmp.lt.u32.totalorder %s12797_s25, %s14684_s11 }
0x3903   :  { %p12803_p3 = pnand %p12801_p2, %p12798_p1 }
0x3905   :  { %12806 = shalt.err (!%p12803_p3)
}
0x3906   :  { %9908 = dma.vmem_to_hbm [thread:$0]  %s9903_s22, 512, %s14684_s11, [#allocation4], %s12830_s7, %s12830_s7, %s12831_s30  }
0x3907   :  { %12819 = dma.done.wait [#allocation4], 512  }
0x3908   :  { %12820 = vsyncadd [#allocation4], 4294966784 }
0x3909   :  { %9912 = vsyncpa [#allocation3], 1 }
0x390a   :  { %9913 = vsyncpa [#allocation6], 1 }
0x390b   :  { %9914 = vsyncpa [#allocation9], 1 }
0x390c   :  { %9915 = vsyncpa [#allocation12], 1 }
0x390d   :  { %9916 = vsyncpa [#allocation15], 1 }
0x390e   :  { %9917 = vsyncpa [#allocation18], 1 }
0x390f   :  { %9918 = vsyncpa [#allocation4], 1 }

</bundles_post_ra>
